<compile_context>
chip_gen: v7x
topology: tpu7x:2x2x1
jax: 0.10.0
libtpu: 0.0.40
codegen_flags: <defaults>
</compile_context>

<pallas_src>
import functools

import jax
import jax.numpy as jnp
from jax.experimental import pallas as pl
from jax.experimental.pallas import tpu as pltpu

EPS = 1e-08


# ----------------------------- Pallas kernel ------------------------------ #
def capsule_kernel(x_ref, w_ref, o_ref, *, routings):
    # x_ref: (B_blk, C, U)   f32   (C on sublanes, U on lanes)
    # w_ref: (N, D, C, U)    f32   (grid-invariant, pre-transposed weights)
    # o_ref: (B_blk, N, D, 1) f32
    N, D, C, U = w_ref.shape
    b_blk = x_ref.shape[0]

    wk = w_ref[...]                                          # hoisted load

    for n in range(b_blk):                                   # unrolled (small)
        x_n = x_ref[n]                                       # (C, U)

        # u_hat[j, d, i] = sum_c x[c, i] * W[i, j, c, d]
        # -> pure VPU multiply + sublane reduction, no MXU.
        uht = jnp.sum(x_n[None, None, :, :] * wk, axis=2)    # (N, D, U)

        b_log = jnp.zeros((N, 1, U), jnp.float32)            # routing logits
        v = jnp.zeros((N, D, 1), jnp.float32)

        for _ in range(routings):                            # unrolled (3)
            # softmax over the in_units (lane) axis
            m = jnp.max(b_log, axis=-1, keepdims=True)       # (N, 1, 1)
            e = jnp.exp(b_log - m)                           # (N, 1, U)
            c = e / jnp.sum(e, axis=-1, keepdims=True)       # (N, 1, U)

            # s[j, d] = sum_i c[j, i] * u_hat[j, d, i]   (lane reduce)
            s = jnp.sum(c * uht, axis=2, keepdims=True)      # (N, D, 1)

            # squash over dim_capsule (sublane reduce)
            nrm = jnp.sum(s * s, axis=1, keepdims=True) + EPS    # (N, 1, 1)
            v = (jnp.sqrt(nrm) / (1.0 + nrm)) * s                # (N, D, 1)

            # sim[j, i] = sum_d u_hat[j, d, i] * v[j, d]  (sublane reduce)
            sim = jnp.sum(uht * v, axis=1, keepdims=True)        # (N, 1, U)
            b_log = b_log + sim

        o_ref[n] = v.astype(o_ref.dtype)                     # (N, D, 1)


# ------------------------------- wrapper ----------------------------------- #
def capsule_pallas(x, W, *, routings=3, b_blk=2):
    """x: (B, in_channels, in_units); W: (in_units, num_capsule, in_channels,
    dim_capsule). Returns (B, dim_capsule, num_capsule)."""
    B, C, U = x.shape
    U2, N, C2, D = W.shape
    assert U2 == U and C2 == C
    assert B % b_blk == 0

    # one-time parameter glue in plain JAX: W[i, j, c, d] -> Wr[j, d, c, i]
    Wr = jnp.transpose(W, (1, 3, 2, 0)).astype(jnp.float32)   # (N, D, C, U)

    kernel = functools.partial(capsule_kernel, routings=routings)

    out = pl.pallas_call(
        kernel,
        out_shape=jax.ShapeDtypeStruct((B, N, D, 1), x.dtype),
        grid=(B // b_blk,),
        in_specs=[
            pl.BlockSpec((b_blk, C, U), lambda g: (g, 0, 0)),
            pl.BlockSpec((N, D, C, U), lambda g: (0, 0, 0, 0)),
        ],
        out_specs=pl.BlockSpec((b_blk, N, D, 1), lambda g: (g, 0, 0, 0)),
        compiler_params=pltpu.CompilerParams(
            dimension_semantics=("parallel",)),
    )(x, Wr)

    # (B, N, D, 1) -> (B, D, N)   (cheap layout fix-up outside the kernel)
    return out.reshape(B, N, D).transpose(0, 2, 1)


# -------------------------- pure-JAX reference ------------------------------ #
def capsule_reference(x, W, *, routings=3):
    B = x.shape[0]
    U, N, C, D = W.shape
    u_hat = jnp.einsum('bci,ijcd->bijd', x, W)                   # (B, U, N, D)
    u_hat2 = jnp.transpose(u_hat, (0, 2, 1, 3))                  # (B, N, U, D)
    b_log = jnp.zeros((B, N, 1, U), x.dtype)
    v_last = None
    for _ in range(routings):
        c = jax.nn.softmax(b_log, axis=-1)                       # (B, N, 1, U)
        s = jnp.matmul(c, u_hat2)                                # (B, N, 1, D)
        s = jnp.squeeze(jnp.transpose(s, (0, 3, 1, 2)), axis=3)  # (B, D, N)
        nrm = jnp.sum(s * s, axis=1, keepdims=True) + EPS        # (B, 1, N)
        v_last = (jnp.sqrt(nrm) / (1.0 + nrm)) * s               # (B, D, N)
        vv = jnp.transpose(v_last, (0, 2, 1))[..., None]         # (B, N, D, 1)
        sim = jnp.matmul(u_hat2, vv)                             # (B, N, U, 1)
        b_log = b_log + jnp.transpose(sim, (0, 1, 3, 2))         # (B, N, 1, U)
    return v_last                                                # (B, D, N)


# --------------------------------- main ------------------------------------ #
if __name__ == "__main__":
    B = 4
    in_units = 8        # U
    in_channels = 16    # C
    num_capsule = 4     # N
    dim_capsule = 16    # D
    routings = 3

    key = jax.random.PRNGKey(0)
    kx, kw = jax.random.split(key)

    # module input: (B, in_channels, in_units)
    x = jax.random.normal(kx, (B, in_channels, in_units), dtype=jnp.float32)
    # nn.Parameter(torch.randn(in_units, num_capsule, in_channels, dim_capsule))
    W = jax.random.normal(
        kw, (in_units, num_capsule, in_channels, dim_capsule), dtype=jnp.float32)

    out = capsule_pallas(x, W, routings=routings, b_blk=2)
    out = jax.block_until_ready(out)

    ref = capsule_reference(x, W, routings=routings)
    assert out.shape == (B, dim_capsule, num_capsule)
    assert jnp.allclose(out, ref, rtol=1e-4, atol=1e-4), (
        f"max abs err {jnp.max(jnp.abs(out - ref))}")

    print("KERNEL_OK")
</pallas_src>

<mosaic_0001>
module attributes {stable_mosaic.version = 11 : i64} {
  func.func @capsule_kernel(%arg0: i32, %arg1: memref<2x16x8xf32, #tpu.memory_space<vmem>>, %arg2: memref<4x16x16x8xf32, #tpu.memory_space<vmem>>, %arg3: memref<2x4x16x1xf32, #tpu.memory_space<vmem>>) attributes {dimension_semantics = [#tpu.dimension_semantics<parallel>], iteration_bounds = array<i64: 2>, scalar_prefetch = 0 : i64, scratch_operands = 0 : i64, tpu.core_type = #tpu.core_type<tc>, window_params = [{transform_indices = @transform_0, window_bounds = array<i64: 2, 16, 8>}, {pipeline_mode = #tpu.pipeline_mode<synchronous>, transform_indices = @transform_1, window_bounds = array<i64: 4, 16, 16, 8>}, {transform_indices = @transform_2, window_bounds = array<i64: 2, 4, 16, 1>}]} {
    %c0 = arith.constant 0 : index
    %c0_0 = arith.constant 0 : index
    %c0_1 = arith.constant 0 : index
    %c0_2 = arith.constant 0 : index
    %0 = vector.load %arg2[%c0, %c0_0, %c0_1, %c0_2] : memref<4x16x16x8xf32, #tpu.memory_space<vmem>>, vector<4x16x16x8xf32>
    %c0_3 = arith.constant 0 : index
    %c0_4 = arith.constant 0 : index
    %c0_5 = arith.constant 0 : index
    %1 = vector.load %arg1[%c0_3, %c0_4, %c0_5] : memref<2x16x8xf32, #tpu.memory_space<vmem>>, vector<1x16x8xf32>
    %2 = vector.shape_cast %1 : vector<1x16x8xf32> to vector<16x8xf32>
    %3 = vector.shape_cast %2 : vector<16x8xf32> to vector<1x1x16x8xf32>
    %4 = vector.broadcast %3 : vector<1x1x16x8xf32> to vector<4x16x16x8xf32>
    %5 = arith.mulf %4, %0 : vector<4x16x16x8xf32>
    %cst = arith.constant dense<0.000000e+00> : vector<4x16x8xf32>
    %6 = vector.multi_reduction <add>, %5, %cst [2] : vector<4x16x16x8xf32> to vector<4x16x8xf32>
    %cst_6 = arith.constant 0.000000e+00 : f32
    %7 = vector.broadcast %cst_6 : f32 to vector<4x1x8xf32>
    %cst_7 = arith.constant dense<0xFF800000> : vector<4x1xf32>
    %8 = vector.multi_reduction <maximumf>, %7, %cst_7 [2] : vector<4x1x8xf32> to vector<4x1xf32>
    %9 = vector.shape_cast %8 : vector<4x1xf32> to vector<4x1x1xf32>
    %10 = vector.broadcast %9 : vector<4x1x1xf32> to vector<4x1x8xf32>
    %11 = arith.subf %7, %10 : vector<4x1x8xf32>
    %12 = math.exp %11 : vector<4x1x8xf32>
    %cst_8 = arith.constant dense<0.000000e+00> : vector<4x1xf32>
    %13 = vector.multi_reduction <add>, %12, %cst_8 [2] : vector<4x1x8xf32> to vector<4x1xf32>
    %14 = vector.shape_cast %13 : vector<4x1xf32> to vector<4x1x1xf32>
    %15 = vector.broadcast %14 : vector<4x1x1xf32> to vector<4x1x8xf32>
    %16 = arith.divf %12, %15 : vector<4x1x8xf32>
    %17 = vector.broadcast %16 : vector<4x1x8xf32> to vector<4x16x8xf32>
    %18 = arith.mulf %17, %6 : vector<4x16x8xf32>
    %cst_9 = arith.constant dense<0.000000e+00> : vector<4x16xf32>
    %19 = vector.multi_reduction <add>, %18, %cst_9 [2] : vector<4x16x8xf32> to vector<4x16xf32>
    %20 = vector.shape_cast %19 : vector<4x16xf32> to vector<4x16x1xf32>
    %21 = arith.mulf %20, %20 : vector<4x16x1xf32>
    %cst_10 = arith.constant dense<0.000000e+00> : vector<4x1xf32>
    %22 = vector.multi_reduction <add>, %21, %cst_10 [1] : vector<4x16x1xf32> to vector<4x1xf32>
    %23 = vector.shape_cast %22 : vector<4x1xf32> to vector<4x1x1xf32>
    %cst_11 = arith.constant 9.99999993E-9 : f32
    %24 = vector.broadcast %cst_11 : f32 to vector<4x1x1xf32>
    %25 = arith.addf %23, %24 : vector<4x1x1xf32>
    %26 = math.sqrt %25 : vector<4x1x1xf32>
    %cst_12 = arith.constant 1.000000e+00 : f32
    %27 = vector.broadcast %cst_12 : f32 to vector<4x1x1xf32>
    %28 = arith.addf %27, %25 : vector<4x1x1xf32>
    %29 = arith.divf %26, %28 : vector<4x1x1xf32>
    %30 = vector.broadcast %29 : vector<4x1x1xf32> to vector<4x16x1xf32>
    %31 = arith.mulf %30, %20 : vector<4x16x1xf32>
    %32 = vector.broadcast %31 : vector<4x16x1xf32> to vector<4x16x8xf32>
    %33 = arith.mulf %6, %32 : vector<4x16x8xf32>
    %cst_13 = arith.constant dense<0.000000e+00> : vector<4x8xf32>
    %34 = vector.multi_reduction <add>, %33, %cst_13 [1] : vector<4x16x8xf32> to vector<4x8xf32>
    %35 = vector.shape_cast %34 : vector<4x8xf32> to vector<4x1x8xf32>
    %36 = arith.addf %7, %35 : vector<4x1x8xf32>
    %cst_14 = arith.constant dense<0xFF800000> : vector<4x1xf32>
    %37 = vector.multi_reduction <maximumf>, %36, %cst_14 [2] : vector<4x1x8xf32> to vector<4x1xf32>
    %38 = vector.shape_cast %37 : vector<4x1xf32> to vector<4x1x1xf32>
    %39 = vector.broadcast %38 : vector<4x1x1xf32> to vector<4x1x8xf32>
    %40 = arith.subf %36, %39 : vector<4x1x8xf32>
    %41 = math.exp %40 : vector<4x1x8xf32>
    %cst_15 = arith.constant dense<0.000000e+00> : vector<4x1xf32>
    %42 = vector.multi_reduction <add>, %41, %cst_15 [2] : vector<4x1x8xf32> to vector<4x1xf32>
    %43 = vector.shape_cast %42 : vector<4x1xf32> to vector<4x1x1xf32>
    %44 = vector.broadcast %43 : vector<4x1x1xf32> to vector<4x1x8xf32>
    %45 = arith.divf %41, %44 : vector<4x1x8xf32>
    %46 = vector.broadcast %45 : vector<4x1x8xf32> to vector<4x16x8xf32>
    %47 = arith.mulf %46, %6 : vector<4x16x8xf32>
    %cst_16 = arith.constant dense<0.000000e+00> : vector<4x16xf32>
    %48 = vector.multi_reduction <add>, %47, %cst_16 [2] : vector<4x16x8xf32> to vector<4x16xf32>
    %49 = vector.shape_cast %48 : vector<4x16xf32> to vector<4x16x1xf32>
    %50 = arith.mulf %49, %49 : vector<4x16x1xf32>
    %cst_17 = arith.constant dense<0.000000e+00> : vector<4x1xf32>
    %51 = vector.multi_reduction <add>, %50, %cst_17 [1] : vector<4x16x1xf32> to vector<4x1xf32>
    %52 = vector.shape_cast %51 : vector<4x1xf32> to vector<4x1x1xf32>
    %cst_18 = arith.constant 9.99999993E-9 : f32
    %53 = vector.broadcast %cst_18 : f32 to vector<4x1x1xf32>
    %54 = arith.addf %52, %53 : vector<4x1x1xf32>
    %55 = math.sqrt %54 : vector<4x1x1xf32>
    %cst_19 = arith.constant 1.000000e+00 : f32
    %56 = vector.broadcast %cst_19 : f32 to vector<4x1x1xf32>
    %57 = arith.addf %56, %54 : vector<4x1x1xf32>
    %58 = arith.divf %55, %57 : vector<4x1x1xf32>
    %59 = vector.broadcast %58 : vector<4x1x1xf32> to vector<4x16x1xf32>
    %60 = arith.mulf %59, %49 : vector<4x16x1xf32>
    %61 = vector.broadcast %60 : vector<4x16x1xf32> to vector<4x16x8xf32>
    %62 = arith.mulf %6, %61 : vector<4x16x8xf32>
    %cst_20 = arith.constant dense<0.000000e+00> : vector<4x8xf32>
    %63 = vector.multi_reduction <add>, %62, %cst_20 [1] : vector<4x16x8xf32> to vector<4x8xf32>
    %64 = vector.shape_cast %63 : vector<4x8xf32> to vector<4x1x8xf32>
    %65 = arith.addf %36, %64 : vector<4x1x8xf32>
    %cst_21 = arith.constant dense<0xFF800000> : vector<4x1xf32>
    %66 = vector.multi_reduction <maximumf>, %65, %cst_21 [2] : vector<4x1x8xf32> to vector<4x1xf32>
    %67 = vector.shape_cast %66 : vector<4x1xf32> to vector<4x1x1xf32>
    %68 = vector.broadcast %67 : vector<4x1x1xf32> to vector<4x1x8xf32>
    %69 = arith.subf %65, %68 : vector<4x1x8xf32>
    %70 = math.exp %69 : vector<4x1x8xf32>
    %cst_22 = arith.constant dense<0.000000e+00> : vector<4x1xf32>
    %71 = vector.multi_reduction <add>, %70, %cst_22 [2] : vector<4x1x8xf32> to vector<4x1xf32>
    %72 = vector.shape_cast %71 : vector<4x1xf32> to vector<4x1x1xf32>
    %73 = vector.broadcast %72 : vector<4x1x1xf32> to vector<4x1x8xf32>
    %74 = arith.divf %70, %73 : vector<4x1x8xf32>
    %75 = vector.broadcast %74 : vector<4x1x8xf32> to vector<4x16x8xf32>
    %76 = arith.mulf %75, %6 : vector<4x16x8xf32>
    %cst_23 = arith.constant dense<0.000000e+00> : vector<4x16xf32>
    %77 = vector.multi_reduction <add>, %76, %cst_23 [2] : vector<4x16x8xf32> to vector<4x16xf32>
    %78 = vector.shape_cast %77 : vector<4x16xf32> to vector<4x16x1xf32>
    %79 = arith.mulf %78, %78 : vector<4x16x1xf32>
    %cst_24 = arith.constant dense<0.000000e+00> : vector<4x1xf32>
    %80 = vector.multi_reduction <add>, %79, %cst_24 [1] : vector<4x16x1xf32> to vector<4x1xf32>
    %81 = vector.shape_cast %80 : vector<4x1xf32> to vector<4x1x1xf32>
    %cst_25 = arith.constant 9.99999993E-9 : f32
    %82 = vector.broadcast %cst_25 : f32 to vector<4x1x1xf32>
    %83 = arith.addf %81, %82 : vector<4x1x1xf32>
    %84 = math.sqrt %83 : vector<4x1x1xf32>
    %cst_26 = arith.constant 1.000000e+00 : f32
    %85 = vector.broadcast %cst_26 : f32 to vector<4x1x1xf32>
    %86 = arith.addf %85, %83 : vector<4x1x1xf32>
    %87 = arith.divf %84, %86 : vector<4x1x1xf32>
    %88 = vector.broadcast %87 : vector<4x1x1xf32> to vector<4x16x1xf32>
    %89 = arith.mulf %88, %78 : vector<4x16x1xf32>
    %c0_27 = arith.constant 0 : index
    %c0_28 = arith.constant 0 : index
    %c0_29 = arith.constant 0 : index
    %c0_30 = arith.constant 0 : index
    %90 = vector.load %arg3[%c0_27, %c0_28, %c0_29, %c0_30] : memref<2x4x16x1xf32, #tpu.memory_space<vmem>>, vector<1x4x16x1xf32>
    %91 = vector.shape_cast %90 : vector<1x4x16x1xf32> to vector<4x16x1xf32>
    %92 = vector.shape_cast %89 : vector<4x16x1xf32> to vector<1x4x16x1xf32>
    tpu.vector_store %arg3[%c0_27, %c0_28, %c0_29, %c0_30], %92 {strides = array<i32>} : memref<2x4x16x1xf32, #tpu.memory_space<vmem>>, vector<1x4x16x1xf32>,
    %c1 = arith.constant 1 : index
    %c0_31 = arith.constant 0 : index
    %c0_32 = arith.constant 0 : index
    %93 = vector.load %arg1[%c1, %c0_31, %c0_32] : memref<2x16x8xf32, #tpu.memory_space<vmem>>, vector<1x16x8xf32>
    %94 = vector.shape_cast %93 : vector<1x16x8xf32> to vector<16x8xf32>
    %95 = vector.shape_cast %94 : vector<16x8xf32> to vector<1x1x16x8xf32>
    %96 = vector.broadcast %95 : vector<1x1x16x8xf32> to vector<4x16x16x8xf32>
    %97 = arith.mulf %96, %0 : vector<4x16x16x8xf32>
    %cst_33 = arith.constant dense<0.000000e+00> : vector<4x16x8xf32>
    %98 = vector.multi_reduction <add>, %97, %cst_33 [2] : vector<4x16x16x8xf32> to vector<4x16x8xf32>
    %cst_34 = arith.constant 0.000000e+00 : f32
    %99 = vector.broadcast %cst_34 : f32 to vector<4x1x8xf32>
    %cst_35 = arith.constant dense<0xFF800000> : vector<4x1xf32>
    %100 = vector.multi_reduction <maximumf>, %99, %cst_35 [2] : vector<4x1x8xf32> to vector<4x1xf32>
    %101 = vector.shape_cast %100 : vector<4x1xf32> to vector<4x1x1xf32>
    %102 = vector.broadcast %101 : vector<4x1x1xf32> to vector<4x1x8xf32>
    %103 = arith.subf %99, %102 : vector<4x1x8xf32>
    %104 = math.exp %103 : vector<4x1x8xf32>
    %cst_36 = arith.constant dense<0.000000e+00> : vector<4x1xf32>
    %105 = vector.multi_reduction <add>, %104, %cst_36 [2] : vector<4x1x8xf32> to vector<4x1xf32>
    %106 = vector.shape_cast %105 : vector<4x1xf32> to vector<4x1x1xf32>
    %107 = vector.broadcast %106 : vector<4x1x1xf32> to vector<4x1x8xf32>
    %108 = arith.divf %104, %107 : vector<4x1x8xf32>
    %109 = vector.broadcast %108 : vector<4x1x8xf32> to vector<4x16x8xf32>
    %110 = arith.mulf %109, %98 : vector<4x16x8xf32>
    %cst_37 = arith.constant dense<0.000000e+00> : vector<4x16xf32>
    %111 = vector.multi_reduction <add>, %110, %cst_37 [2] : vector<4x16x8xf32> to vector<4x16xf32>
    %112 = vector.shape_cast %111 : vector<4x16xf32> to vector<4x16x1xf32>
    %113 = arith.mulf %112, %112 : vector<4x16x1xf32>
    %cst_38 = arith.constant dense<0.000000e+00> : vector<4x1xf32>
    %114 = vector.multi_reduction <add>, %113, %cst_38 [1] : vector<4x16x1xf32> to vector<4x1xf32>
    %115 = vector.shape_cast %114 : vector<4x1xf32> to vector<4x1x1xf32>
    %cst_39 = arith.constant 9.99999993E-9 : f32
    %116 = vector.broadcast %cst_39 : f32 to vector<4x1x1xf32>
    %117 = arith.addf %115, %116 : vector<4x1x1xf32>
    %118 = math.sqrt %117 : vector<4x1x1xf32>
    %cst_40 = arith.constant 1.000000e+00 : f32
    %119 = vector.broadcast %cst_40 : f32 to vector<4x1x1xf32>
    %120 = arith.addf %119, %117 : vector<4x1x1xf32>
    %121 = arith.divf %118, %120 : vector<4x1x1xf32>
    %122 = vector.broadcast %121 : vector<4x1x1xf32> to vector<4x16x1xf32>
    %123 = arith.mulf %122, %112 : vector<4x16x1xf32>
    %124 = vector.broadcast %123 : vector<4x16x1xf32> to vector<4x16x8xf32>
    %125 = arith.mulf %98, %124 : vector<4x16x8xf32>
    %cst_41 = arith.constant dense<0.000000e+00> : vector<4x8xf32>
    %126 = vector.multi_reduction <add>, %125, %cst_41 [1] : vector<4x16x8xf32> to vector<4x8xf32>
    %127 = vector.shape_cast %126 : vector<4x8xf32> to vector<4x1x8xf32>
    %128 = arith.addf %99, %127 : vector<4x1x8xf32>
    %cst_42 = arith.constant dense<0xFF800000> : vector<4x1xf32>
    %129 = vector.multi_reduction <maximumf>, %128, %cst_42 [2] : vector<4x1x8xf32> to vector<4x1xf32>
    %130 = vector.shape_cast %129 : vector<4x1xf32> to vector<4x1x1xf32>
    %131 = vector.broadcast %130 : vector<4x1x1xf32> to vector<4x1x8xf32>
    %132 = arith.subf %128, %131 : vector<4x1x8xf32>
    %133 = math.exp %132 : vector<4x1x8xf32>
    %cst_43 = arith.constant dense<0.000000e+00> : vector<4x1xf32>
    %134 = vector.multi_reduction <add>, %133, %cst_43 [2] : vector<4x1x8xf32> to vector<4x1xf32>
    %135 = vector.shape_cast %134 : vector<4x1xf32> to vector<4x1x1xf32>
    %136 = vector.broadcast %135 : vector<4x1x1xf32> to vector<4x1x8xf32>
    %137 = arith.divf %133, %136 : vector<4x1x8xf32>
    %138 = vector.broadcast %137 : vector<4x1x8xf32> to vector<4x16x8xf32>
    %139 = arith.mulf %138, %98 : vector<4x16x8xf32>
    %cst_44 = arith.constant dense<0.000000e+00> : vector<4x16xf32>
    %140 = vector.multi_reduction <add>, %139, %cst_44 [2] : vector<4x16x8xf32> to vector<4x16xf32>
    %141 = vector.shape_cast %140 : vector<4x16xf32> to vector<4x16x1xf32>
    %142 = arith.mulf %141, %141 : vector<4x16x1xf32>
    %cst_45 = arith.constant dense<0.000000e+00> : vector<4x1xf32>
    %143 = vector.multi_reduction <add>, %142, %cst_45 [1] : vector<4x16x1xf32> to vector<4x1xf32>
    %144 = vector.shape_cast %143 : vector<4x1xf32> to vector<4x1x1xf32>
    %cst_46 = arith.constant 9.99999993E-9 : f32
    %145 = vector.broadcast %cst_46 : f32 to vector<4x1x1xf32>
    %146 = arith.addf %144, %145 : vector<4x1x1xf32>
    %147 = math.sqrt %146 : vector<4x1x1xf32>
    %cst_47 = arith.constant 1.000000e+00 : f32
    %148 = vector.broadcast %cst_47 : f32 to vector<4x1x1xf32>
    %149 = arith.addf %148, %146 : vector<4x1x1xf32>
    %150 = arith.divf %147, %149 : vector<4x1x1xf32>
    %151 = vector.broadcast %150 : vector<4x1x1xf32> to vector<4x16x1xf32>
    %152 = arith.mulf %151, %141 : vector<4x16x1xf32>
    %153 = vector.broadcast %152 : vector<4x16x1xf32> to vector<4x16x8xf32>
    %154 = arith.mulf %98, %153 : vector<4x16x8xf32>
    %cst_48 = arith.constant dense<0.000000e+00> : vector<4x8xf32>
    %155 = vector.multi_reduction <add>, %154, %cst_48 [1] : vector<4x16x8xf32> to vector<4x8xf32>
    %156 = vector.shape_cast %155 : vector<4x8xf32> to vector<4x1x8xf32>
    %157 = arith.addf %128, %156 : vector<4x1x8xf32>
    %cst_49 = arith.constant dense<0xFF800000> : vector<4x1xf32>
    %158 = vector.multi_reduction <maximumf>, %157, %cst_49 [2] : vector<4x1x8xf32> to vector<4x1xf32>
    %159 = vector.shape_cast %158 : vector<4x1xf32> to vector<4x1x1xf32>
    %160 = vector.broadcast %159 : vector<4x1x1xf32> to vector<4x1x8xf32>
    %161 = arith.subf %157, %160 : vector<4x1x8xf32>
    %162 = math.exp %161 : vector<4x1x8xf32>
    %cst_50 = arith.constant dense<0.000000e+00> : vector<4x1xf32>
    %163 = vector.multi_reduction <add>, %162, %cst_50 [2] : vector<4x1x8xf32> to vector<4x1xf32>
    %164 = vector.shape_cast %163 : vector<4x1xf32> to vector<4x1x1xf32>
    %165 = vector.broadcast %164 : vector<4x1x1xf32> to vector<4x1x8xf32>
    %166 = arith.divf %162, %165 : vector<4x1x8xf32>
    %167 = vector.broadcast %166 : vector<4x1x8xf32> to vector<4x16x8xf32>
    %168 = arith.mulf %167, %98 : vector<4x16x8xf32>
    %cst_51 = arith.constant dense<0.000000e+00> : vector<4x16xf32>
    %169 = vector.multi_reduction <add>, %168, %cst_51 [2] : vector<4x16x8xf32> to vector<4x16xf32>
    %170 = vector.shape_cast %169 : vector<4x16xf32> to vector<4x16x1xf32>
    %171 = arith.mulf %170, %170 : vector<4x16x1xf32>
    %cst_52 = arith.constant dense<0.000000e+00> : vector<4x1xf32>
    %172 = vector.multi_reduction <add>, %171, %cst_52 [1] : vector<4x16x1xf32> to vector<4x1xf32>
    %173 = vector.shape_cast %172 : vector<4x1xf32> to vector<4x1x1xf32>
    %cst_53 = arith.constant 9.99999993E-9 : f32
    %174 = vector.broadcast %cst_53 : f32 to vector<4x1x1xf32>
    %175 = arith.addf %173, %174 : vector<4x1x1xf32>
    %176 = math.sqrt %175 : vector<4x1x1xf32>
    %cst_54 = arith.constant 1.000000e+00 : f32
    %177 = vector.broadcast %cst_54 : f32 to vector<4x1x1xf32>
    %178 = arith.addf %177, %175 : vector<4x1x1xf32>
    %179 = arith.divf %176, %178 : vector<4x1x1xf32>
    %180 = vector.broadcast %179 : vector<4x1x1xf32> to vector<4x16x1xf32>
    %181 = arith.mulf %180, %170 : vector<4x16x1xf32>
    %c1_55 = arith.constant 1 : index
    %c0_56 = arith.constant 0 : index
    %c0_57 = arith.constant 0 : index
    %c0_58 = arith.constant 0 : index
    %182 = vector.load %arg3[%c1_55, %c0_56, %c0_57, %c0_58] : memref<2x4x16x1xf32, #tpu.memory_space<vmem>>, vector<1x4x16x1xf32>
    %183 = vector.shape_cast %182 : vector<1x4x16x1xf32> to vector<4x16x1xf32>
    %184 = vector.shape_cast %181 : vector<4x16x1xf32> to vector<1x4x16x1xf32>
    tpu.vector_store %arg3[%c1_55, %c0_56, %c0_57, %c0_58], %184 {strides = array<i32>} : memref<2x4x16x1xf32, #tpu.memory_space<vmem>>, vector<1x4x16x1xf32>,
    return
  }
  func.func @transform_0(%arg0: i32) -> (i32, i32, i32) {
    %c0_i32 = arith.constant 0 : i32
    %c0_i32_0 = arith.constant 0 : i32
    %c0_i32_1 = arith.constant 0 : i32
    return %arg0, %c0_i32, %c0_i32_0 : i32, i32, i32
  }
  func.func @transform_1(%arg0: i32) -> (i32, i32, i32, i32) {
    %c0_i32 = arith.constant 0 : i32
    %c0_i32_0 = arith.constant 0 : i32
    %c0_i32_1 = arith.constant 0 : i32
    %c0_i32_2 = arith.constant 0 : i32
    %c0_i32_3 = arith.constant 0 : i32
    return %c0_i32, %c0_i32_0, %c0_i32_1, %c0_i32_2 : i32, i32, i32, i32
  }
  func.func @transform_2(%arg0: i32) -> (i32, i32, i32, i32) {
    %c0_i32 = arith.constant 0 : i32
    %c0_i32_0 = arith.constant 0 : i32
    %c0_i32_1 = arith.constant 0 : i32
    %c0_i32_2 = arith.constant 0 : i32
    return %arg0, %c0_i32, %c0_i32_0, %c0_i32_1 : i32, i32, i32, i32
  }
}

</mosaic_0001>

<bundles_post_ra>
// kernel: tpu_custom_call.1
= control target key start
LH: loop header
LB: loop body
LE: loop exit
PB: predicated region body
PF: predicated region fallthrough
CT: control target
= control target key end

     0   :  { %s5383_s9 = smov 0   ;;  %s9004_s0 = inlined_call_operand.vmem [shape: f32[4,16,8], index: 0, kind: input, shape index: {}]   ;;  %s9005_s1 = inlined_call_operand.vmem [shape: f32[4,16,16,8], index: 1, kind: input, shape index: {}]   ;;  %s9006_s2 = inlined_call_operand.vmem [shape: f32[4,4,16,1], index: 2, kind: output, shape index: {}]  }
   0x1 LB: > { %s5031_s10 = sadd.s32 4294967295, %s5365_s9   ;;  %p5035_p0 = scmp.ge.s32.totalorder %s5365_s9, 1  ;;  %s5365_s9 = sphi %s5383_s9, %s12_s9  }
   0x2   : > { %p114_p1 = scmp.lt.s32.totalorder %s5365_s9, 3 }
   0x4   : > { %p115_p2 = pnand %p5035_p0, %p114_p1 }
   0x6   : > { %118 = sbr.rel (%p115_p2) target bundleno = 1720 (0x6b8), region = 28 }
   0xd   : > { %vm410_vm0 = vcmask 64512   ;;  %v5367_v0 = vmov 0.0   ;;  %s5036_s11 = sshll.u32 %s5031_s10, 1  ;;  %v168_v2 = vld [vmem:[%s9005_s1 + $0x80] sm:$0xff]  ;;  %v169_v3 = vld [vmem:[%s9005_s1 + $0x88] sm:$0xff]  ;;  %v170_v4 = vld [vmem:[%s9005_s1 + $0x90] sm:$0xff] }
   0xe   : > { %v987_v1 = vsel %vm410_vm0, 1.0, %v5367_v0  ;;  %p139_p3 = scmp.lt.s32.totalorder %s5036_s11, 3  ;;  %v171_v5 = vld [vmem:[%s9005_s1 + $0x98] sm:$0xff]  ;;  %v172_v6 = vld [vmem:[%s9005_s1 + $0xa0] sm:$0xff]  ;;  %v173_v7 = vld [vmem:[%s9005_s1 + $0xa8] sm:$0xff]  ;;  %vm1120_vm1 = vcmask 1041409  }
   0xf   : > { %988 = vadd.xlane.f32.xlu0 %v987_v1  ;;  %v174_v8 = vld [vmem:[%s9005_s1 + $0xb0] sm:$0xff]  ;;  %v175_v9 = vld [vmem:[%s9005_s1 + $0xb8] sm:$0xff]  ;;  %v176_v10 = vld [vmem:[%s9005_s1 + $0xc0] sm:$0xff]  ;;  %vm1122_vm2 = vcmask 1042434   ;;  %vm1124_vm3 = vcmask 1043459   ;;  %vm1126_vm4 = vcmask 1044484  }
  0x10   : > { %s9791_s11 = smov (!%p139_p3, %s5036_s11), 3  ;;  %v177_v11 = vld [vmem:[%s9005_s1 + $0xc8] sm:$0xff]  ;;  %v178_v12 = vld [vmem:[%s9005_s1 + $0xd0] sm:$0xff]  ;;  %v179_v13 = vld [vmem:[%s9005_s1 + $0xd8] sm:$0xff]  ;;  %vm1128_vm5 = vcmask 1045509   ;;  %vm1130_vm6 = vcmask 1046534  }
  0x11   : > { %s5054_s12 = sshll.u32 %s9791_s11, 4  ;;  %v180_v14 = vld [vmem:[%s9005_s1 + $0xe0] sm:$0xff]  ;;  %v181_v17 = vld [vmem:[%s9005_s1 + $0xe8] sm:$0xff]  ;;  %v182_v18 = vld [vmem:[%s9005_s1 + $0xf0] sm:$0xff]  ;;  %vm1132_vm7 = vcmask 1047559   ;;  %s5055_s24 = sshll.u32 %s9791_s11, 6 }
  0x12   : > { %s5407_s21 = scalar_lea.vmem %s9004_s0, %s5054_s12  ;;  %v183_v19 = vld [vmem:[%s9005_s1 + $0xf8] sm:$0xff]  ;;  %s8967_s27 = scalar_lea.vmem %s9006_s2, %s5055_s24 }
  0x13   : > { %v5440_v15 = vld [vmem:[%s5407_s21] sm:$0xff]  ;;  %v5443_v16 = vld [vmem:[%s5407_s21 + $0x8] sm:$0xff] }
  0x14   : > { %v298_v20 = vmul.f32 %v5440_v15, %v168_v2  ;;  %v299_v21 = vmul.f32 %v5443_v16, %v169_v3  ;;  %v300_v22 = vmul.f32 %v5440_v15, %v170_v4  ;;  %v301_v23 = vmul.f32 %v5443_v16, %v171_v5 }
  0x15   : > { %v302_v24 = vmul.f32 %v5440_v15, %v172_v6  ;;  %v303_v25 = vmul.f32 %v5443_v16, %v173_v7  ;;  %v304_v26 = vmul.f32 %v5440_v15, %v174_v8  ;;  %v305_v27 = vmul.f32 %v5443_v16, %v175_v9 }
  0x16   : > { %v306_v28 = vmul.f32 %v5440_v15, %v176_v10  ;;  %v307_v29 = vmul.f32 %v5443_v16, %v177_v11  ;;  %v308_v30 = vmul.f32 %v5440_v15, %v178_v12  ;;  %v309_v31 = vmul.f32 %v5443_v16, %v179_v13 }
  0x17   : > { %v310_v32 = vmul.f32 %v5440_v15, %v180_v14  ;;  %v311_v33 = vmul.f32 %v5443_v16, %v181_v17  ;;  %v312_v34 = vmul.f32 %v5440_v15, %v182_v18  ;;  %v313_v35 = vmul.f32 %v5443_v16, %v183_v19 }
  0x18   : > { %v483_v36 = vsel %vm410_vm0, %v298_v20, 0.0  ;;  %v484_v37 = vsel %vm410_vm0, %v299_v21, 0.0  ;;  %v492_v38 = vsel %vm410_vm0, %v300_v22, 0.0  ;;  %v493_v39 = vsel %vm410_vm0, %v301_v23, 0.0 }
  0x19   : > { %v485_v40 = vadd.f32 %v484_v37, %v483_v36  ;;  %v494_v41 = vadd.f32 %v493_v39, %v492_v38  ;;  %v501_v42 = vsel %vm410_vm0, %v302_v24, 0.0  ;;  %v502_v43 = vsel %vm410_vm0, %v303_v25, 0.0  ;;  %v154_v37 = vld [vmem:[%s9005_s1 + $0x10] sm:$0xff]  ;;  %v155_v38 = vld [vmem:[%s9005_s1 + $0x18] sm:$0xff]  ;;  %v156_v39 = vld [vmem:[%s9005_s1 + $0x20] sm:$0xff] }
  0x1a   : > { %v503_v44 = vadd.f32 %v502_v43, %v501_v42  ;;  %v510_v45 = vsel %vm410_vm0, %v304_v26, 0.0  ;;  %v511_v46 = vsel %vm410_vm0, %v305_v27, 0.0  ;;  %v519_v47 = vsel %vm410_vm0, %v306_v28, 0.0 }
  0x1b   : > { %v486_v48 = vrot.slane %v485_v40, 4  ;;  %v495_v49 = vrot.slane %v494_v41, 4  ;;  %v512_v50 = vadd.f32 %v511_v46, %v510_v45  ;;  %v520_v51 = vsel %vm410_vm0, %v307_v29, 0.0  ;;  %v158_v45 = vld [vmem:[%s9005_s1 + $0x30] sm:$0xff]  ;;  %v159_v46 = vld [vmem:[%s9005_s1 + $0x38] sm:$0xff] }
  0x1c   : > { %v504_v52 = vrot.slane %v503_v44, 4  ;;  %v521_v53 = vadd.f32 %v520_v51, %v519_v47  ;;  %v528_v54 = vsel %vm410_vm0, %v308_v30, 0.0  ;;  %v529_v55 = vsel %vm410_vm0, %v309_v31, 0.0  ;;  %v161_v51 = vld [vmem:[%s9005_s1 + $0x48] sm:$0xff] }
  0x1d   : > { %v487_v56 = vadd.f32 %v486_v48, %v485_v40  ;;  %v496_v57 = vadd.f32 %v495_v49, %v494_v41  ;;  %v513_v58 = vrot.slane %v512_v50, 4  ;;  %v530_v59 = vadd.f32 %v529_v55, %v528_v54  ;;  %v163_v54 = vld [vmem:[%s9005_s1 + $0x58] sm:$0xff]  ;;  %v164_v55 = vld [vmem:[%s9005_s1 + $0x60] sm:$0xff] }
  0x1e   : > { %v505_v60 = vadd.f32 %v504_v52, %v503_v44  ;;  %v522_v61 = vrot.slane %v521_v53, 4  ;;  %v537_v62 = vsel %vm410_vm0, %v310_v32, 0.0  ;;  %v538_v63 = vsel %vm410_vm0, %v311_v33, 0.0  ;;  %v152_v32 = vld [vmem:[%s9005_s1] sm:$0xff]  ;;  %v153_v33 = vld [vmem:[%s9005_s1 + $0x8] sm:$0xff]  ;;  %v162_v52 = vld [vmem:[%s9005_s1 + $0x50] sm:$0xff] }
  0x1f   : > { %v488_v0 = vrot.slane %v487_v56, 2  ;;  %v497_v1 = vrot.slane %v496_v57, 2  ;;  %v514_v2 = vadd.f32 %v513_v58, %v512_v50  ;;  %v531_v3 = vrot.slane %v530_v59, 4  ;;  %v157_v44 = vld [vmem:[%s9005_s1 + $0x28] sm:$0xff]  ;;  %v160_v50 = vld [vmem:[%s9005_s1 + $0x40] sm:$0xff] }
  0x20   : > { %v506_v4 = vrot.slane %v505_v60, 2  ;;  %v523_v5 = vadd.f32 %v522_v61, %v521_v53  ;;  %v539_v6 = vadd.f32 %v538_v63, %v537_v62  ;;  %v546_v7 = vsel %vm410_vm0, %v312_v34, 0.0  ;;  %v166_v63 = vld [vmem:[%s9005_s1 + $0x70] sm:$0xff] }
  0x21   : > { %v489_v8 = vadd.f32 %v488_v0, %v487_v56  ;;  %v498_v9 = vadd.f32 %v497_v1, %v496_v57  ;;  %v515_v10 = vrot.slane %v514_v2, 2  ;;  %v532_v11 = vadd.f32 %v531_v3, %v530_v59  ;;  %v165_v56 = vld [vmem:[%s9005_s1 + $0x68] sm:$0xff]  ;;  %v167_v0 = vld [vmem:[%s9005_s1 + $0x78] sm:$0xff] }
  0x22   : > { %v507_v12 = vadd.f32 %v506_v4, %v505_v60  ;;  %v524_v13 = vrot.slane %v523_v5, 2  ;;  %v540_v14 = vrot.slane %v539_v6, 4  ;;  %v547_v17 = vsel %vm410_vm0, %v313_v35, 0.0 }
  0x23   : > { %v516_v18 = vadd.f32 %v515_v10, %v514_v2  ;;  %v533_v19 = vrot.slane %v532_v11, 2  ;;  %v490_v20 = vrot.slane %v489_v8, 1  ;;  %v548_v23 = vadd.f32 %v547_v17, %v546_v7 }
  0x24   : > { %v525_v21 = vadd.f32 %v524_v13, %v523_v5  ;;  %v541_v22 = vadd.f32 %v540_v14, %v539_v6  ;;  %v499_v24 = vrot.slane %v498_v9, 1  ;;  %v508_v25 = vrot.slane %v507_v12, 1 }
  0x25   : > { %v517_v26 = vrot.slane %v516_v18, 1  ;;  %v534_v27 = vadd.f32 %v533_v19, %v532_v11  ;;  %v549_v30 = vrot.slane %v548_v23, 4  ;;  %v5492_v34 = vadd.f32 %v490_v20, %v489_v8 }
  0x26   : > { %v526_v28 = vrot.slane %v525_v21, 1  ;;  %v542_v29 = vrot.slane %v541_v22, 2  ;;  %v5503_v40 = vadd.f32 %v499_v24, %v498_v9  ;;  %v5505_v41 = vadd.f32 %v508_v25, %v507_v12 }
  0x27   : > { %v535_v31 = vrot.slane %v534_v27, 1  ;;  %9290 = vst [vmem:[#allocation2_spill] sm:$0xff] %v5492_v34  ;;  %v550_v36 = vadd.f32 %v549_v30, %v548_v23  ;;  %v5507_v42 = vadd.f32 %v517_v26, %v516_v18  ;;  %v282_v53 = vmul.f32 %v5440_v15, %v152_v32 }
  0x28   : > { %v543_v35 = vadd.f32 %v542_v29, %v541_v22  ;;  %9291 = vst [vmem:[#allocation3_spill] sm:$0xff] %v5503_v40  ;;  %9292 = vst [vmem:[#allocation4_spill] sm:$0xff] %v5505_v41  ;;  %v5509_v43 = vadd.f32 %v526_v28, %v525_v21  ;;  %v283_v57 = vmul.f32 %v5443_v16, %v153_v33 }
  0x29   : > { %9293 = vst [vmem:[#allocation5_spill] sm:$0xff] %v5507_v42  ;;  %v5520_v47 = vadd.f32 %v535_v31, %v534_v27  ;;  %v551_v49 = vrot.slane %v550_v36, 2  ;;  %v284_v58 = vmul.f32 %v5440_v15, %v154_v37  ;;  %v285_v59 = vmul.f32 %v5443_v16, %v155_v38 }
  0x2a   : > { %9294 = vst [vmem:[#allocation6_spill] sm:$0xff] %v5509_v43  ;;  %v544_v48 = vrot.slane %v543_v35, 1  ;;  %v286_v60 = vmul.f32 %v5440_v15, %v156_v39  ;;  %v287_v1 = vmul.f32 %v5443_v16, %v157_v44  ;;  %v288_v2 = vmul.f32 %v5440_v15, %v158_v45 }
  0x2b   : > { %9295 = vst [vmem:[#allocation7_spill] sm:$0xff] %v5520_v47  ;;  %v552_v62 = vadd.f32 %v551_v49, %v550_v36  ;;  %v289_v3 = vmul.f32 %v5443_v16, %v159_v46  ;;  %v290_v4 = vmul.f32 %v5440_v15, %v160_v50  ;;  %v291_v5 = vmul.f32 %v5443_v16, %v161_v51 }
  0x2c   : > { %v5545_v61 = vadd.f32 %v544_v48, %v543_v35  ;;  %v292_v6 = vmul.f32 %v5440_v15, %v162_v52  ;;  %v293_v8 = vmul.f32 %v5443_v16, %v163_v54  ;;  %v294_v9 = vmul.f32 %v5440_v15, %v164_v55 }
  0x2d   : > { %v553_v7 = vrot.slane %v552_v62, 1  ;;  %v295_v10 = vmul.f32 %v5443_v16, %v165_v56  ;;  %v296_v11 = vmul.f32 %v5440_v15, %v166_v63  ;;  %v297_v12 = vmul.f32 %v5443_v16, %v167_v0 }
  0x2e   : > { %9296 = vst [vmem:[#allocation8_spill] sm:$0xff] %v5545_v61  ;;  %v411_v13 = vsel %vm410_vm0, %v282_v53, 0.0  ;;  %v412_v14 = vsel %vm410_vm0, %v283_v57, 0.0  ;;  %v420_v19 = vsel %vm410_vm0, %v284_v58, 0.0  ;;  %v421_v20 = vsel %vm410_vm0, %v285_v59, 0.0 }
  0x2f   : > { %v5566_v17 = vadd.f32 %v553_v7, %v552_v62  ;;  %v413_v18 = vadd.f32 %v412_v14, %v411_v13  ;;  %v422_v21 = vadd.f32 %v421_v20, %v420_v19  ;;  %v429_v22 = vsel %vm410_vm0, %v286_v60, 0.0  ;;  %v185_v14 = vld [vmem:[%s9005_s1 + $0x108] sm:$0xff] }
  0x30   : > { %v430_v23 = vsel %vm410_vm0, %v287_v1, 0.0  ;;  %v438_v24 = vsel %vm410_vm0, %v288_v2, 0.0  ;;  %v439_v27 = vsel %vm410_vm0, %v289_v3, 0.0  ;;  %v447_v28 = vsel %vm410_vm0, %v290_v4, 0.0 }
  0x31   : > { %9297 = vst [vmem:[#allocation9_spill] sm:$0xff] %v5566_v17  ;;  %v414_v25 = vrot.slane %v413_v18, 4  ;;  %v431_v26 = vadd.f32 %v430_v23, %v429_v22  ;;  %v423_v29 = vrot.slane %v422_v21, 4  ;;  %v440_v30 = vadd.f32 %v439_v27, %v438_v24  ;;  %v187_v22 = vld [vmem:[%s9005_s1 + $0x118] sm:$0xff]  ;;  %v189_v27 = vld [vmem:[%s9005_s1 + $0x128] sm:$0xff] }
  0x32   : > { %v448_v31 = vsel %vm410_vm0, %v291_v5, 0.0  ;;  %v456_v32 = vsel %vm410_vm0, %v292_v6, 0.0  ;;  %v457_v37 = vsel %vm410_vm0, %v293_v8, 0.0  ;;  %v465_v45 = vsel %vm410_vm0, %v294_v9, 0.0  ;;  %v184_v8 = vld [vmem:[%s9005_s1 + $0x100] sm:$0xff] }
  0x33   : > { %v415_v33 = vadd.f32 %v414_v25, %v413_v18  ;;  %v432_v35 = vrot.slane %v431_v26, 4  ;;  %v449_v36 = vadd.f32 %v448_v31, %v447_v28  ;;  %v424_v38 = vadd.f32 %v423_v29, %v422_v21  ;;  %v186_v21 = vld [vmem:[%s9005_s1 + $0x110] sm:$0xff] }
  0x34   : > { %v441_v39 = vrot.slane %v440_v30, 4  ;;  %v458_v44 = vadd.f32 %v457_v37, %v456_v32  ;;  %v466_v50 = vsel %vm410_vm0, %v295_v10, 0.0  ;;  %v474_v58 = vsel %vm410_vm0, %v296_v11, 0.0  ;;  %v190_v32 = vld [vmem:[%s9005_s1 + $0x130] sm:$0xff] }
  0x35   : > { %v416_v46 = vrot.slane %v415_v33, 2  ;;  %v433_v48 = vadd.f32 %v432_v35, %v431_v26  ;;  %v450_v49 = vrot.slane %v449_v36, 4  ;;  %v425_v51 = vrot.slane %v424_v38, 2  ;;  %v188_v26 = vld [vmem:[%s9005_s1 + $0x120] sm:$0xff] }
  0x36   : > { %v442_v52 = vadd.f32 %v441_v39, %v440_v30  ;;  %v459_v53 = vrot.slane %v458_v44, 4  ;;  %v467_v54 = vadd.f32 %v466_v50, %v465_v45  ;;  %v475_v3 = vsel %vm410_vm0, %v297_v12, 0.0  ;;  %v192_v35 = vld [vmem:[%s9005_s1 + $0x140] sm:$0xff]  ;;  %v193_v39 = vld [vmem:[%s9005_s1 + $0x148] sm:$0xff]  ;;  %v195_v45 = vld [vmem:[%s9005_s1 + $0x158] sm:$0xff] }
  0x37   : > { %v417_v55 = vadd.f32 %v416_v46, %v415_v33  ;;  %v434_v56 = vrot.slane %v433_v48, 2  ;;  %v451_v57 = vadd.f32 %v450_v49, %v449_v36  ;;  %v426_v59 = vadd.f32 %v425_v51, %v424_v38  ;;  %v191_v33 = vld [vmem:[%s9005_s1 + $0x138] sm:$0xff]  ;;  %v196_v51 = vld [vmem:[%s9005_s1 + $0x160] sm:$0xff] }
  0x38   : > { %v443_v60 = vrot.slane %v442_v52, 2  ;;  %v460_v62 = vadd.f32 %v459_v53, %v458_v44  ;;  %v468_v63 = vrot.slane %v467_v54, 4  ;;  %v476_v13 = vadd.f32 %v475_v3, %v474_v58  ;;  %v194_v44 = vld [vmem:[%s9005_s1 + $0x150] sm:$0xff] }
  0x39   : > { %v418_v0 = vrot.slane %v417_v55, 1  ;;  %v435_v1 = vadd.f32 %v434_v56, %v433_v48  ;;  %v452_v2 = vrot.slane %v451_v57, 2  ;;  %v427_v4 = vrot.slane %v426_v59, 1  ;;  %v198_v53 = vld [vmem:[%s9005_s1 + $0x170] sm:$0xff] }
  0x3a   : > { %v444_v5 = vadd.f32 %v443_v60, %v442_v52  ;;  %v461_v6 = vrot.slane %v460_v62, 2  ;;  %v469_v7 = vadd.f32 %v468_v63, %v467_v54  ;;  %v477_v25 = vrot.slane %v476_v13, 4  ;;  %v197_v52 = vld [vmem:[%s9005_s1 + $0x168] sm:$0xff] }
  0x3b   : > { %v5585_v9 = vadd.f32 %v418_v0, %v417_v55  ;;  %v436_v10 = vrot.slane %v435_v1, 1  ;;  %v453_v11 = vadd.f32 %v452_v2, %v451_v57  ;;  %v5590_v18 = vadd.f32 %v427_v4, %v426_v59  ;;  %v199_v57 = vld [vmem:[%s9005_s1 + $0x178] sm:$0xff] }
  0x3c   : > { %v445_v12 = vrot.slane %v444_v5, 1  ;;  %v462_v19 = vadd.f32 %v461_v6, %v460_v62  ;;  %v470_v20 = vrot.slane %v469_v7, 2  ;;  %v314_v28 = vmul.f32 %v5440_v15, %v184_v8 }
  0x3d   : > { %9298 = vst [vmem:[#allocation10_spill] sm:$0xff] %v5585_v9  ;;  %9299 = vst [vmem:[#allocation11_spill] sm:$0xff] %v5590_v18  ;;  %v5598_v23 = vadd.f32 %v436_v10, %v435_v1  ;;  %v454_v24 = vrot.slane %v453_v11, 1  ;;  %v315_v36 = vmul.f32 %v5443_v16, %v185_v14  ;;  %v478_v38 = vadd.f32 %v477_v25, %v476_v13 }
  0x3e   : > { %v5607_v29 = vadd.f32 %v445_v12, %v444_v5  ;;  %v463_v30 = vrot.slane %v462_v19, 1  ;;  %v471_v31 = vadd.f32 %v470_v20, %v469_v7  ;;  %v316_v46 = vmul.f32 %v5440_v15, %v186_v21 }
  0x3f   : > { %9300 = vst [vmem:[#allocation12_spill] sm:$0xff] %v5598_v23  ;;  %v5619_v37 = vadd.f32 %v454_v24, %v453_v11  ;;  %v317_v48 = vmul.f32 %v5443_v16, %v187_v22  ;;  %v318_v54 = vmul.f32 %v5440_v15, %v188_v26  ;;  %v319_v55 = vmul.f32 %v5443_v16, %v189_v27 }
  0x40   : > { %9301 = vst [vmem:[#allocation13_spill] sm:$0xff] %v5607_v29  ;;  %v5632_v49 = vadd.f32 %v463_v30, %v462_v19  ;;  %v472_v50 = vrot.slane %v471_v31, 1  ;;  %v479_v56 = vrot.slane %v478_v38, 2  ;;  %v320_v58 = vmul.f32 %v5440_v15, %v190_v32 }
  0x41   : > { %9302 = vst [vmem:[#allocation14_spill] sm:$0xff] %v5619_v37  ;;  %v321_v59 = vmul.f32 %v5443_v16, %v191_v33  ;;  %v322_v60 = vmul.f32 %v5440_v15, %v192_v35  ;;  %v323_v63 = vmul.f32 %v5443_v16, %v193_v39  ;;  %v324_v0 = vmul.f32 %v5440_v15, %v194_v44 }
  0x42   : > { %9303 = vst [vmem:[#allocation15_spill] sm:$0xff] %v5632_v49  ;;  %v5651_v62 = vadd.f32 %v472_v50, %v471_v31  ;;  %v325_v1 = vmul.f32 %v5443_v16, %v195_v45  ;;  %v480_v2 = vadd.f32 %v479_v56, %v478_v38  ;;  %v326_v3 = vmul.f32 %v5440_v15, %v196_v51 }
  0x43   : > { %v327_v4 = vmul.f32 %v5443_v16, %v197_v52  ;;  %v328_v5 = vmul.f32 %v5440_v15, %v198_v53  ;;  %v329_v6 = vmul.f32 %v5443_v16, %v199_v57  ;;  %v555_v7 = vsel %vm410_vm0, %v314_v28, 0.0 }
  0x44   : > { %9304 = vst [vmem:[#allocation16_spill] sm:$0xff] %v5651_v62  ;;  %v556_v8 = vsel %vm410_vm0, %v315_v36, 0.0  ;;  %v564_v10 = vsel %vm410_vm0, %v316_v46, 0.0  ;;  %v481_v11 = vrot.slane %v480_v2, 1  ;;  %v565_v14 = vsel %vm410_vm0, %v317_v48, 0.0 }
  0x45   : > { %v557_v13 = vadd.f32 %v556_v8, %v555_v7  ;;  %v573_v12 = vsel %vm410_vm0, %v318_v54, 0.0  ;;  %v566_v19 = vadd.f32 %v565_v14, %v564_v10  ;;  %v574_v20 = vsel %vm410_vm0, %v319_v55, 0.0 }
  0x46   : > { %v582_v21 = vsel %vm410_vm0, %v320_v58, 0.0  ;;  %v583_v22 = vsel %vm410_vm0, %v321_v59, 0.0  ;;  %v5668_v24 = vadd.f32 %v481_v11, %v480_v2  ;;  %v575_v26 = vadd.f32 %v574_v20, %v573_v12 }
  0x47   : > { %v558_v25 = vrot.slane %v557_v13, 4  ;;  %v584_v27 = vadd.f32 %v583_v22, %v582_v21  ;;  %v567_v28 = vrot.slane %v566_v19, 4  ;;  %v591_v30 = vsel %vm410_vm0, %v322_v60, 0.0 }
  0x48   : > { %9305 = vst [vmem:[#allocation17_spill] sm:$0xff] %v5668_v24  ;;  %v592_v31 = vsel %vm410_vm0, %v323_v63, 0.0  ;;  %v600_v32 = vsel %vm410_vm0, %v324_v0, 0.0  ;;  %v576_v35 = vrot.slane %v575_v26, 4  ;;  %v601_v44 = vsel %vm410_vm0, %v325_v1, 0.0 }
  0x49   : > { %v559_v33 = vadd.f32 %v558_v25, %v557_v13  ;;  %v585_v36 = vrot.slane %v584_v27, 4  ;;  %v593_v38 = vadd.f32 %v592_v31, %v591_v30  ;;  %v568_v39 = vadd.f32 %v567_v28, %v566_v19  ;;  %v202_v28 = vld [vmem:[%s9005_s1 + $0x190] sm:$0xff]  ;;  %v203_v30 = vld [vmem:[%s9005_s1 + $0x198] sm:$0xff]  ;;  %v204_v31 = vld [vmem:[%s9005_s1 + $0x1a0] sm:$0xff] }
  0x4a   : > { %v609_v45 = vsel %vm410_vm0, %v326_v3, 0.0  ;;  %v610_v46 = vsel %vm410_vm0, %v327_v4, 0.0  ;;  %v577_v50 = vadd.f32 %v576_v35, %v575_v26  ;;  %v602_v54 = vadd.f32 %v601_v44, %v600_v32 }
  0x4b   : > { %v560_v48 = vrot.slane %v559_v33, 2  ;;  %v586_v51 = vadd.f32 %v585_v36, %v584_v27  ;;  %v594_v52 = vrot.slane %v593_v38, 4  ;;  %v569_v53 = vrot.slane %v568_v39, 2  ;;  %v205_v36 = vld [vmem:[%s9005_s1 + $0x1a8] sm:$0xff] }
  0x4c   : > { %v611_v55 = vadd.f32 %v610_v46, %v609_v45  ;;  %v618_v56 = vsel %vm410_vm0, %v328_v5, 0.0  ;;  %v578_v58 = vrot.slane %v577_v50, 2  ;;  %v603_v0 = vrot.slane %v602_v54, 4  ;;  %v200_v5 = vld [vmem:[%s9005_s1 + $0x180] sm:$0xff] }
  0x4d   : > { %v561_v57 = vadd.f32 %v560_v48, %v559_v33  ;;  %v587_v59 = vrot.slane %v586_v51, 2  ;;  %v595_v60 = vadd.f32 %v594_v52, %v593_v38  ;;  %v570_v63 = vadd.f32 %v569_v53, %v568_v39  ;;  %v206_v38 = vld [vmem:[%s9005_s1 + $0x1b0] sm:$0xff]  ;;  %v207_v48 = vld [vmem:[%s9005_s1 + $0x1b8] sm:$0xff] }
  0x4e   : > { %v612_v1 = vrot.slane %v611_v55, 4  ;;  %v619_v2 = vsel %vm410_vm0, %v329_v6, 0.0  ;;  %v579_v4 = vadd.f32 %v578_v58, %v577_v50  ;;  %v604_v11 = vadd.f32 %v603_v0, %v602_v54  ;;  %v201_v6 = vld [vmem:[%s9005_s1 + $0x188] sm:$0xff]  ;;  %v208_v50 = vld [vmem:[%s9005_s1 + $0x1c0] sm:$0xff]  ;;  %v210_v54 = vld [vmem:[%s9005_s1 + $0x1d0] sm:$0xff] }
  0x4f   : > { %v562_v3 = vrot.slane %v561_v57, 1  ;;  %v588_v7 = vadd.f32 %v587_v59, %v586_v51  ;;  %v596_v8 = vrot.slane %v595_v60, 2  ;;  %v571_v10 = vrot.slane %v570_v63, 1  ;;  %v209_v51 = vld [vmem:[%s9005_s1 + $0x1c8] sm:$0xff]  ;;  %v212_v0 = vld [vmem:[%s9005_s1 + $0x1e0] sm:$0xff] }
  0x50   : > { %v613_v13 = vadd.f32 %v612_v1, %v611_v55  ;;  %v620_v14 = vadd.f32 %v619_v2, %v618_v56  ;;  %v580_v19 = vrot.slane %v579_v4, 1  ;;  %v605_v25 = vrot.slane %v604_v11, 2  ;;  %v211_v55 = vld [vmem:[%s9005_s1 + $0x1d8] sm:$0xff]  ;;  %v213_v1 = vld [vmem:[%s9005_s1 + $0x1e8] sm:$0xff]  ;;  %v214_v2 = vld [vmem:[%s9005_s1 + $0x1f0] sm:$0xff] }
  0x51   : > { %v5681_v12 = vadd.f32 %v562_v3, %v561_v57  ;;  %v589_v20 = vrot.slane %v588_v7, 1  ;;  %v597_v21 = vadd.f32 %v596_v8, %v595_v60  ;;  %v5686_v22 = vadd.f32 %v571_v10, %v570_v63 }
  0x52   : > { %v614_v26 = vrot.slane %v613_v13, 2  ;;  %v621_v27 = vrot.slane %v620_v14, 4  ;;  %v5697_v32 = vadd.f32 %v580_v19, %v579_v4  ;;  %v330_v39 = vmul.f32 %v5440_v15, %v200_v5  ;;  %v215_v4 = vld [vmem:[%s9005_s1 + $0x1f8] sm:$0xff] }
  0x53   : > { %9306 = vst [vmem:[#allocation18_spill] sm:$0xff] %v5686_v22  ;;  %v5699_v33 = vadd.f32 %v589_v20, %v588_v7  ;;  %v598_v35 = vrot.slane %v597_v21, 1  ;;  %v606_v44 = vadd.f32 %v605_v25, %v604_v11  ;;  %v331_v52 = vmul.f32 %v5443_v16, %v201_v6 }
  0x54   : > { %9307 = vst [vmem:[#allocation19_spill] sm:$0xff] %v5697_v32  ;;  %v615_v45 = vadd.f32 %v614_v26, %v613_v13  ;;  %v622_v46 = vadd.f32 %v621_v27, %v620_v14  ;;  %v332_v56 = vmul.f32 %v5440_v15, %v202_v28  ;;  %v333_v57 = vmul.f32 %v5443_v16, %v203_v30 }
  0x55   : > { %9308 = vst [vmem:[#allocation20_spill] sm:$0xff] %v5699_v33  ;;  %v5718_v53 = vadd.f32 %v598_v35, %v597_v21  ;;  %v334_v58 = vmul.f32 %v5440_v15, %v204_v31  ;;  %v607_v59 = vrot.slane %v606_v44, 1  ;;  %v335_v3 = vmul.f32 %v5443_v16, %v205_v36 }
  0x56   : > { %v616_v60 = vrot.slane %v615_v45, 1  ;;  %v623_v63 = vrot.slane %v622_v46, 2  ;;  %v336_v7 = vmul.f32 %v5440_v15, %v206_v38  ;;  %v337_v8 = vmul.f32 %v5443_v16, %v207_v48 }
  0x57   : > { %9309 = vst [vmem:[#allocation21_spill] sm:$0xff] %v5718_v53  ;;  %v338_v10 = vmul.f32 %v5440_v15, %v208_v50  ;;  %v339_v11 = vmul.f32 %v5443_v16, %v209_v51  ;;  %v5746_v13 = vadd.f32 %v607_v59, %v606_v44  ;;  %v340_v19 = vmul.f32 %v5440_v15, %v210_v54 }
  0x58   : > { %v5748_v14 = vadd.f32 %v616_v60, %v615_v45  ;;  %v624_v5 = vadd.f32 %v623_v63, %v622_v46  ;;  %v341_v20 = vmul.f32 %v5443_v16, %v211_v55  ;;  %v342_v21 = vmul.f32 %v5440_v15, %v212_v0 }
  0x59   : > { %9310 = vst [vmem:[#allocation22_spill] sm:$0xff] %v5746_v13  ;;  %v343_v6 = vmul.f32 %v5443_v16, %v213_v1  ;;  %v344_v25 = vmul.f32 %v5440_v15, %v214_v2  ;;  %v345_v27 = vmul.f32 %v5443_v16, %v215_v4  ;;  %v627_v28 = vsel %vm410_vm0, %v330_v39, 0.0 }
  0x5a   : > { %9311 = vst [vmem:[#allocation23_spill] sm:$0xff] %v5748_v14  ;;  %v625_v26 = vrot.slane %v624_v5, 1  ;;  %v628_v30 = vsel %vm410_vm0, %v331_v52, 0.0  ;;  %v636_v35 = vsel %vm410_vm0, %v332_v56, 0.0  ;;  %v637_v36 = vsel %vm410_vm0, %v333_v57, 0.0 }
  0x5b   : > { %v629_v31 = vadd.f32 %v628_v30, %v627_v28  ;;  %v645_v38 = vsel %vm410_vm0, %v334_v58, 0.0  ;;  %v638_v45 = vadd.f32 %v637_v36, %v636_v35  ;;  %v646_v46 = vsel %vm410_vm0, %v335_v3, 0.0 }
  0x5c   : > { %v5761_v44 = vadd.f32 %v625_v26, %v624_v5  ;;  %v654_v48 = vsel %vm410_vm0, %v336_v7, 0.0  ;;  %v647_v51 = vadd.f32 %v646_v46, %v645_v38  ;;  %v655_v39 = vsel %vm410_vm0, %v337_v8, 0.0 }
  0x5d   : > { %v630_v50 = vrot.slane %v629_v31, 4  ;;  %v663_v52 = vsel %vm410_vm0, %v338_v10, 0.0  ;;  %v639_v54 = vrot.slane %v638_v45, 4  ;;  %v656_v55 = vadd.f32 %v655_v39, %v654_v48 }
  0x5e   : > { %9312 = vst [vmem:[#allocation24_spill] sm:$0xff] %v5761_v44  ;;  %v664_v56 = vsel %vm410_vm0, %v339_v11, 0.0  ;;  %v672_v57 = vsel %vm410_vm0, %v340_v19, 0.0  ;;  %v648_v59 = vrot.slane %v647_v51, 4  ;;  %v673_v63 = vsel %vm410_vm0, %v341_v20, 0.0 }
  0x5f   : > { %v631_v58 = vadd.f32 %v630_v50, %v629_v31  ;;  %v665_v60 = vadd.f32 %v664_v56, %v663_v52  ;;  %v640_v0 = vadd.f32 %v639_v54, %v638_v45  ;;  %v657_v1 = vrot.slane %v656_v55, 4  ;;  %v216_v54 = vld [vmem:[%s9005_s1 + $0x200] sm:$0xff] }
  0x60   : > { %v674_v2 = vadd.f32 %v673_v63, %v672_v57  ;;  %v681_v3 = vsel %vm410_vm0, %v342_v21, 0.0  ;;  %v649_v7 = vadd.f32 %v648_v59, %v647_v51  ;;  %v682_v10 = vsel %vm410_vm0, %v343_v6, 0.0 }
  0x61   : > { %v632_v4 = vrot.slane %v631_v58, 2  ;;  %v666_v8 = vrot.slane %v665_v60, 4  ;;  %v641_v5 = vrot.slane %v640_v0, 2  ;;  %v658_v26 = vadd.f32 %v657_v1, %v656_v55  ;;  %v219_v1 = vld [vmem:[%s9005_s1 + $0x218] sm:$0xff] }
  0x62   : > { %v675_v11 = vrot.slane %v674_v2, 4  ;;  %v683_v28 = vadd.f32 %v682_v10, %v681_v3  ;;  %v650_v30 = vrot.slane %v649_v7, 2  ;;  %v690_v35 = vsel %vm410_vm0, %v344_v25, 0.0 }
  0x63   : > { %v633_v19 = vadd.f32 %v632_v4, %v631_v58  ;;  %v667_v31 = vadd.f32 %v666_v8, %v665_v60  ;;  %v642_v20 = vadd.f32 %v641_v5, %v640_v0  ;;  %v659_v36 = vrot.slane %v658_v26, 2  ;;  %v217_v58 = vld [vmem:[%s9005_s1 + $0x208] sm:$0xff]  ;;  %v218_v0 = vld [vmem:[%s9005_s1 + $0x210] sm:$0xff] }
  0x64   : > { %v676_v38 = vadd.f32 %v675_v11, %v674_v2  ;;  %v684_v45 = vrot.slane %v683_v28, 4  ;;  %v651_v21 = vadd.f32 %v650_v30, %v649_v7  ;;  %v691_v50 = vsel %vm410_vm0, %v345_v27, 0.0  ;;  %v220_v7 = vld [vmem:[%s9005_s1 + $0x220] sm:$0xff]  ;;  %v221_v8 = vld [vmem:[%s9005_s1 + $0x228] sm:$0xff] }
  0x65   : > { %v634_v46 = vrot.slane %v633_v19, 1  ;;  %v668_v48 = vrot.slane %v667_v31, 2  ;;  %v643_v51 = vrot.slane %v642_v20, 1  ;;  %v660_v6 = vadd.f32 %v659_v36, %v658_v26  ;;  %v224_v30 = vld [vmem:[%s9005_s1 + $0x240] sm:$0xff]  ;;  %v225_v36 = vld [vmem:[%s9005_s1 + $0x248] sm:$0xff] }
  0x66   : > { %v677_v39 = vrot.slane %v676_v38, 2  ;;  %v685_v52 = vadd.f32 %v684_v45, %v683_v28  ;;  %v652_v25 = vrot.slane %v651_v21, 1  ;;  %v692_v57 = vadd.f32 %v691_v50, %v690_v35  ;;  %v222_v28 = vld [vmem:[%s9005_s1 + $0x230] sm:$0xff]  ;;  %v227_v45 = vld [vmem:[%s9005_s1 + $0x258] sm:$0xff] }
  0x67   : > { %v5777_v55 = vadd.f32 %v634_v46, %v633_v19  ;;  %v669_v56 = vadd.f32 %v668_v48, %v667_v31  ;;  %v5782_v59 = vadd.f32 %v643_v51, %v642_v20  ;;  %v661_v27 = vrot.slane %v660_v6, 1  ;;  %v223_v19 = vld [vmem:[%s9005_s1 + $0x238] sm:$0xff]  ;;  %v228_v51 = vld [vmem:[%s9005_s1 + $0x260] sm:$0xff] }
  0x68   : > { %v678_v60 = vadd.f32 %v677_v39, %v676_v38  ;;  %v686_v63 = vrot.slane %v685_v52, 2  ;;  %v5790_v2 = vadd.f32 %v652_v25, %v651_v21  ;;  %v693_v4 = vrot.slane %v692_v57, 4  ;;  %v226_v38 = vld [vmem:[%s9005_s1 + $0x250] sm:$0xff] }
  0x69   : > { %v670_v3 = vrot.slane %v669_v56, 1  ;;  %v346_v10 = vmul.f32 %v5440_v15, %v216_v54  ;;  %v5799_v5 = vadd.f32 %v661_v27, %v660_v6  ;;  %v347_v31 = vmul.f32 %v5443_v16, %v217_v58  ;;  %v229_v6 = vld [vmem:[%s9005_s1 + $0x268] sm:$0xff]  ;;  %v230_v39 = vld [vmem:[%s9005_s1 + $0x270] sm:$0xff] }
  0x6a   : > { %9313 = vst [vmem:[#allocation25_spill] sm:$0xff] %v5790_v2  ;;  %v679_v26 = vrot.slane %v678_v60, 1  ;;  %v687_v11 = vadd.f32 %v686_v63, %v685_v52  ;;  %v694_v20 = vadd.f32 %v693_v4, %v692_v57  ;;  %v348_v46 = vmul.f32 %v5440_v15, %v218_v0 }
  0x6b   : > { %9314 = vst [vmem:[#allocation26_spill] sm:$0xff] %v5799_v5  ;;  %v5811_v35 = vadd.f32 %v670_v3, %v669_v56  ;;  %v349_v21 = vmul.f32 %v5443_v16, %v219_v1  ;;  %v350_v52 = vmul.f32 %v5440_v15, %v220_v7  ;;  %v351_v54 = vmul.f32 %v5443_v16, %v221_v8  ;;  %v231_v56 = vld [vmem:[%s9005_s1 + $0x278] sm:$0xff] }
  0x6c   : > { %v5824_v48 = vadd.f32 %v679_v26, %v678_v60  ;;  %v688_v50 = vrot.slane %v687_v11, 1  ;;  %v695_v25 = vrot.slane %v694_v20, 2  ;;  %v352_v57 = vmul.f32 %v5440_v15, %v222_v28 }
  0x6d   : > { %9315 = vst [vmem:[#allocation27_spill] sm:$0xff] %v5811_v35  ;;  %v353_v58 = vmul.f32 %v5443_v16, %v223_v19  ;;  %v354_v27 = vmul.f32 %v5440_v15, %v224_v30  ;;  %v355_v63 = vmul.f32 %v5443_v16, %v225_v36  ;;  %v356_v0 = vmul.f32 %v5440_v15, %v226_v38 }
  0x6e   : > { %9316 = vst [vmem:[#allocation28_spill] sm:$0xff] %v5824_v48  ;;  %v5843_v60 = vadd.f32 %v688_v50, %v687_v11  ;;  %v357_v1 = vmul.f32 %v5443_v16, %v227_v45  ;;  %v696_v3 = vadd.f32 %v695_v25, %v694_v20  ;;  %v358_v4 = vmul.f32 %v5440_v15, %v228_v51 }
  0x6f   : > { %v359_v7 = vmul.f32 %v5443_v16, %v229_v6  ;;  %v360_v8 = vmul.f32 %v5440_v15, %v230_v39  ;;  %v361_v26 = vmul.f32 %v5443_v16, %v231_v56  ;;  %v699_v28 = vsel %vm410_vm0, %v346_v10, 0.0 }
  0x70   : > { %9317 = vst [vmem:[#allocation29_spill] sm:$0xff] %v5843_v60  ;;  %v700_v11 = vsel %vm410_vm0, %v347_v31, 0.0  ;;  %v708_v19 = vsel %vm410_vm0, %v348_v46, 0.0  ;;  %v697_v30 = vrot.slane %v696_v3, 1  ;;  %v709_v38 = vsel %vm410_vm0, %v349_v21, 0.0 }
  0x71   : > { %v701_v36 = vadd.f32 %v700_v11, %v699_v28  ;;  %v717_v20 = vsel %vm410_vm0, %v350_v52, 0.0  ;;  %v710_v45 = vadd.f32 %v709_v38, %v708_v19  ;;  %v718_v50 = vsel %vm410_vm0, %v351_v54, 0.0 }
  0x72   : > { %v726_v51 = vsel %vm410_vm0, %v352_v57, 0.0  ;;  %v727_v6 = vsel %vm410_vm0, %v353_v58, 0.0  ;;  %v5860_v39 = vadd.f32 %v697_v30, %v696_v3  ;;  %v719_v25 = vadd.f32 %v718_v50, %v717_v20 }
  0x73   : > { %v702_v10 = vrot.slane %v701_v36, 4  ;;  %v728_v31 = vadd.f32 %v727_v6, %v726_v51  ;;  %v711_v56 = vrot.slane %v710_v45, 4  ;;  %v735_v46 = vsel %vm410_vm0, %v354_v27, 0.0 }
  0x74   : > { %9318 = vst [vmem:[#allocation30_spill] sm:$0xff] %v5860_v39  ;;  %v736_v28 = vsel %vm410_vm0, %v355_v63, 0.0  ;;  %v744_v21 = vsel %vm410_vm0, %v356_v0, 0.0  ;;  %v720_v11 = vrot.slane %v719_v25, 4  ;;  %v745_v57 = vsel %vm410_vm0, %v357_v1, 0.0 }
  0x75   : > { %v703_v52 = vadd.f32 %v702_v10, %v701_v36  ;;  %v729_v19 = vrot.slane %v728_v31, 4  ;;  %v737_v54 = vadd.f32 %v736_v28, %v735_v46  ;;  %v712_v38 = vadd.f32 %v711_v56, %v710_v45 }
  0x76   : > { %v753_v58 = vsel %vm410_vm0, %v358_v4, 0.0  ;;  %v754_v3 = vsel %vm410_vm0, %v359_v7, 0.0  ;;  %v721_v20 = vadd.f32 %v720_v11, %v719_v25  ;;  %v746_v6 = vadd.f32 %v745_v57, %v744_v21 }
  0x77   : > { %v704_v30 = vrot.slane %v703_v52, 2  ;;  %v730_v50 = vadd.f32 %v729_v19, %v728_v31  ;;  %v738_v51 = vrot.slane %v737_v54, 4  ;;  %v713_v27 = vrot.slane %v712_v38, 2 }
  0x78   : > { %v755_v63 = vadd.f32 %v754_v3, %v753_v58  ;;  %v762_v0 = vsel %vm410_vm0, %v360_v8, 0.0  ;;  %v722_v10 = vrot.slane %v721_v20, 2  ;;  %v747_v56 = vrot.slane %v746_v6, 4  ;;  %v232_v8 = vld [vmem:[%s9005_s1 + $0x280] sm:$0xff] }
  0x79   : > { %v705_v36 = vadd.f32 %v704_v30, %v703_v52  ;;  %v731_v39 = vrot.slane %v730_v50, 2  ;;  %v739_v46 = vadd.f32 %v738_v51, %v737_v54  ;;  %v714_v45 = vadd.f32 %v713_v27, %v712_v38  ;;  %v236_v51 = vld [vmem:[%s9005_s1 + $0x2a0] sm:$0xff] }
  0x7a   : > { %v756_v1 = vrot.slane %v755_v63, 4  ;;  %v763_v4 = vsel %vm410_vm0, %v361_v26, 0.0  ;;  %v723_v7 = vadd.f32 %v722_v10, %v721_v20  ;;  %v748_v11 = vadd.f32 %v747_v56, %v746_v6  ;;  %v233_v26 = vld [vmem:[%s9005_s1 + $0x288] sm:$0xff]  ;;  %v234_v20 = vld [vmem:[%s9005_s1 + $0x290] sm:$0xff] }
  0x7b   : > { %v706_v28 = vrot.slane %v705_v36, 1  ;;  %v732_v60 = vadd.f32 %v731_v39, %v730_v50  ;;  %v740_v25 = vrot.slane %v739_v46, 2  ;;  %v715_v31 = vrot.slane %v714_v45, 1  ;;  %v235_v50 = vld [vmem:[%s9005_s1 + $0x298] sm:$0xff] }
  0x7c   : > { %v757_v19 = vadd.f32 %v756_v1, %v755_v63  ;;  %v764_v21 = vadd.f32 %v763_v4, %v762_v0  ;;  %v724_v54 = vrot.slane %v723_v7, 1  ;;  %v749_v39 = vrot.slane %v748_v11, 2  ;;  %v237_v0 = vld [vmem:[%s9005_s1 + $0x2a8] sm:$0xff]  ;;  %v240_v1 = vld [vmem:[%s9005_s1 + $0x2c0] sm:$0xff] }
  0x7d   : > { %v5873_v52 = vadd.f32 %v706_v28, %v705_v36  ;;  %v733_v38 = vrot.slane %v732_v60, 1  ;;  %v741_v57 = vadd.f32 %v740_v25, %v739_v46  ;;  %v5878_v58 = vadd.f32 %v715_v31, %v714_v45  ;;  %v238_v36 = vld [vmem:[%s9005_s1 + $0x2b0] sm:$0xff]  ;;  %v241_v4 = vld [vmem:[%s9005_s1 + $0x2c8] sm:$0xff]  ;;  %v243_v25 = vld [vmem:[%s9005_s1 + $0x2d8] sm:$0xff] }
  0x7e   : > { %v758_v3 = vrot.slane %v757_v19, 2  ;;  %v765_v30 = vrot.slane %v764_v21, 4  ;;  %v5889_v27 = vadd.f32 %v724_v54, %v723_v7  ;;  %v362_v10 = vmul.f32 %v5440_v15, %v232_v8  ;;  %v242_v15 = vld [vmem:[%s9005_s1 + $0x2d0] sm:$0xff]  ;;  %v5919_v31 = vld [vmem:[%s5407_s21] sm:$0xff] }
  0x7f   : > { %9319 = vst [vmem:[#allocation31_spill] sm:$0xff] %v5873_v52  ;;  %9320 = vst [vmem:[#allocation32_spill] sm:$0xff] %v5878_v58  ;;  %v5891_v6 = vadd.f32 %v733_v38, %v732_v60  ;;  %v742_v63 = vrot.slane %v741_v57, 1  ;;  %v750_v46 = vadd.f32 %v749_v39, %v748_v11  ;;  %v239_v60 = vld [vmem:[%s9005_s1 + $0x2b8] sm:$0xff]  ;;  %v363_v28 = vmul.f32 %v5443_v16, %v233_v26  ;;  %v245_v26 = vld [vmem:[%s9005_s1 + $0x2e8] sm:$0xff] }
  0x80   : > { %9321 = vst [vmem:[#allocation33_spill] sm:$0xff] %v5889_v27  ;;  %v759_v45 = vadd.f32 %v758_v3, %v757_v19  ;;  %v766_v56 = vadd.f32 %v765_v30, %v764_v21  ;;  %v364_v11 = vmul.f32 %v5919_v31, %v234_v20  ;;  %v5923_v19 = vld [vmem:[%s5407_s21 + $0x8] sm:$0xff]  ;;  %v366_v16 = vmul.f32 %v5919_v31, %v236_v51  ;;  %v246_v39 = vld [vmem:[%s9005_s1 + $0x2f0] sm:$0xff]  ;;  %v247_v30 = vld [vmem:[%s9005_s1 + $0x2f8] sm:$0xff] }
  0x81   : > { %9322 = vst [vmem:[#allocation34_spill] sm:$0xff] %v5891_v6  ;;  %v5910_v7 = vadd.f32 %v742_v63, %v741_v57  ;;  %v365_v21 = vmul.f32 %v5923_v19, %v235_v50  ;;  %v751_v8 = vrot.slane %v750_v46, 1  ;;  %v244_v57 = vld [vmem:[%s9005_s1 + $0x2e0] sm:$0xff]  ;;  %v367_v3 = vmul.f32 %v5923_v19, %v237_v0 }
  0x82   : > { %v760_v54 = vrot.slane %v759_v45, 1  ;;  %v767_v38 = vrot.slane %v766_v56, 2  ;;  %v368_v20 = vmul.f32 %v5919_v31, %v238_v36  ;;  %v369_v50 = vmul.f32 %v5923_v19, %v239_v60 }
  0x83   : > { %9323 = vst [vmem:[#allocation35_spill] sm:$0xff] %v5910_v7  ;;  %v370_v51 = vmul.f32 %v5919_v31, %v240_v1  ;;  %v371_v63 = vmul.f32 %v5923_v19, %v241_v4  ;;  %v5944_v7 = vadd.f32 %v751_v8, %v750_v46  ;;  %v372_v58 = vmul.f32 %v5919_v31, %v242_v15 }
  0x84   : > { %v5946_v6 = vadd.f32 %v760_v54, %v759_v45  ;;  %v768_v27 = vadd.f32 %v767_v38, %v766_v56  ;;  %v373_v0 = vmul.f32 %v5923_v19, %v243_v25  ;;  %v374_v52 = vmul.f32 %v5919_v31, %v244_v57 }
  0x85   : > { %9324 = vst [vmem:[#allocation36_spill] sm:$0xff] %v5944_v7  ;;  %v375_v48 = vmul.f32 %v5923_v19, %v245_v26  ;;  %v376_v36 = vmul.f32 %v5919_v31, %v246_v39  ;;  %v377_v1 = vmul.f32 %v5923_v19, %v247_v30  ;;  %v771_v4 = vsel %vm410_vm0, %v362_v10, 0.0 }
  0x86   : > { %9325 = vst [vmem:[#allocation37_spill] sm:$0xff] %v5946_v6  ;;  %v769_v60 = vrot.slane %v768_v27, 1  ;;  %v772_v46 = vsel %vm410_vm0, %v363_v28, 0.0  ;;  %v780_v56 = vsel %vm410_vm0, %v364_v11, 0.0  ;;  %v781_v15 = vsel %vm410_vm0, %v365_v21, 0.0 }
  0x87   : > { %v773_v45 = vadd.f32 %v772_v46, %v771_v4  ;;  %v789_v25 = vsel %vm410_vm0, %v366_v16, 0.0  ;;  %v782_v54 = vadd.f32 %v781_v15, %v780_v56  ;;  %v790_v38 = vsel %vm410_vm0, %v367_v3, 0.0 }
  0x88   : > { %v5959_v8 = vadd.f32 %v769_v60, %v768_v27  ;;  %v798_v57 = vsel %vm410_vm0, %v368_v20, 0.0  ;;  %v791_v39 = vadd.f32 %v790_v38, %v789_v25  ;;  %v799_v10 = vsel %vm410_vm0, %v369_v50, 0.0 }
  0x89   : > { %v774_v26 = vrot.slane %v773_v45, 4  ;;  %v807_v28 = vsel %vm410_vm0, %v370_v51, 0.0  ;;  %v783_v30 = vrot.slane %v782_v54, 4  ;;  %v800_v4 = vadd.f32 %v799_v10, %v798_v57 }
  0x8a   : > { %9326 = vst [vmem:[#allocation38_spill] sm:$0xff] %v5959_v8  ;;  %v808_v11 = vsel %vm410_vm0, %v371_v63, 0.0  ;;  %v816_v21 = vsel %vm410_vm0, %v372_v58, 0.0  ;;  %v792_v27 = vrot.slane %v791_v39, 4  ;;  %v817_v46 = vsel %vm410_vm0, %v373_v0, 0.0 }
  0x8b   : > { %v775_v16 = vadd.f32 %v774_v26, %v773_v45  ;;  %v809_v60 = vadd.f32 %v808_v11, %v807_v28  ;;  %v784_v3 = vadd.f32 %v783_v30, %v782_v54  ;;  %v801_v56 = vrot.slane %v800_v4, 4 }
  0x8c   : > { %v818_v20 = vadd.f32 %v817_v46, %v816_v21  ;;  %v825_v15 = vsel %vm410_vm0, %v374_v52, 0.0  ;;  %v793_v50 = vadd.f32 %v792_v27, %v791_v39  ;;  %v826_v51 = vsel %vm410_vm0, %v375_v48, 0.0 }
  0x8d   : > { %v776_v25 = vrot.slane %v775_v16, 2  ;;  %v810_v38 = vrot.slane %v809_v60, 4  ;;  %v785_v57 = vrot.slane %v784_v3, 2  ;;  %v802_v10 = vadd.f32 %v801_v56, %v800_v4 }
  0x8e   : > { %v819_v63 = vrot.slane %v818_v20, 4  ;;  %v827_v8 = vadd.f32 %v826_v51, %v825_v15  ;;  %v794_v45 = vrot.slane %v793_v50, 2  ;;  %v834_v28 = vsel %vm410_vm0, %v376_v36, 0.0  ;;  %v248_v36 = vld [vmem:[%s9005_s1 + $0x300] sm:$0xff] }
  0x8f   : > { %v777_v58 = vadd.f32 %v776_v25, %v775_v16  ;;  %v811_v26 = vadd.f32 %v810_v38, %v809_v60  ;;  %v786_v0 = vadd.f32 %v785_v57, %v784_v3  ;;  %v803_v54 = vrot.slane %v802_v10, 2  ;;  %v249_v3 = vld [vmem:[%s9005_s1 + $0x308] sm:$0xff] }
  0x90   : > { %v820_v30 = vadd.f32 %v819_v63, %v818_v20  ;;  %v828_v11 = vrot.slane %v827_v8, 4  ;;  %v795_v52 = vadd.f32 %v794_v45, %v793_v50  ;;  %v835_v39 = vsel %vm410_vm0, %v377_v1, 0.0  ;;  %v251_v63 = vld [vmem:[%s9005_s1 + $0x318] sm:$0xff] }
  0x91   : > { %v778_v21 = vrot.slane %v777_v58, 1  ;;  %v812_v46 = vrot.slane %v811_v26, 2  ;;  %v787_v27 = vrot.slane %v786_v0, 1  ;;  %v804_v48 = vadd.f32 %v803_v54, %v802_v10  ;;  %v256_v54 = vld [vmem:[%s9005_s1 + $0x340] sm:$0xff] }
  0x92   : > { %v821_v6 = vrot.slane %v820_v30, 2  ;;  %v829_v4 = vadd.f32 %v828_v11, %v827_v8  ;;  %v796_v16 = vrot.slane %v795_v52, 1  ;;  %v836_v25 = vadd.f32 %v835_v39, %v834_v28  ;;  %v250_v8 = vld [vmem:[%s9005_s1 + $0x310] sm:$0xff]  ;;  %v257_v39 = vld [vmem:[%s9005_s1 + $0x348] sm:$0xff] }
  0x93   : > { %v5972_v15 = vadd.f32 %v778_v21, %v777_v58  ;;  %v813_v60 = vadd.f32 %v812_v46, %v811_v26  ;;  %v5980_v1 = vadd.f32 %v787_v27, %v786_v0  ;;  %v805_v20 = vrot.slane %v804_v48, 1  ;;  %v252_v58 = vld [vmem:[%s9005_s1 + $0x320] sm:$0xff]  ;;  %v254_v28 = vld [vmem:[%s9005_s1 + $0x330] sm:$0xff]  ;;  %v255_v0 = vld [vmem:[%s9005_s1 + $0x338] sm:$0xff] }
  0x94   : > { %v822_v50 = vadd.f32 %v821_v6, %v820_v30  ;;  %v5985_v38 = vadd.f32 %v796_v16, %v795_v52  ;;  %v830_v57 = vrot.slane %v829_v4, 2  ;;  %v837_v10 = vrot.slane %v836_v25, 4  ;;  %v253_v6 = vld [vmem:[%s9005_s1 + $0x328] sm:$0xff]  ;;  %v258_v27 = vld [vmem:[%s9005_s1 + $0x350] sm:$0xff] }
  0x95   : > { %9327 = vst [vmem:[#allocation39_spill] sm:$0xff] %v5972_v15  ;;  %9328 = vst [vmem:[#allocation40_spill] sm:$0xff] %v5980_v1  ;;  %v814_v51 = vrot.slane %v813_v60, 1  ;;  %v5996_v45 = vadd.f32 %v805_v20, %v804_v48  ;;  %v378_v30 = vmul.f32 %v5919_v31, %v248_v36  ;;  %v379_v11 = vmul.f32 %v5923_v19, %v249_v3  ;;  %v259_v48 = vld [vmem:[%s9005_s1 + $0x358] sm:$0xff] }
  0x96   : > { %9329 = vst [vmem:[#allocation41_spill] sm:$0xff] %v5985_v38  ;;  %v823_v26 = vrot.slane %v822_v50, 1  ;;  %v831_v52 = vadd.f32 %v830_v57, %v829_v4  ;;  %v838_v46 = vadd.f32 %v837_v10, %v836_v25  ;;  %v260_v4 = vld [vmem:[%s9005_s1 + $0x360] sm:$0xff]  ;;  %v381_v25 = vmul.f32 %v5923_v19, %v251_v63 }
  0x97   : > { %9330 = vst [vmem:[#allocation42_spill] sm:$0xff] %v5996_v45  ;;  %v6009_v21 = vadd.f32 %v814_v51, %v813_v60  ;;  %v261_v60 = vld [vmem:[%s9005_s1 + $0x368] sm:$0xff]  ;;  %v382_v36 = vmul.f32 %v5919_v31, %v252_v58  ;;  %v383_v3 = vmul.f32 %v5923_v19, %v253_v6  ;;  %v263_v51 = vld [vmem:[%s9005_s1 + $0x378] sm:$0xff]  ;;  %v384_v57 = vmul.f32 %v5919_v31, %v254_v28 }
  0x98   : > { %v6021_v16 = vadd.f32 %v823_v26, %v822_v50  ;;  %v832_v20 = vrot.slane %v831_v52, 1  ;;  %v262_v50 = vld [vmem:[%s9005_s1 + $0x370] sm:$0xff]  ;;  %v6040_v10 = vmul.f32 %v5923_v19, %v255_v0  ;;  %v6043_v63 = vmul.f32 %v5919_v31, %v256_v54 }
  0x99   : > { %9331 = vst [vmem:[#allocation43_spill] sm:$0xff] %v6009_v21  ;;  %v6046_v58 = vmul.f32 %v5923_v19, %v257_v39  ;;  %v6049_v6 = vmul.f32 %v5919_v31, %v258_v27  ;;  %v6052_v26 = vmul.f32 %v5923_v19, %v259_v48  ;;  %v6059_v0 = vmul.f32 %v5919_v31, %v260_v4 }
  0x9a   : > { %9332 = vst [vmem:[#allocation44_spill] sm:$0xff] %v6021_v16  ;;  %v6054_v16 = vadd.f32 %v832_v20, %v831_v52  ;;  %v6062_v54 = vmul.f32 %v5923_v19, %v261_v60  ;;  %v6065_v39 = vmul.f32 %v5919_v31, %v262_v50  ;;  %v6068_v27 = vmul.f32 %v5923_v19, %v263_v51 }
  0x9b   : > { %v843_v48 = vsel %vm410_vm0, %v378_v30, 0.0  ;;  %v844_v52 = vsel %vm410_vm0, %v379_v11, 0.0  ;;  %v853_v60 = vsel %vm410_vm0, %v381_v25, 0.0  ;;  %v6082_v50 = vsel %vm410_vm0, %v382_v36, 0.0 }
  0x9c   : > { %v989_v56 = vpop.xlane.xlu0 %988  ;;  %9333 = vst [vmem:[#allocation45_spill] sm:$0xff] %v6054_v16  ;;  %9334 = vst [vmem:[#allocation46_spill] sm:$0xff] %v6062_v54  ;;  %v6073_v20 = vadd.f32 %v844_v52, %v843_v48  ;;  %v6085_v51 = vsel %vm410_vm0, %v383_v3, 0.0  ;;  %v6088_v30 = vsel %vm410_vm0, %v384_v57, 0.0 }
  0x9d   : > { %5065 = vrcp.f32 %v989_v56  ;;  %v380_v56 = vmul.f32 %v5919_v31, %v250_v8  ;;  %v839_v8 = vrot.slane %v838_v46, 2 }
  0x9f   : > { %v6056_v28 = vadd.f32 %v839_v8, %v838_v46  ;;  %v852_v4 = vsel %vm410_vm0, %v380_v56, 0.0 }
  0xa0   : > { %v6079_v54 = vadd.f32 %v853_v60, %v852_v4 }
  0xa7   : > { %v6077_v8 = vpop.eup %5065 }
  0xa8   : > { %v1000_v11 = vmul.f32 %v6077_v8, %v5492_v34  ;;  %v1001_v56 = vmul.f32 %v6077_v8, %v5503_v40  ;;  %v1002_v25 = vmul.f32 %v6077_v8, %v5505_v41  ;;  %v1003_v48 = vmul.f32 %v6077_v8, %v5507_v42 }
  0xa9   : > { %v1004_v36 = vmul.f32 %v6077_v8, %v5509_v43  ;;  %v1005_v3 = vmul.f32 %v6077_v8, %v5520_v47  ;;  %v1006_v57 = vmul.f32 %v6077_v8, %v5545_v61  ;;  %v1007_v52 = vmul.f32 %v6077_v8, %v5566_v17 }
  0xaa   : > { %v1134_v4 = vsel %vm1120_vm1, %v1001_v56, %v1000_v11  ;;  %v992_v60 = vmul.f32 %v6077_v8, %v5585_v9  ;;  %v993_v46 = vmul.f32 %v6077_v8, %v5590_v18  ;;  %v994_v43 = vmul.f32 %v6077_v8, %v5598_v23 }
  0xab   : > { %v1135_v42 = vsel %vm1122_vm2, %v1002_v25, %v1134_v4  ;;  %v995_v47 = vmul.f32 %v6077_v8, %v5607_v29  ;;  %v996_v61 = vmul.f32 %v6077_v8, %v5619_v37  ;;  %v997_v11 = vmul.f32 %v6077_v8, %v5632_v49 }
  0xac   : > { %v1136_v56 = vsel %vm1124_vm3, %v1003_v48, %v1135_v42  ;;  %v998_v17 = vmul.f32 %v6077_v8, %v5651_v62  ;;  %v999_v41 = vmul.f32 %v6077_v8, %v5668_v24  ;;  %v1121_v34 = vsel %vm1120_vm1, %v993_v46, %v992_v60 }
  0xad   : > { %v1137_v25 = vsel %vm1126_vm4, %v1004_v36, %v1136_v56  ;;  %v1123_v4 = vsel %vm1122_vm2, %v994_v43, %v1121_v34  ;;  %v1008_v40 = vmul.f32 %v6077_v8, %v5681_v12  ;;  %v1009_v49 = vmul.f32 %v6077_v8, %v5686_v22 }
  0xae   : > { %v1138_v42 = vsel %vm1128_vm5, %v1005_v3, %v1137_v25  ;;  %v1125_v48 = vsel %vm1124_vm3, %v995_v47, %v1123_v4  ;;  %v1010_v62 = vmul.f32 %v6077_v8, %v5697_v32  ;;  %v1011_v46 = vmul.f32 %v6077_v8, %v5699_v33 }
  0xaf   : > { %v1139_v36 = vsel %vm1130_vm6, %v1006_v57, %v1138_v42  ;;  %v1127_v34 = vsel %vm1126_vm4, %v996_v61, %v1125_v48  ;;  %v1012_v43 = vmul.f32 %v6077_v8, %v5718_v53  ;;  %v1013_v60 = vmul.f32 %v6077_v8, %v5746_v13 }
  0xb0   : > { %v1140_v3 = vsel %vm1132_vm7, %v1007_v52, %v1139_v36  ;;  %v1129_v47 = vsel %vm1128_vm5, %v997_v11, %v1127_v34  ;;  %v1014_v56 = vmul.f32 %v6077_v8, %v5748_v14  ;;  %v1015_v25 = vmul.f32 %v6077_v8, %v5761_v44 }
  0xb1   : > { %v1194_v57 = vsel %vm410_vm0, %v1140_v3, 0.0  ;;  %v1131_v61 = vsel %vm1130_vm6, %v998_v17, %v1129_v47  ;;  %v1141_v4 = vsel %vm1120_vm1, %v1009_v49, %v1008_v40  ;;  %v1016_v42 = vmul.f32 %v6077_v8, %v5777_v55  ;;  %v9336_v47 = vld [vmem:[#allocation29_spill] sm:$0xff] }
  0xb2   : > { %1195 = vadd.xlane.f32.xlu1 %v1194_v57  ;;  %v1133_v52 = vsel %vm1132_vm7, %v999_v41, %v1131_v61  ;;  %v1142_v11 = vsel %vm1122_vm2, %v1010_v62, %v1141_v4  ;;  %v1017_v48 = vmul.f32 %v6077_v8, %v5782_v59  ;;  %v1018_v36 = vmul.f32 %v6077_v8, %v5790_v2  ;;  %v9335_v62 = vld [vmem:[#allocation28_spill] sm:$0xff]  ;;  %v9337_v61 = vld [vmem:[#allocation30_spill] sm:$0xff] }
  0xb3   : > { %v1191_v34 = vsel %vm410_vm0, %v1133_v52, 0.0  ;;  %v1143_v17 = vsel %vm1124_vm3, %v1011_v46, %v1142_v11  ;;  %v1019_v40 = vmul.f32 %v6077_v8, %v5799_v5  ;;  %v1020_v49 = vmul.f32 %v6077_v8, %v5811_v35  ;;  %v9338_v11 = vld [vmem:[#allocation31_spill] sm:$0xff]  ;;  %v9339_v35 = vld [vmem:[#allocation32_spill] sm:$0xff]  ;;  %v9341_v2 = vld [vmem:[#allocation34_spill] sm:$0xff] }
  0xb4   : > { %1192 = vadd.xlane.f32.xlu0 %v1191_v34  ;;  %v1144_v41 = vsel %vm1126_vm4, %v1012_v43, %v1143_v17  ;;  %v1021_v3 = vmul.f32 %v6077_v8, %v9335_v62  ;;  %v1022_v57 = vmul.f32 %v6077_v8, %v9336_v47  ;;  %v1023_v4 = vmul.f32 %v6077_v8, %v9337_v61  ;;  %v9340_v62 = vld [vmem:[#allocation33_spill] sm:$0xff] }
  0xb5   : > { %v1145_v46 = vsel %vm1128_vm5, %v1013_v60, %v1144_v41  ;;  %v1148_v52 = vsel %vm1120_vm1, %v1017_v48, %v1016_v42  ;;  %v1024_v5 = vmul.f32 %v6077_v8, %v9338_v11  ;;  %v1025_v34 = vmul.f32 %v6077_v8, %v9339_v35  ;;  %v9342_v48 = vld [vmem:[#allocation35_spill] sm:$0xff] }
  0xb6   : > { %v1146_v43 = vsel %vm1130_vm6, %v1014_v56, %v1145_v46  ;;  %v1149_v17 = vsel %vm1122_vm2, %v1018_v36, %v1148_v52  ;;  %v1026_v47 = vmul.f32 %v6077_v8, %v9340_v62  ;;  %v1027_v61 = vmul.f32 %v6077_v8, %v9341_v2  ;;  %v9343_v46 = vld [vmem:[#allocation37_spill] sm:$0xff]  ;;  %v9344_v62 = vld [vmem:[#allocation38_spill] sm:$0xff] }
  0xb7   : > { %v1147_v60 = vsel %vm1132_vm7, %v1015_v25, %v1146_v43  ;;  %v1150_v42 = vsel %vm1124_vm3, %v1019_v40, %v1149_v17  ;;  %v1028_v41 = vmul.f32 %v6077_v8, %v9342_v48  ;;  %v1029_v35 = vmul.f32 %v6077_v8, %v5944_v7 }
  0xb8   : > { %v1197_v56 = vsel %vm410_vm0, %v1147_v60, 0.0  ;;  %v1151_v36 = vsel %vm1126_vm4, %v1020_v49, %v1150_v42  ;;  %v1030_v52 = vmul.f32 %v6077_v8, %v9343_v46  ;;  %v1031_v2 = vmul.f32 %v6077_v8, %v9344_v62 }
  0xb9   : > { %1198 = vadd.xlane.f32.xlu1 %v1197_v56  ;;  %v1152_v25 = vsel %vm1128_vm5, %v1021_v3, %v1151_v36  ;;  %v1155_v40 = vsel %vm1120_vm1, %v1025_v34, %v1024_v5  ;;  %v9345_v43 = vrot.slane %v6056_v28, 1  ;;  %v1032_v60 = vmul.f32 %v6077_v8, %v5972_v15  ;;  %v9347_v36 = vld [vmem:[#allocation44_spill] sm:$0xff] }
  0xba   : > { %v1153_v49 = vsel %vm1130_vm6, %v1022_v57, %v1152_v25  ;;  %v1156_v42 = vsel %vm1122_vm2, %v1026_v47, %v1155_v40  ;;  %v1033_v62 = vmul.f32 %v6077_v8, %v5980_v1  ;;  %v1034_v3 = vmul.f32 %v6077_v8, %v5985_v38 }
  0xbb   : > { %v6203_v17 = vadd.f32 %v9345_v43, %v6056_v28  ;;  %v1154_v5 = vsel %vm1132_vm7, %v1023_v4, %v1153_v49  ;;  %v1157_v34 = vsel %vm1124_vm3, %v1027_v61, %v1156_v42  ;;  %v1035_v28 = vmul.f32 %v6077_v8, %v5996_v45 }
  0xbc   : > { %v1036_v56 = vmul.f32 %v6077_v8, %v6009_v21  ;;  %v1200_v57 = vsel %vm410_vm0, %v1154_v5, 0.0  ;;  %v1158_v47 = vsel %vm1126_vm4, %v1028_v41, %v1157_v34  ;;  %v1037_v25 = vmul.f32 %v6077_v8, %v9347_v36 }
  0xbd   : > { %9346 = vst [vmem:[#allocation31_spill] sm:$0xff] %v6203_v17  ;;  %v1038_v40 = vmul.f32 %v6077_v8, %v6054_v16  ;;  %1201 = vadd.xlane.f32.xlu0 %v1200_v57  ;;  %v1159_v4 = vsel %vm1128_vm5, %v1029_v35, %v1158_v47  ;;  %v1039_v61 = vmul.f32 %v6077_v8, %v6203_v17  ;;  %v846_v49 = vrot.slane %v6073_v20, 4 }
  0xbe   : > { %v1162_v43 = vsel %vm1120_vm1, %v1033_v62, %v1032_v60  ;;  %v1160_v42 = vsel %vm1130_vm6, %v1030_v52, %v1159_v4  ;;  %v855_v5 = vrot.slane %v6079_v54, 4  ;;  %v863_v34 = vadd.f32 %v6085_v51, %v6082_v50 }
  0xbf   : > { %v1163_v41 = vsel %vm1122_vm2, %v1034_v3, %v1162_v43  ;;  %v1161_v57 = vsel %vm1132_vm7, %v1031_v2, %v1160_v42  ;;  %v847_v47 = vadd.f32 %v846_v49, %v6073_v20  ;;  %v871_v62 = vsel %vm410_vm0, %v6040_v10, 0.0 }
  0xc0   : > { %v1164_v35 = vsel %vm1124_vm3, %v1035_v28, %v1163_v41  ;;  %v1203_v60 = vsel %vm410_vm0, %v1161_v57, 0.0  ;;  %v856_v3 = vadd.f32 %v855_v5, %v6079_v54  ;;  %v864_v4 = vrot.slane %v863_v34, 4 }
  0xc1   : > { %v1165_v52 = vsel %vm1126_vm4, %v1036_v56, %v1164_v35  ;;  %1204 = vadd.xlane.f32.xlu1 %v1203_v60  ;;  %v848_v50 = vrot.slane %v847_v47, 2  ;;  %v872_v2 = vadd.f32 %v871_v62, %v6088_v30  ;;  %v879_v51 = vsel %vm410_vm0, %v6043_v63, 0.0 }
  0xc2   : > { %v1166_v43 = vsel %vm1128_vm5, %v1037_v25, %v1165_v52  ;;  %v857_v28 = vrot.slane %v856_v3, 2  ;;  %v865_v10 = vadd.f32 %v864_v4, %v863_v34  ;;  %v880_v49 = vsel %vm410_vm0, %v6046_v58, 0.0  ;;  %v9349_v4 = vld [vmem:[#allocation46_spill] sm:$0xff] }
  0xc3   : > { %v1167_v20 = vsel %vm1130_vm6, %v1038_v40, %v1166_v43  ;;  %v849_v54 = vadd.f32 %v848_v50, %v847_v47  ;;  %v873_v42 = vrot.slane %v872_v2, 4  ;;  %v881_v41 = vadd.f32 %v880_v49, %v879_v51 }
  0xc4   : > { %v1168_v56 = vsel %vm1132_vm7, %v1039_v61, %v1167_v20  ;;  %v858_v5 = vadd.f32 %v857_v28, %v856_v3  ;;  %v866_v57 = vrot.slane %v865_v10, 2  ;;  %v888_v30 = vsel %vm410_vm0, %v6049_v6, 0.0 }
  0xc5   : > { %v1206_v25 = vsel %vm410_vm0, %v1168_v56, 0.0  ;;  %v850_v63 = vrot.slane %v849_v54, 1  ;;  %v874_v40 = vadd.f32 %v873_v42, %v872_v2  ;;  %v882_v35 = vrot.slane %v881_v41, 4  ;;  %v264_v42 = vld [vmem:[%s9005_s1 + $0x380] sm:$0xff] }
  0xc6   : > { %1207 = vadd.xlane.f32.xlu0 %v1206_v25  ;;  %v889_v34 = vsel %vm410_vm0, %v6052_v26, 0.0  ;;  %v859_v58 = vrot.slane %v858_v5, 1  ;;  %v867_v62 = vadd.f32 %v866_v57, %v865_v10  ;;  %v897_v47 = vsel %vm410_vm0, %v6059_v0, 0.0 }
  0xc7   : > { %v890_v61 = vadd.f32 %v889_v34, %v888_v30  ;;  %v6258_v60 = vadd.f32 %v850_v63, %v849_v54  ;;  %v875_v52 = vrot.slane %v874_v40, 2  ;;  %v883_v3 = vadd.f32 %v882_v35, %v881_v41  ;;  %v266_v35 = vld [vmem:[%s9005_s1 + $0x390] sm:$0xff] }
  0xc8   : > { %v898_v6 = vsel %vm410_vm0, %v9349_v4, 0.0  ;;  %v6262_v43 = vadd.f32 %v859_v58, %v858_v5  ;;  %v868_v50 = vrot.slane %v867_v62, 1  ;;  %v906_v28 = vsel %vm410_vm0, %v6065_v39, 0.0 }
  0xc9   : > { %9348 = vst [vmem:[#allocation47_spill] sm:$0xff] %v6258_v60  ;;  %v891_v2 = vrot.slane %v890_v61, 4  ;;  %v899_v51 = vadd.f32 %v898_v6, %v897_v47  ;;  %v876_v20 = vadd.f32 %v875_v52, %v874_v40  ;;  %v884_v26 = vrot.slane %v883_v3, 2  ;;  %v265_v40 = vld [vmem:[%s9005_s1 + $0x388] sm:$0xff] }
  0xca   : > { %9350 = vst [vmem:[#allocation46_spill] sm:$0xff] %v6262_v43  ;;  %v907_v0 = vsel %vm410_vm0, %v6068_v27, 0.0  ;;  %v6268_v10 = vadd.f32 %v868_v50, %v867_v62  ;;  %v1040_v5 = vmul.f32 %v6077_v8, %v6258_v60  ;;  %v1041_v39 = vmul.f32 %v6077_v8, %v6262_v43  ;;  %v268_v50 = vld [vmem:[%s9005_s1 + $0x3a0] sm:$0xff] }
  0xcb   : > { %v892_v49 = vadd.f32 %v891_v2, %v890_v61  ;;  %v900_v56 = vrot.slane %v899_v51, 4  ;;  %v908_v54 = vadd.f32 %v907_v0, %v906_v28  ;;  %v877_v41 = vrot.slane %v876_v20, 1  ;;  %v267_v61 = vld [vmem:[%s9005_s1 + $0x398] sm:$0xff]  ;;  %v269_v2 = vld [vmem:[%s9005_s1 + $0x3a8] sm:$0xff] }
  0xcc   : > { %9351 = vst [vmem:[#allocation48_spill] sm:$0xff] %v6268_v10  ;;  %v885_v25 = vadd.f32 %v884_v26, %v883_v3  ;;  %v1042_v63 = vmul.f32 %v6077_v8, %v6268_v10  ;;  %v1169_v62 = vsel %vm1120_vm1, %v1041_v39, %v1040_v5  ;;  %v394_v47 = vmul.f32 %v5919_v31, %v264_v42  ;;  %v270_v26 = vld [vmem:[%s9005_s1 + $0x3b0] sm:$0xff]  ;;  %v271_v42 = vld [vmem:[%s9005_s1 + $0x3b8] sm:$0xff] }
  0xcd   : > { %v893_v57 = vrot.slane %v892_v49, 2  ;;  %v901_v30 = vadd.f32 %v900_v56, %v899_v51  ;;  %v909_v27 = vrot.slane %v908_v54, 4  ;;  %v6285_v34 = vadd.f32 %v877_v41, %v876_v20  ;;  %v272_v41 = vld [vmem:[%s9005_s1 + $0x3c0] sm:$0xff] }
  0xce   : > { %v886_v58 = vrot.slane %v885_v25, 1  ;;  %v1170_v6 = vsel %vm1122_vm2, %v1042_v63, %v1169_v62  ;;  %v395_v28 = vmul.f32 %v5923_v19, %v265_v40  ;;  %v396_v0 = vmul.f32 %v5919_v31, %v266_v35 }
  0xcf   : > { %9352 = vst [vmem:[#allocation49_spill] sm:$0xff] %v6285_v34  ;;  %v894_v52 = vadd.f32 %v893_v57, %v892_v49  ;;  %v902_v3 = vrot.slane %v901_v30, 2  ;;  %v910_v4 = vadd.f32 %v909_v27, %v908_v54  ;;  %v1043_v20 = vmul.f32 %v6077_v8, %v6285_v34  ;;  %v275_v27 = vld [vmem:[%s9005_s1 + $0x3d8] sm:$0xff] }
  0xd0   : > { %v6299_v51 = vadd.f32 %v886_v58, %v885_v25  ;;  %v273_v25 = vld [vmem:[%s9005_s1 + $0x3c8] sm:$0xff]  ;;  %v397_v5 = vmul.f32 %v5923_v19, %v267_v61  ;;  %v398_v63 = vmul.f32 %v5919_v31, %v268_v50  ;;  %v399_v40 = vmul.f32 %v5923_v19, %v269_v2  ;;  %v276_v61 = vld [vmem:[%s9005_s1 + $0x3e0] sm:$0xff] }
  0xd1   : > { %v895_v49 = vrot.slane %v894_v52, 1  ;;  %v903_v56 = vadd.f32 %v902_v3, %v901_v30  ;;  %v911_v54 = vrot.slane %v910_v4, 2  ;;  %v1171_v57 = vsel %vm1124_vm3, %v1043_v20, %v1170_v6  ;;  %v274_v30 = vld [vmem:[%s9005_s1 + $0x3d0] sm:$0xff]  ;;  %v277_v3 = vld [vmem:[%s9005_s1 + $0x3e8] sm:$0xff] }
  0xd2   : > { %9353 = vst [vmem:[#allocation50_spill] sm:$0xff] %v6299_v51  ;;  %v1044_v39 = vmul.f32 %v6077_v8, %v6299_v51  ;;  %v278_v6 = vld [vmem:[%s9005_s1 + $0x3f0] sm:$0xff]  ;;  %v400_v50 = vmul.f32 %v5919_v31, %v270_v26  ;;  %v402_v20 = vmul.f32 %v5919_v31, %v272_v41  ;;  %v404_v26 = vmul.f32 %v5919_v31, %v274_v30 }
  0xd3   : > { %v6329_v35 = vadd.f32 %v895_v49, %v894_v52  ;;  %v904_v58 = vrot.slane %v903_v56, 1  ;;  %v912_v62 = vadd.f32 %v911_v54, %v910_v4  ;;  %v279_v52 = vld [vmem:[%s9005_s1 + $0x3f8] sm:$0xff]  ;;  %v401_v4 = vmul.f32 %v5923_v19, %v271_v42 }
  0xd4   : > { %v1172_v2 = vsel %vm1126_vm4, %v1044_v39, %v1171_v57  ;;  %v403_v49 = vmul.f32 %v5923_v19, %v273_v25  ;;  %v405_v39 = vmul.f32 %v5923_v19, %v275_v27  ;;  %v406_v57 = vmul.f32 %v5919_v31, %v276_v61 }
  0xd5   : > { %9354 = vst [vmem:[#allocation51_spill] sm:$0xff] %v6329_v35  ;;  %v6348_v54 = vadd.f32 %v904_v58, %v903_v56  ;;  %v913_v51 = vrot.slane %v912_v62, 1  ;;  %v1045_v34 = vmul.f32 %v6077_v8, %v6329_v35  ;;  %v407_v60 = vmul.f32 %v5923_v19, %v277_v3 }
  0xd6   : > { %v408_v42 = vmul.f32 %v5919_v31, %v278_v6  ;;  %v409_v25 = vmul.f32 %v5923_v19, %v279_v52  ;;  %v915_v58 = vsel %vm410_vm0, %v394_v47, 0.0  ;;  %v916_v30 = vsel %vm410_vm0, %v395_v28, 0.0 }
  0xd7   : > { %9355 = vst [vmem:[#allocation52_spill] sm:$0xff] %v6348_v54  ;;  %v6357_v10 = vadd.f32 %v913_v51, %v912_v62  ;;  %v1046_v56 = vmul.f32 %v6077_v8, %v6348_v54  ;;  %v1173_v41 = vsel %vm1128_vm5, %v1045_v34, %v1172_v2  ;;  %v924_v27 = vsel %vm410_vm0, %v396_v0, 0.0 }
  0xd8   : > { %v925_v61 = vsel %vm410_vm0, %v397_v5, 0.0  ;;  %v917_v62 = vadd.f32 %v916_v30, %v915_v58  ;;  %v933_v6 = vsel %vm410_vm0, %v398_v63, 0.0  ;;  %v934_v34 = vsel %vm410_vm0, %v399_v40, 0.0 }
  0xd9   : > { %9356 = vst [vmem:[#allocation53_spill] sm:$0xff] %v6357_v10  ;;  %v1047_v31 = vmul.f32 %v6077_v8, %v6357_v10  ;;  %v1174_v51 = vsel %vm1130_vm6, %v1046_v56, %v1173_v41  ;;  %v926_v3 = vadd.f32 %v925_v61, %v924_v27  ;;  %v942_v19 = vsel %vm410_vm0, %v400_v50, 0.0 }
  0xda   : > { %v943_v47 = vsel %vm410_vm0, %v401_v4, 0.0  ;;  %v918_v0 = vrot.slane %v917_v62, 4  ;;  %v935_v5 = vadd.f32 %v934_v34, %v933_v6  ;;  %v951_v56 = vsel %vm410_vm0, %v402_v20, 0.0 }
  0xdb   : > { %v1175_v28 = vsel %vm1132_vm7, %v1047_v31, %v1174_v51  ;;  %v927_v2 = vrot.slane %v926_v3, 4  ;;  %v944_v10 = vadd.f32 %v943_v47, %v942_v19  ;;  %v952_v41 = vsel %vm410_vm0, %v403_v49, 0.0 }
  0xdc   : > { %v1209_v52 = vsel %vm410_vm0, %v1175_v28, 0.0  ;;  %v919_v63 = vadd.f32 %v918_v0, %v917_v62  ;;  %v936_v40 = vrot.slane %v935_v5, 4  ;;  %v953_v30 = vadd.f32 %v952_v41, %v951_v56 }
  0xdd   : > { %1210 = vadd.xlane.f32.xlu1 %v1209_v52  ;;  %v928_v58 = vadd.f32 %v927_v2, %v926_v3  ;;  %v945_v50 = vrot.slane %v944_v10, 4  ;;  %v960_v4 = vsel %vm410_vm0, %v404_v26, 0.0  ;;  %v961_v27 = vsel %vm410_vm0, %v405_v39, 0.0 }
  0xde   : > { %v969_v61 = vsel %vm410_vm0, %v406_v57, 0.0  ;;  %v920_v31 = vrot.slane %v919_v63, 2  ;;  %v937_v6 = vadd.f32 %v936_v40, %v935_v5  ;;  %v954_v34 = vrot.slane %v953_v30, 4 }
  0xdf   : > { %v929_v51 = vrot.slane %v928_v58, 2  ;;  %v946_v19 = vadd.f32 %v945_v50, %v944_v10  ;;  %v962_v20 = vadd.f32 %v961_v27, %v960_v4  ;;  %v970_v49 = vsel %vm410_vm0, %v407_v60, 0.0 }
  0xe0   : > { %v978_v62 = vsel %vm410_vm0, %v408_v42, 0.0  ;;  %v921_v3 = vadd.f32 %v920_v31, %v919_v63  ;;  %v938_v28 = vrot.slane %v937_v6, 2  ;;  %v955_v0 = vadd.f32 %v954_v34, %v953_v30  ;;  %v6389_v31 = vld [vmem:[%s5407_s21 + $0x10] sm:$0xff] }
  0xe1   : > { %v930_v47 = vadd.f32 %v929_v51, %v928_v58  ;;  %v947_v2 = vrot.slane %v946_v19, 2  ;;  %v963_v26 = vrot.slane %v962_v20, 4  ;;  %v971_v52 = vadd.f32 %v970_v49, %v969_v61 }
  0xe2   : > { %v979_v39 = vsel %vm410_vm0, %v409_v25, 0.0  ;;  %v922_v57 = vrot.slane %v921_v3, 1  ;;  %v939_v5 = vadd.f32 %v938_v28, %v937_v6  ;;  %v956_v41 = vrot.slane %v955_v0, 2 }
  0xe3   : > { %v931_v56 = vrot.slane %v930_v47, 1  ;;  %v948_v10 = vadd.f32 %v947_v2, %v946_v19  ;;  %v964_v40 = vadd.f32 %v963_v26, %v962_v20  ;;  %v972_v50 = vrot.slane %v971_v52, 4  ;;  %v5229_v26 = vld [vmem:[%s9005_s1] sm:$0xff] }
  0xe4   : > { %v980_v60 = vadd.f32 %v979_v39, %v978_v62  ;;  %v6384_v4 = vadd.f32 %v922_v57, %v921_v3  ;;  %v940_v63 = vrot.slane %v939_v5, 1  ;;  %v957_v58 = vadd.f32 %v956_v41, %v955_v0 }
  0xe5   : > { %v6386_v42 = vadd.f32 %v931_v56, %v930_v47  ;;  %v949_v30 = vrot.slane %v948_v10, 1  ;;  %v965_v27 = vrot.slane %v964_v40, 2  ;;  %v973_v61 = vadd.f32 %v972_v50, %v971_v52  ;;  %v6400_v47 = vld [vmem:[%s5407_s21 + $0x18] sm:$0xff] }
  0xe6   : > { %9357 = vst [vmem:[#allocation54_spill] sm:$0xff] %v6384_v4  ;;  %v981_v25 = vrot.slane %v980_v60, 4  ;;  %v6391_v51 = vadd.f32 %v940_v63, %v939_v5  ;;  %v958_v6 = vrot.slane %v957_v58, 1  ;;  %v1048_v34 = vmul.f32 %v6077_v8, %v6384_v4 }
  0xe7   : > { %9358 = vst [vmem:[#allocation55_spill] sm:$0xff] %v6386_v42  ;;  %v1049_v19 = vmul.f32 %v6077_v8, %v6386_v42  ;;  %v6397_v20 = vadd.f32 %v949_v30, %v948_v10  ;;  %v966_v49 = vadd.f32 %v965_v27, %v964_v40  ;;  %v974_v62 = vrot.slane %v973_v61, 2  ;;  %v5230_v40 = vld [vmem:[%s9005_s1 + $0x8] sm:$0xff] }
  0xe8   : > { %9359 = vst [vmem:[#allocation56_spill] sm:$0xff] %v6391_v51  ;;  %v982_v3 = vadd.f32 %v981_v25, %v980_v60  ;;  %v6402_v28 = vadd.f32 %v958_v6, %v957_v58  ;;  %v1050_v0 = vmul.f32 %v6077_v8, %v6391_v51  ;;  %v2636_v52 = vmul.f32 %v5229_v26, %v6389_v31  ;;  %v5231_v60 = vld [vmem:[%s9005_s1 + $0x10] sm:$0xff]  ;;  %v5232_v6 = vld [vmem:[%s9005_s1 + $0x18] sm:$0xff] }
  0xe9   : > { %9360 = vst [vmem:[#allocation57_spill] sm:$0xff] %v6397_v20  ;;  %v1176_v2 = vsel %vm1120_vm1, %v1049_v19, %v1048_v34  ;;  %v967_v39 = vrot.slane %v966_v49, 1  ;;  %v975_v57 = vadd.f32 %v974_v62, %v973_v61  ;;  %v1051_v5 = vmul.f32 %v6077_v8, %v6397_v20  ;;  %v5233_v19 = vld [vmem:[%s9005_s1 + $0x20] sm:$0xff] }
  0xea   : > { %9361 = vst [vmem:[#allocation58_spill] sm:$0xff] %v6402_v28  ;;  %v983_v56 = vrot.slane %v982_v3, 2  ;;  %v1052_v41 = vmul.f32 %v6077_v8, %v6402_v28  ;;  %v1177_v10 = vsel %vm1122_vm2, %v1050_v0, %v1176_v2  ;;  %v2637_v50 = vmul.f32 %v5230_v40, %v6400_v47  ;;  %v5238_v40 = vld [vmem:[%s9005_s1 + $0x48] sm:$0xff] }
  0xeb   : > { %v2638_v63 = vmul.f32 %v5231_v60, %v6389_v31  ;;  %v6424_v58 = vadd.f32 %v967_v39, %v966_v49  ;;  %v976_v30 = vrot.slane %v975_v57, 1  ;;  %v1178_v61 = vsel %vm1124_vm3, %v1051_v5, %v1177_v10  ;;  %v5234_v49 = vld [vmem:[%s9005_s1 + $0x28] sm:$0xff]  ;;  %v5235_v39 = vld [vmem:[%s9005_s1 + $0x30] sm:$0xff]  ;;  %v5236_v5 = vld [vmem:[%s9005_s1 + $0x38] sm:$0xff] }
  0xec   : > { %v984_v27 = vadd.f32 %v983_v56, %v982_v3  ;;  %v1179_v25 = vsel %vm1126_vm4, %v1052_v41, %v1178_v61  ;;  %v2639_v34 = vmul.f32 %v5232_v6, %v6400_v47  ;;  %v2640_v62 = vmul.f32 %v5233_v19, %v6389_v31 }
  0xed   : > { %9362 = vst [vmem:[#allocation59_spill] sm:$0xff] %v6424_v58  ;;  %v2641_v3 = vmul.f32 %v5234_v49, %v6400_v47  ;;  %v6440_v0 = vadd.f32 %v976_v30, %v975_v57  ;;  %v1053_v26 = vmul.f32 %v6077_v8, %v6424_v58  ;;  %v2642_v56 = vmul.f32 %v5235_v39, %v6389_v31  ;;  %v5237_v57 = vld [vmem:[%s9005_s1 + $0x40] sm:$0xff]  ;;  %v5239_v30 = vld [vmem:[%s9005_s1 + $0x50] sm:$0xff]  ;;  %v5240_v39 = vld [vmem:[%s9005_s1 + $0x58] sm:$0xff] }
  0xee   : > { %v985_v2 = vrot.slane %v984_v27, 1  ;;  %v2643_v41 = vmul.f32 %v5236_v5, %v6400_v47  ;;  %v2644_v10 = vmul.f32 %v5237_v57, %v6389_v31  ;;  %v2645_v60 = vmul.f32 %v5238_v40, %v6400_v47  ;;  %v5241_v57 = vld [vmem:[%s9005_s1 + $0x60] sm:$0xff] }
  0xef   : > { %9363 = vst [vmem:[#allocation60_spill] sm:$0xff] %v6440_v0  ;;  %v2646_v61 = vmul.f32 %v5239_v30, %v6389_v31  ;;  %v1054_v19 = vmul.f32 %v6077_v8, %v6440_v0  ;;  %v1180_v49 = vsel %vm1128_vm5, %v1053_v26, %v1179_v25  ;;  %v2647_v5 = vmul.f32 %v5240_v39, %v6400_v47  ;;  %v5243_v25 = vld [vmem:[%s9005_s1 + $0x70] sm:$0xff]  ;;  %v5244_v30 = vld [vmem:[%s9005_s1 + $0x78] sm:$0xff] }
  0xf0   : > { %v6464_v6 = vadd.f32 %v985_v2, %v984_v27  ;;  %v2648_v40 = vmul.f32 %v5241_v57, %v6389_v31  ;;  %v5242_v27 = vld [vmem:[%s9005_s1 + $0x68] sm:$0xff]  ;;  %v2650_v26 = vmul.f32 %v5243_v25, %v6389_v31  ;;  %v2651_v39 = vmul.f32 %v5244_v30, %v6400_v47 }
  0xf1   : > { %v2649_v2 = vmul.f32 %v5242_v27, %v6400_v47  ;;  %v1181_v0 = vsel %vm1130_vm6, %v1054_v19, %v1180_v49  ;;  %v2764_v58 = vsel %vm410_vm0, %v2636_v52, 0.0  ;;  %v2765_v27 = vsel %vm410_vm0, %v2637_v50, 0.0 }
  0xf2   : > { %9364 = vst [vmem:[#allocation61_spill] sm:$0xff] %v6464_v6  ;;  %v1055_v57 = vmul.f32 %v6077_v8, %v6464_v6  ;;  %v2766_v28 = vadd.f32 %v2765_v27, %v2764_v58  ;;  %v2773_v20 = vsel %vm410_vm0, %v2638_v63, 0.0  ;;  %v2774_v25 = vsel %vm410_vm0, %v2639_v34, 0.0 }
  0xf3   : > { %v2782_v51 = vsel %vm410_vm0, %v2640_v62, 0.0  ;;  %v2775_v4 = vadd.f32 %v2774_v25, %v2773_v20  ;;  %v2783_v30 = vsel %vm410_vm0, %v2641_v3, 0.0  ;;  %v2791_v6 = vsel %vm410_vm0, %v2642_v56, 0.0 }
  0xf4   : > { %v1182_v42 = vsel %vm1132_vm7, %v1055_v57, %v1181_v0  ;;  %v2767_v49 = vrot.slane %v2766_v28, 4  ;;  %v2784_v52 = vadd.f32 %v2783_v30, %v2782_v51  ;;  %v2792_v50 = vsel %vm410_vm0, %v2643_v41, 0.0 }
  0xf5   : > { %v1212_v19 = vsel %vm410_vm0, %v1182_v42, 0.0  ;;  %v2776_v58 = vrot.slane %v2775_v4, 4  ;;  %v2793_v63 = vadd.f32 %v2792_v50, %v2791_v6  ;;  %v2800_v34 = vsel %vm410_vm0, %v2644_v10, 0.0 }
  0xf6   : > { %1213 = vadd.xlane.f32.xlu0 %v1212_v19  ;;  %v2801_v62 = vsel %vm410_vm0, %v2645_v60, 0.0  ;;  %v2768_v27 = vadd.f32 %v2767_v49, %v2766_v28  ;;  %v2785_v0 = vrot.slane %v2784_v52, 4  ;;  %v2809_v3 = vsel %vm410_vm0, %v2646_v61, 0.0 }
  0xf7   : > { %v2802_v20 = vadd.f32 %v2801_v62, %v2800_v34  ;;  %v2777_v57 = vadd.f32 %v2776_v58, %v2775_v4  ;;  %v2794_v56 = vrot.slane %v2793_v63, 4  ;;  %v2810_v42 = vsel %vm410_vm0, %v2647_v5, 0.0 }
  0xf8   : > { %v2818_v51 = vsel %vm410_vm0, %v2648_v40, 0.0  ;;  %v2769_v25 = vrot.slane %v2768_v27, 2  ;;  %v2786_v41 = vadd.f32 %v2785_v0, %v2784_v52  ;;  %v2811_v19 = vadd.f32 %v2810_v42, %v2809_v3 }
  0xf9   : > { %v2803_v30 = vrot.slane %v2802_v20, 4  ;;  %v2778_v6 = vrot.slane %v2777_v57, 2  ;;  %v2795_v50 = vadd.f32 %v2794_v56, %v2793_v63  ;;  %v2819_v10 = vsel %vm410_vm0, %v2649_v2, 0.0 }
  0xfa   : > { %v2827_v28 = vsel %vm410_vm0, %v2650_v26, 0.0  ;;  %v2770_v60 = vadd.f32 %v2769_v25, %v2768_v27  ;;  %v2787_v49 = vrot.slane %v2786_v41, 2  ;;  %v2812_v61 = vrot.slane %v2811_v19, 4 }
  0xfb   : > { %v2804_v34 = vadd.f32 %v2803_v30, %v2802_v20  ;;  %v2779_v4 = vadd.f32 %v2778_v6, %v2777_v57  ;;  %v2796_v58 = vrot.slane %v2795_v50, 2  ;;  %v2820_v62 = vadd.f32 %v2819_v10, %v2818_v51 }
  0xfc   : > { %v2828_v5 = vsel %vm410_vm0, %v2651_v39, 0.0  ;;  %v2771_v40 = vrot.slane %v2770_v60, 1  ;;  %v2788_v54 = vadd.f32 %v2787_v49, %v2786_v41  ;;  %v2813_v0 = vadd.f32 %v2812_v61, %v2811_v19 }
  0xfd   : > { %v2805_v52 = vrot.slane %v2804_v34, 2  ;;  %v2780_v3 = vrot.slane %v2779_v4, 1  ;;  %v2797_v42 = vadd.f32 %v2796_v58, %v2795_v50  ;;  %v2821_v63 = vrot.slane %v2820_v62, 4 }
  0xfe   : > { %v2829_v56 = vadd.f32 %v2828_v5, %v2827_v28  ;;  %v6510_v2 = vadd.f32 %v2771_v40, %v2770_v60  ;;  %v2789_v26 = vrot.slane %v2788_v54, 1  ;;  %v2814_v25 = vrot.slane %v2813_v0, 2 }
  0xff   : > { %v2806_v27 = vadd.f32 %v2805_v52, %v2804_v34  ;;  %v6512_v20 = vadd.f32 %v2780_v3, %v2779_v4  ;;  %v2798_v57 = vrot.slane %v2797_v42, 1  ;;  %v2822_v30 = vadd.f32 %v2821_v63, %v2820_v62 }
 0x100   : > { %9365 = vst [vmem:[#allocation62_spill] sm:$0xff] %v6510_v2  ;;  %v2830_v51 = vrot.slane %v2829_v56, 4  ;;  %v6514_v6 = vadd.f32 %v2789_v26, %v2788_v54  ;;  %v2815_v41 = vadd.f32 %v2814_v25, %v2813_v0  ;;  %v3340_v19 = vmul.f32 %v6077_v8, %v6510_v2  ;;  %v5245_v54 = vld [vmem:[%s9005_s1 + $0x80] sm:$0xff]  ;;  %v5247_v25 = vld [vmem:[%s9005_s1 + $0x90] sm:$0xff] }
 0x101   : > { %9366 = vst [vmem:[#allocation63_spill] sm:$0xff] %v6512_v20  ;;  %v2807_v39 = vrot.slane %v2806_v27, 1  ;;  %v6518_v50 = vadd.f32 %v2798_v57, %v2797_v42  ;;  %v2823_v10 = vrot.slane %v2822_v30, 2  ;;  %v3341_v60 = vmul.f32 %v6077_v8, %v6512_v20  ;;  %v5246_v42 = vld [vmem:[%s9005_s1 + $0x88] sm:$0xff] }
 0x102   : > { %9367 = vst [vmem:[#allocation64_spill] sm:$0xff] %v6514_v6  ;;  %v2831_v28 = vadd.f32 %v2830_v51, %v2829_v56  ;;  %v2816_v34 = vrot.slane %v2815_v41, 1  ;;  %v3342_v61 = vmul.f32 %v6077_v8, %v6514_v6  ;;  %v2652_v4 = vmul.f32 %v5245_v54, %v6389_v31  ;;  %v5251_v54 = vld [vmem:[%s9005_s1 + $0xb0] sm:$0xff] }
 0x103   : > { %9368 = vst [vmem:[#allocation65_spill] sm:$0xff] %v6518_v50  ;;  %v6522_v49 = vadd.f32 %v2807_v39, %v2806_v27  ;;  %v2824_v58 = vadd.f32 %v2823_v10, %v2822_v30  ;;  %v3343_v5 = vmul.f32 %v6077_v8, %v6518_v50  ;;  %v3468_v40 = vsel %vm1120_vm1, %v3341_v60, %v3340_v19  ;;  %v5248_v39 = vld [vmem:[%s9005_s1 + $0x98] sm:$0xff]  ;;  %v5249_v19 = vld [vmem:[%s9005_s1 + $0xa0] sm:$0xff] }
 0x104   : > { %v2832_v62 = vrot.slane %v2831_v28, 2  ;;  %v6533_v52 = vadd.f32 %v2816_v34, %v2815_v41  ;;  %v3469_v3 = vsel %vm1122_vm2, %v3342_v61, %v3468_v40  ;;  %v2653_v63 = vmul.f32 %v5246_v42, %v6400_v47  ;;  %v5250_v34 = vld [vmem:[%s9005_s1 + $0xa8] sm:$0xff] }
 0x105   : > { %9369 = vst [vmem:[#allocation66_spill] sm:$0xff] %v6522_v49  ;;  %v3344_v0 = vmul.f32 %v6077_v8, %v6522_v49  ;;  %v2825_v56 = vrot.slane %v2824_v58, 1  ;;  %v3470_v27 = vsel %vm1124_vm3, %v3343_v5, %v3469_v3  ;;  %v2654_v57 = vmul.f32 %v5247_v25, %v6389_v31  ;;  %v5254_v42 = vld [vmem:[%s9005_s1 + $0xc8] sm:$0xff] }
 0x106   : > { %9370 = vst [vmem:[#allocation67_spill] sm:$0xff] %v6533_v52  ;;  %v2833_v26 = vadd.f32 %v2832_v62, %v2831_v28  ;;  %v3345_v30 = vmul.f32 %v6077_v8, %v6533_v52  ;;  %v2655_v41 = vmul.f32 %v5248_v39, %v6400_v47  ;;  %v2656_v10 = vmul.f32 %v5249_v19, %v6389_v31  ;;  %v5256_v39 = vld [vmem:[%s9005_s1 + $0xd8] sm:$0xff] }
 0x107   : > { %v3471_v51 = vsel %vm1126_vm4, %v3344_v0, %v3470_v27  ;;  %v6558_v28 = vadd.f32 %v2825_v56, %v2824_v58  ;;  %v2657_v61 = vmul.f32 %v5250_v34, %v6400_v47  ;;  %v2658_v62 = vmul.f32 %v5251_v54, %v6389_v31  ;;  %v5252_v58 = vld [vmem:[%s9005_s1 + $0xb8] sm:$0xff]  ;;  %v5253_v0 = vld [vmem:[%s9005_s1 + $0xc0] sm:$0xff]  ;;  %v5258_v34 = vld [vmem:[%s9005_s1 + $0xe8] sm:$0xff] }
 0x108   : > { %v2834_v60 = vrot.slane %v2833_v26, 1  ;;  %v3472_v5 = vsel %vm1128_vm5, %v3345_v30, %v3471_v51  ;;  %v2659_v40 = vmul.f32 %v5252_v58, %v6400_v47  ;;  %v2660_v3 = vmul.f32 %v5253_v0, %v6389_v31  ;;  %v5255_v30 = vld [vmem:[%s9005_s1 + $0xd0] sm:$0xff] }
 0x109   : > { %9371 = vst [vmem:[#allocation68_spill] sm:$0xff] %v6558_v28  ;;  %v2661_v56 = vmul.f32 %v5254_v42, %v6400_v47  ;;  %v3346_v25 = vmul.f32 %v6077_v8, %v6558_v28  ;;  %v2662_v51 = vmul.f32 %v5255_v30, %v6389_v31  ;;  %v2663_v19 = vmul.f32 %v5256_v39, %v6400_v47  ;;  %v5259_v58 = vld [vmem:[%s9005_s1 + $0xf0] sm:$0xff]  ;;  %v5260_v42 = vld [vmem:[%s9005_s1 + $0xf8] sm:$0xff] }
 0x10a   : > { %v6581_v27 = vadd.f32 %v2834_v60, %v2833_v26  ;;  %v5257_v26 = vld [vmem:[%s9005_s1 + $0xe0] sm:$0xff]  ;;  %v2665_v54 = vmul.f32 %v5258_v34, %v6400_v47  ;;  %v2666_v0 = vmul.f32 %v5259_v58, %v6389_v31  ;;  %v2667_v30 = vmul.f32 %v5260_v42, %v6400_v47 }
 0x10b   : > { %v2664_v60 = vmul.f32 %v5257_v26, %v6389_v31  ;;  %v3473_v26 = vsel %vm1130_vm6, %v3346_v25, %v3472_v5  ;;  %v2836_v28 = vsel %vm410_vm0, %v2652_v4, 0.0  ;;  %v2837_v34 = vsel %vm410_vm0, %v2653_v63, 0.0 }
 0x10c   : > { %9372 = vst [vmem:[#allocation69_spill] sm:$0xff] %v6581_v27  ;;  %v3347_v39 = vmul.f32 %v6077_v8, %v6581_v27  ;;  %v2838_v52 = vadd.f32 %v2837_v34, %v2836_v28  ;;  %v2845_v49 = vsel %vm410_vm0, %v2654_v57, 0.0  ;;  %v2846_v58 = vsel %vm410_vm0, %v2655_v41, 0.0 }
 0x10d   : > { %v2854_v50 = vsel %vm410_vm0, %v2656_v10, 0.0  ;;  %v2847_v20 = vadd.f32 %v2846_v58, %v2845_v49  ;;  %v2855_v42 = vsel %vm410_vm0, %v2657_v61, 0.0  ;;  %v2863_v27 = vsel %vm410_vm0, %v2658_v62, 0.0 }
 0x10e   : > { %v3474_v6 = vsel %vm1132_vm7, %v3347_v39, %v3473_v26  ;;  %v2839_v25 = vrot.slane %v2838_v52, 4  ;;  %v2856_v4 = vadd.f32 %v2855_v42, %v2854_v50  ;;  %v2864_v63 = vsel %vm410_vm0, %v2659_v40, 0.0 }
 0x10f   : > { %v3532_v5 = vsel %vm410_vm0, %v3474_v6, 0.0  ;;  %v2848_v28 = vrot.slane %v2847_v20, 4  ;;  %v2865_v57 = vadd.f32 %v2864_v63, %v2863_v27  ;;  %v2872_v41 = vsel %vm410_vm0, %v2660_v3, 0.0 }
 0x110   : > { %3533 = vadd.xlane.f32.xlu1 %v3532_v5  ;;  %v2873_v10 = vsel %vm410_vm0, %v2661_v56, 0.0  ;;  %v2840_v34 = vadd.f32 %v2839_v25, %v2838_v52  ;;  %v2857_v39 = vrot.slane %v2856_v4, 4  ;;  %v2881_v61 = vsel %vm410_vm0, %v2662_v51, 0.0 }
 0x111   : > { %v2874_v49 = vadd.f32 %v2873_v10, %v2872_v41  ;;  %v2849_v26 = vadd.f32 %v2848_v28, %v2847_v20  ;;  %v2866_v62 = vrot.slane %v2865_v57, 4  ;;  %v2882_v6 = vsel %vm410_vm0, %v2663_v19, 0.0 }
 0x112   : > { %v2890_v50 = vsel %vm410_vm0, %v2664_v60, 0.0  ;;  %v2841_v58 = vrot.slane %v2840_v34, 2  ;;  %v2858_v40 = vadd.f32 %v2857_v39, %v2856_v4  ;;  %v2883_v5 = vadd.f32 %v2882_v6, %v2881_v61 }
 0x113   : > { %v2875_v42 = vrot.slane %v2874_v49, 4  ;;  %v2850_v27 = vrot.slane %v2849_v26, 2  ;;  %v2867_v63 = vadd.f32 %v2866_v62, %v2865_v57  ;;  %v2891_v3 = vsel %vm410_vm0, %v2665_v54, 0.0 }
 0x114   : > { %v2899_v52 = vsel %vm410_vm0, %v2666_v0, 0.0  ;;  %v2842_v56 = vadd.f32 %v2841_v58, %v2840_v34  ;;  %v2859_v25 = vrot.slane %v2858_v40, 2  ;;  %v2884_v51 = vrot.slane %v2883_v5, 4 }
 0x115   : > { %v2876_v41 = vadd.f32 %v2875_v42, %v2874_v49  ;;  %v2851_v20 = vadd.f32 %v2850_v27, %v2849_v26  ;;  %v2868_v28 = vrot.slane %v2867_v63, 2  ;;  %v2892_v10 = vadd.f32 %v2891_v3, %v2890_v50 }
 0x116   : > { %v2900_v19 = vsel %vm410_vm0, %v2667_v30, 0.0  ;;  %v2843_v60 = vrot.slane %v2842_v56, 1  ;;  %v2860_v2 = vadd.f32 %v2859_v25, %v2858_v40  ;;  %v2885_v39 = vadd.f32 %v2884_v51, %v2883_v5 }
 0x117   : > { %v2877_v4 = vrot.slane %v2876_v41, 2  ;;  %v2852_v61 = vrot.slane %v2851_v20, 1  ;;  %v2869_v6 = vadd.f32 %v2868_v28, %v2867_v63  ;;  %v2893_v57 = vrot.slane %v2892_v10, 4 }
 0x118   : > { %v2901_v62 = vadd.f32 %v2900_v19, %v2899_v52  ;;  %v6630_v54 = vadd.f32 %v2843_v60, %v2842_v56  ;;  %v2861_v0 = vrot.slane %v2860_v2, 1  ;;  %v2886_v58 = vrot.slane %v2885_v39, 2 }
 0x119   : > { %v2878_v34 = vadd.f32 %v2877_v4, %v2876_v41  ;;  %v6632_v49 = vadd.f32 %v2852_v61, %v2851_v20  ;;  %v2870_v26 = vrot.slane %v2869_v6, 1  ;;  %v2894_v42 = vadd.f32 %v2893_v57, %v2892_v10 }
 0x11a   : > { %9373 = vst [vmem:[#allocation70_spill] sm:$0xff] %v6630_v54  ;;  %v2902_v50 = vrot.slane %v2901_v62, 4  ;;  %v6634_v27 = vadd.f32 %v2861_v0, %v2860_v2  ;;  %v2887_v40 = vadd.f32 %v2886_v58, %v2885_v39  ;;  %v3348_v5 = vmul.f32 %v6077_v8, %v6630_v54  ;;  %v5261_v2 = vld [vmem:[%s9005_s1 + $0x100] sm:$0xff]  ;;  %v5263_v58 = vld [vmem:[%s9005_s1 + $0x110] sm:$0xff] }
 0x11b   : > { %9374 = vst [vmem:[#allocation71_spill] sm:$0xff] %v6632_v49  ;;  %v2879_v30 = vrot.slane %v2878_v34, 1  ;;  %v6638_v63 = vadd.f32 %v2870_v26, %v2869_v6  ;;  %v2895_v3 = vrot.slane %v2894_v42, 2  ;;  %v3349_v56 = vmul.f32 %v6077_v8, %v6632_v49  ;;  %v5262_v6 = vld [vmem:[%s9005_s1 + $0x108] sm:$0xff] }
 0x11c   : > { %9375 = vst [vmem:[#allocation72_spill] sm:$0xff] %v6634_v27  ;;  %v2903_v52 = vadd.f32 %v2902_v50, %v2901_v62  ;;  %v2888_v41 = vrot.slane %v2887_v40, 1  ;;  %v3350_v51 = vmul.f32 %v6077_v8, %v6634_v27  ;;  %v2668_v20 = vmul.f32 %v5261_v2, %v6389_v31  ;;  %v5267_v2 = vld [vmem:[%s9005_s1 + $0x130] sm:$0xff] }
 0x11d   : > { %9376 = vst [vmem:[#allocation73_spill] sm:$0xff] %v6638_v63  ;;  %v6642_v25 = vadd.f32 %v2879_v30, %v2878_v34  ;;  %v2896_v28 = vadd.f32 %v2895_v3, %v2894_v42  ;;  %v3351_v19 = vmul.f32 %v6077_v8, %v6638_v63  ;;  %v3475_v60 = vsel %vm1120_vm1, %v3349_v56, %v3348_v5  ;;  %v5264_v30 = vld [vmem:[%s9005_s1 + $0x118] sm:$0xff]  ;;  %v5265_v5 = vld [vmem:[%s9005_s1 + $0x120] sm:$0xff] }
 0x11e   : > { %v2904_v10 = vrot.slane %v2903_v52, 2  ;;  %v6653_v4 = vadd.f32 %v2888_v41, %v2887_v40  ;;  %v3476_v61 = vsel %vm1122_vm2, %v3350_v51, %v3475_v60  ;;  %v2669_v57 = vmul.f32 %v5262_v6, %v6400_v47  ;;  %v5266_v41 = vld [vmem:[%s9005_s1 + $0x128] sm:$0xff] }
 0x11f   : > { %9377 = vst [vmem:[#allocation74_spill] sm:$0xff] %v6642_v25  ;;  %v3352_v39 = vmul.f32 %v6077_v8, %v6642_v25  ;;  %v2897_v62 = vrot.slane %v2896_v28, 1  ;;  %v3477_v34 = vsel %vm1124_vm3, %v3351_v19, %v3476_v61  ;;  %v2670_v26 = vmul.f32 %v5263_v58, %v6389_v31  ;;  %v5270_v6 = vld [vmem:[%s9005_s1 + $0x148] sm:$0xff] }
 0x120   : > { %9378 = vst [vmem:[#allocation75_spill] sm:$0xff] %v6653_v4  ;;  %v2905_v0 = vadd.f32 %v2904_v10, %v2903_v52  ;;  %v3353_v42 = vmul.f32 %v6077_v8, %v6653_v4  ;;  %v2671_v40 = vmul.f32 %v5264_v30, %v6400_v47  ;;  %v2672_v3 = vmul.f32 %v5265_v5, %v6389_v31  ;;  %v5272_v30 = vld [vmem:[%s9005_s1 + $0x158] sm:$0xff] }
 0x121   : > { %v3478_v50 = vsel %vm1126_vm4, %v3352_v39, %v3477_v34  ;;  %v6678_v52 = vadd.f32 %v2897_v62, %v2896_v28  ;;  %v2673_v51 = vmul.f32 %v5266_v41, %v6400_v47  ;;  %v2674_v10 = vmul.f32 %v5267_v2, %v6389_v31  ;;  %v5268_v28 = vld [vmem:[%s9005_s1 + $0x138] sm:$0xff]  ;;  %v5269_v39 = vld [vmem:[%s9005_s1 + $0x140] sm:$0xff]  ;;  %v5274_v41 = vld [vmem:[%s9005_s1 + $0x168] sm:$0xff] }
 0x122   : > { %v2906_v56 = vrot.slane %v2905_v0, 1  ;;  %v3479_v19 = vsel %vm1128_vm5, %v3353_v42, %v3478_v50  ;;  %v2675_v60 = vmul.f32 %v5268_v28, %v6400_v47  ;;  %v2676_v61 = vmul.f32 %v5269_v39, %v6389_v31  ;;  %v5271_v42 = vld [vmem:[%s9005_s1 + $0x150] sm:$0xff] }
 0x123   : > { %9379 = vst [vmem:[#allocation76_spill] sm:$0xff] %v6678_v52  ;;  %v2677_v62 = vmul.f32 %v5270_v6, %v6400_v47  ;;  %v3354_v58 = vmul.f32 %v6077_v8, %v6678_v52  ;;  %v2678_v50 = vmul.f32 %v5271_v42, %v6389_v31  ;;  %v2679_v5 = vmul.f32 %v5272_v30, %v6400_v47  ;;  %v5275_v28 = vld [vmem:[%s9005_s1 + $0x170] sm:$0xff]  ;;  %v5276_v6 = vld [vmem:[%s9005_s1 + $0x178] sm:$0xff] }
 0x124   : > { %v6701_v34 = vadd.f32 %v2906_v56, %v2905_v0  ;;  %v5273_v0 = vld [vmem:[%s9005_s1 + $0x160] sm:$0xff]  ;;  %v2681_v2 = vmul.f32 %v5274_v41, %v6400_v47  ;;  %v2682_v39 = vmul.f32 %v5275_v28, %v6389_v31  ;;  %v2683_v42 = vmul.f32 %v5276_v6, %v6400_v47 }
 0x125   : > { %v2680_v56 = vmul.f32 %v5273_v0, %v6389_v31  ;;  %v3480_v0 = vsel %vm1130_vm6, %v3354_v58, %v3479_v19  ;;  %v2908_v52 = vsel %vm410_vm0, %v2668_v20, 0.0  ;;  %v2909_v41 = vsel %vm410_vm0, %v2669_v57, 0.0 }
 0x126   : > { %9380 = vst [vmem:[#allocation77_spill] sm:$0xff] %v6701_v34  ;;  %v3355_v30 = vmul.f32 %v6077_v8, %v6701_v34  ;;  %v2910_v4 = vadd.f32 %v2909_v41, %v2908_v52  ;;  %v2917_v25 = vsel %vm410_vm0, %v2670_v26, 0.0  ;;  %v2918_v28 = vsel %vm410_vm0, %v2671_v40, 0.0 }
 0x127   : > { %v2926_v63 = vsel %vm410_vm0, %v2672_v3, 0.0  ;;  %v2919_v27 = vadd.f32 %v2918_v28, %v2917_v25  ;;  %v2927_v6 = vsel %vm410_vm0, %v2673_v51, 0.0  ;;  %v2935_v34 = vsel %vm410_vm0, %v2674_v10, 0.0 }
 0x128   : > { %v3481_v54 = vsel %vm1132_vm7, %v3355_v30, %v3480_v0  ;;  %v2911_v58 = vrot.slane %v2910_v4, 4  ;;  %v2928_v20 = vadd.f32 %v2927_v6, %v2926_v63  ;;  %v2936_v57 = vsel %vm410_vm0, %v2675_v60, 0.0 }
 0x129   : > { %v3535_v19 = vsel %vm410_vm0, %v3481_v54, 0.0  ;;  %v2920_v52 = vrot.slane %v2919_v27, 4  ;;  %v2937_v26 = vadd.f32 %v2936_v57, %v2935_v34  ;;  %v2944_v40 = vsel %vm410_vm0, %v2676_v61, 0.0 }
 0x12a   : > { %3536 = vadd.xlane.f32.xlu0 %v3535_v19  ;;  %v2945_v3 = vsel %vm410_vm0, %v2677_v62, 0.0  ;;  %v2912_v41 = vadd.f32 %v2911_v58, %v2910_v4  ;;  %v2929_v30 = vrot.slane %v2928_v20, 4  ;;  %v2953_v51 = vsel %vm410_vm0, %v2678_v50, 0.0 }
 0x12b   : > { %v2946_v25 = vadd.f32 %v2945_v3, %v2944_v40  ;;  %v2921_v0 = vadd.f32 %v2920_v52, %v2919_v27  ;;  %v2938_v10 = vrot.slane %v2937_v26, 4  ;;  %v2954_v54 = vsel %vm410_vm0, %v2679_v5, 0.0 }
 0x12c   : > { %v2962_v63 = vsel %vm410_vm0, %v2680_v56, 0.0  ;;  %v2913_v28 = vrot.slane %v2912_v41, 2  ;;  %v2930_v60 = vadd.f32 %v2929_v30, %v2928_v20  ;;  %v2955_v19 = vadd.f32 %v2954_v54, %v2953_v51 }
 0x12d   : > { %v2947_v6 = vrot.slane %v2946_v25, 4  ;;  %v2922_v34 = vrot.slane %v2921_v0, 2  ;;  %v2939_v57 = vadd.f32 %v2938_v10, %v2937_v26  ;;  %v2963_v61 = vsel %vm410_vm0, %v2681_v2, 0.0 }
 0x12e   : > { %v2971_v4 = vsel %vm410_vm0, %v2682_v39, 0.0  ;;  %v2914_v62 = vadd.f32 %v2913_v28, %v2912_v41  ;;  %v2931_v58 = vrot.slane %v2930_v60, 2  ;;  %v2956_v50 = vrot.slane %v2955_v19, 4 }
 0x12f   : > { %v2948_v40 = vadd.f32 %v2947_v6, %v2946_v25  ;;  %v2923_v27 = vadd.f32 %v2922_v34, %v2921_v0  ;;  %v2940_v52 = vrot.slane %v2939_v57, 2  ;;  %v2964_v3 = vadd.f32 %v2963_v61, %v2962_v63 }
 0x130   : > { %v2972_v5 = vsel %vm410_vm0, %v2683_v42, 0.0  ;;  %v2915_v56 = vrot.slane %v2914_v62, 1  ;;  %v2932_v49 = vadd.f32 %v2931_v58, %v2930_v60  ;;  %v2957_v30 = vadd.f32 %v2956_v50, %v2955_v19 }
 0x131   : > { %v2949_v20 = vrot.slane %v2948_v40, 2  ;;  %v2924_v51 = vrot.slane %v2923_v27, 1  ;;  %v2941_v54 = vadd.f32 %v2940_v52, %v2939_v57  ;;  %v2965_v26 = vrot.slane %v2964_v3, 4 }
 0x132   : > { %v2973_v10 = vadd.f32 %v2972_v5, %v2971_v4  ;;  %v6750_v2 = vadd.f32 %v2915_v56, %v2914_v62  ;;  %v2933_v39 = vrot.slane %v2932_v49, 1  ;;  %v2958_v28 = vrot.slane %v2957_v30, 2 }
 0x133   : > { %v2950_v41 = vadd.f32 %v2949_v20, %v2948_v40  ;;  %v6752_v25 = vadd.f32 %v2924_v51, %v2923_v27  ;;  %v2942_v0 = vrot.slane %v2941_v54, 1  ;;  %v2966_v6 = vadd.f32 %v2965_v26, %v2964_v3 }
 0x134   : > { %9381 = vst [vmem:[#allocation78_spill] sm:$0xff] %v6750_v2  ;;  %v2974_v63 = vrot.slane %v2973_v10, 4  ;;  %v6754_v34 = vadd.f32 %v2933_v39, %v2932_v49  ;;  %v2959_v60 = vadd.f32 %v2958_v28, %v2957_v30  ;;  %v3356_v19 = vmul.f32 %v6077_v8, %v6750_v2  ;;  %v5277_v49 = vld [vmem:[%s9005_s1 + $0x180] sm:$0xff]  ;;  %v5279_v28 = vld [vmem:[%s9005_s1 + $0x190] sm:$0xff] }
 0x135   : > { %9382 = vst [vmem:[#allocation79_spill] sm:$0xff] %v6752_v25  ;;  %v2951_v42 = vrot.slane %v2950_v41, 1  ;;  %v6758_v57 = vadd.f32 %v2942_v0, %v2941_v54  ;;  %v2967_v61 = vrot.slane %v2966_v6, 2  ;;  %v3357_v62 = vmul.f32 %v6077_v8, %v6752_v25  ;;  %v5278_v54 = vld [vmem:[%s9005_s1 + $0x188] sm:$0xff] }
 0x136   : > { %9383 = vst [vmem:[#allocation80_spill] sm:$0xff] %v6754_v34  ;;  %v2975_v4 = vadd.f32 %v2974_v63, %v2973_v10  ;;  %v2960_v40 = vrot.slane %v2959_v60, 1  ;;  %v3358_v50 = vmul.f32 %v6077_v8, %v6754_v34  ;;  %v2684_v27 = vmul.f32 %v5277_v49, %v6389_v31  ;;  %v5283_v49 = vld [vmem:[%s9005_s1 + $0x1b0] sm:$0xff] }
 0x137   : > { %9384 = vst [vmem:[#allocation81_spill] sm:$0xff] %v6758_v57  ;;  %v6762_v58 = vadd.f32 %v2951_v42, %v2950_v41  ;;  %v2968_v52 = vadd.f32 %v2967_v61, %v2966_v6  ;;  %v3359_v5 = vmul.f32 %v6077_v8, %v6758_v57  ;;  %v3482_v56 = vsel %vm1120_vm1, %v3357_v62, %v3356_v19  ;;  %v5280_v42 = vld [vmem:[%s9005_s1 + $0x198] sm:$0xff]  ;;  %v5281_v19 = vld [vmem:[%s9005_s1 + $0x1a0] sm:$0xff] }
 0x138   : > { %v2976_v3 = vrot.slane %v2975_v4, 2  ;;  %v6773_v20 = vadd.f32 %v2960_v40, %v2959_v60  ;;  %v3483_v51 = vsel %vm1122_vm2, %v3358_v50, %v3482_v56  ;;  %v2685_v26 = vmul.f32 %v5278_v54, %v6400_v47  ;;  %v5282_v40 = vld [vmem:[%s9005_s1 + $0x1a8] sm:$0xff] }
 0x139   : > { %9385 = vst [vmem:[#allocation82_spill] sm:$0xff] %v6762_v58  ;;  %v3360_v30 = vmul.f32 %v6077_v8, %v6762_v58  ;;  %v2969_v10 = vrot.slane %v2968_v52, 1  ;;  %v3484_v41 = vsel %vm1124_vm3, %v3359_v5, %v3483_v51  ;;  %v2686_v0 = vmul.f32 %v5279_v28, %v6389_v31  ;;  %v5286_v54 = vld [vmem:[%s9005_s1 + $0x1c8] sm:$0xff] }
 0x13a   : > { %9386 = vst [vmem:[#allocation83_spill] sm:$0xff] %v6773_v20  ;;  %v2977_v39 = vadd.f32 %v2976_v3, %v2975_v4  ;;  %v3361_v6 = vmul.f32 %v6077_v8, %v6773_v20  ;;  %v2687_v60 = vmul.f32 %v5280_v42, %v6400_v47  ;;  %v2688_v61 = vmul.f32 %v5281_v19, %v6389_v31  ;;  %v5288_v42 = vld [vmem:[%s9005_s1 + $0x1d8] sm:$0xff] }
 0x13b   : > { %v3485_v63 = vsel %vm1126_vm4, %v3360_v30, %v3484_v41  ;;  %v6798_v4 = vadd.f32 %v2969_v10, %v2968_v52  ;;  %v2689_v50 = vmul.f32 %v5282_v40, %v6400_v47  ;;  %v2690_v3 = vmul.f32 %v5283_v49, %v6389_v31  ;;  %v5284_v52 = vld [vmem:[%s9005_s1 + $0x1b8] sm:$0xff]  ;;  %v5285_v30 = vld [vmem:[%s9005_s1 + $0x1c0] sm:$0xff]  ;;  %v5290_v40 = vld [vmem:[%s9005_s1 + $0x1e8] sm:$0xff] }
 0x13c   : > { %v2978_v62 = vrot.slane %v2977_v39, 1  ;;  %v3486_v5 = vsel %vm1128_vm5, %v3361_v6, %v3485_v63  ;;  %v2691_v56 = vmul.f32 %v5284_v52, %v6400_v47  ;;  %v2692_v51 = vmul.f32 %v5285_v30, %v6389_v31  ;;  %v5287_v6 = vld [vmem:[%s9005_s1 + $0x1d0] sm:$0xff] }
 0x13d   : > { %9387 = vst [vmem:[#allocation84_spill] sm:$0xff] %v6798_v4  ;;  %v2693_v10 = vmul.f32 %v5286_v54, %v6400_v47  ;;  %v3362_v28 = vmul.f32 %v6077_v8, %v6798_v4  ;;  %v2694_v63 = vmul.f32 %v5287_v6, %v6389_v31  ;;  %v2695_v19 = vmul.f32 %v5288_v42, %v6400_v47  ;;  %v5291_v52 = vld [vmem:[%s9005_s1 + $0x1f0] sm:$0xff]  ;;  %v5292_v54 = vld [vmem:[%s9005_s1 + $0x1f8] sm:$0xff] }
 0x13e   : > { %v6821_v41 = vadd.f32 %v2978_v62, %v2977_v39  ;;  %v5289_v39 = vld [vmem:[%s9005_s1 + $0x1e0] sm:$0xff]  ;;  %v2697_v49 = vmul.f32 %v5290_v40, %v6400_v47  ;;  %v2698_v30 = vmul.f32 %v5291_v52, %v6389_v31  ;;  %v2699_v6 = vmul.f32 %v5292_v54, %v6400_v47 }
 0x13f   : > { %v2696_v62 = vmul.f32 %v5289_v39, %v6389_v31  ;;  %v3487_v39 = vsel %vm1130_vm6, %v3362_v28, %v3486_v5  ;;  %v2980_v4 = vsel %vm410_vm0, %v2684_v27, 0.0  ;;  %v2981_v40 = vsel %vm410_vm0, %v2685_v26, 0.0 }
 0x140   : > { %9388 = vst [vmem:[#allocation85_spill] sm:$0xff] %v6821_v41  ;;  %v3363_v42 = vmul.f32 %v6077_v8, %v6821_v41  ;;  %v2982_v20 = vadd.f32 %v2981_v40, %v2980_v4  ;;  %v2989_v58 = vsel %vm410_vm0, %v2686_v0, 0.0  ;;  %v2990_v52 = vsel %vm410_vm0, %v2687_v60, 0.0 }
 0x141   : > { %v2998_v57 = vsel %vm410_vm0, %v2688_v61, 0.0  ;;  %v2991_v25 = vadd.f32 %v2990_v52, %v2989_v58  ;;  %v2999_v54 = vsel %vm410_vm0, %v2689_v50, 0.0  ;;  %v3007_v41 = vsel %vm410_vm0, %v2690_v3, 0.0 }
 0x142   : > { %v3488_v34 = vsel %vm1132_vm7, %v3363_v42, %v3487_v39  ;;  %v2983_v28 = vrot.slane %v2982_v20, 4  ;;  %v3000_v27 = vadd.f32 %v2999_v54, %v2998_v57  ;;  %v3008_v26 = vsel %vm410_vm0, %v2691_v56, 0.0 }
 0x143   : > { %v3538_v5 = vsel %vm410_vm0, %v3488_v34, 0.0  ;;  %v2992_v4 = vrot.slane %v2991_v25, 4  ;;  %v3009_v0 = vadd.f32 %v3008_v26, %v3007_v41  ;;  %v3016_v60 = vsel %vm410_vm0, %v2692_v51, 0.0 }
 0x144   : > { %3539 = vadd.xlane.f32.xlu1 %v3538_v5  ;;  %v3017_v61 = vsel %vm410_vm0, %v2693_v10, 0.0  ;;  %v2984_v40 = vadd.f32 %v2983_v28, %v2982_v20  ;;  %v3001_v42 = vrot.slane %v3000_v27, 4  ;;  %v3025_v50 = vsel %vm410_vm0, %v2694_v63, 0.0 }
 0x145   : > { %v3018_v58 = vadd.f32 %v3017_v61, %v3016_v60  ;;  %v2993_v39 = vadd.f32 %v2992_v4, %v2991_v25  ;;  %v3010_v3 = vrot.slane %v3009_v0, 4  ;;  %v3026_v34 = vsel %vm410_vm0, %v2695_v19, 0.0 }
 0x146   : > { %v3034_v57 = vsel %vm410_vm0, %v2696_v62, 0.0  ;;  %v2985_v52 = vrot.slane %v2984_v40, 2  ;;  %v3002_v56 = vadd.f32 %v3001_v42, %v3000_v27  ;;  %v3027_v5 = vadd.f32 %v3026_v34, %v3025_v50 }
 0x147   : > { %v3019_v54 = vrot.slane %v3018_v58, 4  ;;  %v2994_v41 = vrot.slane %v2993_v39, 2  ;;  %v3011_v26 = vadd.f32 %v3010_v3, %v3009_v0  ;;  %v3035_v51 = vsel %vm410_vm0, %v2697_v49, 0.0 }
 0x148   : > { %v3043_v20 = vsel %vm410_vm0, %v2698_v30, 0.0  ;;  %v2986_v10 = vadd.f32 %v2985_v52, %v2984_v40  ;;  %v3003_v28 = vrot.slane %v3002_v56, 2  ;;  %v3028_v63 = vrot.slane %v3027_v5, 4 }
 0x149   : > { %v3020_v60 = vadd.f32 %v3019_v54, %v3018_v58  ;;  %v2995_v25 = vadd.f32 %v2994_v41, %v2993_v39  ;;  %v3012_v4 = vrot.slane %v3011_v26, 2  ;;  %v3036_v61 = vadd.f32 %v3035_v51, %v3034_v57 }
 0x14a   : > { %v3044_v19 = vsel %vm410_vm0, %v2699_v6, 0.0  ;;  %v2987_v62 = vrot.slane %v2986_v10, 1  ;;  %v3004_v2 = vadd.f32 %v3003_v28, %v3002_v56  ;;  %v3029_v42 = vadd.f32 %v3028_v63, %v3027_v5 }
 0x14b   : > { %v3021_v27 = vrot.slane %v3020_v60, 2  ;;  %v2996_v50 = vrot.slane %v2995_v25, 1  ;;  %v3013_v34 = vadd.f32 %v3012_v4, %v3011_v26  ;;  %v3037_v0 = vrot.slane %v3036_v61, 4 }
 0x14c   : > { %v3045_v3 = vadd.f32 %v3044_v19, %v3043_v20  ;;  %v6870_v49 = vadd.f32 %v2987_v62, %v2986_v10  ;;  %v3005_v30 = vrot.slane %v3004_v2, 1  ;;  %v3030_v52 = vrot.slane %v3029_v42, 2 }
 0x14d   : > { %v3022_v40 = vadd.f32 %v3021_v27, %v3020_v60  ;;  %v6872_v58 = vadd.f32 %v2996_v50, %v2995_v25  ;;  %v3014_v39 = vrot.slane %v3013_v34, 1  ;;  %v3038_v54 = vadd.f32 %v3037_v0, %v3036_v61 }
 0x14e   : > { %9389 = vst [vmem:[#allocation86_spill] sm:$0xff] %v6870_v49  ;;  %v3046_v57 = vrot.slane %v3045_v3, 4  ;;  %v6874_v41 = vadd.f32 %v3005_v30, %v3004_v2  ;;  %v3031_v56 = vadd.f32 %v3030_v52, %v3029_v42  ;;  %v3364_v5 = vmul.f32 %v6077_v8, %v6870_v49  ;;  %v5293_v2 = vld [vmem:[%s9005_s1 + $0x200] sm:$0xff]  ;;  %v5295_v52 = vld [vmem:[%s9005_s1 + $0x210] sm:$0xff] }
 0x14f   : > { %9390 = vst [vmem:[#allocation87_spill] sm:$0xff] %v6872_v58  ;;  %v3023_v6 = vrot.slane %v3022_v40, 1  ;;  %v6878_v26 = vadd.f32 %v3014_v39, %v3013_v34  ;;  %v3039_v51 = vrot.slane %v3038_v54, 2  ;;  %v3365_v10 = vmul.f32 %v6077_v8, %v6872_v58  ;;  %v5294_v34 = vld [vmem:[%s9005_s1 + $0x208] sm:$0xff] }
 0x150   : > { %9391 = vst [vmem:[#allocation88_spill] sm:$0xff] %v6874_v41  ;;  %v3047_v20 = vadd.f32 %v3046_v57, %v3045_v3  ;;  %v3032_v60 = vrot.slane %v3031_v56, 1  ;;  %v3366_v63 = vmul.f32 %v6077_v8, %v6874_v41  ;;  %v2700_v25 = vmul.f32 %v5293_v2, %v6389_v31  ;;  %v5299_v2 = vld [vmem:[%s9005_s1 + $0x230] sm:$0xff] }
 0x151   : > { %9392 = vst [vmem:[#allocation89_spill] sm:$0xff] %v6878_v26  ;;  %v6882_v28 = vadd.f32 %v3023_v6, %v3022_v40  ;;  %v3040_v4 = vadd.f32 %v3039_v51, %v3038_v54  ;;  %v3367_v19 = vmul.f32 %v6077_v8, %v6878_v26  ;;  %v3489_v62 = vsel %vm1120_vm1, %v3365_v10, %v3364_v5  ;;  %v5296_v6 = vld [vmem:[%s9005_s1 + $0x218] sm:$0xff]  ;;  %v5297_v5 = vld [vmem:[%s9005_s1 + $0x220] sm:$0xff] }
 0x152   : > { %v3048_v61 = vrot.slane %v3047_v20, 2  ;;  %v6893_v27 = vadd.f32 %v3032_v60, %v3031_v56  ;;  %v3490_v50 = vsel %vm1122_vm2, %v3366_v63, %v3489_v62  ;;  %v2701_v0 = vmul.f32 %v5294_v34, %v6400_v47  ;;  %v5298_v60 = vld [vmem:[%s9005_s1 + $0x228] sm:$0xff] }
 0x153   : > { %9393 = vst [vmem:[#allocation90_spill] sm:$0xff] %v6882_v28  ;;  %v3368_v42 = vmul.f32 %v6077_v8, %v6882_v28  ;;  %v3041_v3 = vrot.slane %v3040_v4, 1  ;;  %v3491_v40 = vsel %vm1124_vm3, %v3367_v19, %v3490_v50  ;;  %v2702_v39 = vmul.f32 %v5295_v52, %v6389_v31  ;;  %v5302_v34 = vld [vmem:[%s9005_s1 + $0x248] sm:$0xff] }
 0x154   : > { %9394 = vst [vmem:[#allocation91_spill] sm:$0xff] %v6893_v27  ;;  %v3049_v30 = vadd.f32 %v3048_v61, %v3047_v20  ;;  %v3369_v54 = vmul.f32 %v6077_v8, %v6893_v27  ;;  %v2703_v56 = vmul.f32 %v5296_v6, %v6400_v47  ;;  %v2704_v51 = vmul.f32 %v5297_v5, %v6389_v31  ;;  %v5304_v6 = vld [vmem:[%s9005_s1 + $0x258] sm:$0xff] }
 0x155   : > { %v3492_v57 = vsel %vm1126_vm4, %v3368_v42, %v3491_v40  ;;  %v6918_v20 = vadd.f32 %v3041_v3, %v3040_v4  ;;  %v2705_v63 = vmul.f32 %v5298_v60, %v6400_v47  ;;  %v2706_v61 = vmul.f32 %v5299_v2, %v6389_v31  ;;  %v5300_v4 = vld [vmem:[%s9005_s1 + $0x238] sm:$0xff]  ;;  %v5301_v42 = vld [vmem:[%s9005_s1 + $0x240] sm:$0xff]  ;;  %v5306_v60 = vld [vmem:[%s9005_s1 + $0x268] sm:$0xff] }
 0x156   : > { %v3050_v10 = vrot.slane %v3049_v30, 1  ;;  %v3493_v19 = vsel %vm1128_vm5, %v3369_v54, %v3492_v57  ;;  %v2707_v62 = vmul.f32 %v5300_v4, %v6400_v47  ;;  %v2708_v50 = vmul.f32 %v5301_v42, %v6389_v31  ;;  %v5303_v54 = vld [vmem:[%s9005_s1 + $0x250] sm:$0xff] }
 0x157   : > { %9395 = vst [vmem:[#allocation92_spill] sm:$0xff] %v6918_v20  ;;  %v2709_v3 = vmul.f32 %v5302_v34, %v6400_v47  ;;  %v3370_v52 = vmul.f32 %v6077_v8, %v6918_v20  ;;  %v2710_v57 = vmul.f32 %v5303_v54, %v6389_v31  ;;  %v2711_v5 = vmul.f32 %v5304_v6, %v6400_v47  ;;  %v5307_v4 = vld [vmem:[%s9005_s1 + $0x270] sm:$0xff]  ;;  %v5308_v34 = vld [vmem:[%s9005_s1 + $0x278] sm:$0xff] }
 0x158   : > { %v6941_v40 = vadd.f32 %v3050_v10, %v3049_v30  ;;  %v5305_v30 = vld [vmem:[%s9005_s1 + $0x260] sm:$0xff]  ;;  %v2713_v2 = vmul.f32 %v5306_v60, %v6400_v47  ;;  %v2714_v42 = vmul.f32 %v5307_v4, %v6389_v31  ;;  %v2715_v54 = vmul.f32 %v5308_v34, %v6400_v47 }
 0x159   : > { %v2712_v10 = vmul.f32 %v5305_v30, %v6389_v31  ;;  %v3494_v30 = vsel %vm1130_vm6, %v3370_v52, %v3493_v19  ;;  %v3052_v20 = vsel %vm410_vm0, %v2700_v25, 0.0  ;;  %v3053_v60 = vsel %vm410_vm0, %v2701_v0, 0.0 }
 0x15a   : > { %9396 = vst [vmem:[#allocation93_spill] sm:$0xff] %v6941_v40  ;;  %v3371_v6 = vmul.f32 %v6077_v8, %v6941_v40  ;;  %v3054_v27 = vadd.f32 %v3053_v60, %v3052_v20  ;;  %v3061_v28 = vsel %vm410_vm0, %v2702_v39, 0.0  ;;  %v3062_v31 = vsel %vm410_vm0, %v2703_v56, 0.0 }
 0x15b   : > { %v3070_v4 = vsel %vm410_vm0, %v2704_v51, 0.0  ;;  %v3063_v41 = vadd.f32 %v3062_v31, %v3061_v28  ;;  %v3071_v47 = vsel %vm410_vm0, %v2705_v63, 0.0  ;;  %v3079_v34 = vsel %vm410_vm0, %v2706_v61, 0.0 }
 0x15c   : > { %v3495_v26 = vsel %vm1132_vm7, %v3371_v6, %v3494_v30  ;;  %v3055_v52 = vrot.slane %v3054_v27, 4  ;;  %v3072_v25 = vadd.f32 %v3071_v47, %v3070_v4  ;;  %v3080_v0 = vsel %vm410_vm0, %v2707_v62, 0.0 }
 0x15d   : > { %v3541_v19 = vsel %vm410_vm0, %v3495_v26, 0.0  ;;  %v3064_v20 = vrot.slane %v3063_v41, 4  ;;  %v3081_v39 = vadd.f32 %v3080_v0, %v3079_v34  ;;  %v3088_v56 = vsel %vm410_vm0, %v2708_v50, 0.0 }
 0x15e   : > { %3542 = vadd.xlane.f32.xlu0 %v3541_v19  ;;  %v3089_v51 = vsel %vm410_vm0, %v2709_v3, 0.0  ;;  %v3056_v60 = vadd.f32 %v3055_v52, %v3054_v27  ;;  %v3073_v6 = vrot.slane %v3072_v25, 4  ;;  %v3097_v63 = vsel %vm410_vm0, %v2710_v57, 0.0 }
 0x15f   : > { %v3090_v28 = vadd.f32 %v3089_v51, %v3088_v56  ;;  %v3065_v30 = vadd.f32 %v3064_v20, %v3063_v41  ;;  %v3082_v61 = vrot.slane %v3081_v39, 4  ;;  %v3098_v26 = vsel %vm410_vm0, %v2711_v5, 0.0 }
 0x160   : > { %v3106_v31 = vsel %vm410_vm0, %v2712_v10, 0.0  ;;  %v3057_v4 = vrot.slane %v3056_v60, 2  ;;  %v3074_v62 = vadd.f32 %v3073_v6, %v3072_v25  ;;  %v3099_v19 = vadd.f32 %v3098_v26, %v3097_v63 }
 0x161   : > { %v3091_v47 = vrot.slane %v3090_v28, 4  ;;  %v3066_v34 = vrot.slane %v3065_v30, 2  ;;  %v3083_v0 = vadd.f32 %v3082_v61, %v3081_v39  ;;  %v3107_v50 = vsel %vm410_vm0, %v2713_v2, 0.0 }
 0x162   : > { %v3115_v27 = vsel %vm410_vm0, %v2714_v42, 0.0  ;;  %v3058_v3 = vadd.f32 %v3057_v4, %v3056_v60  ;;  %v3075_v52 = vrot.slane %v3074_v62, 2  ;;  %v3100_v57 = vrot.slane %v3099_v19, 4 }
 0x163   : > { %v3092_v56 = vadd.f32 %v3091_v47, %v3090_v28  ;;  %v3067_v41 = vadd.f32 %v3066_v34, %v3065_v30  ;;  %v3084_v20 = vrot.slane %v3083_v0, 2  ;;  %v3108_v51 = vadd.f32 %v3107_v50, %v3106_v31 }
 0x164   : > { %v3116_v5 = vsel %vm410_vm0, %v2715_v54, 0.0  ;;  %v3059_v10 = vrot.slane %v3058_v3, 1  ;;  %v3076_v40 = vadd.f32 %v3075_v52, %v3074_v62  ;;  %v3101_v6 = vadd.f32 %v3100_v57, %v3099_v19  ;;  %v5309_v57 = vld [vmem:[%s9005_s1 + $0x280] sm:$0xff] }
 0x165   : > { %v3093_v25 = vrot.slane %v3092_v56, 2  ;;  %v3068_v63 = vrot.slane %v3067_v41, 1  ;;  %v3085_v26 = vadd.f32 %v3084_v20, %v3083_v0  ;;  %v3109_v39 = vrot.slane %v3108_v51, 4 }
 0x166   : > { %v3117_v61 = vadd.f32 %v3116_v5, %v3115_v27  ;;  %v6990_v2 = vadd.f32 %v3059_v10, %v3058_v3  ;;  %v3077_v42 = vrot.slane %v3076_v40, 1  ;;  %v3102_v4 = vrot.slane %v3101_v6, 2 }
 0x167   : > { %v3094_v60 = vadd.f32 %v3093_v25, %v3092_v56  ;;  %v6992_v28 = vadd.f32 %v3068_v63, %v3067_v41  ;;  %v3086_v30 = vrot.slane %v3085_v26, 1  ;;  %v3110_v31 = vadd.f32 %v3109_v39, %v3108_v51  ;;  %v7010_v41 = vld [vmem:[%s5407_s21 + $0x10] sm:$0xff]  ;;  %v5311_v39 = vld [vmem:[%s9005_s1 + $0x288] sm:$0xff] }
 0x168   : > { %9397 = vst [vmem:[#allocation94_spill] sm:$0xff] %v6990_v2  ;;  %v3118_v47 = vrot.slane %v3117_v61, 4  ;;  %v6994_v54 = vadd.f32 %v3077_v42, %v3076_v40  ;;  %v3103_v34 = vadd.f32 %v3102_v4, %v3101_v6  ;;  %v3372_v19 = vmul.f32 %v6077_v8, %v6990_v2 }
 0x169   : > { %9398 = vst [vmem:[#allocation95_spill] sm:$0xff] %v6992_v28  ;;  %v3095_v62 = vrot.slane %v3094_v60, 1  ;;  %v6998_v0 = vadd.f32 %v3086_v30, %v3085_v26  ;;  %v3111_v50 = vrot.slane %v3110_v31, 2  ;;  %v3373_v3 = vmul.f32 %v6077_v8, %v6992_v28 }
 0x16a   : > { %9399 = vst [vmem:[#allocation96_spill] sm:$0xff] %v6994_v54  ;;  %v3119_v27 = vadd.f32 %v3118_v47, %v3117_v61  ;;  %v3104_v56 = vrot.slane %v3103_v34, 1  ;;  %v3374_v40 = vmul.f32 %v6077_v8, %v6994_v54  ;;  %v2716_v20 = vmul.f32 %v7010_v41, %v5309_v57  ;;  %v7025_v61 = vld [vmem:[%s5407_s21 + $0x18] sm:$0xff]  ;;  %v5316_v57 = vld [vmem:[%s9005_s1 + $0x2a8] sm:$0xff] }
 0x16b   : > { %9400 = vst [vmem:[#allocation97_spill] sm:$0xff] %v6998_v0  ;;  %v7002_v52 = vadd.f32 %v3095_v62, %v3094_v60  ;;  %v3112_v51 = vadd.f32 %v3111_v50, %v3110_v31  ;;  %v3375_v10 = vmul.f32 %v6077_v8, %v6998_v0  ;;  %v3496_v25 = vsel %vm1120_vm1, %v3373_v3, %v3372_v19  ;;  %v5313_v31 = vld [vmem:[%s9005_s1 + $0x290] sm:$0xff]  ;;  %v5314_v19 = vld [vmem:[%s9005_s1 + $0x298] sm:$0xff] }
 0x16c   : > { %v3120_v5 = vrot.slane %v3119_v27, 2  ;;  %v7016_v6 = vadd.f32 %v3104_v56, %v3103_v34  ;;  %v3497_v26 = vsel %vm1122_vm2, %v3374_v40, %v3496_v25  ;;  %v2717_v42 = vmul.f32 %v7025_v61, %v5311_v39  ;;  %v5319_v39 = vld [vmem:[%s9005_s1 + $0x2c0] sm:$0xff] }
 0x16d   : > { %9401 = vst [vmem:[#allocation98_spill] sm:$0xff] %v7002_v52  ;;  %v3376_v63 = vmul.f32 %v6077_v8, %v7002_v52  ;;  %v3113_v60 = vrot.slane %v3112_v51, 1  ;;  %v3498_v30 = vsel %vm1124_vm3, %v3375_v10, %v3497_v26  ;;  %v2718_v47 = vmul.f32 %v5313_v31, %v7010_v41  ;;  %v5317_v10 = vld [vmem:[%s9005_s1 + $0x2b0] sm:$0xff] }
 0x16e   : > { %9402 = vst [vmem:[#allocation99_spill] sm:$0xff] %v7016_v6  ;;  %v3121_v4 = vadd.f32 %v3120_v5, %v3119_v27  ;;  %v3377_v62 = vmul.f32 %v6077_v8, %v7016_v6  ;;  %v2719_v50 = vmul.f32 %v5314_v19, %v7025_v61  ;;  %v5315_v27 = vld [vmem:[%s9005_s1 + $0x2a0] sm:$0xff]  ;;  %v2721_v5 = vmul.f32 %v5316_v57, %v7025_v61  ;;  %v5322_v57 = vld [vmem:[%s9005_s1 + $0x2d8] sm:$0xff] }
 0x16f   : > { %v3499_v34 = vsel %vm1126_vm4, %v3376_v63, %v3498_v30  ;;  %v2720_v3 = vmul.f32 %v5315_v27, %v7010_v41  ;;  %v7044_v56 = vadd.f32 %v3113_v60, %v3112_v51  ;;  %v2722_v25 = vmul.f32 %v5317_v10, %v7010_v41  ;;  %v5318_v51 = vld [vmem:[%s9005_s1 + $0x2b8] sm:$0xff]  ;;  %v5320_v30 = vld [vmem:[%s9005_s1 + $0x2c8] sm:$0xff] }
 0x170   : > { %v3122_v40 = vrot.slane %v3121_v4, 1  ;;  %v3500_v63 = vsel %vm1128_vm5, %v3377_v62, %v3499_v34  ;;  %v2723_v26 = vmul.f32 %v5318_v51, %v7025_v61  ;;  %v2724_v60 = vmul.f32 %v5319_v39, %v7010_v41  ;;  %v5321_v34 = vld [vmem:[%s9005_s1 + $0x2d0] sm:$0xff]  ;;  %v5324_v51 = vld [vmem:[%s9005_s1 + $0x2e8] sm:$0xff] }
 0x171   : > { %9403 = vst [vmem:[#allocation100_spill] sm:$0xff] %v7044_v56  ;;  %v2725_v31 = vmul.f32 %v5320_v30, %v7025_v61  ;;  %v3378_v62 = vmul.f32 %v6077_v8, %v7044_v56  ;;  %v2726_v27 = vmul.f32 %v5321_v34, %v7010_v41  ;;  %v2727_v10 = vmul.f32 %v5322_v57, %v7025_v61  ;;  %v5325_v30 = vld [vmem:[%s9005_s1 + $0x2f0] sm:$0xff]  ;;  %v5326_v57 = vld [vmem:[%s9005_s1 + $0x2f8] sm:$0xff] }
 0x172   : > { %v7067_v19 = vadd.f32 %v3122_v40, %v3121_v4  ;;  %v5323_v4 = vld [vmem:[%s9005_s1 + $0x2e0] sm:$0xff]  ;;  %v2729_v39 = vmul.f32 %v5324_v51, %v7025_v61  ;;  %v2730_v34 = vmul.f32 %v5325_v30, %v7010_v41  ;;  %v2731_v56 = vmul.f32 %v5326_v57, %v7025_v61 }
 0x173   : > { %v2728_v40 = vmul.f32 %v5323_v4, %v7010_v41  ;;  %v3501_v6 = vsel %vm1130_vm6, %v3378_v62, %v3500_v63  ;;  %v3124_v52 = vsel %vm410_vm0, %v2716_v20, 0.0  ;;  %v3125_v51 = vsel %vm410_vm0, %v2717_v42, 0.0 }
 0x174   : > { %9404 = vst [vmem:[#allocation101_spill] sm:$0xff] %v7067_v19  ;;  %v3379_v4 = vmul.f32 %v6077_v8, %v7067_v19  ;;  %v3126_v0 = vadd.f32 %v3125_v51, %v3124_v52  ;;  %v3133_v54 = vsel %vm410_vm0, %v2718_v47, 0.0  ;;  %v3134_v30 = vsel %vm410_vm0, %v2719_v50, 0.0 }
 0x175   : > { %v3142_v2 = vsel %vm410_vm0, %v2720_v3, 0.0  ;;  %v3135_v58 = vadd.f32 %v3134_v30, %v3133_v54  ;;  %v3143_v57 = vsel %vm410_vm0, %v2721_v5, 0.0  ;;  %v3151_v19 = vsel %vm410_vm0, %v2722_v25, 0.0 }
 0x176   : > { %v3502_v28 = vsel %vm1132_vm7, %v3379_v4, %v3501_v6  ;;  %v3127_v62 = vrot.slane %v3126_v0, 4  ;;  %v3144_v20 = vadd.f32 %v3143_v57, %v3142_v2  ;;  %v3152_v42 = vsel %vm410_vm0, %v2723_v26, 0.0 }
 0x177   : > { %v3544_v63 = vsel %vm410_vm0, %v3502_v28, 0.0  ;;  %v3136_v52 = vrot.slane %v3135_v58, 4  ;;  %v3153_v47 = vadd.f32 %v3152_v42, %v3151_v19  ;;  %v3160_v50 = vsel %vm410_vm0, %v2724_v60, 0.0 }
 0x178   : > { %3545 = vadd.xlane.f32.xlu1 %v3544_v63  ;;  %v3161_v3 = vsel %vm410_vm0, %v2725_v31, 0.0  ;;  %v3128_v51 = vadd.f32 %v3127_v62, %v3126_v0  ;;  %v3145_v6 = vrot.slane %v3144_v20, 4  ;;  %v3169_v5 = vsel %vm410_vm0, %v2726_v27, 0.0 }
 0x179   : > { %v3162_v54 = vadd.f32 %v3161_v3, %v3160_v50  ;;  %v3137_v4 = vadd.f32 %v3136_v52, %v3135_v58  ;;  %v3154_v25 = vrot.slane %v3153_v47, 4  ;;  %v3170_v28 = vsel %vm410_vm0, %v2727_v10, 0.0 }
 0x17a   : > { %v3178_v2 = vsel %vm410_vm0, %v2728_v40, 0.0  ;;  %v3129_v30 = vrot.slane %v3128_v51, 2  ;;  %v3146_v26 = vadd.f32 %v3145_v6, %v3144_v20  ;;  %v3171_v63 = vadd.f32 %v3170_v28, %v3169_v5 }
 0x17b   : > { %v3163_v57 = vrot.slane %v3162_v54, 4  ;;  %v3138_v19 = vrot.slane %v3137_v4, 2  ;;  %v3155_v42 = vadd.f32 %v3154_v25, %v3153_v47  ;;  %v3179_v60 = vsel %vm410_vm0, %v2729_v39, 0.0 }
 0x17c   : > { %v3187_v0 = vsel %vm410_vm0, %v2730_v34, 0.0  ;;  %v3130_v31 = vadd.f32 %v3129_v30, %v3128_v51  ;;  %v3147_v62 = vrot.slane %v3146_v26, 2  ;;  %v3172_v27 = vrot.slane %v3171_v63, 4 }
 0x17d   : > { %v3164_v50 = vadd.f32 %v3163_v57, %v3162_v54  ;;  %v3139_v58 = vadd.f32 %v3138_v19, %v3137_v4  ;;  %v3156_v52 = vrot.slane %v3155_v42, 2  ;;  %v3180_v3 = vadd.f32 %v3179_v60, %v3178_v2 }
 0x17e   : > { %v3188_v10 = vsel %vm410_vm0, %v2731_v56, 0.0  ;;  %v3131_v40 = vrot.slane %v3130_v31, 1  ;;  %v3148_v49 = vadd.f32 %v3147_v62, %v3146_v26  ;;  %v3173_v6 = vadd.f32 %v3172_v27, %v3171_v63 }
 0x17f   : > { %v3165_v20 = vrot.slane %v3164_v50, 2  ;;  %v3140_v5 = vrot.slane %v3139_v58, 1  ;;  %v3157_v28 = vadd.f32 %v3156_v52, %v3155_v42  ;;  %v3181_v47 = vrot.slane %v3180_v3, 4 }
 0x180   : > { %v3189_v25 = vadd.f32 %v3188_v10, %v3187_v0  ;;  %v7116_v39 = vadd.f32 %v3131_v40, %v3130_v31  ;;  %v3149_v34 = vrot.slane %v3148_v49, 1  ;;  %v3174_v30 = vrot.slane %v3173_v6, 2 }
 0x181   : > { %v3166_v51 = vadd.f32 %v3165_v20, %v3164_v50  ;;  %v7118_v54 = vadd.f32 %v3140_v5, %v3139_v58  ;;  %v3158_v4 = vrot.slane %v3157_v28, 1  ;;  %v3182_v57 = vadd.f32 %v3181_v47, %v3180_v3 }
 0x182   : > { %9405 = vst [vmem:[#allocation102_spill] sm:$0xff] %v7116_v39  ;;  %v3190_v2 = vrot.slane %v3189_v25, 4  ;;  %v7120_v19 = vadd.f32 %v3149_v34, %v3148_v49  ;;  %v3175_v26 = vadd.f32 %v3174_v30, %v3173_v6  ;;  %v3380_v63 = vmul.f32 %v6077_v8, %v7116_v39  ;;  %v5327_v49 = vld [vmem:[%s9005_s1 + $0x300] sm:$0xff]  ;;  %v5329_v30 = vld [vmem:[%s9005_s1 + $0x310] sm:$0xff] }
 0x183   : > { %9406 = vst [vmem:[#allocation103_spill] sm:$0xff] %v7118_v54  ;;  %v3167_v56 = vrot.slane %v3166_v51, 1  ;;  %v7124_v42 = vadd.f32 %v3158_v4, %v3157_v28  ;;  %v3183_v60 = vrot.slane %v3182_v57, 2  ;;  %v3381_v31 = vmul.f32 %v6077_v8, %v7118_v54  ;;  %v5328_v28 = vld [vmem:[%s9005_s1 + $0x308] sm:$0xff] }
 0x184   : > { %9407 = vst [vmem:[#allocation104_spill] sm:$0xff] %v7120_v19  ;;  %v3191_v0 = vadd.f32 %v3190_v2, %v3189_v25  ;;  %v3176_v50 = vrot.slane %v3175_v26, 1  ;;  %v3382_v27 = vmul.f32 %v6077_v8, %v7120_v19  ;;  %v2732_v58 = vmul.f32 %v5327_v49, %v7010_v41  ;;  %v5333_v49 = vld [vmem:[%s9005_s1 + $0x330] sm:$0xff] }
 0x185   : > { %9408 = vst [vmem:[#allocation105_spill] sm:$0xff] %v7124_v42  ;;  %v7128_v62 = vadd.f32 %v3167_v56, %v3166_v51  ;;  %v3184_v52 = vadd.f32 %v3183_v60, %v3182_v57  ;;  %v3383_v10 = vmul.f32 %v6077_v8, %v7124_v42  ;;  %v3503_v40 = vsel %vm1120_vm1, %v3381_v31, %v3380_v63  ;;  %v5330_v56 = vld [vmem:[%s9005_s1 + $0x318] sm:$0xff]  ;;  %v5331_v63 = vld [vmem:[%s9005_s1 + $0x320] sm:$0xff] }
 0x186   : > { %v3192_v3 = vrot.slane %v3191_v0, 2  ;;  %v7139_v20 = vadd.f32 %v3176_v50, %v3175_v26  ;;  %v3504_v5 = vsel %vm1122_vm2, %v3382_v27, %v3503_v40  ;;  %v2733_v47 = vmul.f32 %v5328_v28, %v7025_v61  ;;  %v5332_v50 = vld [vmem:[%s9005_s1 + $0x328] sm:$0xff] }
 0x187   : > { %9409 = vst [vmem:[#allocation106_spill] sm:$0xff] %v7128_v62  ;;  %v3384_v6 = vmul.f32 %v6077_v8, %v7128_v62  ;;  %v3185_v25 = vrot.slane %v3184_v52, 1  ;;  %v3505_v51 = vsel %vm1124_vm3, %v3383_v10, %v3504_v5  ;;  %v2734_v4 = vmul.f32 %v5329_v30, %v7010_v41  ;;  %v5336_v28 = vld [vmem:[%s9005_s1 + $0x348] sm:$0xff] }
 0x188   : > { %9410 = vst [vmem:[#allocation107_spill] sm:$0xff] %v7139_v20  ;;  %v3193_v34 = vadd.f32 %v3192_v3, %v3191_v0  ;;  %v3385_v57 = vmul.f32 %v6077_v8, %v7139_v20  ;;  %v2735_v26 = vmul.f32 %v5330_v56, %v7025_v61  ;;  %v2736_v60 = vmul.f32 %v5331_v63, %v7010_v41  ;;  %v5338_v56 = vld [vmem:[%s9005_s1 + $0x358] sm:$0xff] }
 0x189   : > { %v3506_v2 = vsel %vm1126_vm4, %v3384_v6, %v3505_v51  ;;  %v7164_v0 = vadd.f32 %v3185_v25, %v3184_v52  ;;  %v2737_v27 = vmul.f32 %v5332_v50, %v7025_v61  ;;  %v2738_v3 = vmul.f32 %v5333_v49, %v7010_v41  ;;  %v5334_v52 = vld [vmem:[%s9005_s1 + $0x338] sm:$0xff]  ;;  %v5335_v6 = vld [vmem:[%s9005_s1 + $0x340] sm:$0xff]  ;;  %v5340_v50 = vld [vmem:[%s9005_s1 + $0x368] sm:$0xff] }
 0x18a   : > { %v3194_v31 = vrot.slane %v3193_v34, 1  ;;  %v3507_v10 = vsel %vm1128_vm5, %v3385_v57, %v3506_v2  ;;  %v2739_v40 = vmul.f32 %v5334_v52, %v7025_v61  ;;  %v2740_v5 = vmul.f32 %v5335_v6, %v7010_v41  ;;  %v5337_v57 = vld [vmem:[%s9005_s1 + $0x350] sm:$0xff] }
 0x18b   : > { %9411 = vst [vmem:[#allocation108_spill] sm:$0xff] %v7164_v0  ;;  %v2741_v25 = vmul.f32 %v5336_v28, %v7025_v61  ;;  %v3386_v30 = vmul.f32 %v6077_v8, %v7164_v0  ;;  %v2742_v2 = vmul.f32 %v5337_v57, %v7010_v41  ;;  %v2743_v63 = vmul.f32 %v5338_v56, %v7025_v61  ;;  %v5341_v52 = vld [vmem:[%s9005_s1 + $0x370] sm:$0xff]  ;;  %v5342_v28 = vld [vmem:[%s9005_s1 + $0x378] sm:$0xff] }
 0x18c   : > { %v7187_v51 = vadd.f32 %v3194_v31, %v3193_v34  ;;  %v5339_v34 = vld [vmem:[%s9005_s1 + $0x360] sm:$0xff]  ;;  %v2745_v49 = vmul.f32 %v5340_v50, %v7025_v61  ;;  %v2746_v6 = vmul.f32 %v5341_v52, %v7010_v41  ;;  %v2747_v57 = vmul.f32 %v5342_v28, %v7025_v61 }
 0x18d   : > { %v2744_v31 = vmul.f32 %v5339_v34, %v7010_v41  ;;  %v3508_v34 = vsel %vm1130_vm6, %v3386_v30, %v3507_v10  ;;  %v3196_v0 = vsel %vm410_vm0, %v2732_v58, 0.0  ;;  %v3197_v50 = vsel %vm410_vm0, %v2733_v47, 0.0 }
 0x18e   : > { %9412 = vst [vmem:[#allocation109_spill] sm:$0xff] %v7187_v51  ;;  %v3387_v56 = vmul.f32 %v6077_v8, %v7187_v51  ;;  %v3198_v20 = vadd.f32 %v3197_v50, %v3196_v0  ;;  %v3205_v62 = vsel %vm410_vm0, %v2734_v4, 0.0  ;;  %v3206_v52 = vsel %vm410_vm0, %v2735_v26, 0.0 }
 0x18f   : > { %v3214_v42 = vsel %vm410_vm0, %v2736_v60, 0.0  ;;  %v3207_v54 = vadd.f32 %v3206_v52, %v3205_v62  ;;  %v3215_v28 = vsel %vm410_vm0, %v2737_v27, 0.0  ;;  %v3223_v51 = vsel %vm410_vm0, %v2738_v3, 0.0 }
 0x190   : > { %v3509_v19 = vsel %vm1132_vm7, %v3387_v56, %v3508_v34  ;;  %v3199_v30 = vrot.slane %v3198_v20, 4  ;;  %v3216_v58 = vadd.f32 %v3215_v28, %v3214_v42  ;;  %v3224_v47 = vsel %vm410_vm0, %v2739_v40, 0.0 }
 0x191   : > { %v3547_v10 = vsel %vm410_vm0, %v3509_v19, 0.0  ;;  %v3208_v0 = vrot.slane %v3207_v54, 4  ;;  %v3225_v4 = vadd.f32 %v3224_v47, %v3223_v51  ;;  %v3232_v26 = vsel %vm410_vm0, %v2740_v5, 0.0 }
 0x192   : > { %3548 = vadd.xlane.f32.xlu0 %v3547_v10  ;;  %v3233_v60 = vsel %vm410_vm0, %v2741_v25, 0.0  ;;  %v3200_v50 = vadd.f32 %v3199_v30, %v3198_v20  ;;  %v3217_v56 = vrot.slane %v3216_v58, 4  ;;  %v3241_v27 = vsel %vm410_vm0, %v2742_v2, 0.0 }
 0x193   : > { %v3234_v62 = vadd.f32 %v3233_v60, %v3232_v26  ;;  %v3209_v34 = vadd.f32 %v3208_v0, %v3207_v54  ;;  %v3226_v3 = vrot.slane %v3225_v4, 4  ;;  %v3242_v19 = vsel %vm410_vm0, %v2743_v63, 0.0 }
 0x194   : > { %v3250_v42 = vsel %vm410_vm0, %v2744_v31, 0.0  ;;  %v3201_v52 = vrot.slane %v3200_v50, 2  ;;  %v3218_v40 = vadd.f32 %v3217_v56, %v3216_v58  ;;  %v3243_v10 = vadd.f32 %v3242_v19, %v3241_v27 }
 0x195   : > { %v3235_v28 = vrot.slane %v3234_v62, 4  ;;  %v3210_v51 = vrot.slane %v3209_v34, 2  ;;  %v3227_v47 = vadd.f32 %v3226_v3, %v3225_v4  ;;  %v3251_v5 = vsel %vm410_vm0, %v2745_v49, 0.0 }
 0x196   : > { %v3259_v20 = vsel %vm410_vm0, %v2746_v6, 0.0  ;;  %v3202_v25 = vadd.f32 %v3201_v52, %v3200_v50  ;;  %v3219_v30 = vrot.slane %v3218_v40, 2  ;;  %v3244_v2 = vrot.slane %v3243_v10, 4 }
 0x197   : > { %v3236_v26 = vadd.f32 %v3235_v28, %v3234_v62  ;;  %v3211_v54 = vadd.f32 %v3210_v51, %v3209_v34  ;;  %v3228_v0 = vrot.slane %v3227_v47, 2  ;;  %v3252_v60 = vadd.f32 %v3251_v5, %v3250_v42 }
 0x198   : > { %v3260_v63 = vsel %vm410_vm0, %v2747_v57, 0.0  ;;  %v3203_v31 = vrot.slane %v3202_v25, 1  ;;  %v3220_v39 = vadd.f32 %v3219_v30, %v3218_v40  ;;  %v3245_v56 = vadd.f32 %v3244_v2, %v3243_v10 }
 0x199   : > { %v3237_v58 = vrot.slane %v3236_v26, 2  ;;  %v3212_v27 = vrot.slane %v3211_v54, 1  ;;  %v3229_v19 = vadd.f32 %v3228_v0, %v3227_v47  ;;  %v3253_v4 = vrot.slane %v3252_v60, 4 }
 0x19a   : > { %v3261_v3 = vadd.f32 %v3260_v63, %v3259_v20  ;;  %v7236_v49 = vadd.f32 %v3203_v31, %v3202_v25  ;;  %v3221_v6 = vrot.slane %v3220_v39, 1  ;;  %v3246_v52 = vrot.slane %v3245_v56, 2 }
 0x19b   : > { %v3238_v50 = vadd.f32 %v3237_v58, %v3236_v26  ;;  %v7238_v62 = vadd.f32 %v3212_v27, %v3211_v54  ;;  %v3230_v34 = vrot.slane %v3229_v19, 1  ;;  %v3254_v28 = vadd.f32 %v3253_v4, %v3252_v60 }
 0x19c   : > { %9413 = vst [vmem:[#allocation110_spill] sm:$0xff] %v7236_v49  ;;  %v3262_v42 = vrot.slane %v3261_v3, 4  ;;  %v7240_v51 = vadd.f32 %v3221_v6, %v3220_v39  ;;  %v3247_v40 = vadd.f32 %v3246_v52, %v3245_v56  ;;  %v3388_v10 = vmul.f32 %v6077_v8, %v7236_v49  ;;  %v5343_v39 = vld [vmem:[%s9005_s1 + $0x380] sm:$0xff]  ;;  %v5345_v52 = vld [vmem:[%s9005_s1 + $0x390] sm:$0xff] }
 0x19d   : > { %9414 = vst [vmem:[#allocation111_spill] sm:$0xff] %v7238_v62  ;;  %v3239_v57 = vrot.slane %v3238_v50, 1  ;;  %v7244_v47 = vadd.f32 %v3230_v34, %v3229_v19  ;;  %v3255_v5 = vrot.slane %v3254_v28, 2  ;;  %v3389_v25 = vmul.f32 %v6077_v8, %v7238_v62  ;;  %v5344_v19 = vld [vmem:[%s9005_s1 + $0x388] sm:$0xff] }
 0x19e   : > { %9415 = vst [vmem:[#allocation112_spill] sm:$0xff] %v7240_v51  ;;  %v3263_v20 = vadd.f32 %v3262_v42, %v3261_v3  ;;  %v3248_v26 = vrot.slane %v3247_v40, 1  ;;  %v3390_v2 = vmul.f32 %v6077_v8, %v7240_v51  ;;  %v2748_v54 = vmul.f32 %v5343_v39, %v7010_v41  ;;  %v5349_v39 = vld [vmem:[%s9005_s1 + $0x3b0] sm:$0xff] }
 0x19f   : > { %9416 = vst [vmem:[#allocation113_spill] sm:$0xff] %v7244_v47  ;;  %v7248_v30 = vadd.f32 %v3239_v57, %v3238_v50  ;;  %v3256_v0 = vadd.f32 %v3255_v5, %v3254_v28  ;;  %v3391_v63 = vmul.f32 %v6077_v8, %v7244_v47  ;;  %v3510_v31 = vsel %vm1120_vm1, %v3389_v25, %v3388_v10  ;;  %v5346_v57 = vld [vmem:[%s9005_s1 + $0x398] sm:$0xff]  ;;  %v5347_v10 = vld [vmem:[%s9005_s1 + $0x3a0] sm:$0xff] }
 0x1a0   : > { %v3264_v60 = vrot.slane %v3263_v20, 2  ;;  %v7259_v58 = vadd.f32 %v3248_v26, %v3247_v40  ;;  %v3511_v27 = vsel %vm1122_vm2, %v3390_v2, %v3510_v31  ;;  %v2749_v4 = vmul.f32 %v5344_v19, %v7025_v61  ;;  %v5348_v26 = vld [vmem:[%s9005_s1 + $0x3a8] sm:$0xff] }
 0x1a1   : > { %9417 = vst [vmem:[#allocation114_spill] sm:$0xff] %v7248_v30  ;;  %v3392_v56 = vmul.f32 %v6077_v8, %v7248_v30  ;;  %v3257_v3 = vrot.slane %v3256_v0, 1  ;;  %v3512_v50 = vsel %vm1124_vm3, %v3391_v63, %v3511_v27  ;;  %v2750_v34 = vmul.f32 %v5345_v52, %v7010_v41  ;;  %v5352_v19 = vld [vmem:[%s9005_s1 + $0x3c8] sm:$0xff] }
 0x1a2   : > { %9418 = vst [vmem:[#allocation115_spill] sm:$0xff] %v7259_v58  ;;  %v3265_v6 = vadd.f32 %v3264_v60, %v3263_v20  ;;  %v3393_v28 = vmul.f32 %v6077_v8, %v7259_v58  ;;  %v2751_v40 = vmul.f32 %v5346_v57, %v7025_v61  ;;  %v2752_v5 = vmul.f32 %v5347_v10, %v7010_v41  ;;  %v5354_v57 = vld [vmem:[%s9005_s1 + $0x3d8] sm:$0xff] }
 0x1a3   : > { %v3513_v42 = vsel %vm1126_vm4, %v3392_v56, %v3512_v50  ;;  %v7284_v20 = vadd.f32 %v3257_v3, %v3256_v0  ;;  %v2753_v2 = vmul.f32 %v5348_v26, %v7025_v61  ;;  %v2754_v60 = vmul.f32 %v5349_v39, %v7010_v41  ;;  %v5350_v0 = vld [vmem:[%s9005_s1 + $0x3b8] sm:$0xff]  ;;  %v5351_v56 = vld [vmem:[%s9005_s1 + $0x3c0] sm:$0xff]  ;;  %v7319_v26 = vpop.xlane.xlu1 %1195  ;;  %v7321_v39 = vpop.xlane.xlu0 %1192 }
 0x1a4   : > { %v3266_v25 = vrot.slane %v3265_v6, 1  ;;  %v3514_v63 = vsel %vm1128_vm5, %v3393_v28, %v3513_v42  ;;  %v2755_v31 = vmul.f32 %v5350_v0, %v7025_v61  ;;  %v2756_v27 = vmul.f32 %v5351_v56, %v7010_v41  ;;  %v5353_v28 = vld [vmem:[%s9005_s1 + $0x3d0] sm:$0xff]  ;;  %v5356_v0 = vld [vmem:[%s9005_s1 + $0x3e8] sm:$0xff] }
 0x1a5   : > { %9419 = vst [vmem:[#allocation116_spill] sm:$0xff] %v7284_v20  ;;  %v2757_v3 = vmul.f32 %v5352_v19, %v7025_v61  ;;  %v3394_v52 = vmul.f32 %v6077_v8, %v7284_v20  ;;  %v2758_v42 = vmul.f32 %v5353_v28, %v7010_v41  ;;  %v2759_v10 = vmul.f32 %v5354_v57, %v7025_v61  ;;  %v5357_v19 = vld [vmem:[%s9005_s1 + $0x3f0] sm:$0xff]  ;;  %v5358_v57 = vld [vmem:[%s9005_s1 + $0x3f8] sm:$0xff] }
 0x1a6   : > { %v7307_v50 = vadd.f32 %v3266_v25, %v3265_v6  ;;  %v5355_v6 = vld [vmem:[%s9005_s1 + $0x3e0] sm:$0xff]  ;;  %v2761_v56 = vmul.f32 %v5356_v0, %v7025_v61  ;;  %v2762_v28 = vmul.f32 %v5357_v19, %v7010_v41  ;;  %v2763_v20 = vmul.f32 %v5358_v57, %v7025_v61 }
 0x1a7   : > { %v2760_v25 = vmul.f32 %v5355_v6, %v7010_v41  ;;  %v3515_v58 = vsel %vm1130_vm6, %v3394_v52, %v3514_v63  ;;  %v3268_v30 = vsel %vm410_vm0, %v2748_v54, 0.0  ;;  %v3269_v0 = vsel %vm410_vm0, %v2749_v4, 0.0 }
 0x1a8   : > { %9420 = vst [vmem:[#allocation117_spill] sm:$0xff] %v7307_v50  ;;  %v3395_v6 = vmul.f32 %v6077_v8, %v7307_v50  ;;  %v3270_v47 = vadd.f32 %v3269_v0, %v3268_v30  ;;  %v3277_v49 = vsel %vm410_vm0, %v2750_v34, 0.0  ;;  %v3278_v41 = vsel %vm410_vm0, %v2751_v40, 0.0  ;;  %v7354_v0 = vpop.xlane.xlu1 %1198 }
 0x1a9   : > { %v3286_v19 = vsel %vm410_vm0, %v2752_v5, 0.0  ;;  %v3279_v62 = vadd.f32 %v3278_v41, %v3277_v49  ;;  %v3287_v61 = vsel %vm410_vm0, %v2753_v2, 0.0  ;;  %v3295_v57 = vsel %vm410_vm0, %v2754_v60, 0.0  ;;  %v7356_v49 = vpop.xlane.xlu0 %1201 }
 0x1aa   : > { %v3516_v51 = vsel %vm1132_vm7, %v3395_v6, %v3515_v58  ;;  %v3271_v52 = vrot.slane %v3270_v47, 4  ;;  %v3288_v54 = vadd.f32 %v3287_v61, %v3286_v19  ;;  %v3296_v4 = vsel %vm410_vm0, %v2755_v31, 0.0 }
 0x1ab   : > { %v3550_v63 = vsel %vm410_vm0, %v3516_v51, 0.0  ;;  %v3280_v30 = vrot.slane %v3279_v62, 4  ;;  %v3297_v34 = vadd.f32 %v3296_v4, %v3295_v57  ;;  %v3304_v40 = vsel %vm410_vm0, %v2756_v27, 0.0 }
 0x1ac   : > { %3551 = vadd.xlane.f32.xlu1 %v3550_v63  ;;  %v3305_v5 = vsel %vm410_vm0, %v2757_v3, 0.0  ;;  %v3272_v58 = vadd.f32 %v3271_v52, %v3270_v47  ;;  %v3289_v2 = vrot.slane %v3288_v54, 4  ;;  %v3313_v51 = vsel %vm410_vm0, %v2758_v42, 0.0 }
 0x1ad   : > { %v3306_v60 = vadd.f32 %v3305_v5, %v3304_v40  ;;  %v3281_v6 = vadd.f32 %v3280_v30, %v3279_v62  ;;  %v3298_v41 = vrot.slane %v3297_v34, 4  ;;  %v3314_v31 = vsel %vm410_vm0, %v2759_v10, 0.0 }
 0x1ae   : > { %v3322_v19 = vsel %vm410_vm0, %v2760_v25, 0.0  ;;  %v3273_v61 = vrot.slane %v3272_v58, 2  ;;  %v3290_v57 = vadd.f32 %v3289_v2, %v3288_v54  ;;  %v3315_v63 = vadd.f32 %v3314_v31, %v3313_v51  ;;  %v7364_v25 = vpop.xlane.xlu1 %1204  ;;  %v7366_v54 = vpop.xlane.xlu0 %1207 }
 0x1af   : > { %v3307_v27 = vrot.slane %v3306_v60, 4  ;;  %v3282_v3 = vrot.slane %v3281_v6, 2  ;;  %v3299_v4 = vadd.f32 %v3298_v41, %v3297_v34  ;;  %v3323_v50 = vsel %vm410_vm0, %v2761_v56, 0.0 }
 0x1b0   : > { %v3331_v47 = vsel %vm410_vm0, %v2762_v28, 0.0  ;;  %v3274_v52 = vadd.f32 %v3273_v61, %v3272_v58  ;;  %v3291_v40 = vrot.slane %v3290_v57, 2  ;;  %v3316_v42 = vrot.slane %v3315_v63, 4 }
 0x1b1   : > { %v3308_v5 = vadd.f32 %v3307_v27, %v3306_v60  ;;  %v3283_v62 = vadd.f32 %v3282_v3, %v3281_v6  ;;  %v3300_v30 = vrot.slane %v3299_v4, 2  ;;  %v3324_v35 = vadd.f32 %v3323_v50, %v3322_v19 }
 0x1b2   : > { %v3332_v10 = vsel %vm410_vm0, %v2763_v20, 0.0  ;;  %v3275_v2 = vrot.slane %v3274_v52, 1  ;;  %v3292_v51 = vadd.f32 %v3291_v40, %v3290_v57  ;;  %v3317_v41 = vadd.f32 %v3316_v42, %v3315_v63  ;;  %v7382_v42 = vpop.xlane.xlu0 %1213 }
 0x1b3   : > { %v3309_v34 = vrot.slane %v3308_v5, 2  ;;  %v3284_v56 = vrot.slane %v3283_v62, 1  ;;  %v3301_v31 = vadd.f32 %v3300_v30, %v3299_v4  ;;  %v3325_v28 = vrot.slane %v3324_v35, 4 }
 0x1b4   : > { %v3333_v58 = vadd.f32 %v3332_v10, %v3331_v47  ;;  %v7368_v61 = vadd.f32 %v3275_v2, %v3274_v52  ;;  %v3293_v60 = vrot.slane %v3292_v51, 1  ;;  %v3318_v27 = vrot.slane %v3317_v41, 2 }
 0x1b5   : > { %v3310_v6 = vadd.f32 %v3309_v34, %v3308_v5  ;;  %v7370_v50 = vadd.f32 %v3284_v56, %v3283_v62  ;;  %v3302_v20 = vrot.slane %v3301_v31, 1  ;;  %v3326_v19 = vadd.f32 %v3325_v28, %v3324_v35  ;;  %v7380_v5 = vpop.xlane.xlu1 %1210 }
 0x1b6   : > { %9421 = vst [vmem:[#allocation118_spill] sm:$0xff] %v7368_v61  ;;  %v3334_v3 = vrot.slane %v3333_v58, 4  ;;  %v7372_v43 = vadd.f32 %v3293_v60, %v3292_v51  ;;  %v3319_v57 = vadd.f32 %v3318_v27, %v3317_v41  ;;  %v3396_v63 = vmul.f32 %v6077_v8, %v7368_v61 }
 0x1b7   : > { %9422 = vst [vmem:[#allocation119_spill] sm:$0xff] %v7370_v50  ;;  %v3311_v17 = vrot.slane %v3310_v6, 1  ;;  %v7376_v4 = vadd.f32 %v3302_v20, %v3301_v31  ;;  %v3327_v47 = vrot.slane %v3326_v19, 2  ;;  %v3397_v40 = vmul.f32 %v6077_v8, %v7370_v50 }
 0x1b8   : > { %9423 = vst [vmem:[#allocation120_spill] sm:$0xff] %v7372_v43  ;;  %v3335_v52 = vadd.f32 %v3334_v3, %v3333_v58  ;;  %v3320_v62 = vrot.slane %v3319_v57, 1  ;;  %v3398_v30 = vmul.f32 %v6077_v8, %v7372_v43  ;;  %v1216_v10 = vmul.f32 %v7319_v26, %v7319_v26 }
 0x1b9   : > { %9424 = vst [vmem:[#allocation121_spill] sm:$0xff] %v7376_v4  ;;  %v7384_v35 = vadd.f32 %v3311_v17, %v3310_v6  ;;  %v3328_v2 = vadd.f32 %v3327_v47, %v3326_v19  ;;  %v3399_v34 = vmul.f32 %v6077_v8, %v7376_v4  ;;  %v3517_v41 = vsel %vm1120_vm1, %v3397_v40, %v3396_v63 }
 0x1ba   : > { %v3336_v51 = vrot.slane %v3335_v52, 2  ;;  %v7393_v56 = vadd.f32 %v3320_v62, %v3319_v57  ;;  %v3518_v31 = vsel %vm1122_vm2, %v3398_v30, %v3517_v41  ;;  %v1215_v28 = vmul.f32 %v7321_v39, %v7321_v39  ;;  %v7414_v62 = vpop.xlane.xlu1 %3533  ;;  %v7416_v30 = vpop.xlane.xlu0 %3536 }
 0x1bb   : > { %9425 = vst [vmem:[#allocation122_spill] sm:$0xff] %v7384_v35  ;;  %v3400_v17 = vmul.f32 %v6077_v8, %v7384_v35  ;;  %v3329_v58 = vrot.slane %v3328_v2, 1  ;;  %v3519_v6 = vsel %vm1124_vm3, %v3399_v34, %v3518_v31  ;;  %v1217_v27 = vmul.f32 %v7354_v0, %v7354_v0  ;;  %9428 = vst [vmem:[#allocation125_spill] sm:$0xff] %v7414_v62 }
 0x1bc   : > { %9426 = vst [vmem:[#allocation123_spill] sm:$0xff] %v7393_v56  ;;  %v3337_v60 = vadd.f32 %v3336_v51, %v3335_v52  ;;  %v3401_v20 = vmul.f32 %v6077_v8, %v7393_v56  ;;  %v1223_v3 = vadd.f32 %v1216_v10, %v1215_v28  ;;  %v1218_v57 = vmul.f32 %v7356_v49, %v7356_v49 }
 0x1bd   : > { %v3520_v19 = vsel %vm1126_vm4, %v3400_v17, %v3519_v6  ;;  %v7408_v63 = vadd.f32 %v3329_v58, %v3328_v2  ;;  %v1219_v52 = vmul.f32 %v7364_v25, %v7364_v25  ;;  %v1220_v40 = vmul.f32 %v7366_v54, %v7366_v54  ;;  %9429 = vst [vmem:[#allocation126_spill] sm:$0xff] %v7416_v30 }
 0x1be   : > { %v3338_v47 = vrot.slane %v3337_v60, 1  ;;  %v3521_v51 = vsel %vm1128_vm5, %v3401_v20, %v3520_v19  ;;  %v1224_v34 = vrot.slane %v1223_v3, 4  ;;  %v1230_v10 = vadd.f32 %v1218_v57, %v1217_v27 }
 0x1bf   : > { %9427 = vst [vmem:[#allocation124_spill] sm:$0xff] %v7408_v63  ;;  %v1221_v41 = vmul.f32 %v7380_v5, %v7380_v5  ;;  %v3402_v17 = vmul.f32 %v6077_v8, %v7408_v63  ;;  %v1237_v31 = vadd.f32 %v1220_v40, %v1219_v52  ;;  %v1222_v28 = vmul.f32 %v7382_v42, %v7382_v42 }
 0x1c0   : > { %v7421_v2 = vadd.f32 %v3338_v47, %v3337_v60  ;;  %v1225_v58 = vadd.f32 %v1224_v34, %v1223_v3  ;;  %v1231_v6 = vrot.slane %v1230_v10, 4  ;;  %v3556_v56 = vmul.f32 %v7414_v62, %v7414_v62 }
 0x1c1   : > { %v3557_v27 = vmul.f32 %v7416_v30, %v7416_v30  ;;  %v3522_v60 = vsel %vm1130_vm6, %v3402_v17, %v3521_v51  ;;  %v1238_v19 = vrot.slane %v1237_v31, 4  ;;  %v1244_v57 = vadd.f32 %v1222_v28, %v1221_v41 }
 0x1c2   : > { %9430 = vst [vmem:[#allocation127_spill] sm:$0xff] %v7421_v2  ;;  %v3403_v20 = vmul.f32 %v6077_v8, %v7421_v2  ;;  %v1232_v47 = vadd.f32 %v1231_v6, %v1230_v10  ;;  %v1226_v35 = vrot.slane %v1225_v58, 2 }
 0x1c3   : > { %v3564_v52 = vadd.f32 %v3557_v27, %v3556_v56  ;;  %v1239_v63 = vadd.f32 %v1238_v19, %v1237_v31  ;;  %v1245_v3 = vrot.slane %v1244_v57, 4 }
 0x1c4   : > { %v3523_v40 = vsel %vm1132_vm7, %v3403_v20, %v3522_v60  ;;  %v1233_v4 = vrot.slane %v1232_v47, 2  ;;  %v1227_v8 = vadd.f32 %v1226_v35, %v1225_v58 }
 0x1c5   : > { %v3553_v34 = vsel %vm410_vm0, %v3523_v40, 0.0  ;;  %v1246_v61 = vadd.f32 %v1245_v3, %v1244_v57  ;;  %v3565_v43 = vrot.slane %v3564_v52, 4  ;;  %v1240_v50 = vrot.slane %v1239_v63, 2 }
 0x1c6   : > { %3554 = vadd.xlane.f32.xlu0 %v3553_v34  ;;  %v1234_v2 = vadd.f32 %v1233_v4, %v1232_v47  ;;  %v1228_v10 = vrot.slane %v1227_v8, 1 }
 0x1c7   : > { %v1247_v30 = vrot.slane %v1246_v61, 2  ;;  %v3566_v51 = vadd.f32 %v3565_v43, %v3564_v52  ;;  %v1241_v17 = vadd.f32 %v1240_v50, %v1239_v63 }
 0x1c8   : > { %v1235_v56 = vrot.slane %v1234_v2, 1  ;;  %v1229_v27 = vadd.f32 %v1228_v10, %v1227_v8 }
 0x1c9   : > { %v1248_v41 = vadd.f32 %v1247_v30, %v1246_v61  ;;  %v3567_v28 = vrot.slane %v3566_v51, 2  ;;  %v1242_v6 = vrot.slane %v1241_v17, 1 }
 0x1ca   : > { %v1236_v20 = vadd.f32 %v1235_v56, %v1234_v2  ;;  %v1251_v34 = vadd.f32 1e-08, %v1229_v27 }
 0x1cb   : > { %v1249_v31 = vrot.slane %v1248_v41, 1  ;;  %v3568_v60 = vadd.f32 %v3567_v28, %v3566_v51  ;;  %v1243_v19 = vadd.f32 %v1242_v6, %v1241_v17 }
 0x1cc   : > { %v1252_v57 = vadd.f32 1e-08, %v1236_v20  ;;  %5067 = vrsqrt.f32 %v1251_v34  ;;  %v1283_v50 = vadd.f32 1.0, %v1251_v34  ;;  %vm1257_vm8 = vcmp.eq.f32.partialorder %v1251_v34, inf }
 0x1cd   : > { %v1250_v40 = vadd.f32 %v1249_v31, %v1248_v41  ;;  %v3569_v3 = vrot.slane %v3568_v60, 1  ;;  %v1253_v62 = vadd.f32 1e-08, %v1243_v19  ;;  %vm1259_vm9 = vcmp.eq.f32.partialorder %v1251_v34, 0.0 }
 0x1ce   : > { %5069 = vrsqrt.f32 %v1252_v57  ;;  %v1284_v4 = vadd.f32 1.0, %v1252_v57  ;;  %v1260_v6 = vand.u32 2147483648, %v1251_v34  ;;  %vm1264_vm10 = vcmp.eq.f32.partialorder %v1252_v57, inf }
 0x1cf   : > { %v1254_v16 = vadd.f32 1e-08, %v1250_v40  ;;  %v3570_v43 = vadd.f32 %v3569_v3, %v3568_v60  ;;  %5071 = vrsqrt.f32 %v1253_v62  ;;  %v1285_v63 = vadd.f32 1.0, %v1253_v62 }
 0x1d0   : > { %vm1266_vm11 = vcmp.eq.f32.partialorder %v1252_v57, 0.0  ;;  %vm1271_vm12 = vcmp.eq.f32.partialorder %v1253_v62, inf  ;;  %v1267_v40 = vand.u32 2147483648, %v1252_v57  ;;  %vm1273_vm14 = vcmp.eq.f32.partialorder %v1253_v62, 0.0 }
 0x1d1   : > { %5073 = vrsqrt.f32 %v1254_v16  ;;  %v7436_v61 = vadd.f32 1e-08, %v3570_v43  ;;  %v1286_v2 = vadd.f32 1.0, %v1254_v16  ;;  %v7439_v8 = vpop.xlane.xlu1 %3539  ;;  %vm1278_vm13 = vcmp.eq.f32.partialorder %v1254_v16, inf }
 0x1d2   : > { %v3558_v28 = vmul.f32 %v7439_v8, %v7439_v8  ;;  %vm1280_vm15 = vcmp.eq.f32.partialorder %v1254_v16, 0.0 }
 0x1d3   : > { %5075 = vrsqrt.f32 %v7436_v61  ;;  %v3624_v56 = vadd.f32 1.0, %v7436_v61 }
 0x1d4   : > { %5077 = vrcp.f32 %v1283_v50  ;;  %v1274_v50 = vand.u32 2147483648, %v1253_v62 }
 0x1d5   : > { %5079 = vrcp.f32 %v1284_v4  ;;  %v1281_v4 = vand.u32 2147483648, %v1254_v16 }
 0x1d6   : > { %v5068_v35 = vpop.eup %5067  ;;  %5081 = vrcp.f32 %v1285_v63 }
 0x1d7   : > { %v1256_v52 = vmul.f32 %v5068_v35, %v1251_v34  ;;  %5083 = vrcp.f32 %v1286_v2 }
 0x1d8   : > { %v5070_v30 = vpop.eup %5069  ;;  %5085 = vrcp.f32 %v3624_v56 }
 0x1d9   : > { %v5072_v58 = vpop.eup %5071  ;;  %v1263_v51 = vmul.f32 %v5070_v30, %v1252_v57  ;;  %v1258_v10 = vsel %vm1257_vm8, %v1251_v34, %v1256_v52  ;;  %vm3598_vm8 = vcmp.eq.f32.partialorder %v7436_v61, inf }
 0x1da   : > { %v1270_v17 = vmul.f32 %v5072_v58, %v1253_v62  ;;  %v1261_v19 = vsel %vm1259_vm9, %v1260_v6, %v1258_v10  ;;  %vm3600_vm9 = vcmp.eq.f32.partialorder %v7436_v61, 0.0 }
 0x1db   : > { %v5074_v47 = vpop.eup %5073  ;;  %v1265_v20 = vsel %vm1264_vm10, %v1252_v57, %v1263_v51 }
 0x1dc   : > { %v1277_v41 = vmul.f32 %v5074_v47, %v1254_v16  ;;  %v1272_v3 = vsel %vm1271_vm12, %v1253_v62, %v1270_v17  ;;  %v1268_v63 = vsel %vm1266_vm11, %v1267_v40, %v1265_v20  ;;  %vm1719_vm12 = vcmask 57344  }
 0x1dd   : > { %v5076_v27 = vpop.eup %5075  ;;  %v1275_v47 = vsel %vm1273_vm14, %v1274_v50, %v1272_v3 }
 0x1de   : > { %v1279_v43 = vsel %vm1278_vm13, %v1254_v16, %v1277_v41  ;;  %v5078_v34 = vpop.eup %5077  ;;  %v3597_v30 = vmul.f32 %v5076_v27, %v7436_v61  ;;  %v3601_v16 = vand.u32 2147483648, %v7436_v61 }
 0x1df   : > { %v5080_v2 = vpop.eup %5079  ;;  %v1288_v58 = vmul.f32 %v5078_v34, %v1261_v19  ;;  %v1282_v52 = vsel %vm1280_vm15, %v1281_v4, %v1279_v43 }
 0x1e0   : > { %v5082_v10 = vpop.eup %5081  ;;  %v1290_v17 = vmul.f32 %v5080_v2, %v1268_v63  ;;  %v3599_v57 = vsel %vm3598_vm8, %v7436_v61, %v3597_v30 }
 0x1e1   : > { %v5084_v6 = vpop.eup %5083  ;;  %v1292_v56 = vmul.f32 %v5082_v10, %v1275_v47  ;;  %v1295_v62 = vmul.f32 %v1288_v58, %v7321_v39  ;;  %v1296_v20 = vmul.f32 %v1288_v58, %v7319_v26  ;;  %v3602_v19 = vsel %vm3600_vm9, %v3601_v16, %v3599_v57  ;;  %v9433_v16 = vld [vmem:[#allocation15_spill] sm:$0xff] }
 0x1e2   : > { %v7460_v3 = vmul.f32 %v1290_v17, %v7356_v49  ;;  %v5086_v61 = vpop.eup %5085 }
 0x1e3   : > { %v7463_v43 = vmul.f32 %v1292_v56, %v7364_v25  ;;  %v7466_v39 = vmul.f32 %v1292_v56, %v7366_v54  ;;  %v1311_v4 = vrot.slane %v1295_v62, 1  ;;  %v7474_v34 = vmul.f32 %v5086_v61, %v3602_v19  ;;  %v9434_v19 = vld [vmem:[#allocation16_spill] sm:$0xff]  ;;  %v9435_v61 = vld [vmem:[#allocation3_spill] sm:$0xff] }
 0x1e4   : > { %v1313_v49 = vrot.slane %v1295_v62, 3  ;;  %v1314_v63 = vrot.slane %v1295_v62, 4  ;;  %v1315_v30 = vrot.slane %v1295_v62, 5  ;;  %v1316_v2 = vrot.slane %v1295_v62, 6 }
 0x1e5   : > { %v1317_v58 = vrot.slane %v1295_v62, 7  ;;  %v1318_v54 = vrot.slane %v1296_v20, 1  ;;  %v1319_v47 = vrot.slane %v1296_v20, 2  ;;  %v1431_v56 = vmul.f32 %v1295_v62, %v5585_v9 }
 0x1e6   : > { %v1435_v57 = vmul.f32 %v1314_v63, %v5619_v37 }
 0x1eb   : > { %v7444_v31 = vpop.xlane.xlu0 %3542 }
 0x1ec   : > { %v3559_v60 = vmul.f32 %v7444_v31, %v7444_v31 }
 0x1ee   : > { %v3571_v35 = vadd.f32 %v3559_v60, %v3558_v28  ;;  %v1294_v28 = vmul.f32 %v5084_v6, %v1282_v52  ;;  %v7457_v60 = vmul.f32 %v1290_v17, %v7354_v0  ;;  %v1320_v52 = vrot.slane %v1296_v20, 3 }
 0x1ef   : > { %v1432_v6 = vmul.f32 %v1311_v4, %v5590_v18  ;;  %v1438_v4 = vmul.f32 %v1317_v58, %v5668_v24  ;;  %v9437_v18 = vld [vmem:[#allocation4_spill] sm:$0xff] }
 0x1f0   : > { %v3572_v51 = vrot.slane %v3571_v35, 4  ;;  %v7469_v50 = vmul.f32 %v1294_v28, %v7380_v5  ;;  %v7472_v26 = vmul.f32 %v1294_v28, %v7382_v42  ;;  %v1321_v5 = vrot.slane %v1296_v20, 4 }
 0x1f1   : > { %v1323_v42 = vrot.slane %v1296_v20, 6  ;;  %v1434_v28 = vmul.f32 %v1313_v49, %v5607_v29  ;;  %v9438_v29 = vld [vmem:[#allocation5_spill] sm:$0xff]  ;;  %v1559_v37 = vrot.slane %v1432_v6, 7  ;;  %v1565_v6 = vrot.slane %v1435_v57, 4 }
 0x1f2   : > { %v3573_v41 = vadd.f32 %v3572_v51, %v3571_v35  ;;  %9431 = vst [vmem:[#allocation128_spill] sm:$0xff] %v7469_v50  ;;  %9432 = vst [vmem:[#allocation129_spill] sm:$0xff] %v7472_v26  ;;  %v1312_v35 = vrot.slane %v1295_v62, 2  ;;  %v1322_v51 = vrot.slane %v1296_v20, 5  ;;  %v1441_v62 = vmul.f32 %v1319_v47, %v9437_v18  ;;  %v9439_v26 = vld [vmem:[#allocation6_spill] sm:$0xff] }
 0x1f3   : > { %v1442_v63 = vmul.f32 %v1320_v52, %v9438_v29  ;;  %v1563_v58 = vrot.slane %v1434_v28, 5 }
 0x1f4   : > { %v3574_v27 = vrot.slane %v3573_v41, 2  ;;  %v1433_v17 = vmul.f32 %v1312_v35, %v5598_v23  ;;  %v9436_v35 = vld [vmem:[#allocation2_spill] sm:$0xff] }
 0x1f5   : > { %v1439_v23 = vmul.f32 %v1296_v20, %v9436_v35 }
 0x1f6   : > { %v3575_v40 = vadd.f32 %v3574_v27, %v3573_v41  ;;  %v1324_v41 = vrot.slane %v1296_v20, 7  ;;  %v1436_v27 = vmul.f32 %v1315_v30, %v9433_v16  ;;  %v1561_v9 = vrot.slane %v1433_v17, 6  ;;  %v9440_v16 = vld [vmem:[#allocation7_spill] sm:$0xff] }
 0x1f7   : > { %v1443_v30 = vmul.f32 %v1321_v5, %v9439_v26  ;;  %v1560_v20 = vsel %vm1120_vm1, %v1559_v37, %v1431_v56  ;;  %v1575_v5 = vrot.slane %v1441_v62, 6  ;;  %v1571_v37 = vrot.slane %v1438_v4, 1 }
 0x1f8   : > { %v3576_v0 = vrot.slane %v3575_v40, 1  ;;  %v1562_v52 = vsel %vm1122_vm2, %v1561_v9, %v1560_v20  ;;  %v1567_v17 = vrot.slane %v1436_v27, 3 }
 0x1f9   : > { %v1579_v28 = vrot.slane %v1443_v30, 4 }
 0x1fa   : > { %v3577_v25 = vadd.f32 %v3576_v0, %v3575_v40  ;;  %v1437_v40 = vmul.f32 %v1316_v2, %v9434_v19  ;;  %v1440_v0 = vmul.f32 %v1318_v54, %v9435_v61  ;;  %v1444_v2 = vmul.f32 %v1322_v51, %v9440_v16  ;;  %v9441_v19 = vld [vmem:[#allocation8_spill] sm:$0xff]  ;;  %v9442_v61 = vld [vmem:[#allocation9_spill] sm:$0xff] }
 0x1fb   : > { %v1445_v54 = vmul.f32 %v1323_v42, %v9441_v19  ;;  %v1446_v50 = vmul.f32 %v1324_v41, %v9442_v61  ;;  %v1564_v51 = vsel %vm1124_vm3, %v1563_v58, %v1562_v52  ;;  %v1577_v41 = vrot.slane %v1442_v63, 5 }
 0x1fc   : > { %v7476_v10 = vadd.f32 1e-08, %v3577_v25  ;;  %v1573_v47 = vrot.slane %v1440_v0, 7  ;;  %v1569_v24 = vrot.slane %v1437_v40, 2  ;;  %v1581_v57 = vrot.slane %v1444_v2, 3 }
 0x1fd   : > { %v1583_v27 = vrot.slane %v1445_v54, 2  ;;  %v1585_v63 = vrot.slane %v1446_v50, 1  ;;  %v1325_v58 = vrot.slane %v7457_v60, 1  ;;  %v1328_v50 = vrot.slane %v7457_v60, 4 }
 0x1fe   : > { %5087 = vrsqrt.f32 %v7476_v10  ;;  %v3625_v25 = vadd.f32 1.0, %v7476_v10  ;;  %v3608_v49 = vand.u32 2147483648, %v7476_v10  ;;  %vm3605_vm10 = vcmp.eq.f32.partialorder %v7476_v10, inf }
 0x1ff   : > { %vm3607_vm11 = vcmp.eq.f32.partialorder %v7476_v10, 0.0  ;;  %v1574_v42 = vsel %vm1120_vm1, %v1573_v47, %v1439_v23  ;;  %v1326_v47 = vrot.slane %v7457_v60, 2 }
 0x200   : > { %5089 = vrcp.f32 %v3625_v25  ;;  %v1566_v25 = vsel %vm1126_vm4, %v1565_v6, %v1564_v51  ;;  %v1576_v56 = vsel %vm1122_vm2, %v1575_v5, %v1574_v42  ;;  %v1330_v5 = vrot.slane %v7457_v60, 6 }
 0x201   : > { %v1568_v0 = vsel %vm1128_vm5, %v1567_v17, %v1566_v25  ;;  %v1578_v9 = vsel %vm1124_vm3, %v1577_v41, %v1576_v56  ;;  %v1329_v17 = vrot.slane %v7457_v60, 5  ;;  %v1331_v41 = vrot.slane %v7457_v60, 7 }
 0x202   : > { %v1570_v23 = vsel %vm1130_vm6, %v1569_v24, %v1568_v0  ;;  %v1580_v62 = vsel %vm1126_vm4, %v1579_v28, %v1578_v9  ;;  %v1327_v24 = vrot.slane %v7457_v60, 3  ;;  %v1332_v25 = vrot.slane %v7460_v3, 1 }
 0x203   : > { %v1572_v4 = vsel %vm1132_vm7, %v1571_v37, %v1570_v23  ;;  %v1582_v30 = vsel %vm1128_vm5, %v1581_v57, %v1580_v62  ;;  %v1333_v0 = vrot.slane %v7460_v3, 2  ;;  %v1334_v9 = vrot.slane %v7460_v3, 3 }
 0x204   : > { %v1584_v54 = vsel %vm1130_vm6, %v1583_v27, %v1582_v30  ;;  %v1679_v52 = vsel %vm410_vm0, %v1572_v4, 0.0  ;;  %v1335_v27 = vrot.slane %v7460_v3, 4  ;;  %v1336_v23 = vrot.slane %v7460_v3, 5 }
 0x205   : > { %v7503_v61 = vpop.xlane.xlu1 %3545  ;;  %v1586_v6 = vsel %vm1132_vm7, %v1585_v63, %v1584_v54  ;;  %v1337_v62 = vrot.slane %v7460_v3, 6  ;;  %v1449_v4 = vmul.f32 %v1326_v47, %v5697_v32  ;;  %v1450_v30 = vmul.f32 %v1327_v24, %v5699_v33  ;;  %v9445_v32 = vld [vmem:[#allocation27_spill] sm:$0xff] }
 0x206   : > { %v7511_v40 = vmul.f32 %v7503_v61, %v7503_v61  ;;  %v1680_v42 = vsel %vm410_vm0, %v1586_v6, 0.0  ;;  %v1452_v54 = vmul.f32 %v1329_v17, %v5746_v13  ;;  %v1453_v6 = vmul.f32 %v1330_v5, %v5748_v14  ;;  %v9447_v17 = vld [vmem:[#allocation29_spill] sm:$0xff]  ;;  %v9448_v5 = vld [vmem:[#allocation30_spill] sm:$0xff] }
 0x207   : > { %v1681_v28 = vadd.f32 %v1680_v42, %v1679_v52  ;;  %v1455_v42 = vmul.f32 %v7460_v3, %v5777_v55  ;;  %v1459_v24 = vmul.f32 %v1335_v27, %v9445_v32 }
 0x208   : > { %v5088_v20 = vpop.eup %5087 }
 0x209   : > { %v3604_v2 = vmul.f32 %v5088_v20, %v7476_v10  ;;  %v1682_v63 = vrot.slane %v1681_v28, 4  ;;  %v1338_v20 = vrot.slane %v7460_v3, 7 }
 0x20a   : > { %v5090_v37 = vpop.eup %5089 }
 0x20b   : > { %v3606_v51 = vsel %vm3605_vm10, %v7476_v10, %v3604_v2  ;;  %v1447_v10 = vmul.f32 %v7457_v60, %v5681_v12  ;;  %v1451_v2 = vmul.f32 %v1328_v50, %v5718_v53  ;;  %v1683_v52 = vadd.f32 %v1682_v63, %v1681_v28  ;;  %v9446_v50 = vld [vmem:[#allocation28_spill] sm:$0xff] }
 0x20c   : > { %v3609_v56 = vsel %vm3607_vm11, %v3608_v49, %v3606_v51  ;;  %v1448_v49 = vmul.f32 %v1325_v58, %v5686_v22  ;;  %v1454_v51 = vmul.f32 %v1331_v41, %v5761_v44  ;;  %v1456_v60 = vmul.f32 %v1332_v25, %v5782_v59  ;;  %v9443_v58 = vld [vmem:[#allocation25_spill] sm:$0xff] }
 0x20d   : > { %v7537_v57 = vmul.f32 %v5090_v37, %v3609_v56  ;;  %v1457_v37 = vmul.f32 %v1333_v0, %v9443_v58  ;;  %v9444_v56 = vld [vmem:[#allocation26_spill] sm:$0xff]  ;;  %v1684_v33 = vrot.slane %v1683_v52, 2  ;;  %v1460_v53 = vmul.f32 %v1336_v23, %v9446_v50 }
 0x20e   : > { %v1458_v47 = vmul.f32 %v1334_v9, %v9444_v56  ;;  %v1461_v28 = vmul.f32 %v1337_v62, %v9447_v17  ;;  %v1587_v63 = vrot.slane %v1448_v49, 7  ;;  %v1462_v14 = vmul.f32 %v1338_v20, %v9448_v5 }
 0x20f   : > { %v1589_v41 = vrot.slane %v1449_v4, 6  ;;  %v1591_v44 = vrot.slane %v1450_v30, 5  ;;  %v1593_v13 = vrot.slane %v1451_v2, 4  ;;  %v1685_v3 = vadd.f32 %v1684_v33, %v1683_v52 }
 0x210   : > { %v1588_v25 = vsel %vm1120_vm1, %v1587_v63, %v1447_v10  ;;  %v1595_v22 = vrot.slane %v1452_v54, 3  ;;  %v1597_v0 = vrot.slane %v1453_v6, 2  ;;  %v1599_v56 = vrot.slane %v1454_v51, 1 }
 0x211   : > { %v1590_v9 = vsel %vm1122_vm2, %v1589_v41, %v1588_v25  ;;  %v1601_v27 = vrot.slane %v1456_v60, 7  ;;  %v1603_v32 = vrot.slane %v1457_v37, 6  ;;  %v1686_v58 = vrot.slane %v1685_v3, 1 }
 0x212   : > { %v1592_v23 = vsel %vm1124_vm3, %v1591_v44, %v1590_v9  ;;  %v1605_v62 = vrot.slane %v1458_v47, 5  ;;  %v1607_v49 = vrot.slane %v1459_v24, 4  ;;  %v1609_v30 = vrot.slane %v1460_v53, 3 }
 0x213   : > { %v1594_v20 = vsel %vm1126_vm4, %v1593_v13, %v1592_v23  ;;  %v1602_v4 = vsel %vm1120_vm1, %v1601_v27, %v1455_v42  ;;  %v1611_v33 = vrot.slane %v1461_v28, 2  ;;  %v7566_v2 = vadd.f32 %v1686_v58, %v1685_v3 }
 0x214   : > { %v1596_v10 = vsel %vm1128_vm5, %v1595_v22, %v1594_v20  ;;  %v1604_v54 = vsel %vm1122_vm2, %v1603_v32, %v1602_v4  ;;  %v1613_v52 = vrot.slane %v1462_v14, 1  ;;  %v1339_v44 = vrot.slane %v7463_v43, 1  ;;  %v9450_v4 = vld [vmem:[#allocation32_spill] sm:$0xff] }
 0x215   : > { %9449 = vst [vmem:[#allocation2_spill] sm:$0xff] %v7566_v2  ;;  %v1598_v6 = vsel %vm1130_vm6, %v1597_v0, %v1596_v10  ;;  %v1606_v51 = vsel %vm1124_vm3, %v1605_v62, %v1604_v54  ;;  %v1340_v60 = vrot.slane %v7463_v43, 2  ;;  %v1720_v13 = vsel %vm1719_vm12, %v7566_v2, -inf }
 0x216   : > { %v1600_v53 = vsel %vm1132_vm7, %v1599_v56, %v1598_v6  ;;  %v1608_v42 = vsel %vm1126_vm4, %v1607_v49, %v1606_v51  ;;  %v1341_v22 = vrot.slane %v7463_v43, 3  ;;  %1721 = vmax.xlane.f32.xlu1 %v1720_v13  ;;  %v1342_v58 = vrot.slane %v7463_v43, 4 }
 0x217   : > { %v1610_v32 = vsel %vm1128_vm5, %v1609_v30, %v1608_v42  ;;  %v1688_v14 = vsel %vm410_vm0, %v1600_v53, 0.0  ;;  %v1343_v37 = vrot.slane %v7463_v43, 5  ;;  %v1344_v24 = vrot.slane %v7463_v43, 6 }
 0x218   : > { %v1612_v47 = vsel %vm1130_vm6, %v1611_v33, %v1610_v32  ;;  %v1345_v28 = vrot.slane %v7463_v43, 7  ;;  %v1346_v56 = vrot.slane %v7466_v39, 1  ;;  %v1347_v41 = vrot.slane %v7466_v39, 2  ;;  %v9451_v33 = vld [vmem:[#allocation33_spill] sm:$0xff]  ;;  %v9453_v32 = vld [vmem:[#allocation38_spill] sm:$0xff] }
 0x219   : > { %v1614_v63 = vsel %vm1132_vm7, %v1613_v52, %v1612_v47  ;;  %v1348_v3 = vrot.slane %v7466_v39, 3  ;;  %v1349_v25 = vrot.slane %v7466_v39, 4  ;;  %v1350_v9 = vrot.slane %v7466_v39, 5  ;;  %v9452_v52 = vld [vmem:[#allocation34_spill] sm:$0xff] }
 0x21a   : > { %v1689_v0 = vsel %vm410_vm0, %v1614_v63, 0.0  ;;  %v1351_v27 = vrot.slane %v7466_v39, 6  ;;  %v1352_v23 = vrot.slane %v7466_v39, 7  ;;  %v1463_v20 = vmul.f32 %v7463_v43, %v9338_v11 }
 0x21b   : > { %v1690_v49 = vadd.f32 %v1689_v0, %v1688_v14  ;;  %v1464_v30 = vmul.f32 %v1339_v44, %v9450_v4  ;;  %v1465_v10 = vmul.f32 %v1340_v60, %v9451_v33  ;;  %v1466_v6 = vmul.f32 %v1341_v22, %v9452_v52  ;;  %v9454_v0 = vld [vmem:[#allocation45_spill] sm:$0xff] }
 0x21c   : > { %v1467_v51 = vmul.f32 %v1342_v58, %v9342_v48  ;;  %v1468_v13 = vmul.f32 %v1343_v37, %v5944_v7  ;;  %v1469_v42 = vmul.f32 %v1344_v24, %v9343_v46  ;;  %v1470_v14 = vmul.f32 %v1345_v28, %v9453_v32  ;;  %v9455_v28 = vld [vmem:[#allocation31_spill] sm:$0xff] }
 0x21d   : > { %v1691_v53 = vrot.slane %v1690_v49, 4  ;;  %v1471_v43 = vmul.f32 %v7466_v39, %v5972_v15  ;;  %v1472_v60 = vmul.f32 %v1346_v56, %v5980_v1  ;;  %v1473_v47 = vmul.f32 %v1347_v41, %v5985_v38 }
 0x21e   : > { %v1474_v22 = vmul.f32 %v1348_v3, %v5996_v45  ;;  %v1475_v58 = vmul.f32 %v1349_v25, %v6009_v21  ;;  %v1476_v37 = vmul.f32 %v1350_v9, %v9347_v36  ;;  %v1477_v24 = vmul.f32 %v1351_v27, %v9454_v0  ;;  %v9468_v21 = vld [vmem:[#allocation53_spill] sm:$0xff] }
 0x21f   : > { %v7595_v62 = vpop.xlane.xlu0 %3548  ;;  %v1692_v63 = vadd.f32 %v1691_v53, %v1690_v49  ;;  %v1478_v32 = vmul.f32 %v1352_v23, %v9455_v28  ;;  %v1615_v7 = vrot.slane %v1464_v30, 7  ;;  %v1617_v39 = vrot.slane %v1465_v10, 6 }
 0x220   : > { %v3561_v54 = vmul.f32 %v7595_v62, %v7595_v62  ;;  %v1623_v56 = vrot.slane %v1468_v13, 3  ;;  %v1625_v3 = vrot.slane %v1469_v42, 2  ;;  %v1629_v49 = vrot.slane %v1472_v60, 7 }
 0x221   : > { %v1693_v48 = vrot.slane %v1692_v63, 2  ;;  %v1616_v41 = vsel %vm1120_vm1, %v1615_v7, %v1463_v20  ;;  %v1627_v9 = vrot.slane %v1470_v14, 1  ;;  %v1631_v36 = vrot.slane %v1473_v47, 6 }
 0x222   : > { %v3578_v44 = vadd.f32 %v3561_v54, %v7511_v40  ;;  %v1619_v40 = vrot.slane %v1466_v6, 5  ;;  %v1621_v54 = vrot.slane %v1467_v51, 4  ;;  %v1618_v25 = vsel %vm1122_vm2, %v1617_v39, %v1616_v41  ;;  %v9458_v39 = vld [vmem:[#allocation126_spill] sm:$0xff] }
 0x223   : > { %v1694_v53 = vadd.f32 %v1693_v48, %v1692_v63  ;;  %v1630_v23 = vsel %vm1120_vm1, %v1629_v49, %v1471_v43  ;;  %v1633_v30 = vrot.slane %v1474_v22, 5  ;;  %v1635_v51 = vrot.slane %v1475_v58, 4  ;;  %v9457_v63 = vld [vmem:[#allocation125_spill] sm:$0xff] }
 0x224   : > { %v3579_v46 = vrot.slane %v3578_v44, 4  ;;  %v1620_v0 = vsel %vm1124_vm3, %v1619_v40, %v1618_v25  ;;  %v1637_v13 = vrot.slane %v1476_v37, 3  ;;  %v1639_v43 = vrot.slane %v1477_v24, 2 }
 0x225   : > { %v1695_v10 = vrot.slane %v1694_v53, 1  ;;  %v1622_v6 = vsel %vm1126_vm4, %v1621_v54, %v1620_v0  ;;  %v7642_v24 = vmul.f32 %v7474_v34, %v9458_v39  ;;  %v7646_v40 = vmul.f32 %v7537_v57, %v7439_v8 }
 0x226   : > { %v3580_v52 = vadd.f32 %v3579_v46, %v3578_v44  ;;  %v1632_v46 = vsel %vm1122_vm2, %v1631_v36, %v1630_v23  ;;  %v1624_v20 = vsel %vm1128_vm5, %v1623_v56, %v1622_v6  ;;  %v1641_v36 = vrot.slane %v1478_v32, 1 }
 0x227   : > { %v1634_v48 = vsel %vm1124_vm3, %v1633_v30, %v1632_v46  ;;  %v7626_v42 = vadd.f32 %v1695_v10, %v1694_v53  ;;  %v1626_v14 = vsel %vm1130_vm6, %v1625_v3, %v1624_v20  ;;  %v7651_v56 = vmul.f32 %v7537_v57, %v7444_v31  ;;  %v9459_v3 = vld [vmem:[#allocation128_spill] sm:$0xff]  ;;  %v9460_v57 = vld [vmem:[#allocation129_spill] sm:$0xff] }
 0x228   : > { %v3581_v27 = vrot.slane %v3580_v52, 2  ;;  %v1636_v44 = vsel %vm1126_vm4, %v1635_v51, %v1634_v48  ;;  %v1628_v47 = vsel %vm1132_vm7, %v1627_v9, %v1626_v14  ;;  %v1353_v49 = vrot.slane %v9459_v3, 1 }
 0x229   : > { %9456 = vst [vmem:[#allocation4_spill] sm:$0xff] %v7626_v42  ;;  %v1638_v22 = vsel %vm1128_vm5, %v1637_v13, %v1636_v44  ;;  %v1723_v58 = vsel %vm1719_vm12, %v7626_v42, -inf  ;;  %v1697_v0 = vsel %vm410_vm0, %v1628_v47, 0.0  ;;  %v1354_v53 = vrot.slane %v9459_v3, 2  ;;  %v9461_v44 = vld [vmem:[#allocation46_spill] sm:$0xff] }
 0x22a   : > { %v3582_v7 = vadd.f32 %v3581_v27, %v3580_v52  ;;  %v7634_v52 = vmul.f32 %v7474_v34, %v9457_v63  ;;  %v1640_v37 = vsel %vm1130_vm6, %v1639_v43, %v1638_v22  ;;  %1724 = vmax.xlane.f32.xlu0 %v1723_v58  ;;  %v1355_v8 = vrot.slane %v9459_v3, 3  ;;  %v9464_v58 = vld [vmem:[#allocation49_spill] sm:$0xff] }
 0x22b   : > { %v1642_v54 = vsel %vm1132_vm7, %v1641_v36, %v1640_v37  ;;  %v1356_v9 = vrot.slane %v9459_v3, 4  ;;  %v1357_v27 = vrot.slane %v9459_v3, 5  ;;  %v1358_v23 = vrot.slane %v9459_v3, 6  ;;  %v9463_v36 = vld [vmem:[#allocation47_spill] sm:$0xff] }
 0x22c   : > { %v3583_v60 = vrot.slane %v3582_v7, 1  ;;  %v1698_v41 = vsel %vm410_vm0, %v1642_v54, 0.0  ;;  %v1359_v31 = vrot.slane %v9459_v3, 7  ;;  %v1360_v30 = vrot.slane %v9460_v57, 1 }
 0x22d   : > { %v1699_v25 = vadd.f32 %v1698_v41, %v1697_v0  ;;  %v1361_v10 = vrot.slane %v9460_v57, 2  ;;  %v1362_v6 = vrot.slane %v9460_v57, 3  ;;  %v1363_v46 = vrot.slane %v9460_v57, 4  ;;  %v9465_v0 = vld [vmem:[#allocation50_spill] sm:$0xff]  ;;  %v9467_v41 = vld [vmem:[#allocation52_spill] sm:$0xff] }
 0x22e   : > { %v3584_v32 = vadd.f32 %v3583_v60, %v3582_v7  ;;  %v1364_v20 = vrot.slane %v9460_v57, 5  ;;  %v1365_v48 = vrot.slane %v9460_v57, 6  ;;  %v1366_v14 = vrot.slane %v9460_v57, 7  ;;  %v9462_v60 = vld [vmem:[#allocation48_spill] sm:$0xff] }
 0x22f   : > { %v1700_v7 = vrot.slane %v1699_v25, 4  ;;  %v1480_v43 = vmul.f32 %v1353_v49, %v9461_v44  ;;  %v1481_v47 = vmul.f32 %v1354_v53, %v9462_v60  ;;  %v1479_v63 = vmul.f32 %v9459_v3, %v9463_v36  ;;  %v9469_v53 = vld [vmem:[#allocation54_spill] sm:$0xff]  ;;  %v9470_v3 = vld [vmem:[#allocation55_spill] sm:$0xff]  ;;  %v9476_v36 = vld [vmem:[#allocation61_spill] sm:$0xff] }
 0x230   : > { %v7656_v34 = vadd.f32 1e-08, %v3584_v32  ;;  %v1482_v37 = vmul.f32 %v1355_v8, %v9464_v58  ;;  %v1483_v39 = vmul.f32 %v1356_v9, %v9465_v0  ;;  %v9466_v32 = vld [vmem:[#allocation51_spill] sm:$0xff]  ;;  %v1485_v28 = vmul.f32 %v1358_v23, %v9467_v41  ;;  %v9471_v8 = vld [vmem:[#allocation56_spill] sm:$0xff]  ;;  %v9472_v9 = vld [vmem:[#allocation57_spill] sm:$0xff] }
 0x231   : > { %v1701_v22 = vadd.f32 %v1700_v7, %v1699_v25  ;;  %v1484_v54 = vmul.f32 %v1357_v27, %v9466_v32  ;;  %v1486_v45 = vmul.f32 %v1359_v31, %v9468_v21  ;;  %v1487_v25 = vmul.f32 %v9460_v57, %v9469_v53  ;;  %v9473_v60 = vld [vmem:[#allocation58_spill] sm:$0xff]  ;;  %v9474_v23 = vld [vmem:[#allocation59_spill] sm:$0xff]  ;;  %v9475_v31 = vld [vmem:[#allocation60_spill] sm:$0xff] }
 0x232   : > { %5091 = vrsqrt.f32 %v7656_v34  ;;  %v3626_v51 = vadd.f32 1.0, %v7656_v34  ;;  %v3615_v13 = vand.u32 2147483648, %v7656_v34  ;;  %vm3612_vm13 = vcmp.eq.f32.partialorder %v7656_v34, inf }
 0x233   : > { %vm3614_vm14 = vcmp.eq.f32.partialorder %v7656_v34, 0.0  ;;  %v1702_v49 = vrot.slane %v1701_v22, 2  ;;  %v1488_v7 = vmul.f32 %v1360_v30, %v9470_v3  ;;  %v1489_v58 = vmul.f32 %v1361_v10, %v9471_v8  ;;  %v9487_v8 = vld [vmem:[#allocation72_spill] sm:$0xff] }
 0x234   : > { %5093 = vrcp.f32 %v3626_v51  ;;  %v1490_v0 = vmul.f32 %v1362_v6, %v9472_v9  ;;  %v1491_v51 = vmul.f32 %v1363_v46, %v9473_v60  ;;  %v1643_v44 = vrot.slane %v1480_v43, 7 }
 0x235   : > { %v1645_v27 = vrot.slane %v1481_v47, 6  ;;  %v1703_v32 = vadd.f32 %v1702_v49, %v1701_v22  ;;  %v1492_v41 = vmul.f32 %v1364_v20, %v9474_v23  ;;  %v1493_v21 = vmul.f32 %v1365_v48, %v9475_v31  ;;  %v9486_v23 = vld [vmem:[#allocation71_spill] sm:$0xff] }
 0x236   : > { %v1494_v33 = vmul.f32 %v1366_v14, %v9476_v36  ;;  %v1644_v38 = vsel %vm1120_vm1, %v1643_v44, %v1479_v63  ;;  %v1647_v57 = vrot.slane %v1482_v37, 5  ;;  %v1649_v53 = vrot.slane %v1483_v39, 4  ;;  %v9485_v36 = vld [vmem:[#allocation69_spill] sm:$0xff] }
 0x237   : > { %v1651_v30 = vrot.slane %v1484_v54, 3  ;;  %v1704_v3 = vrot.slane %v1703_v32, 1  ;;  %v1646_v10 = vsel %vm1122_vm2, %v1645_v27, %v1644_v38  ;;  %v1657_v6 = vrot.slane %v1488_v7, 7 }
 0x238   : > { %v1659_v9 = vrot.slane %v1489_v58, 6  ;;  %v1648_v43 = vsel %vm1124_vm3, %v1647_v57, %v1646_v10  ;;  %v1653_v47 = vrot.slane %v1485_v28, 2  ;;  %v1655_v22 = vrot.slane %v1486_v45, 1 }
 0x239   : > { %v1661_v20 = vrot.slane %v1490_v0, 5  ;;  %v7697_v49 = vadd.f32 %v1704_v3, %v1703_v32  ;;  %v1650_v14 = vsel %vm1126_vm4, %v1649_v53, %v1648_v43  ;;  %v1658_v44 = vsel %vm1120_vm1, %v1657_v6, %v1487_v25  ;;  %v7701_v63 = vpop.xlane.xlu1 %3551 }
 0x23a   : > { %v1652_v38 = vsel %vm1128_vm5, %v1651_v30, %v1650_v14  ;;  %v1660_v58 = vsel %vm1122_vm2, %v1659_v9, %v1658_v44  ;;  %v1663_v37 = vrot.slane %v1491_v51, 4  ;;  %v1665_v39 = vrot.slane %v1492_v41, 3 }
 0x23b   : > { %9477 = vst [vmem:[#allocation5_spill] sm:$0xff] %v7697_v49  ;;  %v1726_v28 = vsel %vm1719_vm12, %v7697_v49, -inf  ;;  %v1654_v0 = vsel %vm1130_vm6, %v1653_v47, %v1652_v38  ;;  %v1662_v32 = vsel %vm1124_vm3, %v1661_v20, %v1660_v58  ;;  %v1667_v3 = vrot.slane %v1493_v21, 2 }
 0x23c   : > { %v5092_v46 = vpop.eup %5091  ;;  %1727 = vmax.xlane.f32.xlu1 %v1726_v28  ;;  %v1656_v25 = vsel %vm1132_vm7, %v1655_v22, %v1654_v0  ;;  %v1664_v41 = vsel %vm1126_vm4, %v1663_v37, %v1662_v32  ;;  %v7720_v9 = vmul.f32 %v7701_v63, %v7701_v63  ;;  %v1669_v27 = vrot.slane %v1494_v33, 1  ;;  %v9479_v0 = vld [vmem:[#allocation63_spill] sm:$0xff] }
 0x23d   : > { %v3611_v48 = vmul.f32 %v5092_v46, %v7656_v34  ;;  %v1666_v51 = vsel %vm1128_vm5, %v1665_v39, %v1664_v41  ;;  %v3653_v30 = vrot.slane %v7634_v52, 2  ;;  %v3654_v21 = vrot.slane %v7634_v52, 3 }
 0x23e   : > { %v5094_v54 = vpop.eup %5093  ;;  %v1668_v57 = vsel %vm1130_vm6, %v1667_v3, %v1666_v51  ;;  %v3655_v6 = vrot.slane %v7634_v52, 4  ;;  %v3656_v46 = vrot.slane %v7634_v52, 5  ;;  %v3657_v47 = vrot.slane %v7634_v52, 6  ;;  %v9482_v3 = vld [vmem:[#allocation66_spill] sm:$0xff] }
 0x23f   : > { %v3613_v45 = vsel %vm3612_vm13, %v7656_v34, %v3611_v48  ;;  %v1706_v34 = vsel %vm410_vm0, %v1656_v25, 0.0  ;;  %v1670_v10 = vsel %vm1132_vm7, %v1669_v27, %v1668_v57  ;;  %v3658_v22 = vrot.slane %v7634_v52, 7  ;;  %v9481_v25 = vld [vmem:[#allocation65_spill] sm:$0xff]  ;;  %v9483_v27 = vld [vmem:[#allocation67_spill] sm:$0xff] }
 0x240   : > { %v3616_v53 = vsel %vm3614_vm14, %v3615_v13, %v3613_v45  ;;  %v3652_v13 = vrot.slane %v7634_v52, 1  ;;  %v1707_v33 = vsel %vm410_vm0, %v1670_v10, 0.0  ;;  %v3659_v48 = vrot.slane %v7642_v24, 1  ;;  %v9478_v45 = vld [vmem:[#allocation62_spill] sm:$0xff] }
 0x241   : > { %v7716_v7 = vmul.f32 %v5094_v54, %v3616_v53  ;;  %v1708_v20 = vadd.f32 %v1707_v33, %v1706_v34  ;;  %v3660_v14 = vrot.slane %v7642_v24, 2  ;;  %v3661_v44 = vrot.slane %v7642_v24, 3  ;;  %v9480_v54 = vld [vmem:[#allocation64_spill] sm:$0xff] }
 0x242   : > { %v3662_v38 = vrot.slane %v7642_v24, 4  ;;  %v3663_v58 = vrot.slane %v7642_v24, 5  ;;  %v3665_v37 = vrot.slane %v7642_v24, 7  ;;  %v3772_v28 = vmul.f32 %v7634_v52, %v9478_v45  ;;  %v9484_v34 = vld [vmem:[#allocation68_spill] sm:$0xff]  ;;  %v9488_v52 = vld [vmem:[#allocation70_spill] sm:$0xff] }
 0x243   : > { %v7733_v43 = vmul.f32 %v7716_v7, %v7503_v61  ;;  %v3664_v61 = vrot.slane %v7642_v24, 6  ;;  %v1709_v39 = vrot.slane %v1708_v20, 4  ;;  %v3773_v32 = vmul.f32 %v3652_v13, %v9479_v0  ;;  %v9489_v0 = vld [vmem:[#allocation73_spill] sm:$0xff] }
 0x244   : > { %v3774_v53 = vmul.f32 %v3653_v30, %v9480_v54  ;;  %v3775_v41 = vmul.f32 %v3654_v21, %v9481_v25  ;;  %v3776_v51 = vmul.f32 %v3655_v6, %v9482_v3  ;;  %v3777_v57 = vmul.f32 %v3656_v46, %v9483_v27  ;;  %v9490_v54 = vld [vmem:[#allocation74_spill] sm:$0xff]  ;;  %v9491_v25 = vld [vmem:[#allocation75_spill] sm:$0xff]  ;;  %v9492_v46 = vld [vmem:[#allocation76_spill] sm:$0xff] }
 0x245   : > { %v3778_v10 = vmul.f32 %v3657_v47, %v9484_v34  ;;  %v1710_v33 = vadd.f32 %v1709_v39, %v1708_v20  ;;  %v3779_v31 = vmul.f32 %v3658_v22, %v9485_v36  ;;  %v3781_v60 = vmul.f32 %v3659_v48, %v9486_v23  ;;  %v9493_v39 = vld [vmem:[#allocation77_spill] sm:$0xff]  ;;  %v9503_v23 = vld [vmem:[#allocation86_spill] sm:$0xff] }
 0x246   : > { %v3782_v4 = vmul.f32 %v3660_v14, %v9487_v8  ;;  %v3780_v13 = vmul.f32 %v7642_v24, %v9488_v52  ;;  %v3783_v30 = vmul.f32 %v3661_v44, %v9489_v0  ;;  %v3784_v21 = vmul.f32 %v3662_v38, %v9490_v54 }
 0x247   : > { %v3785_v6 = vmul.f32 %v3663_v58, %v9491_v25  ;;  %v1711_v3 = vrot.slane %v1710_v33, 2  ;;  %v3786_v27 = vmul.f32 %v3664_v61, %v9492_v46  ;;  %v3900_v47 = vrot.slane %v3773_v32, 7  ;;  %v9502_v46 = vld [vmem:[#allocation85_spill] sm:$0xff] }
 0x248   : > { %v3902_v20 = vrot.slane %v3774_v53, 6  ;;  %v3787_v22 = vmul.f32 %v3665_v37, %v9493_v39  ;;  %v3904_v36 = vrot.slane %v3775_v41, 5  ;;  %v3906_v48 = vrot.slane %v3776_v51, 4 }
 0x249   : > { %v3908_v34 = vrot.slane %v3777_v57, 3  ;;  %v1712_v14 = vadd.f32 %v1711_v3, %v1710_v33  ;;  %v3901_v8 = vsel %vm1120_vm1, %v3900_v47, %v3772_v28  ;;  %v3914_v24 = vrot.slane %v3781_v60, 7 }
 0x24a   : > { %v3916_v45 = vrot.slane %v3782_v4, 6  ;;  %v3903_v44 = vsel %vm1122_vm2, %v3902_v20, %v3901_v8  ;;  %v3910_v38 = vrot.slane %v3778_v10, 2  ;;  %v3912_v54 = vrot.slane %v3779_v31, 1 }
 0x24b   : > { %v3918_v58 = vrot.slane %v3783_v30, 5  ;;  %v1713_v25 = vrot.slane %v1712_v14, 1  ;;  %v3905_v61 = vsel %vm1124_vm3, %v3904_v36, %v3903_v44  ;;  %v3915_v32 = vsel %vm1120_vm1, %v3914_v24, %v3780_v13 }
 0x24c   : > { %v3920_v53 = vrot.slane %v3784_v21, 4  ;;  %v3907_v37 = vsel %vm1126_vm4, %v3906_v48, %v3905_v61  ;;  %v3917_v41 = vsel %vm1122_vm2, %v3916_v45, %v3915_v32  ;;  %v3922_v3 = vrot.slane %v3785_v6, 3 }
 0x24d   : > { %v3924_v51 = vrot.slane %v3786_v27, 2  ;;  %v7769_v28 = vadd.f32 %v1713_v25, %v1712_v14  ;;  %v3909_v4 = vsel %vm1128_vm5, %v3908_v34, %v3907_v37  ;;  %v3919_v60 = vsel %vm1124_vm3, %v3918_v58, %v3917_v41 }
 0x24e   : > { %v3926_v8 = vrot.slane %v3787_v22, 1  ;;  %v3911_v31 = vsel %vm1130_vm6, %v3910_v38, %v3909_v4  ;;  %v3921_v36 = vsel %vm1126_vm4, %v3920_v53, %v3919_v60  ;;  %v3666_v57 = vrot.slane %v7646_v40, 1  ;;  %v9496_v4 = vld [vmem:[#allocation79_spill] sm:$0xff] }
 0x24f   : > { %9494 = vst [vmem:[#allocation6_spill] sm:$0xff] %v7769_v28  ;;  %v3667_v10 = vrot.slane %v7646_v40, 2  ;;  %v1729_v45 = vsel %vm1719_vm12, %v7769_v28, -inf  ;;  %v3913_v25 = vsel %vm1132_vm7, %v3912_v54, %v3911_v31  ;;  %v3923_v27 = vsel %vm1128_vm5, %v3922_v3, %v3921_v36  ;;  %v9495_v3 = vld [vmem:[#allocation78_spill] sm:$0xff]  ;;  %v9498_v36 = vld [vmem:[#allocation81_spill] sm:$0xff] }
 0x250   : > { %v3668_v34 = vrot.slane %v7646_v40, 3  ;;  %1730 = vmax.xlane.f32.xlu0 %v1729_v45  ;;  %v3925_v30 = vsel %vm1130_vm6, %v3924_v51, %v3923_v27  ;;  %v4020_v21 = vsel %vm410_vm0, %v3913_v25, 0.0  ;;  %v3669_v6 = vrot.slane %v7646_v40, 4  ;;  %v9499_v27 = vld [vmem:[#allocation82_spill] sm:$0xff] }
 0x251   : > { %v3927_v47 = vsel %vm1132_vm7, %v3926_v8, %v3925_v30  ;;  %v3670_v20 = vrot.slane %v7646_v40, 5  ;;  %v3671_v54 = vrot.slane %v7646_v40, 6  ;;  %v3672_v22 = vrot.slane %v7646_v40, 7  ;;  %v9497_v8 = vld [vmem:[#allocation80_spill] sm:$0xff]  ;;  %v9500_v30 = vld [vmem:[#allocation83_spill] sm:$0xff] }
 0x252   : > { %v4021_v14 = vsel %vm410_vm0, %v3927_v47, 0.0  ;;  %v3673_v24 = vrot.slane %v7651_v56, 1  ;;  %v3674_v44 = vrot.slane %v7651_v56, 2  ;;  %v3675_v58 = vrot.slane %v7651_v56, 3  ;;  %v9501_v47 = vld [vmem:[#allocation84_spill] sm:$0xff] }
 0x253   : > { %v7777_v33 = vpop.xlane.xlu0 %3554  ;;  %v4022_v38 = vadd.f32 %v4021_v14, %v4020_v21  ;;  %v3676_v61 = vrot.slane %v7651_v56, 4  ;;  %v3677_v32 = vrot.slane %v7651_v56, 5  ;;  %v3678_v37 = vrot.slane %v7651_v56, 6 }
 0x254   : > { %v3563_v13 = vmul.f32 %v7777_v33, %v7777_v33  ;;  %v3679_v41 = vrot.slane %v7651_v56, 7  ;;  %v3789_v60 = vmul.f32 %v3666_v57, %v9496_v4  ;;  %v3790_v31 = vmul.f32 %v3667_v10, %v9497_v8  ;;  %v9505_v4 = vld [vmem:[#allocation88_spill] sm:$0xff]  ;;  %v9506_v8 = vld [vmem:[#allocation89_spill] sm:$0xff] }
 0x255   : > { %v4023_v51 = vrot.slane %v4022_v38, 4  ;;  %v3791_v45 = vmul.f32 %v3668_v34, %v9498_v36  ;;  %v3793_v21 = vmul.f32 %v3670_v20, %v9500_v30  ;;  %v3794_v14 = vmul.f32 %v3671_v54, %v9501_v47 }
 0x256   : > { %v3585_v48 = vadd.f32 %v3563_v13, %v7720_v9  ;;  %v3788_v9 = vmul.f32 %v7646_v40, %v9495_v3  ;;  %v3792_v13 = vmul.f32 %v3669_v6, %v9499_v27  ;;  %v3795_v0 = vmul.f32 %v3672_v22, %v9502_v46  ;;  %v9504_v3 = vld [vmem:[#allocation87_spill] sm:$0xff]  ;;  %v9510_v46 = vld [vmem:[#allocation93_spill] sm:$0xff] }
 0x257   : > { %v4024_v39 = vadd.f32 %v4023_v51, %v4022_v38  ;;  %v3796_v40 = vmul.f32 %v7651_v56, %v9503_v23  ;;  %v3797_v52 = vmul.f32 %v3673_v24, %v9504_v3  ;;  %v3798_v10 = vmul.f32 %v3674_v44, %v9505_v4  ;;  %v9508_v27 = vld [vmem:[#allocation91_spill] sm:$0xff]  ;;  %v9509_v51 = vld [vmem:[#allocation92_spill] sm:$0xff] }
 0x258   : > { %v3586_v53 = vrot.slane %v3585_v48, 4  ;;  %v3799_v34 = vmul.f32 %v3675_v58, %v9506_v8  ;;  %v3801_v20 = vmul.f32 %v3677_v32, %v9508_v27  ;;  %v3928_v30 = vrot.slane %v3789_v60, 7 }
 0x259   : > { %v4025_v6 = vrot.slane %v4024_v39, 2  ;;  %v3930_v54 = vrot.slane %v3790_v31, 6  ;;  %v3802_v22 = vmul.f32 %v3678_v37, %v9509_v51  ;;  %v3803_v47 = vmul.f32 %v3679_v41, %v9510_v46 }
 0x25a   : > { %v3587_v25 = vadd.f32 %v3586_v53, %v3585_v48  ;;  %v9507_v48 = vld [vmem:[#allocation90_spill] sm:$0xff]  ;;  %v3932_v56 = vrot.slane %v3791_v45, 5  ;;  %v3929_v24 = vsel %vm1120_vm1, %v3928_v30, %v3788_v9  ;;  %v3934_v3 = vrot.slane %v3792_v13, 4 }
 0x25b   : > { %v3800_v53 = vmul.f32 %v3676_v61, %v9507_v48  ;;  %v4026_v36 = vadd.f32 %v4025_v6, %v4024_v39  ;;  %v3936_v44 = vrot.slane %v3793_v21, 3  ;;  %v3931_v58 = vsel %vm1122_vm2, %v3930_v54, %v3929_v24 }
 0x25c   : > { %v3588_v57 = vrot.slane %v3587_v25, 2  ;;  %v3942_v61 = vrot.slane %v3797_v52, 7  ;;  %v3944_v48 = vrot.slane %v3798_v10, 6  ;;  %v3933_v32 = vsel %vm1124_vm3, %v3932_v56, %v3931_v58 }
 0x25d   : > { %v4027_v8 = vrot.slane %v4026_v36, 1  ;;  %v3938_v60 = vrot.slane %v3794_v14, 2  ;;  %v3940_v31 = vrot.slane %v3795_v0, 1  ;;  %v3935_v37 = vsel %vm1126_vm4, %v3934_v3, %v3933_v32 }
 0x25e   : > { %v3589_v38 = vadd.f32 %v3588_v57, %v3587_v25  ;;  %v3943_v41 = vsel %vm1120_vm1, %v3942_v61, %v3796_v40  ;;  %v3946_v39 = vrot.slane %v3799_v34, 5  ;;  %v3937_v9 = vsel %vm1128_vm5, %v3936_v44, %v3935_v37  ;;  %v9512_v37 = vld [vmem:[#allocation95_spill] sm:$0xff] }
 0x25f   : > { %v7825_v45 = vadd.f32 %v4027_v8, %v4026_v36  ;;  %v3945_v13 = vsel %vm1122_vm2, %v3944_v48, %v3943_v41  ;;  %v3948_v30 = vrot.slane %v3800_v53, 4  ;;  %v3939_v21 = vsel %vm1130_vm6, %v3938_v60, %v3937_v9 }
 0x260   : > { %v3590_v4 = vrot.slane %v3589_v38, 1  ;;  %v3947_v14 = vsel %vm1124_vm3, %v3946_v39, %v3945_v13  ;;  %v3941_v3 = vsel %vm1132_vm7, %v3940_v31, %v3939_v21  ;;  %v3950_v8 = vrot.slane %v3801_v20, 3  ;;  %v9513_v13 = vld [vmem:[#allocation94_spill] sm:$0xff]  ;;  %v9514_v21 = vld [vmem:[#allocation96_spill] sm:$0xff] }
 0x261   : > { %9511 = vst [vmem:[#allocation7_spill] sm:$0xff] %v7825_v45  ;;  %v4060_v0 = vsel %vm1719_vm12, %v7825_v45, -inf  ;;  %v7839_v36 = vmul.f32 %v7716_v7, %v7595_v62  ;;  %v3952_v40 = vrot.slane %v3802_v22, 2  ;;  %v3954_v34 = vrot.slane %v3803_v47, 1 }
 0x262   : > { %v3591_v25 = vadd.f32 %v3590_v4, %v3589_v38  ;;  %v3949_v4 = vsel %vm1126_vm4, %v3948_v30, %v3947_v14  ;;  %4061 = vmax.xlane.f32.xlu1 %v4060_v0  ;;  %v3680_v48 = vrot.slane %v7733_v43, 1  ;;  %v4029_v20 = vsel %vm410_vm0, %v3941_v3, 0.0  ;;  %v9515_v0 = vld [vmem:[#allocation97_spill] sm:$0xff] }
 0x263   : > { %v3951_v10 = vsel %vm1128_vm5, %v3950_v8, %v3949_v4  ;;  %v3681_v62 = vrot.slane %v7733_v43, 2  ;;  %v3682_v54 = vrot.slane %v7733_v43, 3  ;;  %v3683_v38 = vrot.slane %v7733_v43, 4  ;;  %v9516_v4 = vld [vmem:[#allocation98_spill] sm:$0xff] }
 0x264   : > { %v7829_v52 = vadd.f32 1e-08, %v3591_v25  ;;  %v3953_v6 = vsel %vm1130_vm6, %v3952_v40, %v3951_v10  ;;  %v3684_v22 = vrot.slane %v7733_v43, 5  ;;  %v3685_v56 = vrot.slane %v7733_v43, 6  ;;  %v9517_v40 = vld [vmem:[#allocation99_spill] sm:$0xff]  ;;  %v9518_v10 = vld [vmem:[#allocation100_spill] sm:$0xff] }
 0x265   : > { %v3955_v7 = vsel %vm1132_vm7, %v3954_v34, %v3953_v6  ;;  %v3686_v24 = vrot.slane %v7733_v43, 7  ;;  %v3687_v58 = vrot.slane %v7839_v36, 1  ;;  %v3688_v61 = vrot.slane %v7839_v36, 2 }
 0x266   : > { %5095 = vrsqrt.f32 %v7829_v52  ;;  %v3627_v57 = vadd.f32 1.0, %v7829_v52  ;;  %v3622_v53 = vand.u32 2147483648, %v7829_v52  ;;  %vm3619_vm15 = vcmp.eq.f32.partialorder %v7829_v52, inf }
 0x267   : > { %v4030_v47 = vsel %vm410_vm0, %v3955_v7, 0.0  ;;  %vm3621_vm8 = vcmp.eq.f32.partialorder %v7829_v52, 0.0  ;;  %v3689_v32 = vrot.slane %v7839_v36, 3  ;;  %v3690_v60 = vrot.slane %v7839_v36, 4 }
 0x268   : > { %5097 = vrcp.f32 %v3627_v57  ;;  %v4031_v44 = vadd.f32 %v4030_v47, %v4029_v20  ;;  %v3691_v31 = vrot.slane %v7839_v36, 5  ;;  %v3692_v25 = vrot.slane %v7839_v36, 6  ;;  %v9519_v20 = vld [vmem:[#allocation101_spill] sm:$0xff] }
 0x269   : > { %v3805_v41 = vmul.f32 %v3680_v48, %v9512_v37  ;;  %v3693_v9 = vrot.slane %v7839_v36, 7  ;;  %v3804_v30 = vmul.f32 %v7733_v43, %v9513_v13  ;;  %v3806_v14 = vmul.f32 %v3681_v62, %v9514_v21  ;;  %v9520_v48 = vld [vmem:[#allocation102_spill] sm:$0xff]  ;;  %v9521_v37 = vld [vmem:[#allocation103_spill] sm:$0xff]  ;;  %v9522_v43 = vld [vmem:[#allocation104_spill] sm:$0xff] }
 0x26a   : > { %v4032_v39 = vrot.slane %v4031_v44, 4  ;;  %v3807_v3 = vmul.f32 %v3682_v54, %v9515_v0  ;;  %v3808_v8 = vmul.f32 %v3683_v38, %v9516_v4  ;;  %v3809_v57 = vmul.f32 %v3684_v22, %v9517_v40  ;;  %v9523_v62 = vld [vmem:[#allocation105_spill] sm:$0xff]  ;;  %v9524_v54 = vld [vmem:[#allocation106_spill] sm:$0xff] }
 0x26b   : > { %v3810_v34 = vmul.f32 %v3685_v56, %v9518_v10  ;;  %v3811_v7 = vmul.f32 %v3686_v24, %v9519_v20  ;;  %v3812_v47 = vmul.f32 %v7839_v36, %v9520_v48  ;;  %v3813_v46 = vmul.f32 %v3687_v58, %v9521_v37  ;;  %v9525_v56 = vld [vmem:[#allocation107_spill] sm:$0xff]  ;;  %v9526_v24 = vld [vmem:[#allocation108_spill] sm:$0xff] }
 0x26c   : > { %v4033_v6 = vadd.f32 %v4032_v39, %v4031_v44  ;;  %v3814_v13 = vmul.f32 %v3688_v61, %v9522_v43  ;;  %v3815_v21 = vmul.f32 %v3689_v32, %v9523_v62  ;;  %v3816_v0 = vmul.f32 %v3690_v60, %v9524_v54  ;;  %v9538_v54 = vld [vmem:[#allocation117_spill] sm:$0xff] }
 0x26d   : > { %v3956_v38 = vrot.slane %v3805_v41, 7  ;;  %v3817_v44 = vmul.f32 %v3691_v31, %v9525_v56  ;;  %v3958_v39 = vrot.slane %v3806_v14, 6  ;;  %v3818_v20 = vmul.f32 %v3692_v25, %v9526_v24 }
 0x26e   : > { %v4034_v40 = vrot.slane %v4033_v6, 2  ;;  %v3960_v10 = vrot.slane %v3807_v3, 5  ;;  %v3962_v58 = vrot.slane %v3808_v8, 4  ;;  %v3964_v41 = vrot.slane %v3809_v57, 3 }
 0x26f   : > { %v3957_v36 = vsel %vm1120_vm1, %v3956_v38, %v3804_v30  ;;  %v3970_v14 = vrot.slane %v3813_v46, 7  ;;  %v3972_v25 = vrot.slane %v3814_v13, 6  ;;  %v3966_v8 = vrot.slane %v3810_v34, 2  ;;  %v9527_v38 = vld [vmem:[#allocation109_spill] sm:$0xff] }
 0x270   : > { %v5096_v51 = vpop.eup %5095  ;;  %v4035_v32 = vadd.f32 %v4034_v40, %v4033_v6  ;;  %v3959_v60 = vsel %vm1122_vm2, %v3958_v39, %v3957_v36  ;;  %v3819_v56 = vmul.f32 %v3693_v9, %v9527_v38  ;;  %v3968_v6 = vrot.slane %v3811_v7, 1 }
 0x271   : > { %v3618_v22 = vmul.f32 %v5096_v51, %v7829_v52  ;;  %v3961_v31 = vsel %vm1124_vm3, %v3960_v10, %v3959_v60  ;;  %v3971_v57 = vsel %vm1120_vm1, %v3970_v14, %v3812_v47  ;;  %v3974_v46 = vrot.slane %v3815_v21, 5 }
 0x272   : > { %v5098_v4 = vpop.eup %5097  ;;  %v4036_v30 = vrot.slane %v4035_v32, 1  ;;  %v3963_v3 = vsel %vm1126_vm4, %v3962_v58, %v3961_v31  ;;  %v3976_v10 = vrot.slane %v3816_v0, 4  ;;  %v3978_v47 = vrot.slane %v3817_v44, 3 }
 0x273   : > { %v3620_v61 = vsel %vm3619_vm15, %v7829_v52, %v3618_v22  ;;  %v3965_v40 = vsel %vm1128_vm5, %v3964_v41, %v3963_v3  ;;  %v3980_v39 = vrot.slane %v3818_v20, 2  ;;  %v3982_v36 = vrot.slane %v3819_v56, 1 }
 0x274   : > { %v3623_v51 = vsel %vm3621_vm8, %v3622_v53, %v3620_v61  ;;  %v7896_v52 = vadd.f32 %v4036_v30, %v4035_v32  ;;  %v3967_v53 = vsel %vm1130_vm6, %v3966_v8, %v3965_v40  ;;  %v9529_v40 = vld [vmem:[#allocation111_spill] sm:$0xff] }
 0x275   : > { %v3635_v24 = vmul.f32 %v5098_v4, %v3623_v51  ;;  %v3969_v13 = vsel %vm1132_vm7, %v3968_v6, %v3967_v53  ;;  %v3973_v4 = vsel %vm1122_vm2, %v3972_v25, %v3971_v57  ;;  %v9530_v57 = vld [vmem:[#allocation112_spill] sm:$0xff] }
 0x276   : > { %9528 = vst [vmem:[#allocation8_spill] sm:$0xff] %v7896_v52  ;;  %v4063_v9 = vsel %vm1719_vm12, %v7896_v52, -inf  ;;  %v3975_v7 = vsel %vm1124_vm3, %v3974_v46, %v3973_v4  ;;  %v4038_v21 = vsel %vm410_vm0, %v3969_v13, 0.0  ;;  %v9531_v13 = vld [vmem:[#allocation110_spill] sm:$0xff] }
 0x277   : > { %v3642_v22 = vmul.f32 %v3635_v24, %v7701_v63  ;;  %v3643_v34 = vmul.f32 %v3635_v24, %v7777_v33  ;;  %4064 = vmax.xlane.f32.xlu0 %v4063_v9  ;;  %v3977_v63 = vsel %vm1126_vm4, %v3976_v10, %v3975_v7  ;;  %v9532_v10 = vld [vmem:[#allocation113_spill] sm:$0xff]  ;;  %v9533_v7 = vld [vmem:[#allocation114_spill] sm:$0xff] }
 0x278   : > { %v3979_v58 = vsel %vm1128_vm5, %v3978_v47, %v3977_v63 }
 0x279   : > { %v3694_v61 = vrot.slane %v3642_v22, 1  ;;  %v3695_v32 = vrot.slane %v3642_v22, 2  ;;  %v3696_v0 = vrot.slane %v3642_v22, 3  ;;  %v3981_v33 = vsel %vm1130_vm6, %v3980_v39, %v3979_v58  ;;  %v9534_v39 = vld [vmem:[#allocation115_spill] sm:$0xff] }
 0x27a   : > { %v3697_v24 = vrot.slane %v3642_v22, 4  ;;  %v3698_v60 = vrot.slane %v3642_v22, 5  ;;  %v3699_v41 = vrot.slane %v3642_v22, 6  ;;  %v3983_v51 = vsel %vm1132_vm7, %v3982_v36, %v3981_v33  ;;  %v9535_v58 = vld [vmem:[#allocation119_spill] sm:$0xff] }
 0x27b   : > { %v3700_v44 = vrot.slane %v3642_v22, 7  ;;  %v3701_v31 = vrot.slane %v3643_v34, 1  ;;  %v3702_v14 = vrot.slane %v3643_v34, 2  ;;  %v4039_v20 = vsel %vm410_vm0, %v3983_v51, 0.0  ;;  %v9536_v51 = vld [vmem:[#allocation120_spill] sm:$0xff] }
 0x27c   : > { %v3703_v56 = vrot.slane %v3643_v34, 3  ;;  %v3704_v25 = vrot.slane %v3643_v34, 4  ;;  %v3705_v30 = vrot.slane %v3643_v34, 5  ;;  %v4040_v3 = vadd.f32 %v4039_v20, %v4038_v21  ;;  %v9537_v21 = vld [vmem:[#allocation116_spill] sm:$0xff] }
 0x27d   : > { %v3706_v8 = vrot.slane %v3643_v34, 6  ;;  %v3821_v6 = vmul.f32 %v3694_v61, %v9529_v40  ;;  %v3822_v53 = vmul.f32 %v3695_v32, %v9530_v57  ;;  %v3707_v46 = vrot.slane %v3643_v34, 7  ;;  %v9539_v40 = vld [vmem:[#allocation118_spill] sm:$0xff]  ;;  %v9540_v57 = vld [vmem:[#allocation121_spill] sm:$0xff] }
 0x27e   : > { %v3820_v4 = vmul.f32 %v3642_v22, %v9531_v13  ;;  %v3823_v9 = vmul.f32 %v3696_v0, %v9532_v10  ;;  %v3824_v47 = vmul.f32 %v3697_v24, %v9533_v7  ;;  %v4041_v63 = vrot.slane %v4040_v3, 4  ;;  %v9541_v13 = vld [vmem:[#allocation122_spill] sm:$0xff]  ;;  %v9542_v7 = vld [vmem:[#allocation123_spill] sm:$0xff] }
 0x27f   : > { %v3825_v36 = vmul.f32 %v3698_v60, %v9534_v39  ;;  %v3829_v33 = vmul.f32 %v3701_v31, %v9535_v58  ;;  %v3830_v38 = vmul.f32 %v3702_v14, %v9536_v51  ;;  %v3826_v20 = vmul.f32 %v3699_v41, %v9537_v21  ;;  %v9543_v60 = vld [vmem:[#allocation124_spill] sm:$0xff]  ;;  %v9544_v31 = vld [vmem:[#allocation127_spill] sm:$0xff] }
 0x280   : > { %v3827_v61 = vmul.f32 %v3700_v44, %v9538_v54  ;;  %v3828_v32 = vmul.f32 %v3643_v34, %v9539_v40  ;;  %v3831_v62 = vmul.f32 %v3703_v56, %v9540_v57  ;;  %v4042_v22 = vadd.f32 %v4041_v63, %v4040_v3 }
 0x281   : > { %v3832_v0 = vmul.f32 %v3704_v25, %v9541_v13  ;;  %v3984_v10 = vrot.slane %v3821_v6, 7  ;;  %v3986_v24 = vrot.slane %v3822_v53, 6  ;;  %v3833_v43 = vmul.f32 %v3705_v30, %v9542_v7 }
 0x282   : > { %v3834_v39 = vmul.f32 %v3706_v8, %v9543_v60  ;;  %v3835_v58 = vmul.f32 %v3707_v46, %v9544_v31  ;;  %v3988_v14 = vrot.slane %v3823_v9, 5  ;;  %v4043_v51 = vrot.slane %v4042_v22, 2 }
 0x283   : > { %v3985_v41 = vsel %vm1120_vm1, %v3984_v10, %v3820_v4  ;;  %v3998_v44 = vrot.slane %v3829_v33, 7  ;;  %v4000_v54 = vrot.slane %v3830_v38, 6  ;;  %v3990_v56 = vrot.slane %v3824_v47, 4 }
 0x284   : > { %v3987_v34 = vsel %vm1122_vm2, %v3986_v24, %v3985_v41  ;;  %v3992_v3 = vrot.slane %v3825_v36, 3  ;;  %v3994_v63 = vrot.slane %v3826_v20, 2  ;;  %v4044_v25 = vadd.f32 %v4043_v51, %v4042_v22 }
 0x285   : > { %v3989_v6 = vsel %vm1124_vm3, %v3988_v14, %v3987_v34  ;;  %v3999_v30 = vsel %vm1120_vm1, %v3998_v44, %v3828_v32  ;;  %v4002_v53 = vrot.slane %v3831_v62, 5  ;;  %v3996_v46 = vrot.slane %v3827_v61, 1 }
 0x286   : > { %v3991_v8 = vsel %vm1126_vm4, %v3990_v56, %v3989_v6  ;;  %v4001_v9 = vsel %vm1122_vm2, %v4000_v54, %v3999_v30  ;;  %v4004_v31 = vrot.slane %v3832_v0, 4  ;;  %v4045_v4 = vrot.slane %v4044_v25, 1 }
 0x287   : > { %v3993_v38 = vsel %vm1128_vm5, %v3992_v3, %v3991_v8  ;;  %v4003_v10 = vsel %vm1124_vm3, %v4002_v53, %v4001_v9  ;;  %v4006_v47 = vrot.slane %v3833_v43, 3  ;;  %v4008_v51 = vrot.slane %v3834_v39, 2 }
 0x288   : > { %v3995_v36 = vsel %vm1130_vm6, %v3994_v63, %v3993_v38  ;;  %v4005_v33 = vsel %vm1126_vm4, %v4004_v31, %v4003_v10  ;;  %v7937_v20 = vadd.f32 %v4045_v4, %v4044_v25  ;;  %v4010_v32 = vrot.slane %v3835_v58, 1 }
 0x289   : > { %v3997_v62 = vsel %vm1132_vm7, %v3996_v46, %v3995_v36  ;;  %v4007_v61 = vsel %vm1128_vm5, %v4006_v47, %v4005_v33 }
 0x28a   : > { %9545 = vst [vmem:[#allocation125_spill] sm:$0xff] %v7937_v20  ;;  %v4009_v54 = vsel %vm1130_vm6, %v4008_v51, %v4007_v61  ;;  %v4047_v22 = vsel %vm410_vm0, %v3997_v62, 0.0  ;;  %v4066_v0 = vsel %vm1719_vm12, %v7937_v20, -inf }
 0x28b   : > { %v4011_v43 = vsel %vm1132_vm7, %v4010_v32, %v4009_v54  ;;  %4067 = vmax.xlane.f32.xlu1 %v4066_v0 }
 0x28c   : > { %v4048_v24 = vsel %vm410_vm0, %v4011_v43, 0.0 }
 0x28d   : > { %v4049_v39 = vadd.f32 %v4048_v24, %v4047_v22 }
 0x28f   : > { %v4050_v31 = vrot.slane %v4049_v39, 4 }
 0x291   : > { %v4051_v14 = vadd.f32 %v4050_v31, %v4049_v39 }
 0x293   : > { %v4052_v41 = vrot.slane %v4051_v14, 2 }
 0x295   : > { %v4053_v44 = vadd.f32 %v4052_v41, %v4051_v14 }
 0x297   : > { %v4054_v34 = vrot.slane %v4053_v44, 1 }
 0x299   : > { %v7947_v56 = vadd.f32 %v4054_v34, %v4053_v44 }
 0x29b   : > { %9546 = vst [vmem:[#allocation126_spill] sm:$0xff] %v7947_v56  ;;  %v4069_v58 = vsel %vm1719_vm12, %v7947_v56, -inf }
 0x29c   : > { %4070 = vmax.xlane.f32.xlu0 %v4069_v58 }
 0x2a3   : > { %v1722_v3 = vpop.xlane.xlu1 %1721 }
 0x2a4   : > { %v1732_v63 = vsub.f32 %v7566_v2, %v1722_v3 }
 0x2a6   : > { %v1736_v25 = vmul.f32 1.442695, %v1732_v63 }
 0x2a8   : > { %5099 = vpow2.f32 %v1736_v25 }
 0x2b2   : > { %v7952_v6 = vpop.eup %5099 }
 0x2b3   : > { %v1744_v30 = vsel %vm1719_vm12, %v7952_v6, 0.0 }
 0x2b4   : > { %1745 = vadd.xlane.f32.xlu1 %v1744_v30 }
 0x2b7   : > { %v1725_v53 = vpop.xlane.xlu0 %1724 }
 0x2b8   : > { %v1733_v8 = vsub.f32 %v7626_v42, %v1725_v53 }
 0x2ba   : > { %v1738_v46 = vmul.f32 1.442695, %v1733_v8 }
 0x2bc   : > { %5101 = vpow2.f32 %v1738_v46 }
 0x2c6   : > { %v7957_v9 = vpop.eup %5101 }
 0x2c7   : > { %v1747_v4 = vsel %vm1719_vm12, %v7957_v9, 0.0 }
 0x2c8   : > { %1748 = vadd.xlane.f32.xlu0 %v1747_v4 }
 0x2c9   : > { %v1728_v38 = vpop.xlane.xlu1 %1727 }
 0x2ca   : > { %v1734_v10 = vsub.f32 %v7697_v49, %v1728_v38 }
 0x2cc   : > { %v1740_v47 = vmul.f32 1.442695, %v1734_v10  ;;  %v9547_v10 = vld [vmem:[#allocation10_spill] sm:$0xff] }
 0x2ce   : > { %5103 = vpow2.f32 %v1740_v47  ;;  %v9548_v47 = vld [vmem:[#allocation11_spill] sm:$0xff] }
 0x2d8   : > { %v7962_v36 = vpop.eup %5103 }
 0x2d9   : > { %v1750_v33 = vsel %vm1719_vm12, %v7962_v36, 0.0 }
 0x2da   : > { %1751 = vadd.xlane.f32.xlu1 %v1750_v33  ;;  %v1844_v33 = vsel %vm1120_vm1, %v9548_v47, %v9547_v10 }
 0x2dd   : > { %v1731_v51 = vpop.xlane.xlu0 %1730 }
 0x2de   : > { %v1735_v62 = vsub.f32 %v7769_v28, %v1731_v51  ;;  %v9549_v51 = vld [vmem:[#allocation3_spill] sm:$0xff]  ;;  %v9566_v28 = vld [vmem:[#allocation21_spill] sm:$0xff] }
 0x2e0   : > { %v1742_v61 = vmul.f32 1.442695, %v1735_v62  ;;  %v1851_v62 = vsel %vm1120_vm1, %v9549_v51, %v9436_v35 }
 0x2e2   : > { %5105 = vpow2.f32 %v1742_v61  ;;  %v9550_v61 = vld [vmem:[#allocation12_spill] sm:$0xff] }
 0x2ec   : > { %v7967_v32 = vpop.eup %5105 }
 0x2ed   : > { %v1753_v54 = vsel %vm1719_vm12, %v7967_v32, 0.0 }
 0x2ee   : > { %1754 = vadd.xlane.f32.xlu0 %v1753_v54  ;;  %v1845_v54 = vsel %vm1122_vm2, %v9550_v61, %v1844_v33 }
 0x2ef   : > { %v4062_v22 = vpop.xlane.xlu1 %4061 }
 0x2f0   : > { %v4072_v0 = vsub.f32 %v7825_v45, %v4062_v22  ;;  %v1852_v22 = vsel %vm1122_vm2, %v9437_v18, %v1851_v62 }
 0x2f2   : > { %v4076_v43 = vmul.f32 1.442695, %v4072_v0 }
 0x2f4   : > { %5107 = vpow2.f32 %v4076_v43  ;;  %v9551_v43 = vld [vmem:[#allocation13_spill] sm:$0xff] }
 0x2fe   : > { %v7972_v24 = vpop.eup %5107 }
 0x2ff   : > { %v4084_v39 = vsel %vm1719_vm12, %v7972_v24, 0.0 }
 0x300   : > { %4085 = vadd.xlane.f32.xlu1 %v4084_v39  ;;  %v1846_v39 = vsel %vm1124_vm3, %v9551_v43, %v1845_v54 }
 0x304   : > { %v4065_v31 = vpop.xlane.xlu0 %4064 }
 0x305   : > { %v4073_v14 = vsub.f32 %v7896_v52, %v4065_v31  ;;  %v1853_v31 = vsel %vm1124_vm3, %v9438_v29, %v1852_v22  ;;  %v9556_v22 = vld [vmem:[#allocation17_spill] sm:$0xff]  ;;  %v9563_v52 = vld [vmem:[#allocation26_spill] sm:$0xff] }
 0x307   : > { %v4078_v41 = vmul.f32 1.442695, %v4073_v14  ;;  %v1764_v14 = vlaneseq }
 0x309   : > { %5109 = vpow2.f32 %v4078_v41  ;;  %v9552_v41 = vld [vmem:[#allocation14_spill] sm:$0xff] }
 0x313   : > { %v7977_v44 = vpop.eup %5109 }
 0x314   : > { %v4087_v34 = vsel %vm1719_vm12, %v7977_v44, 0.0 }
 0x315   : > { %4088 = vadd.xlane.f32.xlu0 %v4087_v34  ;;  %v1847_v34 = vsel %vm1126_vm4, %v9552_v41, %v1846_v39  ;;  %v9558_v39 = vld [vmem:[#allocation9_spill] sm:$0xff] }
 0x318   : > { %v4068_v58 = vpop.xlane.xlu1 %4067 }
 0x319   : > { %v4074_v3 = vsub.f32 %v7937_v20, %v4068_v58  ;;  %v1854_v58 = vsel %vm1126_vm4, %v9439_v26, %v1853_v31 }
 0x31b   : > { %v4080_v63 = vmul.f32 1.442695, %v4074_v3  ;;  %v1765_v3 = vshrl.u32 %v1764_v14, 7 }
 0x31d   : > { %5111 = vpow2.f32 %v4080_v63  ;;  %v9553_v63 = vld [vmem:[#allocation15_spill] sm:$0xff] }
 0x327   : > { %v7982_v25 = vpop.eup %5111 }
 0x328   : > { %v4090_v53 = vsel %vm1719_vm12, %v7982_v25, 0.0 }
 0x329   : > { %v4071_v30 = vpop.xlane.xlu0 %4070  ;;  %4091 = vadd.xlane.f32.xlu1 %v4090_v53  ;;  %v1855_v53 = vsel %vm1128_vm5, %v9440_v16, %v1854_v58  ;;  %v9560_v58 = vld [vmem:[#allocation18_spill] sm:$0xff] }
 0x32a   : > { %v4075_v8 = vsub.f32 %v7947_v56, %v4071_v30  ;;  %v1848_v30 = vsel %vm1128_vm5, %v9553_v63, %v1847_v34  ;;  %v1856_v33 = vsel %vm1130_vm6, %v9441_v19, %v1855_v53  ;;  %v1865_v34 = vsel %vm1120_vm1, %v5782_v59, %v5777_v55  ;;  %v9561_v53 = vld [vmem:[#allocation25_spill] sm:$0xff] }
 0x32b   : > { %v8026_v31 = vsel %vm1132_vm7, %v9558_v39, %v1856_v33 }
 0x32c   : > { %v4082_v46 = vmul.f32 1.442695, %v4075_v8  ;;  %v8013_v8 = vsub.s32 0, %v1765_v3  ;;  %9559 = vst [vmem:[#allocation10_spill] sm:$0xff] %v8026_v31  ;;  %v1858_v3 = vsel %vm1120_vm1, %v9560_v58, %v5681_v12 }
 0x32e   : > { %5113 = vpow2.f32 %v4082_v46  ;;  %9554 = vst [vmem:[#allocation128_spill] sm:$0xff] %v8013_v8  ;;  %v9555_v46 = vld [vmem:[#allocation16_spill] sm:$0xff] }
 0x338   : > { %v7987_v4 = vpop.eup %5113 }
 0x339   : > { %v4093_v38 = vsel %vm1719_vm12, %v7987_v4, 0.0 }
 0x33a   : > { %4094 = vadd.xlane.f32.xlu0 %v4093_v38  ;;  %v1849_v38 = vsel %vm1130_vm6, %v9555_v46, %v1848_v30 }
 0x341   : > { %v1746_v0 = vpop.xlane.xlu1 %1745 }
 0x342   : > { %5115 = vrcp.f32 %v1746_v0  ;;  %v8022_v0 = vsel %vm1132_vm7, %v9556_v22, %v1849_v38  ;;  %v1866_v38 = vsel %vm1122_vm2, %v9561_v53, %v1865_v34 }
 0x343   : > { %9557 = vst [vmem:[#allocation129_spill] sm:$0xff] %v8022_v0  ;;  %v1867_v45 = vsel %vm1124_vm3, %v9563_v52, %v1866_v38 }
 0x34c   : > { %v5116_v62 = vpop.eup %5115 }
 0x34d   : > { %v1757_v54 = vmul.f32 %v5116_v62, %v7952_v6  ;;  %v9562_v62 = vld [vmem:[#allocation19_spill] sm:$0xff] }
 0x34e   : > { %v1859_v33 = vsel %vm1122_vm2, %v9562_v62, %v1858_v3 }
 0x34f   : > { %v1767_v14 = vrot.slane %v1757_v54, %v8013_v8 }
 0x351   : > { %v1908_v6 = vmul.f32 %v8022_v0, %v1767_v14  ;;  %v1909_v30 = vmul.f32 %v8026_v31, %v1767_v14  ;;  %v9564_v0 = vld [vmem:[#allocation20_spill] sm:$0xff]  ;;  %v9565_v31 = vld [vmem:[#allocation27_spill] sm:$0xff] }
 0x352   : > { %v1860_v14 = vsel %vm1124_vm3, %v9564_v0, %v1859_v33  ;;  %v1868_v34 = vsel %vm1126_vm4, %v9565_v31, %v1867_v45 }
 0x353   : > { %v1916_v54 = vsel %vm410_vm0, %v1908_v6, 0.0  ;;  %v1919_v56 = vsel %vm410_vm0, %v1909_v30, 0.0  ;;  %v1861_v3 = vsel %vm1126_vm4, %v9566_v28, %v1860_v14  ;;  %v1869_v6 = vsel %vm1128_vm5, %v9446_v50, %v1868_v34  ;;  %v9567_v30 = vld [vmem:[#allocation22_spill] sm:$0xff]  ;;  %v9570_v14 = vld [vmem:[#allocation24_spill] sm:$0xff] }
 0x354   : > { %1917 = vadd.xlane.f32.xlu1 %v1916_v54  ;;  %1920 = vadd.xlane.f32.xlu0 %v1919_v56  ;;  %v1862_v54 = vsel %vm1128_vm5, %v9567_v30, %v1861_v3  ;;  %v9568_v56 = vld [vmem:[#allocation23_spill] sm:$0xff]  ;;  %v1879_v34 = vsel %vm1120_vm1, %v5980_v1, %v5972_v15  ;;  %v9572_v3 = vld [vmem:[#allocation32_spill] sm:$0xff]  ;;  %v9575_v15 = vld [vmem:[#allocation42_spill] sm:$0xff] }
 0x355   : > { %v1749_v20 = vpop.xlane.xlu0 %1748  ;;  %v1863_v38 = vsel %vm1130_vm6, %v9568_v56, %v1862_v54 }
 0x356   : > { %5117 = vrcp.f32 %v1749_v20  ;;  %v1870_v20 = vsel %vm1130_vm6, %v9447_v17, %v1869_v6  ;;  %v8066_v42 = vsel %vm1132_vm7, %v9570_v14, %v1863_v38  ;;  %v1872_v6 = vsel %vm1120_vm1, %v9572_v3, %v9338_v11  ;;  %v9580_v3 = vld [vmem:[#allocation36_spill] sm:$0xff] }
 0x357   : > { %v8062_v45 = vsel %vm1132_vm7, %v9448_v5, %v1870_v20  ;;  %9571 = vst [vmem:[#allocation3_spill] sm:$0xff] %v8066_v42  ;;  %v9573_v20 = vld [vmem:[#allocation41_spill] sm:$0xff] }
 0x358   : > { %9569 = vst [vmem:[#allocation11_spill] sm:$0xff] %v8062_v45  ;;  %v1880_v2 = vsel %vm1122_vm2, %v9573_v20, %v1879_v34  ;;  %v9574_v5 = vld [vmem:[#allocation33_spill] sm:$0xff]  ;;  %v9578_v20 = vld [vmem:[#allocation35_spill] sm:$0xff] }
 0x359   : > { %v1873_v38 = vsel %vm1122_vm2, %v9574_v5, %v1872_v6  ;;  %v9579_v5 = vld [vmem:[#allocation44_spill] sm:$0xff] }
 0x360   : > { %v5118_v49 = vpop.eup %5117 }
 0x361   : > { %v1759_v33 = vmul.f32 %v5118_v49, %v7957_v9 }
 0x363   : > { %v1771_v54 = vrot.slane %v1759_v33, %v8013_v8  ;;  %v1881_v33 = vsel %vm1124_vm3, %v9575_v15, %v1880_v2 }
 0x365   : > { %v1911_v49 = vmul.f32 %v8062_v45, %v1771_v54  ;;  %v1910_v9 = vmul.f32 %v8066_v42, %v1771_v54  ;;  %v9576_v45 = vld [vmem:[#allocation34_spill] sm:$0xff]  ;;  %v9577_v42 = vld [vmem:[#allocation43_spill] sm:$0xff] }
 0x366   : > { %v1874_v54 = vsel %vm1124_vm3, %v9576_v45, %v1873_v38  ;;  %v1882_v34 = vsel %vm1126_vm4, %v9577_v42, %v1881_v33  ;;  %v9583_v45 = vld [vmem:[#allocation31_spill] sm:$0xff] }
 0x367   : > { %v1752_v17 = vpop.xlane.xlu1 %1751  ;;  %v1925_v50 = vsel %vm410_vm0, %v1911_v49, 0.0  ;;  %v1922_v1 = vsel %vm410_vm0, %v1910_v9, 0.0  ;;  %v1875_v6 = vsel %vm1126_vm4, %v9578_v20, %v1874_v54  ;;  %v1883_v49 = vsel %vm1128_vm5, %v9579_v5, %v1882_v34  ;;  %v9582_v9 = vld [vmem:[#allocation37_spill] sm:$0xff]  ;;  %v9585_v54 = vld [vmem:[#allocation38_spill] sm:$0xff]  ;;  %v9588_v5 = vld [vmem:[#allocation55_spill] sm:$0xff] }
 0x368   : > { %5119 = vrcp.f32 %v1752_v17  ;;  %1926 = vadd.xlane.f32.xlu0 %v1925_v50  ;;  %1923 = vadd.xlane.f32.xlu1 %v1922_v1  ;;  %v1876_v17 = vsel %vm1128_vm5, %v9580_v3, %v1875_v6  ;;  %v9581_v50 = vld [vmem:[#allocation45_spill] sm:$0xff]  ;;  %v9587_v6 = vld [vmem:[#allocation54_spill] sm:$0xff] }
 0x369   : > { %v1884_v1 = vsel %vm1130_vm6, %v9581_v50, %v1883_v49  ;;  %v1877_v2 = vsel %vm1130_vm6, %v9582_v9, %v1876_v17  ;;  %v1893_v49 = vsel %vm1120_vm1, %v9588_v5, %v9587_v6  ;;  %v9589_v50 = vld [vmem:[#allocation47_spill] sm:$0xff]  ;;  %v9590_v3 = vld [vmem:[#allocation46_spill] sm:$0xff]  ;;  %v9593_v6 = vld [vmem:[#allocation57_spill] sm:$0xff] }
 0x36a   : > { %v8102_v33 = vsel %vm1132_vm7, %v9583_v45, %v1884_v1  ;;  %v8106_v42 = vsel %vm1132_vm7, %v9585_v54, %v1877_v2  ;;  %v1886_v17 = vsel %vm1120_vm1, %v9590_v3, %v9589_v50  ;;  %v9591_v2 = vld [vmem:[#allocation56_spill] sm:$0xff] }
 0x36b   : > { %9584 = vst [vmem:[#allocation12_spill] sm:$0xff] %v8102_v33  ;;  %9586 = vst [vmem:[#allocation13_spill] sm:$0xff] %v8106_v42  ;;  %v1894_v54 = vsel %vm1122_vm2, %v9591_v2, %v1893_v49  ;;  %v9597_v49 = vld [vmem:[#allocation59_spill] sm:$0xff] }
 0x36c   : > { %v1895_v3 = vsel %vm1124_vm3, %v9593_v6, %v1894_v54 }
 0x372   : > { %v5120_v15 = vpop.eup %5119 }
 0x373   : > { %v1761_v38 = vmul.f32 %v5120_v15, %v7962_v36 }
 0x375   : > { %v1775_v34 = vrot.slane %v1761_v38, %v8013_v8  ;;  %v9592_v38 = vld [vmem:[#allocation48_spill] sm:$0xff] }
 0x376   : > { %v1887_v9 = vsel %vm1122_vm2, %v9592_v38, %v1886_v17  ;;  %v9598_v17 = vld [vmem:[#allocation51_spill] sm:$0xff]  ;;  %v9600_v38 = vld [vmem:[#allocation52_spill] sm:$0xff] }
 0x377   : > { %v1913_v15 = vmul.f32 %v8102_v33, %v1775_v34  ;;  %v1912_v36 = vmul.f32 %v8106_v42, %v1775_v34  ;;  %v9594_v33 = vld [vmem:[#allocation49_spill] sm:$0xff]  ;;  %v9595_v42 = vld [vmem:[#allocation58_spill] sm:$0xff] }
 0x378   : > { %v1888_v34 = vsel %vm1124_vm3, %v9594_v33, %v1887_v9  ;;  %v9601_v33 = vld [vmem:[#allocation61_spill] sm:$0xff] }
 0x379   : > { %v1931_v1 = vsel %vm410_vm0, %v1913_v15, 0.0  ;;  %v1928_v45 = vsel %vm410_vm0, %v1912_v36, 0.0  ;;  %v1896_v15 = vsel %vm1126_vm4, %v9595_v42, %v1895_v3  ;;  %v9596_v36 = vld [vmem:[#allocation50_spill] sm:$0xff] }
 0x37a   : > { %1932 = vadd.xlane.f32.xlu0 %v1931_v1  ;;  %1929 = vadd.xlane.f32.xlu1 %v1928_v45  ;;  %v1889_v50 = vsel %vm1126_vm4, %v9596_v36, %v1888_v34  ;;  %v1897_v2 = vsel %vm1128_vm5, %v9597_v49, %v1896_v15  ;;  %v9599_v1 = vld [vmem:[#allocation60_spill] sm:$0xff]  ;;  %v9603_v34 = vld [vmem:[#allocation53_spill] sm:$0xff]  ;;  %v9605_v15 = vld [vmem:[#allocation70_spill] sm:$0xff] }
 0x37b   : > { %v1755_v5 = vpop.xlane.xlu0 %1754  ;;  %v1890_v45 = vsel %vm1128_vm5, %v9598_v17, %v1889_v50  ;;  %v9606_v49 = vld [vmem:[#allocation71_spill] sm:$0xff]  ;;  %v9607_v17 = vld [vmem:[#allocation62_spill] sm:$0xff] }
 0x37c   : > { %5121 = vrcp.f32 %v1755_v5  ;;  %v1898_v5 = vsel %vm1130_vm6, %v9599_v1, %v1897_v2  ;;  %v1891_v54 = vsel %vm1130_vm6, %v9600_v38, %v1890_v45  ;;  %v4191_v50 = vsel %vm1120_vm1, %v9606_v49, %v9605_v15  ;;  %v9608_v2 = vld [vmem:[#allocation63_spill] sm:$0xff]  ;;  %v9610_v38 = vld [vmem:[#allocation64_spill] sm:$0xff]  ;;  %v9611_v15 = vld [vmem:[#allocation73_spill] sm:$0xff] }
 0x37d   : > { %v8142_v3 = vsel %vm1132_vm7, %v9601_v33, %v1898_v5  ;;  %v8146_v42 = vsel %vm1132_vm7, %v9603_v34, %v1891_v54  ;;  %v4184_v1 = vsel %vm1120_vm1, %v9608_v2, %v9607_v17  ;;  %v9609_v5 = vld [vmem:[#allocation72_spill] sm:$0xff]  ;;  %v9615_v17 = vld [vmem:[#allocation75_spill] sm:$0xff] }
 0x37e   : > { %9602 = vst [vmem:[#allocation14_spill] sm:$0xff] %v8142_v3  ;;  %9604 = vst [vmem:[#allocation15_spill] sm:$0xff] %v8146_v42  ;;  %v4192_v33 = vsel %vm1122_vm2, %v9609_v5, %v4191_v50  ;;  %v4185_v54 = vsel %vm1122_vm2, %v9610_v38, %v4184_v1  ;;  %v9614_v5 = vld [vmem:[#allocation66_spill] sm:$0xff]  ;;  %v9616_v38 = vld [vmem:[#allocation67_spill] sm:$0xff] }
 0x386   : > { %v5122_v6 = vpop.eup %5121 }
 0x387   : > { %v1763_v9 = vmul.f32 %v5122_v6, %v7967_v32 }
 0x389   : > { %v1779_v45 = vrot.slane %v1763_v9, %v8013_v8  ;;  %v4193_v9 = vsel %vm1124_vm3, %v9611_v15, %v4192_v33 }
 0x38b   : > { %v1915_v32 = vmul.f32 %v8142_v3, %v1779_v45  ;;  %v1914_v6 = vmul.f32 %v8146_v42, %v1779_v45  ;;  %v9612_v3 = vld [vmem:[#allocation65_spill] sm:$0xff]  ;;  %v9613_v42 = vld [vmem:[#allocation74_spill] sm:$0xff] }
 0x38c   : > { %v4186_v45 = vsel %vm1124_vm3, %v9612_v3, %v4185_v54  ;;  %v4194_v50 = vsel %vm1126_vm4, %v9613_v42, %v4193_v9  ;;  %v9619_v3 = vld [vmem:[#allocation77_spill] sm:$0xff] }
 0x38d   : > { %v4086_v34 = vpop.xlane.xlu1 %4085  ;;  %v1937_v36 = vsel %vm410_vm0, %v1915_v32, 0.0  ;;  %v1934_v49 = vsel %vm410_vm0, %v1914_v6, 0.0  ;;  %v4187_v1 = vsel %vm1126_vm4, %v9614_v5, %v4186_v45  ;;  %v4195_v32 = vsel %vm1128_vm5, %v9615_v17, %v4194_v50  ;;  %v9618_v6 = vld [vmem:[#allocation68_spill] sm:$0xff]  ;;  %v9621_v45 = vld [vmem:[#allocation69_spill] sm:$0xff]  ;;  %v9625_v17 = vld [vmem:[#allocation79_spill] sm:$0xff] }
 0x38e   : > { %5123 = vrcp.f32 %v4086_v34  ;;  %1938 = vadd.xlane.f32.xlu0 %v1937_v36  ;;  %1935 = vadd.xlane.f32.xlu1 %v1934_v49  ;;  %v4188_v34 = vsel %vm1128_vm5, %v9616_v38, %v4187_v1  ;;  %v9617_v36 = vld [vmem:[#allocation76_spill] sm:$0xff]  ;;  %v9623_v1 = vld [vmem:[#allocation87_spill] sm:$0xff] }
 0x38f   : > { %v4196_v49 = vsel %vm1130_vm6, %v9617_v36, %v4195_v32  ;;  %v4189_v33 = vsel %vm1130_vm6, %v9618_v6, %v4188_v34  ;;  %v4205_v32 = vsel %vm1120_vm1, %v9623_v1, %v9503_v23  ;;  %v9624_v36 = vld [vmem:[#allocation78_spill] sm:$0xff]  ;;  %v9628_v23 = vld [vmem:[#allocation89_spill] sm:$0xff] }
 0x390   : > { %v8182_v9 = vsel %vm1132_vm7, %v9619_v3, %v4196_v49  ;;  %v8186_v42 = vsel %vm1132_vm7, %v9621_v45, %v4189_v33  ;;  %v4198_v34 = vsel %vm1120_vm1, %v9625_v17, %v9624_v36  ;;  %v9626_v33 = vld [vmem:[#allocation88_spill] sm:$0xff] }
 0x391   : > { %9620 = vst [vmem:[#allocation16_spill] sm:$0xff] %v8182_v9  ;;  %9622 = vst [vmem:[#allocation17_spill] sm:$0xff] %v8186_v42  ;;  %v4206_v45 = vsel %vm1122_vm2, %v9626_v33, %v4205_v32  ;;  %v9634_v33 = vld [vmem:[#allocation84_spill] sm:$0xff] }
 0x392   : > { %v4207_v17 = vsel %vm1124_vm3, %v9628_v23, %v4206_v45 }
 0x398   : > { %v5124_v15 = vpop.eup %5123 }
 0x399   : > { %v4097_v54 = vmul.f32 %v5124_v15, %v7972_v24 }
 0x39b   : > { %v4107_v50 = vrot.slane %v4097_v54, %v8013_v8  ;;  %v9627_v54 = vld [vmem:[#allocation80_spill] sm:$0xff] }
 0x39c   : > { %v4199_v6 = vsel %vm1122_vm2, %v9627_v54, %v4198_v34  ;;  %v9632_v34 = vld [vmem:[#allocation83_spill] sm:$0xff] }
 0x39d   : > { %v4249_v24 = vmul.f32 %v8182_v9, %v4107_v50  ;;  %v4248_v15 = vmul.f32 %v8186_v42, %v4107_v50  ;;  %v9629_v9 = vld [vmem:[#allocation81_spill] sm:$0xff]  ;;  %v9630_v42 = vld [vmem:[#allocation90_spill] sm:$0xff] }
 0x39e   : > { %v4200_v50 = vsel %vm1124_vm3, %v9629_v9, %v4199_v6  ;;  %v9635_v9 = vld [vmem:[#allocation93_spill] sm:$0xff] }
 0x39f   : > { %v4259_v49 = vsel %vm410_vm0, %v4249_v24, 0.0  ;;  %v4256_v3 = vsel %vm410_vm0, %v4248_v15, 0.0  ;;  %v4208_v24 = vsel %vm1126_vm4, %v9630_v42, %v4207_v17  ;;  %v9631_v15 = vld [vmem:[#allocation82_spill] sm:$0xff] }
 0x3a0   : > { %4260 = vadd.xlane.f32.xlu0 %v4259_v49  ;;  %4257 = vadd.xlane.f32.xlu1 %v4256_v3  ;;  %v4201_v36 = vsel %vm1126_vm4, %v9631_v15, %v4200_v50  ;;  %v4209_v32 = vsel %vm1128_vm5, %v9508_v27, %v4208_v24  ;;  %v9633_v49 = vld [vmem:[#allocation92_spill] sm:$0xff]  ;;  %v9637_v50 = vld [vmem:[#allocation85_spill] sm:$0xff] }
 0x3a1   : > { %v4202_v3 = vsel %vm1128_vm5, %v9632_v34, %v4201_v36  ;;  %v4219_v36 = vsel %vm1120_vm1, %v9521_v37, %v9520_v48  ;;  %v9643_v37 = vld [vmem:[#allocation105_spill] sm:$0xff] }
 0x3a2   : > { %v4089_v1 = vpop.xlane.xlu0 %4088  ;;  %v4203_v45 = vsel %vm1130_vm6, %v9634_v33, %v4202_v3 }
 0x3a3   : > { %5125 = vrcp.f32 %v4089_v1  ;;  %v4210_v1 = vsel %vm1130_vm6, %v9633_v49, %v4209_v32  ;;  %v8226_v42 = vsel %vm1132_vm7, %v9637_v50, %v4203_v45  ;;  %v9639_v32 = vld [vmem:[#allocation94_spill] sm:$0xff]  ;;  %v9640_v49 = vld [vmem:[#allocation95_spill] sm:$0xff]  ;;  %v9641_v45 = vld [vmem:[#allocation104_spill] sm:$0xff] }
 0x3a4   : > { %v8222_v17 = vsel %vm1132_vm7, %v9635_v9, %v4210_v1  ;;  %9638 = vst [vmem:[#allocation18_spill] sm:$0xff] %v8226_v42  ;;  %v4212_v3 = vsel %vm1120_vm1, %v9640_v49, %v9639_v32  ;;  %v4220_v27 = vsel %vm1122_vm2, %v9641_v45, %v4219_v36  ;;  %v9647_v36 = vld [vmem:[#allocation107_spill] sm:$0xff] }
 0x3a5   : > { %9636 = vst [vmem:[#allocation9_spill] sm:$0xff] %v8222_v17  ;;  %v4221_v32 = vsel %vm1124_vm3, %v9643_v37, %v4220_v27 }
 0x3ad   : > { %v5126_v23 = vpop.eup %5125 }
 0x3ae   : > { %v4099_v6 = vmul.f32 %v5126_v23, %v7977_v44 }
 0x3b0   : > { %v4111_v24 = vrot.slane %v4099_v6, %v8013_v8  ;;  %v9642_v6 = vld [vmem:[#allocation96_spill] sm:$0xff] }
 0x3b1   : > { %v4213_v50 = vsel %vm1122_vm2, %v9642_v6, %v4212_v3  ;;  %v9648_v3 = vld [vmem:[#allocation99_spill] sm:$0xff]  ;;  %v9650_v6 = vld [vmem:[#allocation100_spill] sm:$0xff] }
 0x3b2   : > { %v4251_v23 = vmul.f32 %v8222_v17, %v4111_v24  ;;  %v4250_v44 = vmul.f32 %v8226_v42, %v4111_v24  ;;  %v9644_v17 = vld [vmem:[#allocation97_spill] sm:$0xff]  ;;  %v9645_v42 = vld [vmem:[#allocation106_spill] sm:$0xff] }
 0x3b3   : > { %v4214_v24 = vsel %vm1124_vm3, %v9644_v17, %v4213_v50  ;;  %v9651_v50 = vld [vmem:[#allocation119_spill] sm:$0xff] }
 0x3b4   : > { %v4265_v1 = vsel %vm410_vm0, %v4251_v23, 0.0  ;;  %v4262_v9 = vsel %vm410_vm0, %v4250_v44, 0.0  ;;  %v4222_v23 = vsel %vm1126_vm4, %v9645_v42, %v4221_v32  ;;  %v9646_v44 = vld [vmem:[#allocation98_spill] sm:$0xff]  ;;  %v4233_v32 = vsel %vm1120_vm1, %v9651_v50, %v9539_v40  ;;  %v9653_v17 = vld [vmem:[#allocation111_spill] sm:$0xff]  ;;  %v9659_v40 = vld [vmem:[#allocation112_spill] sm:$0xff] }
 0x3b5   : > { %4266 = vadd.xlane.f32.xlu0 %v4265_v1  ;;  %4263 = vadd.xlane.f32.xlu1 %v4262_v9  ;;  %v4215_v49 = vsel %vm1126_vm4, %v9646_v44, %v4214_v24  ;;  %v4223_v45 = vsel %vm1128_vm5, %v9647_v36, %v4222_v23  ;;  %v9649_v1 = vld [vmem:[#allocation108_spill] sm:$0xff]  ;;  %v9652_v42 = vld [vmem:[#allocation110_spill] sm:$0xff]  ;;  %v9654_v36 = vld [vmem:[#allocation109_spill] sm:$0xff] }
 0x3b6   : > { %v4092_v48 = vpop.xlane.xlu1 %4091  ;;  %v4216_v9 = vsel %vm1128_vm5, %v9648_v3, %v4215_v49  ;;  %v4226_v24 = vsel %vm1120_vm1, %v9653_v17, %v9652_v42  ;;  %v9656_v3 = vld [vmem:[#allocation101_spill] sm:$0xff] }
 0x3b7   : > { %5127 = vrcp.f32 %v4092_v48  ;;  %v4224_v48 = vsel %vm1130_vm6, %v9649_v1, %v4223_v45  ;;  %v4217_v27 = vsel %vm1130_vm6, %v9650_v6, %v4216_v9  ;;  %v9658_v1 = vld [vmem:[#allocation120_spill] sm:$0xff]  ;;  %v4227_v50 = vsel %vm1122_vm2, %v9659_v40, %v4226_v24  ;;  %v9661_v24 = vld [vmem:[#allocation114_spill] sm:$0xff] }
 0x3b8   : > { %v8268_v49 = vsel %vm1132_vm7, %v9654_v36, %v4224_v48  ;;  %v8272_v45 = vsel %vm1132_vm7, %v9656_v3, %v4217_v27  ;;  %v4234_v6 = vsel %vm1122_vm2, %v9658_v1, %v4233_v32  ;;  %v9660_v48 = vld [vmem:[#allocation113_spill] sm:$0xff] }
 0x3b9   : > { %9655 = vst [vmem:[#allocation25_spill] sm:$0xff] %v8268_v49  ;;  %9657 = vst [vmem:[#allocation19_spill] sm:$0xff] %v8272_v45  ;;  %v4228_v27 = vsel %vm1124_vm3, %v9660_v48, %v4227_v50 }
 0x3c1   : > { %v5128_v37 = vpop.eup %5127 }
 0x3c2   : > { %v4101_v23 = vmul.f32 %v5128_v37, %v7982_v25  ;;  %v4235_v25 = vsel %vm1124_vm3, %v9540_v57, %v4234_v6 }
 0x3c3   : > { %v4236_v32 = vsel %vm1126_vm4, %v9541_v13, %v4235_v25 }
 0x3c4   : > { %v4115_v9 = vrot.slane %v4101_v23, %v8013_v8 }
 0x3c6   : > { %v4253_v42 = vmul.f32 %v8268_v49, %v4115_v9  ;;  %v4252_v37 = vmul.f32 %v8272_v45, %v4115_v9  ;;  %v4229_v49 = vsel %vm1126_vm4, %v9661_v24, %v4228_v27  ;;  %v9662_v9 = vld [vmem:[#allocation115_spill] sm:$0xff]  ;;  %v9665_v27 = vld [vmem:[#allocation117_spill] sm:$0xff] }
 0x3c7   : > { %v4095_v44 = vpop.xlane.xlu0 %4094  ;;  %v4230_v6 = vsel %vm1128_vm5, %v9662_v9, %v4229_v49 }
 0x3c8   : > { %5129 = vrcp.f32 %v4095_v44  ;;  %v4271_v23 = vsel %vm410_vm0, %v4253_v42, 0.0  ;;  %v4268_v17 = vsel %vm410_vm0, %v4252_v37, 0.0  ;;  %v4237_v44 = vsel %vm1128_vm5, %v9542_v7, %v4236_v32 }
 0x3c9   : > { %4272 = vadd.xlane.f32.xlu0 %v4271_v23  ;;  %4269 = vadd.xlane.f32.xlu1 %v4268_v17  ;;  %v4238_v50 = vsel %vm1130_vm6, %v9543_v60, %v4237_v44  ;;  %v4231_v42 = vsel %vm1130_vm6, %v9537_v21, %v4230_v6  ;;  %v9663_v23 = vld [vmem:[#allocation127_spill] sm:$0xff] }
 0x3ca   : > { %v8302_v25 = vsel %vm1132_vm7, %v9663_v23, %v4238_v50  ;;  %v8306_v45 = vsel %vm1132_vm7, %v9665_v27, %v4231_v42 }
 0x3cb   : > { %9664 = vst [vmem:[#allocation26_spill] sm:$0xff] %v8302_v25  ;;  %9666 = vst [vmem:[#allocation20_spill] sm:$0xff] %v8306_v45 }
 0x3d2   : > { %v5130_v37 = vpop.eup %5129 }
 0x3d3   : > { %v4103_v17 = vmul.f32 %v5130_v37, %v7987_v4 }
 0x3d5   : > { %v4119_v32 = vrot.slane %v4103_v17, %v8013_v8 }
 0x3d7   : > { %v4255_v49 = vmul.f32 %v8302_v25, %v4119_v32  ;;  %v4254_v44 = vmul.f32 %v8306_v45, %v4119_v32 }
 0x3d9   : > { %v4277_v60 = vsel %vm410_vm0, %v4255_v49, 0.0  ;;  %v4274_v6 = vsel %vm410_vm0, %v4254_v44, 0.0 }
 0x3da   : > { %4278 = vadd.xlane.f32.xlu0 %v4277_v60  ;;  %4275 = vadd.xlane.f32.xlu1 %v4274_v6 }
 0x3e1   : > { %v1918_v4 = vpop.xlane.xlu1 %1917  ;;  %v1921_v37 = vpop.xlane.xlu0 %1920 }
 0x3e2   : > { %v1940_v50 = vmul.f32 %v1918_v4, %v1918_v4  ;;  %v1941_v23 = vmul.f32 %v1921_v37, %v1921_v37 }
 0x3e4   : > { %v1948_v7 = vadd.f32 %v1941_v23, %v1940_v50 }
 0x3e6   : > { %v1949_v13 = vrot.slane %v1948_v7, 4 }
 0x3e8   : > { %v1950_v42 = vadd.f32 %v1949_v13, %v1948_v7 }
 0x3ea   : > { %v1951_v57 = vrot.slane %v1950_v42, 2 }
 0x3ec   : > { %v1952_v27 = vadd.f32 %v1951_v57, %v1950_v42 }
 0x3ee   : > { %v1953_v17 = vrot.slane %v1952_v27, 1 }
 0x3f0   : > { %v1954_v8 = vadd.f32 %v1953_v17, %v1952_v27 }
 0x3f2   : > { %v1976_v25 = vadd.f32 1e-08, %v1954_v8 }
 0x3f4   : > { %5131 = vrsqrt.f32 %v1976_v25  ;;  %v2008_v44 = vadd.f32 1.0, %v1976_v25  ;;  %vm1982_vm9 = vcmp.eq.f32.partialorder %v1976_v25, inf  ;;  %v1985_v42 = vand.u32 2147483648, %v1976_v25 }
 0x3f5   : > { %v8313_v32 = vpop.xlane.xlu1 %1923  ;;  %v8315_v49 = vpop.xlane.xlu0 %1926  ;;  %vm1984_vm10 = vcmp.eq.f32.partialorder %v1976_v25, 0.0 }
 0x3f6   : > { %v1942_v60 = vmul.f32 %v8313_v32, %v8313_v32  ;;  %v1943_v6 = vmul.f32 %v8315_v49, %v8315_v49  ;;  %5133 = vrcp.f32 %v2008_v44 }
 0x3f8   : > { %v1955_v23 = vadd.f32 %v1943_v6, %v1942_v60 }
 0x3fa   : > { %v1956_v13 = vrot.slane %v1955_v23, 4 }
 0x3fc   : > { %v1957_v7 = vadd.f32 %v1956_v13, %v1955_v23 }
 0x3fe   : > { %v1958_v57 = vrot.slane %v1957_v7, 2  ;;  %v5132_v50 = vpop.eup %5131 }
 0x3ff   : > { %v1981_v27 = vmul.f32 %v5132_v50, %v1976_v25 }
 0x400   : > { %v1959_v8 = vadd.f32 %v1958_v57, %v1957_v7  ;;  %v5134_v1 = vpop.eup %5133 }
 0x401   : > { %v1983_v17 = vsel %vm1982_vm9, %v1976_v25, %v1981_v27 }
 0x402   : > { %v1960_v45 = vrot.slane %v1959_v8, 1  ;;  %v1986_v21 = vsel %vm1984_vm10, %v1985_v42, %v1983_v17 }
 0x403   : > { %v2013_v9 = vmul.f32 %v5134_v1, %v1986_v21 }
 0x404   : > { %v1961_v24 = vadd.f32 %v1960_v45, %v1959_v8 }
 0x405   : > { %v2020_v48 = vmul.f32 %v2013_v9, %v1918_v4  ;;  %v8325_v60 = vmul.f32 %v2013_v9, %v1921_v37 }
 0x406   : > { %v1977_v40 = vadd.f32 1e-08, %v1961_v24 }
 0x407   : > { %v8321_v36 = vpop.xlane.xlu1 %1929  ;;  %v8323_v44 = vpop.xlane.xlu0 %1932  ;;  %v2036_v7 = vrot.slane %v2020_v48, 1  ;;  %v2037_v21 = vrot.slane %v2020_v48, 2  ;;  %v2038_v45 = vrot.slane %v2020_v48, 3  ;;  %v2039_v24 = vrot.slane %v2020_v48, 4 }
 0x408   : > { %5135 = vrsqrt.f32 %v1977_v40  ;;  %v2009_v6 = vadd.f32 1.0, %v1977_v40  ;;  %v1944_v23 = vmul.f32 %v8321_v36, %v8321_v36  ;;  %v1945_v25 = vmul.f32 %v8323_v44, %v8323_v44 }
 0x409   : > { %v1992_v13 = vand.u32 2147483648, %v1977_v40  ;;  %v2040_v4 = vrot.slane %v2020_v48, 5  ;;  %vm1989_vm11 = vcmp.eq.f32.partialorder %v1977_v40, inf  ;;  %v2041_v57 = vrot.slane %v2020_v48, 6 }
 0x40a   : > { %v1962_v1 = vadd.f32 %v1945_v25, %v1944_v23  ;;  %5137 = vrcp.f32 %v2009_v6  ;;  %v2042_v9 = vrot.slane %v2020_v48, 7  ;;  %v2043_v37 = vrot.slane %v8325_v60, 1 }
 0x40b   : > { %vm1991_vm13 = vcmp.eq.f32.partialorder %v1977_v40, 0.0  ;;  %v2044_v27 = vrot.slane %v8325_v60, 2  ;;  %v2045_v8 = vrot.slane %v8325_v60, 3  ;;  %v2046_v42 = vrot.slane %v8325_v60, 4 }
 0x40c   : > { %v1963_v50 = vrot.slane %v1962_v1, 4  ;;  %v2047_v17 = vrot.slane %v8325_v60, 5  ;;  %v2048_v23 = vrot.slane %v8325_v60, 6  ;;  %v2157_v25 = vmul.f32 %v2036_v7, %v9548_v47 }
 0x40d   : > { %v2158_v6 = vmul.f32 %v2037_v21, %v9550_v61  ;;  %v2049_v33 = vrot.slane %v8325_v60, 7  ;;  %v2156_v34 = vmul.f32 %v2020_v48, %v9547_v10  ;;  %v2159_v15 = vmul.f32 %v2038_v45, %v9551_v43 }
 0x40e   : > { %v1964_v3 = vadd.f32 %v1963_v50, %v1962_v1  ;;  %v2160_v54 = vmul.f32 %v2039_v24, %v9552_v41  ;;  %v2161_v38 = vmul.f32 %v2040_v4, %v9553_v63  ;;  %v2162_v5 = vmul.f32 %v2041_v57, %v9555_v46 }
 0x40f   : > { %v2163_v2 = vmul.f32 %v2042_v9, %v9556_v22  ;;  %v2164_v47 = vmul.f32 %v8325_v60, %v9436_v35  ;;  %v2165_v61 = vmul.f32 %v2043_v37, %v9549_v51  ;;  %v2166_v7 = vmul.f32 %v2044_v27, %v9437_v18 }
 0x410   : > { %v1965_v20 = vrot.slane %v1964_v3, 2  ;;  %v2167_v10 = vmul.f32 %v2045_v8, %v9438_v29  ;;  %v2168_v43 = vmul.f32 %v2046_v42, %v9439_v26  ;;  %v2284_v41 = vrot.slane %v2157_v25, 7 }
 0x411   : > { %v2286_v48 = vrot.slane %v2158_v6, 6  ;;  %v2169_v46 = vmul.f32 %v2047_v17, %v9440_v16  ;;  %v2170_v22 = vmul.f32 %v2048_v23, %v9441_v19  ;;  %v2288_v35 = vrot.slane %v2159_v15, 5 }
 0x412   : > { %v5136_v21 = vpop.eup %5135  ;;  %v1966_v1 = vadd.f32 %v1965_v20, %v1964_v3  ;;  %v2285_v45 = vsel %vm1120_vm1, %v2284_v41, %v2156_v34  ;;  %v2290_v60 = vrot.slane %v2160_v54, 4  ;;  %v2292_v51 = vrot.slane %v2161_v38, 3 }
 0x413   : > { %v1988_v63 = vmul.f32 %v5136_v21, %v1977_v40  ;;  %v2287_v29 = vsel %vm1122_vm2, %v2286_v48, %v2285_v45  ;;  %v2298_v4 = vrot.slane %v2165_v61, 7  ;;  %v2294_v3 = vrot.slane %v2162_v5, 2 }
 0x414   : > { %v1967_v24 = vrot.slane %v1966_v1, 1  ;;  %v5138_v26 = vpop.eup %5137  ;;  %v2289_v20 = vsel %vm1124_vm3, %v2288_v35, %v2287_v29  ;;  %v2300_v16 = vrot.slane %v2166_v7, 6  ;;  %v2302_v37 = vrot.slane %v2167_v10, 5 }
 0x415   : > { %v1990_v18 = vsel %vm1989_vm11, %v1977_v40, %v1988_v63  ;;  %v2291_v34 = vsel %vm1126_vm4, %v2290_v60, %v2289_v20  ;;  %v2299_v54 = vsel %vm1120_vm1, %v2298_v4, %v2164_v47  ;;  %v2171_v40 = vmul.f32 %v2049_v33, %v9558_v39 }
 0x416   : > { %v1993_v57 = vsel %vm1991_vm13, %v1992_v13, %v1990_v18  ;;  %v1968_v19 = vadd.f32 %v1967_v24, %v1966_v1  ;;  %v2293_v38 = vsel %vm1128_vm5, %v2292_v51, %v2291_v34  ;;  %v2301_v15 = vsel %vm1122_vm2, %v2300_v16, %v2299_v54 }
 0x417   : > { %v2015_v9 = vmul.f32 %v5138_v26, %v1993_v57  ;;  %v2295_v13 = vsel %vm1130_vm6, %v2294_v3, %v2293_v38  ;;  %v2296_v27 = vrot.slane %v2163_v2, 1  ;;  %v2303_v5 = vsel %vm1124_vm3, %v2302_v37, %v2301_v15 }
 0x418   : > { %v8363_v50 = vadd.f32 1e-08, %v1968_v19  ;;  %v2304_v8 = vrot.slane %v2168_v43, 4  ;;  %v2306_v42 = vrot.slane %v2169_v46, 3  ;;  %v2308_v47 = vrot.slane %v2170_v22, 2 }
 0x419   : > { %v2022_v17 = vmul.f32 %v2015_v9, %v8313_v32  ;;  %v2297_v6 = vsel %vm1132_vm7, %v2296_v27, %v2295_v13  ;;  %v2310_v7 = vrot.slane %v2171_v40, 1  ;;  %v8383_v21 = vmul.f32 %v2015_v9, %v8315_v49 }
 0x41a   : > { %5139 = vrsqrt.f32 %v8363_v50  ;;  %v2010_v39 = vadd.f32 1.0, %v8363_v50  ;;  %v2305_v61 = vsel %vm1126_vm4, %v2304_v8, %v2303_v5  ;;  %v2404_v41 = vsel %vm410_vm0, %v2297_v6, 0.0 }
 0x41b   : > { %v8370_v23 = vpop.xlane.xlu1 %1935  ;;  %v8372_v25 = vpop.xlane.xlu0 %1938  ;;  %v2307_v32 = vsel %vm1128_vm5, %v2306_v42, %v2305_v61  ;;  %vm1996_vm14 = vcmp.eq.f32.partialorder %v8363_v50, inf  ;;  %v1999_v48 = vand.u32 2147483648, %v8363_v50  ;;  %v2050_v1 = vrot.slane %v2022_v17, 1 }
 0x41c   : > { %v1946_v2 = vmul.f32 %v8370_v23, %v8370_v23  ;;  %v1947_v33 = vmul.f32 %v8372_v25, %v8372_v25  ;;  %v2309_v43 = vsel %vm1130_vm6, %v2308_v47, %v2307_v32  ;;  %5141 = vrcp.f32 %v2010_v39 }
 0x41d   : > { %v2311_v63 = vsel %vm1132_vm7, %v2310_v7, %v2309_v43  ;;  %vm1998_vm15 = vcmp.eq.f32.partialorder %v8363_v50, 0.0  ;;  %v2051_v49 = vrot.slane %v2022_v17, 2  ;;  %v2052_v45 = vrot.slane %v2022_v17, 3 }
 0x41e   : > { %v1969_v10 = vadd.f32 %v1947_v33, %v1946_v2  ;;  %v2405_v22 = vsel %vm410_vm0, %v2311_v63, 0.0  ;;  %v2053_v60 = vrot.slane %v2022_v17, 4  ;;  %v2054_v51 = vrot.slane %v2022_v17, 5 }
 0x41f   : > { %v2406_v35 = vadd.f32 %v2405_v22, %v2404_v41  ;;  %v2055_v18 = vrot.slane %v2022_v17, 6  ;;  %v2056_v29 = vrot.slane %v2022_v17, 7  ;;  %v2057_v4 = vrot.slane %v8383_v21, 1  ;;  %v9668_v41 = vld [vmem:[#allocation29_spill] sm:$0xff] }
 0x420   : > { %v1970_v46 = vrot.slane %v1969_v10, 4  ;;  %v2058_v26 = vrot.slane %v8383_v21, 2  ;;  %v2059_v20 = vrot.slane %v8383_v21, 3  ;;  %v2060_v3 = vrot.slane %v8383_v21, 4 }
 0x421   : > { %v2407_v57 = vrot.slane %v2406_v35, 4  ;;  %v2061_v16 = vrot.slane %v8383_v21, 5  ;;  %v2062_v19 = vrot.slane %v8383_v21, 6  ;;  %v2063_v34 = vrot.slane %v8383_v21, 7 }
 0x422   : > { %v1971_v24 = vadd.f32 %v1970_v46, %v1969_v10  ;;  %v2172_v54 = vmul.f32 %v2022_v17, %v5681_v12  ;;  %v2173_v37 = vmul.f32 %v2050_v1, %v9560_v58  ;;  %v2174_v40 = vmul.f32 %v2051_v49, %v9562_v62 }
 0x423   : > { %v2408_v15 = vadd.f32 %v2407_v57, %v2406_v35  ;;  %v2175_v13 = vmul.f32 %v2052_v45, %v9564_v0  ;;  %v2176_v8 = vmul.f32 %v2053_v60, %v9566_v28  ;;  %v2177_v42 = vmul.f32 %v2054_v51, %v9567_v30 }
 0x424   : > { %v1972_v9 = vrot.slane %v1971_v24, 2  ;;  %v5140_v38 = vpop.eup %5139  ;;  %v2178_v47 = vmul.f32 %v2055_v18, %v9568_v56  ;;  %v2179_v12 = vmul.f32 %v2056_v29, %v9570_v14  ;;  %v2180_v17 = vmul.f32 %v8383_v21, %v5777_v55  ;;  %v9667_v21 = vld [vmem:[#allocation28_spill] sm:$0xff] }
 0x425   : > { %v1995_v27 = vmul.f32 %v5140_v38, %v8363_v50  ;;  %v2409_v6 = vrot.slane %v2408_v15, 2  ;;  %v2181_v62 = vmul.f32 %v2057_v4, %v5782_v59  ;;  %v2182_v39 = vmul.f32 %v2058_v26, %v9561_v53  ;;  %v9670_v4 = vld [vmem:[#allocation2_spill] sm:$0xff] }
 0x426   : > { %v1973_v5 = vadd.f32 %v1972_v9, %v1971_v24  ;;  %v5142_v28 = vpop.eup %5141  ;;  %v2312_v56 = vrot.slane %v2173_v37, 7  ;;  %v2314_v33 = vrot.slane %v2174_v40, 6  ;;  %v2183_v55 = vmul.f32 %v2059_v20, %v9563_v52 }
 0x427   : > { %v1997_v58 = vsel %vm1996_vm14, %v8363_v50, %v1995_v27  ;;  %v2410_v2 = vadd.f32 %v2409_v6, %v2408_v15  ;;  %v2184_v32 = vmul.f32 %v2060_v3, %v9565_v31  ;;  %v2185_v10 = vmul.f32 %v2061_v16, %v9667_v21 }
 0x428   : > { %v1974_v0 = vrot.slane %v1973_v5, 1  ;;  %v2000_v30 = vsel %vm1998_vm15, %v1999_v48, %v1997_v58  ;;  %v2313_v59 = vsel %vm1120_vm1, %v2312_v56, %v2172_v54  ;;  %v2316_v43 = vrot.slane %v2175_v13, 5  ;;  %v9669_v48 = vld [vmem:[#allocation30_spill] sm:$0xff] }
 0x429   : > { %v2017_v14 = vmul.f32 %v5142_v28, %v2000_v30  ;;  %v2411_v7 = vrot.slane %v2410_v2, 1  ;;  %v2186_v50 = vmul.f32 %v2062_v19, %v9668_v41  ;;  %v2187_v63 = vmul.f32 %v2063_v34, %v9669_v48 }
 0x42a   : > { %v1975_v61 = vadd.f32 %v1974_v0, %v1973_v5  ;;  %v2315_v1 = vsel %vm1122_vm2, %v2314_v33, %v2313_v59  ;;  %v2318_v49 = vrot.slane %v2176_v8, 4  ;;  %v2326_v45 = vrot.slane %v2181_v62, 7 }
 0x42b   : > { %v2412_v52 = vadd.f32 %v2411_v7, %v2410_v2  ;;  %v2317_v31 = vsel %vm1124_vm3, %v2316_v43, %v2315_v1  ;;  %v8432_v35 = vmul.f32 %v2017_v14, %v8321_v36  ;;  %v2320_v60 = vrot.slane %v2177_v42, 3 }
 0x42c   : > { %v8421_v53 = vadd.f32 1e-08, %v1975_v61  ;;  %v2322_v51 = vrot.slane %v2178_v47, 2  ;;  %v2319_v57 = vsel %vm1126_vm4, %v2318_v49, %v2317_v31  ;;  %v2324_v20 = vrot.slane %v2179_v12, 1 }
 0x42d   : > { %v8426_v46 = vpop.xlane.xlu1 %4257  ;;  %v8428_v22 = vpop.xlane.xlu0 %4260  ;;  %v8441_v26 = vadd.f32 %v2412_v52, %v9670_v4  ;;  %v2327_v36 = vsel %vm1120_vm1, %v2326_v45, %v2180_v17  ;;  %v2328_v3 = vrot.slane %v2182_v39, 6  ;;  %v2321_v19 = vsel %vm1128_vm5, %v2320_v60, %v2319_v57  ;;  %v9672_v57 = vld [vmem:[#allocation33_spill] sm:$0xff] }
 0x42e   : > { %5143 = vrsqrt.f32 %v8421_v53  ;;  %v2011_v18 = vadd.f32 1.0, %v8421_v53  ;;  %v4280_v24 = vmul.f32 %v8426_v46, %v8426_v46  ;;  %v4281_v29 = vmul.f32 %v8428_v22, %v8428_v22 }
 0x42f   : > { %v2444_v9 = vsel %vm1719_vm12, %v8441_v26, -inf  ;;  %v2330_v34 = vrot.slane %v2183_v55, 5  ;;  %v2323_v54 = vsel %vm1130_vm6, %v2322_v51, %v2321_v19  ;;  %v2329_v38 = vsel %vm1122_vm2, %v2328_v3, %v2327_v36  ;;  %v9673_v36 = vld [vmem:[#allocation34_spill] sm:$0xff] }
 0x430   : > { %v4288_v16 = vadd.f32 %v4281_v29, %v4280_v24  ;;  %5145 = vrcp.f32 %v2011_v18  ;;  %2445 = vmax.xlane.f32.xlu1 %v2444_v9  ;;  %v2332_v15 = vrot.slane %v2184_v32, 4  ;;  %v2325_v40 = vsel %vm1132_vm7, %v2324_v20, %v2323_v54  ;;  %v9671_v29 = vld [vmem:[#allocation32_spill] sm:$0xff] }
 0x431   : > { %v2331_v13 = vsel %vm1124_vm3, %v2330_v34, %v2329_v38  ;;  %v2334_v27 = vrot.slane %v2185_v10, 3  ;;  %v8453_v5 = vmul.f32 %v2017_v14, %v8323_v44  ;;  %vm2003_vm8 = vcmp.eq.f32.partialorder %v8421_v53, inf  ;;  %v9676_v38 = vld [vmem:[#allocation37_spill] sm:$0xff] }
 0x432   : > { %v4289_v37 = vrot.slane %v4288_v16, 4  ;;  %v2333_v8 = vsel %vm1126_vm4, %v2332_v15, %v2331_v13  ;;  %v2336_v42 = vrot.slane %v2186_v50, 2  ;;  %vm2005_vm9 = vcmp.eq.f32.partialorder %v8421_v53, 0.0 }
 0x433   : > { %v2335_v47 = vsel %vm1128_vm5, %v2334_v27, %v2333_v8  ;;  %v2338_v12 = vrot.slane %v2187_v63, 1  ;;  %v2006_v17 = vand.u32 2147483648, %v8421_v53  ;;  %v2413_v0 = vsel %vm410_vm0, %v2325_v40, 0.0  ;;  %v9678_v40 = vld [vmem:[#allocation39_spill] sm:$0xff]  ;;  %v9679_v27 = vld [vmem:[#allocation40_spill] sm:$0xff] }
 0x434   : > { %v4290_v6 = vadd.f32 %v4289_v37, %v4288_v16  ;;  %v2337_v58 = vsel %vm1130_vm6, %v2336_v42, %v2335_v47  ;;  %v2064_v44 = vrot.slane %v8432_v35, 1  ;;  %v2065_v28 = vrot.slane %v8432_v35, 2  ;;  %v9674_v16 = vld [vmem:[#allocation35_spill] sm:$0xff]  ;;  %v9677_v37 = vld [vmem:[#allocation38_spill] sm:$0xff]  ;;  %v9680_v42 = vld [vmem:[#allocation41_spill] sm:$0xff] }
 0x435   : > { %v2339_v39 = vsel %vm1132_vm7, %v2338_v12, %v2337_v58  ;;  %v2066_v30 = vrot.slane %v8432_v35, 3  ;;  %v2067_v33 = vrot.slane %v8432_v35, 4  ;;  %v2068_v14 = vrot.slane %v8432_v35, 5 }
 0x436   : > { %v4291_v62 = vrot.slane %v4290_v6, 2  ;;  %v2414_v56 = vsel %vm410_vm0, %v2339_v39, 0.0  ;;  %v2069_v61 = vrot.slane %v8432_v35, 6  ;;  %v2070_v21 = vrot.slane %v8432_v35, 7 }
 0x437   : > { %v2415_v7 = vadd.f32 %v2414_v56, %v2413_v0  ;;  %v2071_v10 = vrot.slane %v8453_v5, 1  ;;  %v2072_v59 = vrot.slane %v8453_v5, 2  ;;  %v2073_v43 = vrot.slane %v8453_v5, 3  ;;  %v9682_v0 = vld [vmem:[#allocation43_spill] sm:$0xff] }
 0x438   : > { %v5144_v2 = vpop.eup %5143  ;;  %v4292_v32 = vadd.f32 %v4291_v62, %v4290_v6  ;;  %v2074_v41 = vrot.slane %v8453_v5, 4  ;;  %v2075_v1 = vrot.slane %v8453_v5, 5  ;;  %v2076_v49 = vrot.slane %v8453_v5, 6  ;;  %v9683_v62 = vld [vmem:[#allocation44_spill] sm:$0xff] }
 0x439   : > { %v2002_v55 = vmul.f32 %v5144_v2, %v8421_v53  ;;  %v2416_v63 = vrot.slane %v2415_v7, 4  ;;  %v2077_v45 = vrot.slane %v8453_v5, 7  ;;  %v2188_v60 = vmul.f32 %v8432_v35, %v9338_v11  ;;  %v9684_v2 = vld [vmem:[#allocation45_spill] sm:$0xff] }
 0x43a   : > { %v4293_v48 = vrot.slane %v4292_v32, 1  ;;  %v5146_v52 = vpop.eup %5145  ;;  %v2189_v4 = vmul.f32 %v2064_v44, %v9671_v29  ;;  %v2190_v20 = vmul.f32 %v2065_v28, %v9672_v57  ;;  %v2191_v3 = vmul.f32 %v2066_v30, %v9673_v36 }
 0x43b   : > { %v2004_v50 = vsel %vm2003_vm8, %v8421_v53, %v2002_v55  ;;  %v2417_v24 = vadd.f32 %v2416_v63, %v2415_v7  ;;  %v2192_v9 = vmul.f32 %v2067_v33, %v9674_v16  ;;  %v9675_v53 = vld [vmem:[#allocation36_spill] sm:$0xff]  ;;  %v2194_v15 = vmul.f32 %v2069_v61, %v9676_v38  ;;  %v9685_v33 = vld [vmem:[#allocation31_spill] sm:$0xff] }
 0x43c   : > { %v2007_v31 = vsel %vm2005_vm9, %v2006_v17, %v2004_v50  ;;  %v4294_v18 = vadd.f32 %v4293_v48, %v4292_v32  ;;  %v2193_v19 = vmul.f32 %v2068_v14, %v9675_v53  ;;  %v2195_v11 = vmul.f32 %v2070_v21, %v9677_v37  ;;  %v9681_v17 = vld [vmem:[#allocation42_spill] sm:$0xff] }
 0x43d   : > { %v2019_v51 = vmul.f32 %v5146_v52, %v2007_v31  ;;  %v2418_v54 = vrot.slane %v2417_v24, 2  ;;  %v2196_v13 = vmul.f32 %v8453_v5, %v9678_v40  ;;  %v2197_v8 = vmul.f32 %v2071_v10, %v9679_v27 }
 0x43e   : > { %v8491_v34 = vadd.f32 1e-08, %v4294_v18  ;;  %v2198_v6 = vmul.f32 %v2072_v59, %v9680_v42  ;;  %v2199_v58 = vmul.f32 %v2073_v43, %v9681_v17  ;;  %v2200_v44 = vmul.f32 %v2074_v41, %v9682_v0 }
 0x43f   : > { %v8496_v35 = vmul.f32 %v2019_v51, %v8370_v23  ;;  %v2201_v23 = vmul.f32 %v2075_v1, %v9683_v62  ;;  %v2419_v30 = vadd.f32 %v2418_v54, %v2417_v24  ;;  %v2202_v56 = vmul.f32 %v2076_v49, %v9684_v2  ;;  %v9686_v24 = vld [vmem:[#allocation4_spill] sm:$0xff] }
 0x440   : > { %5147 = vrsqrt.f32 %v8491_v34  ;;  %v4348_v39 = vadd.f32 1.0, %v8491_v34  ;;  %v2203_v14 = vmul.f32 %v2077_v45, %v9685_v33  ;;  %v2340_v61 = vrot.slane %v2189_v4, 7 }
 0x441   : > { %v2342_v55 = vrot.slane %v2190_v20, 6  ;;  %v2420_v7 = vrot.slane %v2419_v30, 1  ;;  %v2344_v21 = vrot.slane %v2191_v3, 5  ;;  %v2346_v59 = vrot.slane %v2192_v9, 4 }
 0x442   : > { %v8503_v47 = vpop.xlane.xlu1 %4263  ;;  %v8505_v12 = vpop.xlane.xlu0 %4266  ;;  %5149 = vrcp.f32 %v4348_v39  ;;  %v2341_v10 = vsel %vm1120_vm1, %v2340_v61, %v2188_v60  ;;  %v2348_v43 = vrot.slane %v2193_v19, 3  ;;  %v2350_v41 = vrot.slane %v2194_v15, 2 }
 0x443   : > { %v4282_v5 = vmul.f32 %v8503_v47, %v8503_v47  ;;  %v4283_v28 = vmul.f32 %v8505_v12, %v8505_v12  ;;  %v2421_v48 = vadd.f32 %v2420_v7, %v2419_v30  ;;  %v2343_v63 = vsel %vm1122_vm2, %v2342_v55, %v2341_v10 }
 0x444   : > { %v2354_v1 = vrot.slane %v2197_v8, 7  ;;  %v2345_v52 = vsel %vm1124_vm3, %v2344_v21, %v2343_v63  ;;  %v2352_v31 = vrot.slane %v2195_v11, 1  ;;  %v2356_v49 = vrot.slane %v2198_v6, 6  ;;  %v9688_v63 = vld [vmem:[#allocation46_spill] sm:$0xff] }
 0x445   : > { %v4295_v32 = vadd.f32 %v4283_v28, %v4282_v5  ;;  %v2358_v45 = vrot.slane %v2199_v58, 5  ;;  %v8521_v29 = vadd.f32 %v2421_v48, %v9686_v24  ;;  %v2347_v4 = vsel %vm1126_vm4, %v2346_v59, %v2345_v52  ;;  %v9689_v24 = vld [vmem:[#allocation48_spill] sm:$0xff] }
 0x446   : > { %v2355_v60 = vsel %vm1120_vm1, %v2354_v1, %v2196_v13  ;;  %v2349_v57 = vsel %vm1128_vm5, %v2348_v43, %v2347_v4  ;;  %v2360_v36 = vrot.slane %v2200_v44, 4  ;;  %v2362_v3 = vrot.slane %v2201_v23, 3 }
 0x447   : > { %v4296_v50 = vrot.slane %v4295_v32, 4  ;;  %v2357_v20 = vsel %vm1122_vm2, %v2356_v49, %v2355_v60  ;;  %v2447_v9 = vsel %vm1719_vm12, %v8521_v29, -inf  ;;  %v2351_v53 = vsel %vm1130_vm6, %v2350_v41, %v2349_v57 }
 0x448   : > { %v2359_v19 = vsel %vm1124_vm3, %v2358_v45, %v2357_v20  ;;  %v8532_v38 = vmul.f32 %v2019_v51, %v8372_v25  ;;  %2448 = vmax.xlane.f32.xlu0 %v2447_v9  ;;  %v2353_v15 = vsel %vm1132_vm7, %v2352_v31, %v2351_v53  ;;  %v2364_v11 = vrot.slane %v2202_v56, 2  ;;  %v9692_v9 = vld [vmem:[#allocation51_spill] sm:$0xff] }
 0x449   : > { %v4297_v18 = vadd.f32 %v4296_v50, %v4295_v32  ;;  %v2361_v37 = vsel %vm1126_vm4, %v2360_v36, %v2359_v19  ;;  %v2366_v8 = vrot.slane %v2203_v14, 1  ;;  %vm4322_vm10 = vcmp.eq.f32.partialorder %v8491_v34, inf  ;;  %v9687_v50 = vld [vmem:[#allocation47_spill] sm:$0xff]  ;;  %v9691_v36 = vld [vmem:[#allocation50_spill] sm:$0xff]  ;;  %v9693_v19 = vld [vmem:[#allocation52_spill] sm:$0xff] }
 0x44a   : > { %v5148_v54 = vpop.eup %5147  ;;  %v2363_v27 = vsel %vm1128_vm5, %v2362_v3, %v2361_v37  ;;  %v4325_v42 = vand.u32 2147483648, %v8491_v34  ;;  %v2422_v25 = vsel %vm410_vm0, %v2353_v15, 0.0  ;;  %vm4324_vm11 = vcmp.eq.f32.partialorder %v8491_v34, 0.0  ;;  %v9694_v37 = vld [vmem:[#allocation53_spill] sm:$0xff] }
 0x44b   : > { %v4298_v16 = vrot.slane %v4297_v18, 2  ;;  %v4321_v40 = vmul.f32 %v5148_v54, %v8491_v34  ;;  %v2365_v6 = vsel %vm1130_vm6, %v2364_v11, %v2363_v27  ;;  %v2078_v23 = vrot.slane %v8496_v35, 1  ;;  %v9696_v27 = vld [vmem:[#allocation55_spill] sm:$0xff] }
 0x44c   : > { %v5150_v51 = vpop.eup %5149  ;;  %v2367_v0 = vsel %vm1132_vm7, %v2366_v8, %v2365_v6  ;;  %v2079_v39 = vrot.slane %v8496_v35, 2  ;;  %v2080_v30 = vrot.slane %v8496_v35, 3  ;;  %v2081_v2 = vrot.slane %v8496_v35, 4  ;;  %v9697_v6 = vld [vmem:[#allocation56_spill] sm:$0xff] }
 0x44d   : > { %v4299_v13 = vadd.f32 %v4298_v16, %v4297_v18  ;;  %v4323_v17 = vsel %vm4322_vm10, %v8491_v34, %v4321_v40  ;;  %v2423_v62 = vsel %vm410_vm0, %v2367_v0, 0.0  ;;  %v2082_v34 = vrot.slane %v8496_v35, 5  ;;  %v9695_v40 = vld [vmem:[#allocation54_spill] sm:$0xff] }
 0x44e   : > { %v4326_v44 = vsel %vm4324_vm11, %v4325_v42, %v4323_v17  ;;  %v2424_v28 = vadd.f32 %v2423_v62, %v2422_v25  ;;  %v2083_v33 = vrot.slane %v8496_v35, 6  ;;  %v2084_v14 = vrot.slane %v8496_v35, 7  ;;  %v9700_v62 = vld [vmem:[#allocation59_spill] sm:$0xff] }
 0x44f   : > { %v4300_v58 = vrot.slane %v4299_v13, 1  ;;  %v8550_v56 = vmul.f32 %v5150_v51, %v4326_v44  ;;  %v2085_v32 = vrot.slane %v8532_v38, 1  ;;  %v2086_v7 = vrot.slane %v8532_v38, 2  ;;  %v9698_v51 = vld [vmem:[#allocation57_spill] sm:$0xff] }
 0x450   : > { %v2425_v55 = vrot.slane %v2424_v28, 4  ;;  %v2087_v21 = vrot.slane %v8532_v38, 3  ;;  %v2088_v10 = vrot.slane %v8532_v38, 4  ;;  %v2089_v59 = vrot.slane %v8532_v38, 5 }
 0x451   : > { %v4301_v5 = vadd.f32 %v4300_v58, %v4299_v13  ;;  %v2090_v43 = vrot.slane %v8532_v38, 6  ;;  %v2091_v41 = vrot.slane %v8532_v38, 7  ;;  %v2204_v48 = vmul.f32 %v8496_v35, %v9687_v50  ;;  %v9690_v35 = vld [vmem:[#allocation49_spill] sm:$0xff]  ;;  %v9699_v58 = vld [vmem:[#allocation58_spill] sm:$0xff] }
 0x452   : > { %v2205_v1 = vmul.f32 %v2078_v23, %v9688_v63  ;;  %v2426_v18 = vadd.f32 %v2425_v55, %v2424_v28  ;;  %v2206_v4 = vmul.f32 %v2079_v39, %v9689_v24  ;;  %v2207_v20 = vmul.f32 %v2080_v30, %v9690_v35  ;;  %v9701_v39 = vld [vmem:[#allocation60_spill] sm:$0xff]  ;;  %v9703_v24 = vld [vmem:[#allocation5_spill] sm:$0xff] }
 0x453   : > { %v8555_v61 = vadd.f32 1e-08, %v4301_v5  ;;  %v2208_v3 = vmul.f32 %v2081_v2, %v9691_v36  ;;  %v2209_v53 = vmul.f32 %v2082_v34, %v9692_v9  ;;  %v2210_v54 = vmul.f32 %v2083_v33, %v9693_v19  ;;  %v9702_v2 = vld [vmem:[#allocation61_spill] sm:$0xff] }
 0x454   : > { %v2427_v16 = vrot.slane %v2426_v18, 2  ;;  %v2211_v11 = vmul.f32 %v2084_v14, %v9694_v37  ;;  %v2212_v13 = vmul.f32 %v8532_v38, %v9695_v40  ;;  %v2213_v8 = vmul.f32 %v2085_v32, %v9696_v27 }
 0x455   : > { %5151 = vrsqrt.f32 %v8555_v61  ;;  %v4332_v52 = vand.u32 2147483648, %v8555_v61  ;;  %v4349_v31 = vadd.f32 1.0, %v8555_v61  ;;  %vm4329_vm13 = vcmp.eq.f32.partialorder %v8555_v61, inf }
 0x456   : > { %v8570_v49 = vpop.xlane.xlu1 %4269  ;;  %v8572_v45 = vpop.xlane.xlu0 %4272  ;;  %vm4331_vm14 = vcmp.eq.f32.partialorder %v8555_v61, 0.0  ;;  %v2428_v42 = vadd.f32 %v2427_v16, %v2426_v18  ;;  %v2214_v25 = vmul.f32 %v2086_v7, %v9697_v6  ;;  %v2215_v17 = vmul.f32 %v2087_v21, %v9698_v51 }
 0x457   : > { %v4284_v60 = vmul.f32 %v8570_v49, %v8570_v49  ;;  %v4285_v57 = vmul.f32 %v8572_v45, %v8572_v45  ;;  %5153 = vrcp.f32 %v4349_v31  ;;  %v2216_v0 = vmul.f32 %v2088_v10, %v9699_v58 }
 0x458   : > { %v2217_v23 = vmul.f32 %v2089_v59, %v9700_v62  ;;  %v2218_v5 = vmul.f32 %v2090_v43, %v9701_v39  ;;  %v2368_v28 = vrot.slane %v2205_v1, 7  ;;  %v2429_v30 = vrot.slane %v2428_v42, 1 }
 0x459   : > { %v4302_v15 = vadd.f32 %v4285_v57, %v4284_v60  ;;  %v2219_v38 = vmul.f32 %v2091_v41, %v9702_v2  ;;  %v2370_v34 = vrot.slane %v2206_v4, 6  ;;  %v2372_v33 = vrot.slane %v2207_v20, 5 }
 0x45a   : > { %v2369_v55 = vsel %vm1120_vm1, %v2368_v28, %v2204_v48  ;;  %v2374_v32 = vrot.slane %v2208_v3, 4  ;;  %v2376_v7 = vrot.slane %v2209_v53, 3  ;;  %v2430_v50 = vadd.f32 %v2429_v30, %v2428_v42 }
 0x45b   : > { %v4303_v44 = vrot.slane %v4302_v15, 4  ;;  %v2371_v21 = vsel %vm1122_vm2, %v2370_v34, %v2369_v55  ;;  %v2378_v10 = vrot.slane %v2210_v54, 2  ;;  %v2382_v63 = vrot.slane %v2213_v8, 7 }
 0x45c   : > { %v2373_v43 = vsel %vm1124_vm3, %v2372_v33, %v2371_v21  ;;  %v2384_v1 = vrot.slane %v2214_v25, 6  ;;  %v2386_v18 = vrot.slane %v2215_v17, 5  ;;  %v8600_v4 = vadd.f32 %v2430_v50, %v9703_v24 }
 0x45d   : > { %v4304_v14 = vadd.f32 %v4303_v44, %v4302_v15  ;;  %v2375_v48 = vsel %vm1126_vm4, %v2374_v32, %v2373_v43  ;;  %v2383_v60 = vsel %vm1120_vm1, %v2382_v63, %v2212_v13  ;;  %v2388_v36 = vrot.slane %v2216_v0, 4 }
 0x45e   : > { %v2377_v35 = vsel %vm1128_vm5, %v2376_v7, %v2375_v48  ;;  %v2385_v20 = vsel %vm1122_vm2, %v2384_v1, %v2383_v60  ;;  %v2450_v9 = vsel %vm1719_vm12, %v8600_v4, -inf  ;;  %v2380_v37 = vrot.slane %v2211_v11, 1  ;;  %v9705_v48 = vld [vmem:[#allocation64_spill] sm:$0xff] }
 0x45f   : > { %v5152_v31 = vpop.eup %5151  ;;  %v4305_v59 = vrot.slane %v4304_v14, 2  ;;  %v2379_v53 = vsel %vm1130_vm6, %v2378_v10, %v2377_v35  ;;  %v2387_v19 = vsel %vm1124_vm3, %v2386_v18, %v2385_v20  ;;  %2451 = vmax.xlane.f32.xlu1 %v2450_v9  ;;  %v4360_v13 = vmul.f32 %v8550_v56, %v8426_v46  ;;  %v9706_v35 = vld [vmem:[#allocation62_spill] sm:$0xff] }
 0x460   : > { %v4328_v41 = vmul.f32 %v5152_v31, %v8555_v61  ;;  %v2389_v40 = vsel %vm1126_vm4, %v2388_v36, %v2387_v19  ;;  %v2390_v27 = vrot.slane %v2217_v23, 3  ;;  %v2381_v6 = vsel %vm1132_vm7, %v2380_v37, %v2379_v53  ;;  %v9707_v36 = vld [vmem:[#allocation65_spill] sm:$0xff]  ;;  %v9709_v19 = vld [vmem:[#allocation67_spill] sm:$0xff] }
 0x461   : > { %v4306_v57 = vadd.f32 %v4305_v59, %v4304_v14  ;;  %v5154_v3 = vpop.eup %5153  ;;  %v2392_v25 = vrot.slane %v2218_v5, 2  ;;  %v8635_v44 = vmul.f32 %v8550_v56, %v8428_v22  ;;  %v2431_v23 = vsel %vm410_vm0, %v2381_v6, 0.0  ;;  %v9712_v6 = vld [vmem:[#allocation70_spill] sm:$0xff] }
 0x462   : > { %v4330_v16 = vsel %vm4329_vm13, %v8555_v61, %v4328_v41  ;;  %v2391_v61 = vsel %vm1128_vm5, %v2390_v27, %v2389_v40  ;;  %v4376_v5 = vrot.slane %v4360_v13, 1  ;;  %v4377_v28 = vrot.slane %v4360_v13, 2  ;;  %v9704_v41 = vld [vmem:[#allocation63_spill] sm:$0xff]  ;;  %v9711_v40 = vld [vmem:[#allocation69_spill] sm:$0xff] }
 0x463   : > { %v4333_v54 = vsel %vm4331_vm14, %v4332_v52, %v4330_v16  ;;  %v4307_v15 = vrot.slane %v4306_v57, 1  ;;  %v2394_v52 = vrot.slane %v2219_v38, 1  ;;  %v2393_v0 = vsel %vm1130_vm6, %v2392_v25, %v2391_v61  ;;  %v9708_v16 = vld [vmem:[#allocation66_spill] sm:$0xff]  ;;  %v9713_v61 = vld [vmem:[#allocation71_spill] sm:$0xff] }
 0x464   : > { %v8618_v8 = vmul.f32 %v5154_v3, %v4333_v54  ;;  %v4378_v34 = vrot.slane %v4360_v13, 3  ;;  %v4379_v56 = vrot.slane %v4360_v13, 4  ;;  %v4380_v33 = vrot.slane %v4360_v13, 5 }
 0x465   : > { %v4308_v42 = vadd.f32 %v4307_v15, %v4306_v57  ;;  %v2395_v62 = vsel %vm1132_vm7, %v2394_v52, %v2393_v0  ;;  %v4381_v14 = vrot.slane %v4360_v13, 6  ;;  %v4382_v7 = vrot.slane %v4360_v13, 7  ;;  %v9710_v15 = vld [vmem:[#allocation68_spill] sm:$0xff] }
 0x466   : > { %v8641_v39 = vmul.f32 %v8618_v8, %v8503_v47  ;;  %v2432_v38 = vsel %vm410_vm0, %v2395_v62, 0.0  ;;  %v4383_v47 = vrot.slane %v8635_v44, 1  ;;  %v4384_v21 = vrot.slane %v8635_v44, 2  ;;  %v9715_v62 = vld [vmem:[#allocation73_spill] sm:$0xff] }
 0x467   : > { %v8621_v51 = vpop.xlane.xlu1 %4275  ;;  %v8623_v17 = vpop.xlane.xlu0 %4278  ;;  %v8626_v11 = vadd.f32 1e-08, %v4308_v42  ;;  %v2433_v22 = vadd.f32 %v2432_v38, %v2431_v23  ;;  %v4385_v10 = vrot.slane %v8635_v44, 3  ;;  %v4386_v31 = vrot.slane %v8635_v44, 4  ;;  %v9716_v38 = vld [vmem:[#allocation74_spill] sm:$0xff] }
 0x468   : > { %v4286_v58 = vmul.f32 %v8621_v51, %v8621_v51  ;;  %v4287_v46 = vmul.f32 %v8623_v17, %v8623_v17  ;;  %v4387_v59 = vrot.slane %v8635_v44, 5  ;;  %v4388_v43 = vrot.slane %v8635_v44, 6 }
 0x469   : > { %5155 = vrsqrt.f32 %v8626_v11  ;;  %v4350_v30 = vadd.f32 1.0, %v8626_v11  ;;  %v4339_v55 = vand.u32 2147483648, %v8626_v11  ;;  %vm4336_vm15 = vcmp.eq.f32.partialorder %v8626_v11, inf }
 0x46a   : > { %v4309_v2 = vadd.f32 %v4287_v46, %v4286_v58  ;;  %v2434_v50 = vrot.slane %v2433_v22, 4  ;;  %vm4338_vm8 = vcmp.eq.f32.partialorder %v8626_v11, 0.0  ;;  %v4389_v18 = vrot.slane %v8635_v44, 7  ;;  %v9714_v58 = vld [vmem:[#allocation72_spill] sm:$0xff] }
 0x46b   : > { %5157 = vrcp.f32 %v4350_v30  ;;  %v4497_v24 = vmul.f32 %v4376_v5, %v9704_v41  ;;  %v4498_v60 = vmul.f32 %v4377_v28, %v9705_v48  ;;  %v4496_v20 = vmul.f32 %v4360_v13, %v9706_v35 }
 0x46c   : > { %v4310_v32 = vrot.slane %v4309_v2, 4  ;;  %v2435_v1 = vadd.f32 %v2434_v50, %v2433_v22  ;;  %v4499_v3 = vmul.f32 %v4378_v34, %v9707_v36  ;;  %v4500_v9 = vmul.f32 %v4379_v56, %v9708_v16 }
 0x46d   : > { %v4501_v54 = vmul.f32 %v4380_v33, %v9709_v19  ;;  %v4502_v37 = vmul.f32 %v4381_v14, %v9710_v15  ;;  %v4503_v27 = vmul.f32 %v4382_v7, %v9711_v40  ;;  %v4504_v25 = vmul.f32 %v8635_v44, %v9712_v6 }
 0x46e   : > { %v4311_v63 = vadd.f32 %v4310_v32, %v4309_v2  ;;  %v2436_v53 = vrot.slane %v2435_v1, 2  ;;  %v4505_v52 = vmul.f32 %v4383_v47, %v9713_v61  ;;  %v4506_v46 = vmul.f32 %v4384_v21, %v9714_v58 }
 0x46f   : > { %v4507_v23 = vmul.f32 %v4385_v10, %v9715_v62  ;;  %v4624_v5 = vrot.slane %v4497_v24, 7  ;;  %v4626_v28 = vrot.slane %v4498_v60, 6  ;;  %v4508_v34 = vmul.f32 %v4386_v31, %v9716_v38  ;;  %v9717_v24 = vld [vmem:[#allocation75_spill] sm:$0xff] }
 0x470   : > { %v4312_v57 = vrot.slane %v4311_v63, 2  ;;  %v2437_v0 = vadd.f32 %v2436_v53, %v2435_v1  ;;  %v4628_v22 = vrot.slane %v4499_v3, 5  ;;  %v4630_v44 = vrot.slane %v4500_v9, 4 }
 0x471   : > { %v4625_v33 = vsel %vm1120_vm1, %v4624_v5, %v4496_v20  ;;  %v4632_v14 = vrot.slane %v4501_v54, 3  ;;  %v4638_v50 = vrot.slane %v4505_v52, 7  ;;  %v4640_v1 = vrot.slane %v4506_v46, 6  ;;  %v9718_v20 = vld [vmem:[#allocation6_spill] sm:$0xff]  ;;  %v9720_v54 = vld [vmem:[#allocation77_spill] sm:$0xff] }
 0x472   : > { %v4313_v42 = vadd.f32 %v4312_v57, %v4311_v63  ;;  %v2438_v56 = vrot.slane %v2437_v0, 1  ;;  %v4627_v47 = vsel %vm1122_vm2, %v4626_v28, %v4625_v33  ;;  %v4509_v48 = vmul.f32 %v4387_v59, %v9717_v24 }
 0x473   : > { %v5156_v13 = vpop.eup %5155  ;;  %v4629_v31 = vsel %vm1124_vm3, %v4628_v22, %v4627_v47  ;;  %v4639_v57 = vsel %vm1120_vm1, %v4638_v50, %v4504_v25  ;;  %v4634_v9 = vrot.slane %v4502_v37, 2  ;;  %v4642_v53 = vrot.slane %v4507_v23, 5  ;;  %v9721_v50 = vld [vmem:[#allocation78_spill] sm:$0xff] }
 0x474   : > { %v4335_v30 = vmul.f32 %v5156_v13, %v8626_v11  ;;  %v4314_v2 = vrot.slane %v4313_v42, 1  ;;  %v2439_v63 = vadd.f32 %v2438_v56, %v2437_v0  ;;  %v4631_v60 = vsel %vm1126_vm4, %v4630_v44, %v4629_v31  ;;  %v9723_v31 = vld [vmem:[#allocation80_spill] sm:$0xff] }
 0x475   : > { %v5158_v21 = vpop.eup %5157  ;;  %v4633_v3 = vsel %vm1128_vm5, %v4632_v14, %v4631_v60  ;;  %v4511_v15 = vmul.f32 %v4389_v18, %v9720_v54  ;;  %v4636_v40 = vrot.slane %v4503_v27, 1  ;;  %v4646_v18 = vrot.slane %v4509_v48, 3  ;;  %v9724_v60 = vld [vmem:[#allocation81_spill] sm:$0xff] }
 0x476   : > { %v4337_v32 = vsel %vm4336_vm15, %v8626_v11, %v4335_v30  ;;  %v4315_v7 = vadd.f32 %v4314_v2, %v4313_v42  ;;  %v8685_v36 = vadd.f32 %v2439_v63, %v9718_v20  ;;  %v4641_v11 = vsel %vm1122_vm2, %v4640_v1, %v4639_v57 }
 0x477   : > { %v4340_v10 = vsel %vm4338_vm8, %v4339_v55, %v4337_v32  ;;  %v9719_v55 = vld [vmem:[#allocation76_spill] sm:$0xff]  ;;  %v8697_v42 = vmul.f32 %v8618_v8, %v8505_v12  ;;  %v4635_v6 = vsel %vm1130_vm6, %v4634_v9, %v4633_v3  ;;  %v4643_v25 = vsel %vm1124_vm3, %v4642_v53, %v4641_v11  ;;  %v9726_v3 = vld [vmem:[#allocation83_spill] sm:$0xff]  ;;  %v9728_v9 = vld [vmem:[#allocation85_spill] sm:$0xff] }
 0x478   : > { %v8679_v41 = vadd.f32 1e-08, %v4315_v7  ;;  %v4357_v35 = vmul.f32 %v5158_v21, %v4340_v10  ;;  %v4510_v16 = vmul.f32 %v4388_v43, %v9719_v55  ;;  %v2453_v19 = vsel %vm1719_vm12, %v8685_v36, -inf  ;;  %v9722_v10 = vld [vmem:[#allocation79_spill] sm:$0xff]  ;;  %v9727_v55 = vld [vmem:[#allocation84_spill] sm:$0xff] }
 0x479   : > { %2454 = vmax.xlane.f32.xlu0 %v2453_v19  ;;  %v4644_v43 = vrot.slane %v4508_v34, 4  ;;  %v4637_v52 = vsel %vm1132_vm7, %v4636_v40, %v4635_v6  ;;  %v4391_v0 = vrot.slane %v8641_v39, 2  ;;  %v4392_v62 = vrot.slane %v8641_v39, 3  ;;  %v9731_v6 = vld [vmem:[#allocation88_spill] sm:$0xff] }
 0x47a   : > { %5159 = vrsqrt.f32 %v8679_v41  ;;  %v4351_v59 = vadd.f32 1.0, %v8679_v41  ;;  %v8702_v37 = vmul.f32 %v4357_v35, %v8570_v49  ;;  %v8705_v61 = vmul.f32 %v4357_v35, %v8572_v45  ;;  %v9725_v35 = vld [vmem:[#allocation82_spill] sm:$0xff] }
 0x47b   : > { %vm4343_vm9 = vcmp.eq.f32.partialorder %v8679_v41, inf  ;;  %v4346_v12 = vand.u32 2147483648, %v8679_v41  ;;  %v4645_v8 = vsel %vm1126_vm4, %v4644_v43, %v4643_v25  ;;  %v4648_v27 = vrot.slane %v4510_v16, 2 }
 0x47c   : > { %5161 = vrcp.f32 %v4351_v59  ;;  %vm4345_vm10 = vcmp.eq.f32.partialorder %v8679_v41, 0.0  ;;  %v4647_v58 = vsel %vm1128_vm5, %v4646_v18, %v4645_v8  ;;  %v4650_v49 = vrot.slane %v4511_v15, 1  ;;  %v9729_v59 = vld [vmem:[#allocation86_spill] sm:$0xff]  ;;  %v9730_v15 = vld [vmem:[#allocation87_spill] sm:$0xff]  ;;  %v9732_v18 = vld [vmem:[#allocation89_spill] sm:$0xff] }
 0x47d   : > { %v4744_v46 = vsel %vm410_vm0, %v4637_v52, 0.0  ;;  %v4390_v45 = vrot.slane %v8641_v39, 1  ;;  %v4649_v13 = vsel %vm1130_vm6, %v4648_v27, %v4647_v58  ;;  %v4393_v23 = vrot.slane %v8641_v39, 4 }
 0x47e   : > { %v4651_v5 = vsel %vm1132_vm7, %v4650_v49, %v4649_v13  ;;  %v4394_v28 = vrot.slane %v8641_v39, 5  ;;  %v4395_v30 = vrot.slane %v8641_v39, 6  ;;  %v4396_v2 = vrot.slane %v8641_v39, 7  ;;  %v9734_v13 = vld [vmem:[#allocation91_spill] sm:$0xff] }
 0x47f   : > { %v4745_v38 = vsel %vm410_vm0, %v4651_v5, 0.0  ;;  %v4397_v34 = vrot.slane %v8697_v42, 1  ;;  %v4398_v22 = vrot.slane %v8697_v42, 2  ;;  %v4399_v56 = vrot.slane %v8697_v42, 3  ;;  %v9736_v5 = vld [vmem:[#allocation93_spill] sm:$0xff] }
 0x480   : > { %v4746_v33 = vadd.f32 %v4745_v38, %v4744_v46  ;;  %v4400_v44 = vrot.slane %v8697_v42, 4  ;;  %v4401_v14 = vrot.slane %v8697_v42, 5  ;;  %v4402_v32 = vrot.slane %v8697_v42, 6  ;;  %v9733_v46 = vld [vmem:[#allocation90_spill] sm:$0xff] }
 0x481   : > { %v4403_v47 = vrot.slane %v8697_v42, 7  ;;  %v4512_v21 = vmul.f32 %v8641_v39, %v9721_v50  ;;  %v4513_v63 = vmul.f32 %v4390_v45, %v9722_v10  ;;  %v4514_v1 = vmul.f32 %v4391_v0, %v9723_v31 }
 0x482   : > { %v4747_v48 = vrot.slane %v4746_v33, 4  ;;  %v4515_v57 = vmul.f32 %v4392_v62, %v9724_v60  ;;  %v4516_v20 = vmul.f32 %v4393_v23, %v9725_v35  ;;  %v4517_v11 = vmul.f32 %v4394_v28, %v9726_v3  ;;  %v9735_v62 = vld [vmem:[#allocation92_spill] sm:$0xff] }
 0x483   : > { %v4518_v16 = vmul.f32 %v4395_v30, %v9727_v55  ;;  %v4519_v53 = vmul.f32 %v4396_v2, %v9728_v9  ;;  %v4520_v39 = vmul.f32 %v8697_v42, %v9729_v59  ;;  %v4521_v40 = vmul.f32 %v4397_v34, %v9730_v15 }
 0x484   : > { %v5160_v7 = vpop.eup %5159  ;;  %v4748_v54 = vadd.f32 %v4747_v48, %v4746_v33  ;;  %v4522_v25 = vmul.f32 %v4398_v22, %v9731_v6  ;;  %v4523_v8 = vmul.f32 %v4399_v56, %v9732_v18  ;;  %v4652_v27 = vrot.slane %v4513_v63, 7 }
 0x485   : > { %v4342_v24 = vmul.f32 %v5160_v7, %v8679_v41  ;;  %v4654_v58 = vrot.slane %v4514_v1, 6  ;;  %v4524_v45 = vmul.f32 %v4400_v44, %v9733_v46  ;;  %v4525_v0 = vmul.f32 %v4401_v14, %v9734_v13 }
 0x486   : > { %v5162_v43 = vpop.eup %5161  ;;  %v4749_v42 = vrot.slane %v4748_v54, 2  ;;  %v4526_v23 = vmul.f32 %v4402_v32, %v9735_v62  ;;  %v4527_v28 = vmul.f32 %v4403_v47, %v9736_v5  ;;  %v4653_v30 = vsel %vm1120_vm1, %v4652_v27, %v4512_v21  ;;  %v9740_v5 = vld [vmem:[#allocation94_spill] sm:$0xff] }
 0x487   : > { %v4344_v19 = vsel %vm4343_vm9, %v8679_v41, %v4342_v24  ;;  %v4656_v2 = vrot.slane %v4515_v57, 5  ;;  %v4658_v38 = vrot.slane %v4516_v20, 4  ;;  %v4660_v34 = vrot.slane %v4517_v11, 3  ;;  %v9737_v20 = vld [vmem:[#allocation7_spill] sm:$0xff] }
 0x488   : > { %v4347_v52 = vsel %vm4345_vm10, %v4346_v12, %v4344_v19  ;;  %v4750_v41 = vadd.f32 %v4749_v42, %v4748_v54  ;;  %v4655_v12 = vsel %vm1122_vm2, %v4654_v58, %v4653_v30  ;;  %v4662_v56 = vrot.slane %v4518_v16, 2  ;;  %v9741_v30 = vld [vmem:[#allocation97_spill] sm:$0xff] }
 0x489   : > { %v8751_v49 = vmul.f32 %v5162_v43, %v4347_v52  ;;  %v4657_v22 = vsel %vm1124_vm3, %v4656_v2, %v4655_v12  ;;  %v4666_v33 = vrot.slane %v4521_v40, 7  ;;  %v4668_v7 = vrot.slane %v4522_v25, 6 }
 0x48a   : > { %v4751_v14 = vrot.slane %v4750_v41, 1  ;;  %v4659_v32 = vsel %vm1126_vm4, %v4658_v38, %v4657_v22  ;;  %v4664_v47 = vrot.slane %v4519_v53, 1  ;;  %v4670_v10 = vrot.slane %v4523_v8, 5 }
 0x48b   : > { %v8762_v44 = vmul.f32 %v8751_v49, %v8621_v51  ;;  %v4661_v50 = vsel %vm1128_vm5, %v4660_v34, %v4659_v32  ;;  %v4667_v21 = vsel %vm1120_vm1, %v4666_v33, %v4520_v39  ;;  %v4672_v63 = vrot.slane %v4524_v45, 4  ;;  %v9738_v45 = vld [vmem:[#allocation95_spill] sm:$0xff]  ;;  %v9746_v32 = vld [vmem:[#allocation101_spill] sm:$0xff] }
 0x48c   : > { %v4752_v31 = vadd.f32 %v4751_v14, %v4750_v41  ;;  %v4663_v1 = vsel %vm1130_vm6, %v4662_v56, %v4661_v50  ;;  %v4669_v24 = vsel %vm1122_vm2, %v4668_v7, %v4667_v21  ;;  %v4674_v48 = vrot.slane %v4525_v0, 3  ;;  %v9739_v0 = vld [vmem:[#allocation96_spill] sm:$0xff]  ;;  %v9742_v41 = vld [vmem:[#allocation98_spill] sm:$0xff]  ;;  %v9743_v34 = vld [vmem:[#allocation99_spill] sm:$0xff] }
 0x48d   : > { %v4665_v60 = vsel %vm1132_vm7, %v4664_v47, %v4663_v1  ;;  %v4671_v51 = vsel %vm1124_vm3, %v4670_v10, %v4669_v24  ;;  %v4676_v57 = vrot.slane %v4526_v23, 2  ;;  %v4678_v35 = vrot.slane %v4527_v28, 1  ;;  %v9744_v56 = vld [vmem:[#allocation100_spill] sm:$0xff]  ;;  %v9745_v7 = vld [vmem:[#allocation103_spill] sm:$0xff]  ;;  %v9747_v50 = vld [vmem:[#allocation102_spill] sm:$0xff] }
 0x48e   : > { %v8772_v3 = vadd.f32 %v4752_v31, %v9737_v20  ;;  %v4673_v11 = vsel %vm1126_vm4, %v4672_v63, %v4671_v51  ;;  %v4404_v55 = vrot.slane %v8702_v37, 1  ;;  %v4405_v16 = vrot.slane %v8702_v37, 2  ;;  %v9748_v10 = vld [vmem:[#allocation104_spill] sm:$0xff]  ;;  %v9749_v31 = vld [vmem:[#allocation105_spill] sm:$0xff]  ;;  %v9750_v24 = vld [vmem:[#allocation106_spill] sm:$0xff] }
 0x48f   : > { %v4675_v9 = vsel %vm1128_vm5, %v4674_v48, %v4673_v11  ;;  %v4753_v53 = vsel %vm410_vm0, %v4665_v60, 0.0  ;;  %v4406_v59 = vrot.slane %v8702_v37, 3  ;;  %v4407_v39 = vrot.slane %v8702_v37, 4  ;;  %v9752_v20 = vld [vmem:[#allocation108_spill] sm:$0xff] }
 0x490   : > { %v4784_v19 = vsel %vm1719_vm12, %v8772_v3, -inf  ;;  %v4677_v54 = vsel %vm1130_vm6, %v4676_v57, %v4675_v9  ;;  %v4408_v15 = vrot.slane %v8702_v37, 5  ;;  %v4409_v40 = vrot.slane %v8702_v37, 6  ;;  %v9751_v57 = vld [vmem:[#allocation107_spill] sm:$0xff] }
 0x491   : > { %4785 = vmax.xlane.f32.xlu1 %v4784_v19  ;;  %v4679_v6 = vsel %vm1132_vm7, %v4678_v35, %v4677_v54  ;;  %v4410_v25 = vrot.slane %v8702_v37, 7  ;;  %v4411_v43 = vrot.slane %v8705_v61, 1  ;;  %v4412_v52 = vrot.slane %v8705_v61, 2 }
 0x492   : > { %v4754_v18 = vsel %vm410_vm0, %v4679_v6, 0.0  ;;  %v4413_v8 = vrot.slane %v8705_v61, 3  ;;  %v4414_v27 = vrot.slane %v8705_v61, 4  ;;  %v4415_v58 = vrot.slane %v8705_v61, 5 }
 0x493   : > { %v4755_v42 = vadd.f32 %v4754_v18, %v4753_v53  ;;  %v4416_v46 = vrot.slane %v8705_v61, 6  ;;  %v4529_v13 = vmul.f32 %v4404_v55, %v9738_v45  ;;  %v4530_v62 = vmul.f32 %v4405_v16, %v9739_v0  ;;  %v9753_v55 = vld [vmem:[#allocation109_spill] sm:$0xff] }
 0x494   : > { %v4417_v23 = vrot.slane %v8705_v61, 7  ;;  %v4528_v28 = vmul.f32 %v8702_v37, %v9740_v5  ;;  %v4531_v2 = vmul.f32 %v4406_v59, %v9741_v30  ;;  %v4532_v12 = vmul.f32 %v4407_v39, %v9742_v41 }
 0x495   : > { %v4756_v38 = vrot.slane %v4755_v42, 4  ;;  %v4533_v22 = vmul.f32 %v4408_v15, %v9743_v34  ;;  %v4534_v33 = vmul.f32 %v4409_v40, %v9744_v56  ;;  %v4537_v14 = vmul.f32 %v4411_v43, %v9745_v7 }
 0x496   : > { %v4535_v47 = vmul.f32 %v4410_v25, %v9746_v32  ;;  %v4536_v21 = vmul.f32 %v8705_v61, %v9747_v50  ;;  %v4538_v63 = vmul.f32 %v4412_v52, %v9748_v10  ;;  %v4539_v37 = vmul.f32 %v4413_v8, %v9749_v31 }
 0x497   : > { %v4757_v1 = vadd.f32 %v4756_v38, %v4755_v42  ;;  %v4540_v48 = vmul.f32 %v4414_v27, %v9750_v24  ;;  %v4680_v60 = vrot.slane %v4529_v13, 7  ;;  %v4682_v51 = vrot.slane %v4530_v62, 6 }
 0x498   : > { %v4541_v35 = vmul.f32 %v4415_v58, %v9751_v57  ;;  %v4542_v11 = vmul.f32 %v4416_v46, %v9752_v20  ;;  %v4543_v16 = vmul.f32 %v4417_v23, %v9753_v55  ;;  %v4684_v9 = vrot.slane %v4531_v2, 5  ;;  %v9756_v20 = vld [vmem:[#allocation112_spill] sm:$0xff]  ;;  %v9757_v55 = vld [vmem:[#allocation110_spill] sm:$0xff] }
 0x499   : > { %v4758_v53 = vrot.slane %v4757_v1, 2  ;;  %v4681_v59 = vsel %vm1120_vm1, %v4680_v60, %v4528_v28  ;;  %v4686_v61 = vrot.slane %v4532_v12, 4  ;;  %v4694_v39 = vrot.slane %v4537_v14, 7 }
 0x49a   : > { %v4683_v19 = vsel %vm1122_vm2, %v4682_v51, %v4681_v59  ;;  %v4688_v54 = vrot.slane %v4533_v22, 3  ;;  %v4690_v15 = vrot.slane %v4534_v33, 2  ;;  %v4696_v40 = vrot.slane %v4538_v63, 6  ;;  %v9759_v59 = vld [vmem:[#allocation114_spill] sm:$0xff] }
 0x49b   : > { %v4759_v6 = vadd.f32 %v4758_v53, %v4757_v1  ;;  %v4685_v25 = vsel %vm1124_vm3, %v4684_v9, %v4683_v19  ;;  %v4695_v43 = vsel %vm1120_vm1, %v4694_v39, %v4536_v21  ;;  %v4698_v52 = vrot.slane %v4539_v37, 5  ;;  %v9758_v9 = vld [vmem:[#allocation113_spill] sm:$0xff]  ;;  %v9760_v39 = vld [vmem:[#allocation115_spill] sm:$0xff] }
 0x49c   : > { %v4687_v18 = vsel %vm1126_vm4, %v4686_v61, %v4685_v25  ;;  %v4692_v8 = vrot.slane %v4535_v47, 1  ;;  %v4697_v27 = vsel %vm1122_vm2, %v4696_v40, %v4695_v43  ;;  %v4700_v58 = vrot.slane %v4540_v48, 4  ;;  %v9755_v48 = vld [vmem:[#allocation111_spill] sm:$0xff]  ;;  %v9763_v43 = vld [vmem:[#allocation120_spill] sm:$0xff] }
 0x49d   : > { %v4760_v42 = vrot.slane %v4759_v6, 1  ;;  %v4689_v46 = vsel %vm1128_vm5, %v4688_v54, %v4687_v18  ;;  %v4699_v45 = vsel %vm1124_vm3, %v4698_v52, %v4697_v27  ;;  %v4702_v13 = vrot.slane %v4541_v35, 3  ;;  %v9764_v18 = vld [vmem:[#allocation117_spill] sm:$0xff]  ;;  %v9765_v27 = vld [vmem:[#allocation118_spill] sm:$0xff] }
 0x49e   : > { %v4367_v0 = vmul.f32 %v8751_v49, %v8623_v17  ;;  %v4691_v62 = vsel %vm1130_vm6, %v4690_v15, %v4689_v46  ;;  %v4701_v23 = vsel %vm1126_vm4, %v4700_v58, %v4699_v45  ;;  %v4704_v5 = vrot.slane %v4542_v11, 2  ;;  %v9754_v17 = vld [vmem:[#allocation8_spill] sm:$0xff] }
 0x49f   : > { %v4761_v28 = vadd.f32 %v4760_v42, %v4759_v6  ;;  %v4693_v30 = vsel %vm1132_vm7, %v4692_v8, %v4691_v62  ;;  %v4703_v2 = vsel %vm1128_vm5, %v4702_v13, %v4701_v23  ;;  %v4706_v41 = vrot.slane %v4543_v16, 1  ;;  %v9761_v15 = vld [vmem:[#allocation116_spill] sm:$0xff]  ;;  %v9762_v6 = vld [vmem:[#allocation119_spill] sm:$0xff]  ;;  %v9766_v42 = vld [vmem:[#allocation121_spill] sm:$0xff] }
 0x4a0   : > { %v4705_v12 = vsel %vm1130_vm6, %v4704_v5, %v4703_v2  ;;  %v4762_v38 = vsel %vm410_vm0, %v4693_v30, 0.0  ;;  %v4418_v34 = vrot.slane %v8762_v44, 1  ;;  %v4419_v22 = vrot.slane %v8762_v44, 2  ;;  %v9767_v13 = vld [vmem:[#allocation122_spill] sm:$0xff]  ;;  %v9768_v23 = vld [vmem:[#allocation123_spill] sm:$0xff]  ;;  %v9769_v30 = vld [vmem:[#allocation124_spill] sm:$0xff] }
 0x4a1   : > { %v8833_v49 = vadd.f32 %v4761_v28, %v9754_v17  ;;  %v4707_v56 = vsel %vm1132_vm7, %v4706_v41, %v4705_v12  ;;  %v4420_v33 = vrot.slane %v8762_v44, 3  ;;  %v4421_v7 = vrot.slane %v8762_v44, 4 }
 0x4a2   : > { %v4763_v14 = vsel %vm410_vm0, %v4707_v56, 0.0  ;;  %v4422_v32 = vrot.slane %v8762_v44, 5  ;;  %v4423_v47 = vrot.slane %v8762_v44, 6  ;;  %v4424_v50 = vrot.slane %v8762_v44, 7  ;;  %v9770_v56 = vld [vmem:[#allocation127_spill] sm:$0xff] }
 0x4a3   : > { %v4787_v21 = vsel %vm1719_vm12, %v8833_v49, -inf  ;;  %v4764_v10 = vadd.f32 %v4763_v14, %v4762_v38  ;;  %v4425_v63 = vrot.slane %v4367_v0, 1  ;;  %v4426_v31 = vrot.slane %v4367_v0, 2 }
 0x4a4   : > { %4788 = vmax.xlane.f32.xlu0 %v4787_v21  ;;  %v4427_v37 = vrot.slane %v4367_v0, 3  ;;  %v4428_v1 = vrot.slane %v4367_v0, 4  ;;  %v4429_v24 = vrot.slane %v4367_v0, 5  ;;  %v4545_v60 = vmul.f32 %v4418_v34, %v9755_v48 }
 0x4a5   : > { %v4765_v51 = vrot.slane %v4764_v10, 4  ;;  %v4430_v57 = vrot.slane %v4367_v0, 6  ;;  %v4431_v35 = vrot.slane %v4367_v0, 7  ;;  %v4546_v11 = vmul.f32 %v4419_v22, %v9756_v20 }
 0x4a6   : > { %v4544_v16 = vmul.f32 %v8762_v44, %v9757_v55  ;;  %v4547_v53 = vmul.f32 %v4420_v33, %v9758_v9  ;;  %v4548_v61 = vmul.f32 %v4421_v7, %v9759_v59  ;;  %v4549_v19 = vmul.f32 %v4422_v32, %v9760_v39 }
 0x4a7   : > { %v4766_v54 = vadd.f32 %v4765_v51, %v4764_v10  ;;  %v4550_v40 = vmul.f32 %v4423_v47, %v9761_v15  ;;  %v4553_v25 = vmul.f32 %v4425_v63, %v9762_v6  ;;  %v4554_v52 = vmul.f32 %v4426_v31, %v9763_v43 }
 0x4a8   : > { %v4551_v8 = vmul.f32 %v4424_v50, %v9764_v18  ;;  %v4552_v58 = vmul.f32 %v4367_v0, %v9765_v27  ;;  %v4555_v46 = vmul.f32 %v4427_v37, %v9766_v42  ;;  %v4708_v44 = vrot.slane %v4545_v60, 7 }
 0x4a9   : > { %v4767_v45 = vrot.slane %v4766_v54, 2  ;;  %v4556_v62 = vmul.f32 %v4428_v1, %v9767_v13  ;;  %v4557_v5 = vmul.f32 %v4429_v24, %v9768_v23  ;;  %v4710_v28 = vrot.slane %v4546_v11, 6  ;;  %v9771_v11 = vld [vmem:[#allocation125_spill] sm:$0xff] }
 0x4aa   : > { %v4558_v2 = vmul.f32 %v4430_v57, %v9769_v30  ;;  %v4709_v41 = vsel %vm1120_vm1, %v4708_v44, %v4544_v16  ;;  %v4712_v12 = vrot.slane %v4547_v53, 5  ;;  %v4714_v38 = vrot.slane %v4548_v61, 4 }
 0x4ab   : > { %v4768_v34 = vadd.f32 %v4767_v45, %v4766_v54  ;;  %v4711_v22 = vsel %vm1122_vm2, %v4710_v28, %v4709_v41  ;;  %v4722_v17 = vrot.slane %v4553_v25, 7  ;;  %v4724_v0 = vrot.slane %v4554_v52, 6 }
 0x4ac   : > { %v4559_v33 = vmul.f32 %v4431_v35, %v9770_v56  ;;  %v4713_v7 = vsel %vm1124_vm3, %v4712_v12, %v4711_v22  ;;  %v4716_v14 = vrot.slane %v4549_v19, 3  ;;  %v4718_v32 = vrot.slane %v4550_v40, 2 }
 0x4ad   : > { %v4769_v47 = vrot.slane %v4768_v34, 1  ;;  %v4715_v50 = vsel %vm1126_vm4, %v4714_v38, %v4713_v7  ;;  %v4723_v21 = vsel %vm1120_vm1, %v4722_v17, %v4552_v58  ;;  %v4726_v10 = vrot.slane %v4555_v46, 5  ;;  %v9772_v58 = vld [vmem:[#allocation126_spill] sm:$0xff] }
 0x4ae   : > { %v4717_v63 = vsel %vm1128_vm5, %v4716_v14, %v4715_v50  ;;  %v4720_v31 = vrot.slane %v4551_v8, 1  ;;  %v4725_v37 = vsel %vm1122_vm2, %v4724_v0, %v4723_v21  ;;  %v4728_v1 = vrot.slane %v4556_v62, 4 }
 0x4af   : > { %v4770_v24 = vadd.f32 %v4769_v47, %v4768_v34  ;;  %v4719_v48 = vsel %vm1130_vm6, %v4718_v32, %v4717_v63  ;;  %v4727_v60 = vsel %vm1124_vm3, %v4726_v10, %v4725_v37  ;;  %v4730_v51 = vrot.slane %v4557_v5, 3 }
 0x4b0   : > { %v4721_v57 = vsel %vm1132_vm7, %v4720_v31, %v4719_v48  ;;  %v4729_v35 = vsel %vm1126_vm4, %v4728_v1, %v4727_v60  ;;  %v4732_v20 = vrot.slane %v4558_v2, 2  ;;  %v4734_v9 = vrot.slane %v4559_v33, 1 }
 0x4b1   : > { %v8873_v55 = vadd.f32 %v4770_v24, %v9771_v11  ;;  %v4731_v16 = vsel %vm1128_vm5, %v4730_v51, %v4729_v35  ;;  %v4771_v59 = vsel %vm410_vm0, %v4721_v57, 0.0  ;;  %v9773_v35 = vld [vmem:[#allocation128_spill] sm:$0xff]  ;;  %v9774_v11 = vld [vmem:[#allocation129_spill] sm:$0xff]  ;;  %vm2624_vm2 = vcmask 7168  }
 0x4b2   : > { %v4733_v53 = vsel %vm1130_vm6, %v4732_v20, %v4731_v16  ;;  %v9775_v16 = vld [vmem:[#allocation10_spill] sm:$0xff] }
 0x4b3   : > { %v4790_v61 = vsel %vm1719_vm12, %v8873_v55, -inf  ;;  %v4735_v39 = vsel %vm1132_vm7, %v4734_v9, %v4733_v53 }
 0x4b4   : > { %4791 = vmax.xlane.f32.xlu1 %v4790_v61  ;;  %v4772_v19 = vsel %vm410_vm0, %v4735_v39, 0.0 }
 0x4b5   : > { %v4773_v54 = vadd.f32 %v4772_v19, %v4771_v59 }
 0x4b7   : > { %v4774_v15 = vrot.slane %v4773_v54, 4 }
 0x4b9   : > { %v4775_v40 = vadd.f32 %v4774_v15, %v4773_v54  ;;  %v9776_v15 = vld [vmem:[#allocation11_spill] sm:$0xff] }
 0x4bb   : > { %v4776_v6 = vrot.slane %v4775_v40, 2 }
 0x4bd   : > { %v4777_v25 = vadd.f32 %v4776_v6, %v4775_v40  ;;  %v2446_v43 = vpop.xlane.xlu1 %2445  ;;  %v9777_v6 = vld [vmem:[#allocation3_spill] sm:$0xff] }
 0x4be   : > { %v2456_v52 = vsub.f32 %v8441_v26, %v2446_v43 }
 0x4bf   : > { %v4778_v18 = vrot.slane %v4777_v25, 1 }
 0x4c0   : > { %v2460_v8 = vmul.f32 1.442695, %v2456_v52 }
 0x4c1   : > { %v4779_v27 = vadd.f32 %v4778_v18, %v4777_v25 }
 0x4c2   : > { %5163 = vpow2.f32 %v2460_v8 }
 0x4c3   : > { %v4783_v42 = vadd.f32 %v4779_v27, %v9772_v58 }
 0x4c5   : > { %v4793_v46 = vsel %vm1719_vm12, %v4783_v42, -inf }
 0x4c6   : > { %4794 = vmax.xlane.f32.xlu0 %v4793_v46 }
 0x4cc   : > { %v5164_v44 = vpop.eup %5163 }
 0x4cd   : > { %v2468_v45 = vsel %vm1719_vm12, %v5164_v44, 0.0 }
 0x4ce   : > { %2469 = vadd.xlane.f32.xlu1 %v2468_v45 }
 0x4d5   : > { %v2449_v13 = vpop.xlane.xlu0 %2448 }
 0x4d6   : > { %v2457_v62 = vsub.f32 %v8521_v29, %v2449_v13 }
 0x4d8   : > { %v2462_v23 = vmul.f32 1.442695, %v2457_v62 }
 0x4da   : > { %5165 = vpow2.f32 %v2462_v23 }
 0x4e4   : > { %v5166_v5 = vpop.eup %5165 }
 0x4e5   : > { %v2471_v26 = vsel %vm1719_vm12, %v5166_v5, 0.0 }
 0x4e6   : > { %2472 = vadd.xlane.f32.xlu0 %v2471_v26 }
 0x4ec   : > { %v2452_v28 = vpop.xlane.xlu1 %2451 }
 0x4ed   : > { %v2458_v30 = vsub.f32 %v8600_v4, %v2452_v28 }
 0x4ef   : > { %v2464_v2 = vmul.f32 1.442695, %v2458_v30  ;;  %v9780_v30 = vld [vmem:[#allocation14_spill] sm:$0xff] }
 0x4f1   : > { %5167 = vpow2.f32 %v2464_v2 }
 0x4fb   : > { %v8889_v41 = vpop.eup %5167 }
 0x4fc   : > { %v2474_v12 = vsel %vm1719_vm12, %v8889_v41, 0.0 }
 0x4fd   : > { %2475 = vadd.xlane.f32.xlu1 %v2474_v12 }
 0x506   : > { %v2455_v38 = vpop.xlane.xlu0 %2454 }
 0x507   : > { %v2459_v29 = vsub.f32 %v8685_v36, %v2455_v38 }
 0x509   : > { %v2466_v34 = vmul.f32 1.442695, %v2459_v29 }
 0x50b   : > { %5169 = vpow2.f32 %v2466_v34 }
 0x515   : > { %v8894_v22 = vpop.eup %5169 }
 0x516   : > { %v2477_v17 = vsel %vm1719_vm12, %v8894_v22, 0.0 }
 0x517   : > { %2478 = vadd.xlane.f32.xlu0 %v2477_v17 }
 0x51e   : > { %v4786_v4 = vpop.xlane.xlu1 %4785 }
 0x51f   : > { %v4796_v0 = vsub.f32 %v8772_v3, %v4786_v4 }
 0x521   : > { %v4800_v56 = vmul.f32 1.442695, %v4796_v0 }
 0x523   : > { %5171 = vpow2.f32 %v4800_v56 }
 0x52d   : > { %v8899_v33 = vpop.eup %5171 }
 0x52e   : > { %v4808_v7 = vsel %vm1719_vm12, %v8899_v33, 0.0 }
 0x52f   : > { %4809 = vadd.xlane.f32.xlu1 %v4808_v7  ;;  %v9783_v7 = vld [vmem:[#allocation17_spill] sm:$0xff] }
 0x531   : > { %v4789_v36 = vpop.xlane.xlu0 %4788 }
 0x532   : > { %v4797_v14 = vsub.f32 %v8833_v49, %v4789_v36 }
 0x534   : > { %v4802_v32 = vmul.f32 1.442695, %v4797_v14 }
 0x536   : > { %5173 = vpow2.f32 %v4802_v32 }
 0x540   : > { %v8904_v47 = vpop.eup %5173 }
 0x541   : > { %v4792_v50 = vpop.xlane.xlu1 %4791  ;;  %v4811_v21 = vsel %vm1719_vm12, %v8904_v47, 0.0 }
 0x542   : > { %v4798_v3 = vsub.f32 %v8873_v55, %v4792_v50  ;;  %4812 = vadd.xlane.f32.xlu0 %v4811_v21 }
 0x544   : > { %v4804_v10 = vmul.f32 1.442695, %v4798_v3 }
 0x546   : > { %5175 = vpow2.f32 %v4804_v10 }
 0x550   : > { %v8909_v63 = vpop.eup %5175 }
 0x551   : > { %v4814_v31 = vsel %vm1719_vm12, %v8909_v63, 0.0 }
 0x552   : > { %4815 = vadd.xlane.f32.xlu1 %v4814_v31  ;;  %v9784_v31 = vld [vmem:[#allocation9_spill] sm:$0xff] }
 0x553   : > { %v4795_v49 = vpop.xlane.xlu0 %4794 }
 0x554   : > { %v4799_v37 = vsub.f32 %v4783_v42, %v4795_v49  ;;  %v9778_v42 = vld [vmem:[#allocation12_spill] sm:$0xff] }
 0x556   : > { %v4806_v1 = vmul.f32 1.442695, %v4799_v37  ;;  %v9785_v37 = vld [vmem:[#allocation18_spill] sm:$0xff] }
 0x558   : > { %5177 = vpow2.f32 %v4806_v1 }
 0x55b   : > { %v2470_v24 = vpop.xlane.xlu1 %2469 }
 0x55c   : > { %5179 = vrcp.f32 %v2470_v24 }
 0x562   : > { %v8913_v48 = vpop.eup %5177 }
 0x563   : > { %v4817_v60 = vsel %vm1719_vm12, %v8913_v48, 0.0 }
 0x564   : > { %4818 = vadd.xlane.f32.xlu0 %v4817_v60 }
 0x566   : > { %v5180_v51 = vpop.eup %5179 }
 0x567   : > { %v2481_v57 = vmul.f32 %v5180_v51, %v5164_v44  ;;  %v9779_v44 = vld [vmem:[#allocation13_spill] sm:$0xff] }
 0x569   : > { %v2491_v20 = vrot.slane %v2481_v57, %v9773_v35 }
 0x56b   : > { %v2504_v55 = vmul.f32 %v2491_v20, %v9774_v11  ;;  %v2505_v9 = vmul.f32 %v2491_v20, %v9775_v16 }
 0x56d   : > { %v2512_v53 = vsel %vm410_vm0, %v2504_v55, 0.0  ;;  %v2515_v59 = vsel %vm410_vm0, %v2505_v9, 0.0  ;;  %v9787_v55 = vld [vmem:[#allocation19_spill] sm:$0xff] }
 0x56e   : > { %2513 = vadd.xlane.f32.xlu1 %v2512_v53  ;;  %2516 = vadd.xlane.f32.xlu0 %v2515_v59 }
 0x573   : > { %v2473_v61 = vpop.xlane.xlu0 %2472 }
 0x574   : > { %5181 = vrcp.f32 %v2473_v61 }
 0x57e   : > { %v5182_v39 = vpop.eup %5181 }
 0x57f   : > { %v2483_v19 = vmul.f32 %v5182_v39, %v5166_v5 }
 0x581   : > { %v2495_v54 = vrot.slane %v2483_v19, %v9773_v35 }
 0x583   : > { %v2507_v40 = vmul.f32 %v2495_v54, %v9776_v15  ;;  %v2506_v25 = vmul.f32 %v2495_v54, %v9777_v6 }
 0x585   : > { %v2521_v43 = vsel %vm410_vm0, %v2507_v40, 0.0  ;;  %v2518_v52 = vsel %vm410_vm0, %v2506_v25, 0.0 }
 0x586   : > { %2522 = vadd.xlane.f32.xlu0 %v2521_v43  ;;  %2519 = vadd.xlane.f32.xlu1 %v2518_v52  ;;  %v9788_v43 = vld [vmem:[#allocation26_spill] sm:$0xff] }
 0x58a   : > { %v2476_v18 = vpop.xlane.xlu1 %2475 }
 0x58b   : > { %5183 = vrcp.f32 %v2476_v18  ;;  %v9789_v18 = vld [vmem:[#allocation20_spill] sm:$0xff] }
 0x595   : > { %v5184_v8 = vpop.eup %5183 }
 0x596   : > { %v2485_v27 = vmul.f32 %v5184_v8, %v8889_v41  ;;  %v9781_v41 = vld [vmem:[#allocation15_spill] sm:$0xff] }
 0x598   : > { %v2499_v58 = vrot.slane %v2485_v27, %v9773_v35 }
 0x59a   : > { %v2509_v46 = vmul.f32 %v2499_v58, %v9778_v42  ;;  %v2508_v45 = vmul.f32 %v2499_v58, %v9779_v44 }
 0x59c   : > { %v2527_v13 = vsel %vm410_vm0, %v2509_v46, 0.0  ;;  %v2524_v62 = vsel %vm410_vm0, %v2508_v45, 0.0 }
 0x59d   : > { %2528 = vadd.xlane.f32.xlu0 %v2527_v13  ;;  %2525 = vadd.xlane.f32.xlu1 %v2524_v62 }
 0x5a4   : > { %v2479_v23 = vpop.xlane.xlu0 %2478 }
 0x5a5   : > { %5185 = vrcp.f32 %v2479_v23 }
 0x5af   : > { %v5186_v5 = vpop.eup %5185 }
 0x5b0   : > { %v2487_v26 = vmul.f32 %v5186_v5, %v8894_v22  ;;  %v9782_v22 = vld [vmem:[#allocation16_spill] sm:$0xff] }
 0x5b2   : > { %v2503_v28 = vrot.slane %v2487_v26, %v9773_v35 }
 0x5b4   : > { %v2511_v2 = vmul.f32 %v2503_v28, %v9780_v30  ;;  %v2510_v12 = vmul.f32 %v2503_v28, %v9781_v41 }
 0x5b6   : > { %v2533_v38 = vsel %vm410_vm0, %v2511_v2, 0.0  ;;  %v2530_v29 = vsel %vm410_vm0, %v2510_v12, 0.0 }
 0x5b7   : > { %2534 = vadd.xlane.f32.xlu0 %v2533_v38  ;;  %2531 = vadd.xlane.f32.xlu1 %v2530_v29 }
 0x5bc   : > { %v4810_v34 = vpop.xlane.xlu1 %4809 }
 0x5bd   : > { %5187 = vrcp.f32 %v4810_v34 }
 0x5c7   : > { %v5188_v17 = vpop.eup %5187 }
 0x5c8   : > { %v4821_v4 = vmul.f32 %v5188_v17, %v8899_v33 }
 0x5ca   : > { %v4831_v0 = vrot.slane %v4821_v4, %v9773_v35 }
 0x5cc   : > { %v4845_v56 = vmul.f32 %v4831_v0, %v9782_v22  ;;  %v4844_v36 = vmul.f32 %v4831_v0, %v9783_v7 }
 0x5ce   : > { %v4855_v14 = vsel %vm410_vm0, %v4845_v56, 0.0  ;;  %v4852_v32 = vsel %vm410_vm0, %v4844_v36, 0.0 }
 0x5cf   : > { %v4813_v50 = vpop.xlane.xlu0 %4812  ;;  %4856 = vadd.xlane.f32.xlu0 %v4855_v14  ;;  %4853 = vadd.xlane.f32.xlu1 %v4852_v32 }
 0x5d0   : > { %5189 = vrcp.f32 %v4813_v50 }
 0x5da   : > { %v5190_v21 = vpop.eup %5189 }
 0x5db   : > { %v4823_v3 = vmul.f32 %v5190_v21, %v8904_v47  ;;  %v9786_v47 = vld [vmem:[#allocation25_spill] sm:$0xff] }
 0x5dd   : > { %v4835_v10 = vrot.slane %v4823_v3, %v9773_v35 }
 0x5df   : > { %v4816_v33 = vpop.xlane.xlu1 %4815  ;;  %v4847_v49 = vmul.f32 %v4835_v10, %v9784_v31  ;;  %v4846_v1 = vmul.f32 %v4835_v10, %v9785_v37 }
 0x5e0   : > { %5191 = vrcp.f32 %v4816_v33 }
 0x5e1   : > { %v4861_v24 = vsel %vm410_vm0, %v4847_v49, 0.0  ;;  %v4858_v60 = vsel %vm410_vm0, %v4846_v1, 0.0 }
 0x5e2   : > { %4862 = vadd.xlane.f32.xlu0 %v4861_v24  ;;  %4859 = vadd.xlane.f32.xlu1 %v4858_v60 }
 0x5ea   : > { %v5192_v51 = vpop.eup %5191 }
 0x5eb   : > { %v4825_v57 = vmul.f32 %v5192_v51, %v8909_v63 }
 0x5ed   : > { %v4839_v20 = vrot.slane %v4825_v57, %v9773_v35 }
 0x5ef   : > { %v4849_v11 = vmul.f32 %v4839_v20, %v9786_v47  ;;  %v4848_v16 = vmul.f32 %v4839_v20, %v9787_v55 }
 0x5f1   : > { %v4819_v9 = vpop.xlane.xlu0 %4818  ;;  %v4867_v53 = vsel %vm410_vm0, %v4849_v11, 0.0  ;;  %v4864_v59 = vsel %vm410_vm0, %v4848_v16, 0.0 }
 0x5f2   : > { %5193 = vrcp.f32 %v4819_v9  ;;  %4868 = vadd.xlane.f32.xlu0 %v4867_v53  ;;  %4865 = vadd.xlane.f32.xlu1 %v4864_v59 }
 0x5fb   : > { %v2514_v61 = vpop.xlane.xlu1 %2513  ;;  %v2517_v39 = vpop.xlane.xlu0 %2516 }
 0x5fc   : > { %v5194_v19 = vpop.eup %5193  ;;  %v2536_v54 = vmul.f32 %v2514_v61, %v2514_v61  ;;  %v2537_v15 = vmul.f32 %v2517_v39, %v2517_v39 }
 0x5fd   : > { %v4827_v63 = vmul.f32 %v5194_v19, %v8913_v48 }
 0x5fe   : > { %v2544_v40 = vadd.f32 %v2537_v15, %v2536_v54 }
 0x5ff   : > { %v4843_v6 = vrot.slane %v4827_v63, %v9773_v35 }
 0x600   : > { %v2545_v25 = vrot.slane %v2544_v40, 4 }
 0x601   : > { %v4851_v52 = vmul.f32 %v4843_v6, %v9788_v43  ;;  %v4850_v8 = vmul.f32 %v4843_v6, %v9789_v18 }
 0x602   : > { %v2546_v27 = vadd.f32 %v2545_v25, %v2544_v40 }
 0x603   : > { %v4873_v58 = vsel %vm410_vm0, %v4851_v52, 0.0  ;;  %v4870_v42 = vsel %vm410_vm0, %v4850_v8, 0.0 }
 0x604   : > { %4874 = vadd.xlane.f32.xlu0 %v4873_v58  ;;  %4871 = vadd.xlane.f32.xlu1 %v4870_v42  ;;  %v2547_v46 = vrot.slane %v2546_v27, 2 }
 0x606   : > { %v2548_v44 = vadd.f32 %v2547_v46, %v2546_v27 }
 0x608   : > { %v2549_v45 = vrot.slane %v2548_v44, 1 }
 0x60a   : > { %v2550_v48 = vadd.f32 %v2549_v45, %v2548_v44 }
 0x60c   : > { %v2572_v13 = vadd.f32 1e-08, %v2550_v48 }
 0x60e   : > { %5195 = vrsqrt.f32 %v2572_v13  ;;  %v2604_v35 = vadd.f32 1.0, %v2572_v13  ;;  %vm2578_vm0 = vcmp.eq.f32.partialorder %v2572_v13, inf  ;;  %v2581_v12 = vand.u32 2147483648, %v2572_v13 }
 0x60f   : > { %vm2580_vm1 = vcmp.eq.f32.partialorder %v2572_v13, 0.0 }
 0x610   : > { %5197 = vrcp.f32 %v2604_v35 }
 0x613   : > { %v2520_v62 = vpop.xlane.xlu1 %2519  ;;  %v2523_v23 = vpop.xlane.xlu0 %2522 }
 0x614   : > { %v2538_v5 = vmul.f32 %v2520_v62, %v2520_v62  ;;  %v2539_v26 = vmul.f32 %v2523_v23, %v2523_v23 }
 0x616   : > { %v2551_v28 = vadd.f32 %v2539_v26, %v2538_v5 }
 0x618   : > { %v5196_v30 = vpop.eup %5195  ;;  %v2552_v41 = vrot.slane %v2551_v28, 4 }
 0x619   : > { %v2577_v2 = vmul.f32 %v5196_v30, %v2572_v13 }
 0x61a   : > { %v2553_v29 = vadd.f32 %v2552_v41, %v2551_v28  ;;  %v5198_v34 = vpop.eup %5197 }
 0x61b   : > { %v2579_v38 = vsel %vm2578_vm0, %v2572_v13, %v2577_v2 }
 0x61c   : > { %v2582_v17 = vsel %vm2580_vm1, %v2581_v12, %v2579_v38  ;;  %v2554_v0 = vrot.slane %v2553_v29, 2 }
 0x61d   : > { %v2609_v4 = vmul.f32 %v5198_v34, %v2582_v17 }
 0x61e   : > { %v2555_v7 = vadd.f32 %v2554_v0, %v2553_v29 }
 0x61f   : > { %v2616_v22 = vmul.f32 %v2609_v4, %v2514_v61  ;;  %v2617_v56 = vmul.f32 %v2609_v4, %v2517_v39 }
 0x620   : > { %v2556_v36 = vrot.slane %v2555_v7, 1 }
 0x621   : > { %2625 = vst.msk [vmem:[%s8967_s27] sm:$0xff] %vm2624_vm2, %v2616_v22  ;;  %2626 = vst.msk [vmem:[%s8967_s27 + $0x8] sm:$0xff] %vm2624_vm2, %v2617_v56 }
 0x622   : > { %v2557_v14 = vadd.f32 %v2556_v36, %v2555_v7 }
 0x624   : > { %v2573_v32 = vadd.f32 1e-08, %v2557_v14 }
 0x626   : > { %5199 = vrsqrt.f32 %v2573_v32  ;;  %v2605_v50 = vadd.f32 1.0, %v2573_v32  ;;  %vm2585_vm3 = vcmp.eq.f32.partialorder %v2573_v32, inf  ;;  %v2588_v60 = vand.u32 2147483648, %v2573_v32 }
 0x627   : > { %vm2587_vm4 = vcmp.eq.f32.partialorder %v2573_v32, 0.0 }
 0x628   : > { %5201 = vrcp.f32 %v2605_v50 }
 0x62a   : > { %v2526_v21 = vpop.xlane.xlu1 %2525  ;;  %v2529_v3 = vpop.xlane.xlu0 %2528 }
 0x62b   : > { %v2540_v10 = vmul.f32 %v2526_v21, %v2526_v21  ;;  %v2541_v33 = vmul.f32 %v2529_v3, %v2529_v3 }
 0x62d   : > { %v2558_v31 = vadd.f32 %v2541_v33, %v2540_v10 }
 0x62f   : > { %v2559_v49 = vrot.slane %v2558_v31, 4 }
 0x630   : > { %v5200_v37 = vpop.eup %5199 }
 0x631   : > { %v2584_v1 = vmul.f32 %v5200_v37, %v2573_v32  ;;  %v2560_v24 = vadd.f32 %v2559_v49, %v2558_v31 }
 0x632   : > { %v5202_v20 = vpop.eup %5201 }
 0x633   : > { %v2586_v51 = vsel %vm2585_vm3, %v2573_v32, %v2584_v1  ;;  %v2561_v57 = vrot.slane %v2560_v24, 2 }
 0x634   : > { %v2589_v47 = vsel %vm2587_vm4, %v2588_v60, %v2586_v51 }
 0x635   : > { %v2611_v11 = vmul.f32 %v5202_v20, %v2589_v47  ;;  %v2562_v55 = vadd.f32 %v2561_v57, %v2560_v24 }
 0x637   : > { %v2618_v16 = vmul.f32 %v2611_v11, %v2520_v62  ;;  %v2619_v9 = vmul.f32 %v2611_v11, %v2523_v23  ;;  %v2563_v53 = vrot.slane %v2562_v55, 1 }
 0x639   : > { %2627 = vst.msk [vmem:[%s8967_s27 + $0x10] sm:$0xff] %vm2624_vm2, %v2618_v16  ;;  %2628 = vst.msk [vmem:[%s8967_s27 + $0x18] sm:$0xff] %vm2624_vm2, %v2619_v9  ;;  %v2564_v59 = vadd.f32 %v2563_v53, %v2562_v55 }
 0x63b   : > { %v2574_v61 = vadd.f32 1e-08, %v2564_v59 }
 0x63d   : > { %5203 = vrsqrt.f32 %v2574_v61  ;;  %v2606_v39 = vadd.f32 1.0, %v2574_v61  ;;  %vm2592_vm5 = vcmp.eq.f32.partialorder %v2574_v61, inf  ;;  %v2595_v52 = vand.u32 2147483648, %v2574_v61 }
 0x63e   : > { %vm2594_vm6 = vcmp.eq.f32.partialorder %v2574_v61, 0.0 }
 0x63f   : > { %5205 = vrcp.f32 %v2606_v39 }
 0x644   : > { %v2532_v19 = vpop.xlane.xlu1 %2531  ;;  %v2535_v54 = vpop.xlane.xlu0 %2534 }
 0x645   : > { %v2542_v15 = vmul.f32 %v2532_v19, %v2532_v19  ;;  %v2543_v63 = vmul.f32 %v2535_v54, %v2535_v54 }
 0x647   : > { %v2565_v40 = vadd.f32 %v2543_v63, %v2542_v15  ;;  %v5204_v6 = vpop.eup %5203 }
 0x648   : > { %v2591_v25 = vmul.f32 %v5204_v6, %v2574_v61 }
 0x649   : > { %v2566_v43 = vrot.slane %v2565_v40, 4  ;;  %v5206_v27 = vpop.eup %5205 }
 0x64a   : > { %v2593_v18 = vsel %vm2592_vm5, %v2574_v61, %v2591_v25 }
 0x64b   : > { %v2567_v8 = vadd.f32 %v2566_v43, %v2565_v40  ;;  %v2596_v58 = vsel %vm2594_vm6, %v2595_v52, %v2593_v18 }
 0x64c   : > { %v2613_v42 = vmul.f32 %v5206_v27, %v2596_v58 }
 0x64d   : > { %v2568_v46 = vrot.slane %v2567_v8, 2 }
 0x64e   : > { %v2620_v44 = vmul.f32 %v2613_v42, %v2526_v21  ;;  %v2621_v45 = vmul.f32 %v2613_v42, %v2529_v3 }
 0x64f   : > { %v2569_v48 = vadd.f32 %v2568_v46, %v2567_v8 }
 0x650   : > { %2629 = vst.msk [vmem:[%s8967_s27 + $0x20] sm:$0xff] %vm2624_vm2, %v2620_v44  ;;  %2630 = vst.msk [vmem:[%s8967_s27 + $0x28] sm:$0xff] %vm2624_vm2, %v2621_v45 }
 0x651   : > { %v2570_v13 = vrot.slane %v2569_v48, 1 }
 0x653   : > { %v2571_v35 = vadd.f32 %v2570_v13, %v2569_v48 }
 0x655   : > { %v2575_v62 = vadd.f32 1e-08, %v2571_v35 }
 0x657   : > { %5207 = vrsqrt.f32 %v2575_v62  ;;  %v2607_v23 = vadd.f32 1.0, %v2575_v62  ;;  %vm2599_vm7 = vcmp.eq.f32.partialorder %v2575_v62, inf  ;;  %v2602_v29 = vand.u32 2147483648, %v2575_v62 }
 0x658   : > { %vm2601_vm12 = vcmp.eq.f32.partialorder %v2575_v62, 0.0 }
 0x659   : > { %5209 = vrcp.f32 %v2607_v23 }
 0x65c   : > { %v4854_v5 = vpop.xlane.xlu1 %4853  ;;  %v4857_v26 = vpop.xlane.xlu0 %4856 }
 0x65d   : > { %v4876_v28 = vmul.f32 %v4854_v5, %v4854_v5  ;;  %v4877_v30 = vmul.f32 %v4857_v26, %v4857_v26 }
 0x65f   : > { %v4884_v2 = vadd.f32 %v4877_v30, %v4876_v28 }
 0x661   : > { %v5208_v41 = vpop.eup %5207  ;;  %v4885_v12 = vrot.slane %v4884_v2, 4 }
 0x662   : > { %v2598_v38 = vmul.f32 %v5208_v41, %v2575_v62 }
 0x663   : > { %v4886_v34 = vadd.f32 %v4885_v12, %v4884_v2  ;;  %v5210_v4 = vpop.eup %5209 }
 0x664   : > { %v2600_v17 = vsel %vm2599_vm7, %v2575_v62, %v2598_v38 }
 0x665   : > { %v2603_v0 = vsel %vm2601_vm12, %v2602_v29, %v2600_v17  ;;  %v4887_v22 = vrot.slane %v4886_v34, 2 }
 0x666   : > { %v2615_v56 = vmul.f32 %v5210_v4, %v2603_v0 }
 0x667   : > { %v4888_v7 = vadd.f32 %v4887_v22, %v4886_v34 }
 0x668   : > { %v2622_v36 = vmul.f32 %v2615_v56, %v2532_v19  ;;  %v2623_v14 = vmul.f32 %v2615_v56, %v2535_v54 }
 0x669   : > { %v4889_v32 = vrot.slane %v4888_v7, 1 }
 0x66a   : > { %2631 = vst.msk [vmem:[%s8967_s27 + $0x30] sm:$0xff] %vm2624_vm2, %v2622_v36  ;;  %2632 = vst.msk [vmem:[%s8967_s27 + $0x38] sm:$0xff] %vm2624_vm2, %v2623_v14 }
 0x66b   : > { %v4890_v50 = vadd.f32 %v4889_v32, %v4888_v7 }
 0x66d   : > { %v4912_v21 = vadd.f32 1e-08, %v4890_v50 }
 0x66f   : > { %5211 = vrsqrt.f32 %v4912_v21  ;;  %v4860_v3 = vpop.xlane.xlu1 %4859  ;;  %v4863_v10 = vpop.xlane.xlu0 %4862  ;;  %v4944_v33 = vadd.f32 1.0, %v4912_v21  ;;  %vm4918_vm11 = vcmp.eq.f32.partialorder %v4912_v21, inf  ;;  %v4921_v47 = vand.u32 2147483648, %v4912_v21 }
 0x670   : > { %v4878_v31 = vmul.f32 %v4860_v3, %v4860_v3  ;;  %v4879_v49 = vmul.f32 %v4863_v10, %v4863_v10  ;;  %vm4920_vm13 = vcmp.eq.f32.partialorder %v4912_v21, 0.0 }
 0x671   : > { %5213 = vrcp.f32 %v4944_v33 }
 0x672   : > { %v4891_v37 = vadd.f32 %v4879_v49, %v4878_v31 }
 0x674   : > { %v4892_v1 = vrot.slane %v4891_v37, 4 }
 0x676   : > { %v4893_v24 = vadd.f32 %v4892_v1, %v4891_v37 }
 0x678   : > { %v4894_v60 = vrot.slane %v4893_v24, 2 }
 0x679   : > { %v5212_v51 = vpop.eup %5211 }
 0x67a   : > { %v4917_v57 = vmul.f32 %v5212_v51, %v4912_v21  ;;  %v4895_v20 = vadd.f32 %v4894_v60, %v4893_v24 }
 0x67b   : > { %v5214_v16 = vpop.eup %5213 }
 0x67c   : > { %v4919_v11 = vsel %vm4918_vm11, %v4912_v21, %v4917_v57  ;;  %v4896_v55 = vrot.slane %v4895_v20, 1 }
 0x67d   : > { %v4922_v9 = vsel %vm4920_vm13, %v4921_v47, %v4919_v11 }
 0x67e   : > { %v4949_v53 = vmul.f32 %v5214_v16, %v4922_v9  ;;  %v4897_v59 = vadd.f32 %v4896_v55, %v4895_v20 }
 0x67f   : > { %v4866_v61 = vpop.xlane.xlu1 %4865  ;;  %v4869_v39 = vpop.xlane.xlu0 %4868 }
 0x680   : > { %v4956_v19 = vmul.f32 %v4949_v53, %v4854_v5  ;;  %v4957_v54 = vmul.f32 %v4949_v53, %v4857_v26  ;;  %v4913_v15 = vadd.f32 1e-08, %v4897_v59  ;;  %v4880_v63 = vmul.f32 %v4866_v61, %v4866_v61 }
 0x681   : > { %v4881_v40 = vmul.f32 %v4869_v39, %v4869_v39 }
 0x682   : > { %5044 = vst.msk [vmem:[%s8967_s27 + $0x40] sm:$0xff] %vm2624_vm2, %v4956_v19  ;;  %5045 = vst.msk [vmem:[%s8967_s27 + $0x48] sm:$0xff] %vm2624_vm2, %v4957_v54  ;;  %5215 = vrsqrt.f32 %v4913_v15  ;;  %v4945_v6 = vadd.f32 1.0, %v4913_v15  ;;  %vm4925_vm14 = vcmp.eq.f32.partialorder %v4913_v15, inf  ;;  %v4928_v46 = vand.u32 2147483648, %v4913_v15 }
 0x683   : > { %v4898_v25 = vadd.f32 %v4881_v40, %v4880_v63  ;;  %vm4927_vm15 = vcmp.eq.f32.partialorder %v4913_v15, 0.0 }
 0x684   : > { %5217 = vrcp.f32 %v4945_v6 }
 0x685   : > { %v4899_v43 = vrot.slane %v4898_v25, 4 }
 0x687   : > { %v4900_v52 = vadd.f32 %v4899_v43, %v4898_v25 }
 0x689   : > { %v4901_v18 = vrot.slane %v4900_v52, 2 }
 0x68b   : > { %v4902_v8 = vadd.f32 %v4901_v18, %v4900_v52 }
 0x68c   : > { %v5216_v27 = vpop.eup %5215 }
 0x68d   : > { %v4924_v58 = vmul.f32 %v5216_v27, %v4913_v15  ;;  %v4903_v42 = vrot.slane %v4902_v8, 1 }
 0x68e   : > { %v5218_v48 = vpop.eup %5217 }
 0x68f   : > { %v4926_v44 = vsel %vm4925_vm14, %v4913_v15, %v4924_v58  ;;  %v4904_v45 = vadd.f32 %v4903_v42, %v4902_v8 }
 0x690   : > { %v4929_v13 = vsel %vm4927_vm15, %v4928_v46, %v4926_v44 }
 0x691   : > { %v4951_v35 = vmul.f32 %v5218_v48, %v4929_v13  ;;  %v4914_v62 = vadd.f32 1e-08, %v4904_v45  ;;  %v4872_v23 = vpop.xlane.xlu1 %4871  ;;  %v4875_v5 = vpop.xlane.xlu0 %4874 }
 0x692   : > { %v4882_v26 = vmul.f32 %v4872_v23, %v4872_v23  ;;  %v4883_v28 = vmul.f32 %v4875_v5, %v4875_v5 }
 0x693   : > { %v4958_v30 = vmul.f32 %v4951_v35, %v4860_v3  ;;  %v4959_v2 = vmul.f32 %v4951_v35, %v4863_v10  ;;  %5219 = vrsqrt.f32 %v4914_v62  ;;  %v4946_v41 = vadd.f32 1.0, %v4914_v62 }
 0x694   : > { %v4905_v12 = vadd.f32 %v4883_v28, %v4882_v26  ;;  %vm4932_vm8 = vcmp.eq.f32.partialorder %v4914_v62, inf  ;;  %v4935_v56 = vand.u32 2147483648, %v4914_v62  ;;  %vm4934_vm9 = vcmp.eq.f32.partialorder %v4914_v62, 0.0 }
 0x695   : > { %5046 = vst.msk [vmem:[%s8967_s27 + $0x50] sm:$0xff] %vm2624_vm2, %v4958_v30  ;;  %5047 = vst.msk [vmem:[%s8967_s27 + $0x58] sm:$0xff] %vm2624_vm2, %v4959_v2  ;;  %5221 = vrcp.f32 %v4946_v41 }
 0x696   : > { %v4906_v38 = vrot.slane %v4905_v12, 4 }
 0x698   : > { %v4907_v29 = vadd.f32 %v4906_v38, %v4905_v12 }
 0x69a   : > { %v4908_v34 = vrot.slane %v4907_v29, 2 }
 0x69c   : > { %v4909_v17 = vadd.f32 %v4908_v34, %v4907_v29 }
 0x69d   : > { %v5220_v4 = vpop.eup %5219 }
 0x69e   : > { %v4931_v0 = vmul.f32 %v5220_v4, %v4914_v62  ;;  %v4910_v22 = vrot.slane %v4909_v17, 1 }
 0x69f   : > { %v5222_v14 = vpop.eup %5221 }
 0x6a0   : > { %v4933_v7 = vsel %vm4932_vm8, %v4914_v62, %v4931_v0  ;;  %v4911_v36 = vadd.f32 %v4910_v22, %v4909_v17 }
 0x6a1   : > { %v4936_v32 = vsel %vm4934_vm9, %v4935_v56, %v4933_v7 }
 0x6a2   : > { %v4953_v50 = vmul.f32 %v5222_v14, %v4936_v32  ;;  %v4915_v21 = vadd.f32 1e-08, %v4911_v36 }
 0x6a4   : > { %v4960_v3 = vmul.f32 %v4953_v50, %v4866_v61  ;;  %v4961_v10 = vmul.f32 %v4953_v50, %v4869_v39  ;;  %5223 = vrsqrt.f32 %v4915_v21  ;;  %v4947_v33 = vadd.f32 1.0, %v4915_v21 }
 0x6a5   : > { %vm4939_vm10 = vcmp.eq.f32.partialorder %v4915_v21, inf  ;;  %v4942_v37 = vand.u32 2147483648, %v4915_v21  ;;  %vm4941_vm0 = vcmp.eq.f32.partialorder %v4915_v21, 0.0 }
 0x6a6   : > { %5048 = vst.msk [vmem:[%s8967_s27 + $0x60] sm:$0xff] %vm2624_vm2, %v4960_v3  ;;  %5049 = vst.msk [vmem:[%s8967_s27 + $0x68] sm:$0xff] %vm2624_vm2, %v4961_v10  ;;  %5225 = vrcp.f32 %v4947_v33 }
 0x6ae   : > { %v5224_v31 = vpop.eup %5223 }
 0x6af   : > { %v4938_v49 = vmul.f32 %v5224_v31, %v4915_v21 }
 0x6b0   : > { %v5226_v24 = vpop.eup %5225 }
 0x6b1   : > { %v4940_v1 = vsel %vm4939_vm10, %v4915_v21, %v4938_v49 }
 0x6b2   : > { %v4943_v60 = vsel %vm4941_vm0, %v4942_v37, %v4940_v1 }
 0x6b3   : > { %v4955_v51 = vmul.f32 %v5226_v24, %v4943_v60 }
 0x6b5   : > { %v4962_v57 = vmul.f32 %v4955_v51, %v4872_v23  ;;  %v4963_v20 = vmul.f32 %v4955_v51, %v4875_v5 }
 0x6b7   : > { %5050 = vst.msk [vmem:[%s8967_s27 + $0x70] sm:$0xff] %vm2624_vm2, %v4962_v57  ;;  %5051 = vst.msk [vmem:[%s8967_s27 + $0x78] sm:$0xff] %vm2624_vm2, %v4963_v20 }
 0x6b8 PF: > { %s12_s9 = sadd.s32 1, %s5365_s9  }
 0x6b9   : > { %p9_p4 = scmp.ge.s32.totalorder %s12_s9, 4  }
 0x6bb   :  { %11 = sbr.rel (!%p9_p4) target bundleno = 1 (0x1), region = 60 }

</bundles_post_ra>
